<compile_context>
chip_gen: v7x
topology: tpu7x:2x2x1
jax: 0.10.0
libtpu: 0.0.40
codegen_flags: <defaults>
</compile_context>

<pallas_src>
import functools

import jax
import jax.numpy as jnp
from jax import lax
from jax.experimental import pallas as pl
from jax.experimental.pallas import tpu as pltpu

LANE = 128
NEG = -1e30        # mask value for padded CRF tags (finite, no NaN risk)


def _round_up(x, m):
    return (x + m - 1) // m * m


@functools.lru_cache(maxsize=None)
def _vmem_limit_bytes():
    """Per-generation scoped-VMEM budget: v7x has only 64 MiB physical."""
    try:
        kind = jax.devices()[0].device_kind.lower()
    except Exception:
        kind = ""
    if "v7" in kind:
        return 40 * 1024 * 1024
    return 64 * 1024 * 1024        # v5e / v6e have 128 MiB physical


def _pick_row_tile(n, max_tile=512):
    """Largest divisor of n that is <= max_tile (prefer sublane-aligned)."""
    if n <= max_tile:
        return n
    for t in range(max_tile, 0, -1):
        if n % t == 0 and (t % 8 == 0):
            return t
    return n


def _pick_chunk(n, max_chunk=128):
    if n <= max_chunk:
        return n
    for t in range(max_chunk, 0, -1):
        if n % t == 0:
            return t
    return n


# ----------------------------------------------------------------------------
# Input projection (both directions fused): gates = x @ Wih_cat + b_cat
#   Wih_cat = [Wih_fwd | Wih_bwd] along the gate axis -> (E, 8H)
# ----------------------------------------------------------------------------
def _input_proj_kernel(x_ref, w_ref, b_ref, o_ref):
    # x: (rt, E) bf16, w: (E, 8H) bf16, b: (1, 8H) f32 -> o: (rt, 8H) f32
    o_ref[...] = (jnp.dot(x_ref[...], w_ref[...],
                          preferred_element_type=jnp.float32) + b_ref[...])


def input_projection(x2d, wih_cat, bias_cat):
    """x2d: (N, E) bf16; wih_cat: (E, 8H) bf16; bias_cat: (1, 8H) f32.
    Returns gate pre-activations for both directions, (N, 8H) f32."""
    N, E = x2d.shape
    G = wih_cat.shape[1]                      # 8H
    rt = _pick_row_tile(N)
    return pl.pallas_call(
        _input_proj_kernel,
        out_shape=jax.ShapeDtypeStruct((N, G), jnp.float32),
        grid_spec=pltpu.PrefetchScalarGridSpec(
            num_scalar_prefetch=0,
            grid=(N // rt,),
            in_specs=[
                pl.BlockSpec((rt, E), lambda i: (i, 0)),
                pl.BlockSpec((E, G), lambda i: (0, 0)),
                pl.BlockSpec((1, G), lambda i: (0, 0)),
            ],
            out_specs=pl.BlockSpec((rt, G), lambda i: (i, 0)),
        ),
        compiler_params=pltpu.CompilerParams(
            dimension_semantics=("parallel",),
            vmem_limit_bytes=_vmem_limit_bytes()),
    )(x2d, wih_cat, bias_cat)


# ----------------------------------------------------------------------------
# Fused bidirectional LSTM recurrence: one kernel body, time loop inside.
#   gates layout: columns [0:4H] = forward gates, [4H:8H] = backward gates.
# ----------------------------------------------------------------------------
def _bilstm_recurrent_kernel(gates_ref, whh_ref, hf_ref, hb_ref,
                             hf_scr, cf_scr, hb_scr, cb_scr,
                             *, seq_len, hidden, unroll):
    T, H = seq_len, hidden
    G = 4 * H
    whh_f = whh_ref[0]                        # (H, 4H) bf16, loop-invariant
    whh_b = whh_ref[1]

    hf_scr[...] = jnp.zeros_like(hf_scr)
    cf_scr[...] = jnp.zeros_like(cf_scr)
    hb_scr[...] = jnp.zeros_like(hb_scr)
    cb_scr[...] = jnp.zeros_like(cb_scr)

    def cell(gates, c_prev):
        # PyTorch gate order: i, f, g, o.  Elementwise kept in f32.
        i = jax.nn.sigmoid(gates[:, 0 * H:1 * H])
        f = jax.nn.sigmoid(gates[:, 1 * H:2 * H])
        g = jnp.tanh(gates[:, 2 * H:3 * H])
        o = jax.nn.sigmoid(gates[:, 3 * H:4 * H])
        c = f * c_prev + i * g
        h = o * jnp.tanh(c)
        return h, c

    def step(t, carry):
        tb = T - 1 - t                        # backward direction index
        g_f = gates_ref[t][:, :G] + jnp.dot(
            hf_scr[...].astype(jnp.bfloat16), whh_f,
            preferred_element_type=jnp.float32)
        g_b = gates_ref[tb][:, G:] + jnp.dot(
            hb_scr[...].astype(jnp.bfloat16), whh_b,
            preferred_element_type=jnp.float32)
        h_f, c_f = cell(g_f, cf_scr[...])
        h_b, c_b = cell(g_b, cb_scr[...])
        hf_scr[...] = h_f
        cf_scr[...] = c_f
        hb_scr[...] = h_b
        cb_scr[...] = c_b
        hf_ref[t] = h_f.astype(hf_ref.dtype)      # bf16 writeback
        hb_ref[tb] = h_b.astype(hb_ref.dtype)
        return carry

    lax.fori_loop(0, T, step, 0, unroll=unroll)


def bilstm_layer(gates_tb, whh_stacked, seq_len, batch, hidden):
    """gates_tb: (T, B, 8H) f32; whh_stacked: (2, H, 4H) bf16.
    Returns (h_fwd, h_bwd), each (T, B, H) bf16, time-major."""
    T, B, H = seq_len, batch, hidden
    kern = functools.partial(_bilstm_recurrent_kernel, seq_len=T, hidden=H,
                             unroll=min(T, 8))
    return pl.pallas_call(
        kern,
        out_shape=(jax.ShapeDtypeStruct((T, B, H), jnp.bfloat16),
                   jax.ShapeDtypeStruct((T, B, H), jnp.bfloat16)),
        grid_spec=pltpu.PrefetchScalarGridSpec(
            num_scalar_prefetch=0,
            grid=(1,),
            in_specs=[
                pl.BlockSpec((T, B, 8 * H), lambda i: (0, 0, 0)),
                pl.BlockSpec((2, H, 4 * H), lambda i: (0, 0, 0)),
            ],
            out_specs=(pl.BlockSpec((T, B, H), lambda i: (0, 0, 0)),
                       pl.BlockSpec((T, B, H), lambda i: (0, 0, 0))),
            scratch_shapes=[pltpu.VMEM((B, H), jnp.float32),
                            pltpu.VMEM((B, H), jnp.float32),
                            pltpu.VMEM((B, H), jnp.float32),
                            pltpu.VMEM((B, H), jnp.float32)],
        ),
        compiler_params=pltpu.CompilerParams(
            dimension_semantics=("arbitrary",),
            vmem_limit_bytes=_vmem_limit_bytes()),
    )(gates_tb, whh_stacked)


# ----------------------------------------------------------------------------
# fc over both direction halves in one step (no materialized concat):
#   logits = h_fwd @ W[:H] + h_bwd @ W[H:] + b        (K padded to 128 lanes)
# ----------------------------------------------------------------------------
def _fc_kernel(hf_ref, hb_ref, w_ref, b_ref, o_ref):
    o_ref[...] = (jnp.dot(hf_ref[...], w_ref[0], preferred_element_type=jnp.float32)
                  + jnp.dot(hb_ref[...], w_ref[1], preferred_element_type=jnp.float32)
                  + b_ref[...])


def fc_over_directions(hf2d, hb2d, w_split, bias):
    """hf2d/hb2d: (N, H) bf16; w_split: (2, H, Kp) bf16; bias: (1, Kp) f32.
    Returns logits (N, Kp) f32."""
    N, H = hf2d.shape
    Kp = w_split.shape[2]
    rt = _pick_row_tile(N)
    return pl.pallas_call(
        _fc_kernel,
        out_shape=jax.ShapeDtypeStruct((N, Kp), jnp.float32),
        grid_spec=pltpu.PrefetchScalarGridSpec(
            num_scalar_prefetch=0,
            grid=(N // rt,),
            in_specs=[
                pl.BlockSpec((rt, H), lambda i: (i, 0)),
                pl.BlockSpec((rt, H), lambda i: (i, 0)),
                pl.BlockSpec((2, H, Kp), lambda i: (0, 0, 0)),
                pl.BlockSpec((1, Kp), lambda i: (0, 0)),
            ],
            out_specs=pl.BlockSpec((rt, Kp), lambda i: (i, 0)),
        ),
        compiler_params=pltpu.CompilerParams(
            dimension_semantics=("parallel",),
            vmem_limit_bytes=_vmem_limit_bytes()),
    )(hf2d, hb2d, w_split, bias)


# ----------------------------------------------------------------------------
# CRF Viterbi forward DP — time-chunked grid, score carried in VMEM scratch
# ----------------------------------------------------------------------------
def _viterbi_kernel(em_ref, trans_t_ref, start_ref, end_ref,
                    bp_ref, last_ref, score_scr, *, chunk, unroll):
    c = pl.program_id(0)
    trans_t = trans_t_ref[...]                 # (Kp, Kp), loop-invariant

    def step(t, carry):
        is_first = jnp.logical_and(c == 0, t == 0)

        @pl.when(is_first)
        def _():
            score_scr[...] = start_ref[...] + em_ref[0]     # (1,Kp) + (B,Kp)
            bp_ref[0] = jnp.zeros(bp_ref.shape[1:], jnp.int32)   # slot 0 unused

        @pl.when(jnp.logical_not(is_first))
        def _():
            score = score_scr[...]             # (B, Kp) prev-tag scores
            # cand[b, j, i] = score[b, i] + transitions[i, j] (trans pre-transposed)
            cand = score[:, None, :] + trans_t[None, :, :]
            score_scr[...] = jnp.max(cand, axis=-1) + em_ref[t]
            bp_ref[t] = jnp.argmax(cand, axis=-1).astype(jnp.int32)

        return carry

    lax.fori_loop(0, chunk, step, 0, unroll=unroll)
    # Only the last chunk's writeback survives; adding `end` every chunk is
    # harmless because score_scr never reads last_ref.
    last_ref[...] = score_scr[...] + end_ref[...]


def viterbi_forward(emissions, trans_t, start, end):
    """emissions: (T, B, Kp) f32; trans_t = transitions.T (Kp, Kp); start/end: (1, Kp).
    Returns (backpointers (T,B,Kp) int32, last scores (B,Kp) f32)."""
    T, B, Kp = emissions.shape
    Tc = _pick_chunk(T)
    kern = functools.partial(_viterbi_kernel, chunk=Tc, unroll=min(Tc, 8))
    return pl.pallas_call(
        kern,
        out_shape=(jax.ShapeDtypeStruct((T, B, Kp), jnp.int32),
                   jax.ShapeDtypeStruct((B, Kp), jnp.float32)),
        grid_spec=pltpu.PrefetchScalarGridSpec(
            num_scalar_prefetch=0,
            grid=(T // Tc,),
            in_specs=[
                pl.BlockSpec((Tc, B, Kp), lambda c: (c, 0, 0)),
                pl.BlockSpec((Kp, Kp), lambda c: (0, 0)),
                pl.BlockSpec((1, Kp), lambda c: (0, 0)),
                pl.BlockSpec((1, Kp), lambda c: (0, 0)),
            ],
            out_specs=(pl.BlockSpec((Tc, B, Kp), lambda c: (c, 0, 0)),
                       pl.BlockSpec((B, Kp), lambda c: (0, 0))),
            scratch_shapes=[pltpu.VMEM((B, Kp), jnp.float32)],
        ),
        compiler_params=pltpu.CompilerParams(
            dimension_semantics=("arbitrary",),
            vmem_limit_bytes=_vmem_limit_bytes()),
    )(emissions, trans_t, start, end)


def viterbi_backtrack(backptrs, last_scores):
    """Pure-gather backtracking (plain JAX glue). Returns tags (B, T) int32."""
    last_tag = jnp.argmax(last_scores, axis=-1).astype(jnp.int32)     # (B,)

    def step(tag, bp_t):
        prev = jnp.take_along_axis(bp_t, tag[:, None], axis=1)[:, 0]
        return prev, prev

    _, prevs = lax.scan(step, last_tag, backptrs[1:][::-1])           # (T-1, B)
    tags_tb = jnp.concatenate([prevs[::-1], last_tag[None]], axis=0)  # (T, B)
    return tags_tb.T                                                  # (B, T)


# ----------------------------------------------------------------------------
# Full forward pass of NERLSTM_CRF
# ----------------------------------------------------------------------------
def ner_lstm_crf_forward(x_bt, params):
    """x_bt: (B, T) int32 token ids. Returns (B, T) int32 decoded tags."""
    x_tb = x_bt.T                                                     # x.transpose(0, 1)
    emb = jnp.take(params["embedding"], x_tb, axis=0)                 # (T, B, E) bf16 gather
    T, B, E = emb.shape
    H = params["hidden_size"]

    layer_in = emb.reshape(T * B, E)                                  # free reshape
    num_layers = len(params["lstm_layers"])
    h_f = h_b = None
    for li, layer in enumerate(params["lstm_layers"]):
        gates = input_projection(layer_in, layer["wih"], layer["b"])  # (T*B, 8H) f32
        gates_tb = gates.reshape(T, B, 8 * H)                         # free reshape
        h_f, h_b = bilstm_layer(gates_tb, layer["whh"], T, B, H)      # (T,B,H) bf16 each
        if li + 1 < num_layers:
            # TODO(synk): inter-layer nn.LSTM dropout is stochastic; identity
            # (inference semantics) for this deterministic kernel.
            layer_in = jnp.concatenate([h_f, h_b], axis=-1).reshape(T * B, 2 * H)

    # TODO(synk): the nn.Dropout in forward() is stochastic; identity here.

    logits = fc_over_directions(h_f.reshape(T * B, H), h_b.reshape(T * B, H),
                                params["fc_w_split"], params["fc_b"])  # (T*B, Kp)
    logits = logits.reshape(T, B, -1)                                  # (T, B, Kp)

    backptrs, last_scores = viterbi_forward(
        logits, params["crf_trans_t"], params["crf_start"], params["crf_end"])
    return viterbi_backtrack(backptrs, last_scores)                   # (B, T)


# ----------------------------------------------------------------------------
# Deterministic parameter construction (synthetic, matches module shapes)
# ----------------------------------------------------------------------------
def make_params(key, vocab_size, embed_size, hidden_size, num_layers, target_size):
    keys = iter(jax.random.split(key, 6 + 8 * num_layers))
    s = 0.1
    H = hidden_size
    Kp = _round_up(target_size, LANE)                 # lane-dense tag dim

    def nrm(shape):
        return jax.random.normal(next(keys), shape, jnp.float32) * s

    lstm_layers = []
    in_size = embed_size
    for _ in range(num_layers):
        wih_halves, whh_halves, b_halves = [], [], []
        for _d in range(2):                           # 0: forward, 1: backward
            wih = nrm((4 * H, in_size))               # PyTorch weight_ih_l{k}(_reverse)
            whh = nrm((4 * H, H))                     # PyTorch weight_hh_l{k}(_reverse)
            bih = nrm((4 * H,))
            bhh = nrm((4 * H,))
            wih_halves.append(wih.T)                  # (in, 4H)
            whh_halves.append(whh.T)                  # (H, 4H)
            b_halves.append(bih + bhh)                # (4H,)
        lstm_layers.append({
            # Both directions fused along the gate axis for the single-matmul proj:
            "wih": jnp.concatenate(wih_halves, axis=1).astype(jnp.bfloat16),  # (in, 8H)
            "whh": jnp.stack(whh_halves).astype(jnp.bfloat16),                # (2, H, 4H)
            "b": jnp.concatenate(b_halves)[None, :],                          # (1, 8H) f32
        })
        in_size = 2 * H

    fc_w = nrm((target_size, 2 * H))                  # nn.Linear weight (K, 2H)
    fc_b = nrm((target_size,))
    fc_w_t = jnp.zeros((2 * H, Kp), jnp.float32).at[:, :target_size].set(fc_w.T)
    fc_w_split = fc_w_t.reshape(2, H, Kp).astype(jnp.bfloat16)   # rows: [fwd half; bwd half]
    fc_b_pad = jnp.zeros((1, Kp), jnp.float32).at[0, :target_size].set(fc_b)

    crf_trans = nrm((target_size, target_size))       # CRF.transitions
    crf_start = nrm((target_size,))                   # CRF.start_transitions
    crf_end = nrm((target_size,))                     # CRF.end_transitions
    # Pad tag dim to Kp; padded tags are masked so Viterbi can never decode them.
    trans_t = jnp.full((Kp, Kp), NEG, jnp.float32).at[
        :target_size, :target_size].set(crf_trans.T)  # trans_t[j,i] = trans[i,j]
    start_p = jnp.full((1, Kp), NEG, jnp.float32).at[0, :target_size].set(crf_start)
    end_p = jnp.full((1, Kp), NEG, jnp.float32).at[0, :target_size].set(crf_end)

    return {
        "embedding": nrm((vocab_size, embed_size)).astype(jnp.bfloat16),  # bf16 gather/DMA
        "hidden_size": H,
        "lstm_layers": lstm_layers,
        "fc_w_split": fc_w_split,                     # (2, H, Kp) bf16
        "fc_b": fc_b_pad,                             # (1, Kp) f32
        "crf_trans_t": trans_t,                       # (Kp, Kp) f32
        "crf_start": start_p,                         # (1, Kp) f32
        "crf_end": end_p,                             # (1, Kp) f32
    }


if __name__ == "__main__":
    # Small config consistent with the module's __init__
    VOCAB, EMBED, HIDDEN, LAYERS, TAGS = 32, 16, 32, 1, 8
    BATCH, SEQ = 2, 8

    key = jax.random.PRNGKey(0)
    pkey, xkey = jax.random.split(key)
    params = make_params(pkey, VOCAB, EMBED, HIDDEN, LAYERS, TAGS)
    x = jax.random.randint(xkey, (BATCH, SEQ), 0, VOCAB, dtype=jnp.int32)

    fwd = jax.jit(functools.partial(ner_lstm_crf_forward, params=params))
    tags = fwd(x)
    jax.block_until_ready(tags)
    assert tags.shape == (BATCH, SEQ)
    assert tags.dtype == jnp.int32
    assert int(tags.min()) >= 0 and int(tags.max()) < TAGS   # padded tags never decoded
    print("KERNEL_OK")
</pallas_src>

<mosaic_0001>
module attributes {stable_mosaic.version = 11 : i64} {
  func.func @_input_proj_kernel(%arg0: i32, %arg1: memref<16x16xbf16, #tpu.memory_space<vmem>>, %arg2: memref<16x256xbf16, #tpu.memory_space<vmem>>, %arg3: memref<1x256xf32, #tpu.memory_space<vmem>>, %arg4: memref<16x256xf32, #tpu.memory_space<vmem>>) attributes {dimension_semantics = [#tpu.dimension_semantics<parallel>], iteration_bounds = array<i64: 1>, scalar_prefetch = 0 : i64, scratch_operands = 0 : i64, tpu.core_type = #tpu.core_type<tc>, window_params = [{transform_indices = @transform_0, window_bounds = array<i64: 16, 16>}, {pipeline_mode = #tpu.pipeline_mode<synchronous>, transform_indices = @transform_1, window_bounds = array<i64: 16, 256>}, {pipeline_mode = #tpu.pipeline_mode<synchronous>, transform_indices = @transform_2, window_bounds = array<i64: 1, 256>}, {transform_indices = @transform_3, window_bounds = array<i64: 16, 256>}]} {
    %c0 = arith.constant 0 : index
    %c0_0 = arith.constant 0 : index
    %0 = vector.load %arg1[%c0, %c0_0] : memref<16x16xbf16, #tpu.memory_space<vmem>>, vector<16x16xbf16>
    %c0_1 = arith.constant 0 : index
    %c0_2 = arith.constant 0 : index
    %1 = vector.load %arg2[%c0_1, %c0_2] : memref<16x256xbf16, #tpu.memory_space<vmem>>, vector<16x256xbf16>
    %cst = arith.constant dense<0.000000e+00> : vector<16x256xf32>
    %2 = tpu.matmul %0, %1, %cst {dimension_numbers = #tpu.dot_dimension_numbers<[1], [0], [0], [1], [0, 0, 1, 1], [], []>} : vector<16x16xbf16>, vector<16x256xbf16>, vector<16x256xf32> -> vector<16x256xf32>
    %c0_3 = arith.constant 0 : index
    %c0_4 = arith.constant 0 : index
    %3 = vector.load %arg3[%c0_3, %c0_4] : memref<1x256xf32, #tpu.memory_space<vmem>>, vector<1x256xf32>
    %4 = vector.broadcast %3 : vector<1x256xf32> to vector<16x256xf32>
    %5 = arith.addf %2, %4 : vector<16x256xf32>
    %c0_5 = arith.constant 0 : index
    %c0_6 = arith.constant 0 : index
    %6 = vector.load %arg4[%c0_5, %c0_6] : memref<16x256xf32, #tpu.memory_space<vmem>>, vector<16x256xf32>
    tpu.vector_store %arg4[%c0_5, %c0_6], %5 {strides = array<i32>} : memref<16x256xf32, #tpu.memory_space<vmem>>, vector<16x256xf32>,
    return
  }
  func.func @transform_0(%arg0: i32) -> (i32, i32) {
    %c0_i32 = arith.constant 0 : i32
    %c0_i32_0 = arith.constant 0 : i32
    return %arg0, %c0_i32 : i32, i32
  }
  func.func @transform_1(%arg0: i32) -> (i32, i32) {
    %c0_i32 = arith.constant 0 : i32
    %c0_i32_0 = arith.constant 0 : i32
    %c0_i32_1 = arith.constant 0 : i32
    return %c0_i32, %c0_i32_0 : i32, i32
  }
  func.func @transform_2(%arg0: i32) -> (i32, i32) {
    %c0_i32 = arith.constant 0 : i32
    %c0_i32_0 = arith.constant 0 : i32
    %c0_i32_1 = arith.constant 0 : i32
    return %c0_i32, %c0_i32_0 : i32, i32
  }
  func.func @transform_3(%arg0: i32) -> (i32, i32) {
    %c0_i32 = arith.constant 0 : i32
    %c0_i32_0 = arith.constant 0 : i32
    return %arg0, %c0_i32 : i32, i32
  }
}

module attributes {stable_mosaic.version = 11 : i64} {
  func.func @_fc_kernel(%arg0: i32, %arg1: memref<16x32xbf16, #tpu.memory_space<vmem>>, %arg2: memref<16x32xbf16, #tpu.memory_space<vmem>>, %arg3: memref<2x32x128xbf16, #tpu.memory_space<vmem>>, %arg4: memref<1x128xf32, #tpu.memory_space<vmem>>, %arg5: memref<16x128xf32, #tpu.memory_space<vmem>>) attributes {dimension_semantics = [#tpu.dimension_semantics<parallel>], iteration_bounds = array<i64: 1>, scalar_prefetch = 0 : i64, scratch_operands = 0 : i64, tpu.core_type = #tpu.core_type<tc>, window_params = [{transform_indices = @transform_0, window_bounds = array<i64: 16, 32>}, {transform_indices = @transform_1, window_bounds = array<i64: 16, 32>}, {pipeline_mode = #tpu.pipeline_mode<synchronous>, transform_indices = @transform_2, window_bounds = array<i64: 2, 32, 128>}, {pipeline_mode = #tpu.pipeline_mode<synchronous>, transform_indices = @transform_3, window_bounds = array<i64: 1, 128>}, {transform_indices = @transform_4, window_bounds = array<i64: 16, 128>}]} {
    %c0 = arith.constant 0 : index
    %c0_0 = arith.constant 0 : index
    %0 = vector.load %arg1[%c0, %c0_0] : memref<16x32xbf16, #tpu.memory_space<vmem>>, vector<16x32xbf16>
    %c0_1 = arith.constant 0 : index
    %c0_2 = arith.constant 0 : index
    %c0_3 = arith.constant 0 : index
    %1 = vector.load %arg3[%c0_1, %c0_2, %c0_3] : memref<2x32x128xbf16, #tpu.memory_space<vmem>>, vector<1x32x128xbf16>
    %2 = vector.shape_cast %1 : vector<1x32x128xbf16> to vector<32x128xbf16>
    %cst = arith.constant dense<0.000000e+00> : vector<16x128xf32>
    %3 = tpu.matmul %0, %2, %cst {dimension_numbers = #tpu.dot_dimension_numbers<[1], [0], [0], [1], [0, 0, 1, 1], [], []>} : vector<16x32xbf16>, vector<32x128xbf16>, vector<16x128xf32> -> vector<16x128xf32>
    %c0_4 = arith.constant 0 : index
    %c0_5 = arith.constant 0 : index
    %4 = vector.load %arg2[%c0_4, %c0_5] : memref<16x32xbf16, #tpu.memory_space<vmem>>, vector<16x32xbf16>
    %c1 = arith.constant 1 : index
    %c0_6 = arith.constant 0 : index
    %c0_7 = arith.constant 0 : index
    %5 = vector.load %arg3[%c1, %c0_6, %c0_7] : memref<2x32x128xbf16, #tpu.memory_space<vmem>>, vector<1x32x128xbf16>
    %6 = vector.shape_cast %5 : vector<1x32x128xbf16> to vector<32x128xbf16>
    %cst_8 = arith.constant dense<0.000000e+00> : vector<16x128xf32>
    %7 = tpu.matmul %4, %6, %cst_8 {dimension_numbers = #tpu.dot_dimension_numbers<[1], [0], [0], [1], [0, 0, 1, 1], [], []>} : vector<16x32xbf16>, vector<32x128xbf16>, vector<16x128xf32> -> vector<16x128xf32>
    %8 = arith.addf %3, %7 : vector<16x128xf32>
    %c0_9 = arith.constant 0 : index
    %c0_10 = arith.constant 0 : index
    %9 = vector.load %arg4[%c0_9, %c0_10] : memref<1x128xf32, #tpu.memory_space<vmem>>, vector<1x128xf32>
    %10 = vector.broadcast %9 : vector<1x128xf32> to vector<16x128xf32>
    %11 = arith.addf %8, %10 : vector<16x128xf32>
    %c0_11 = arith.constant 0 : index
    %c0_12 = arith.constant 0 : index
    %12 = vector.load %arg5[%c0_11, %c0_12] : memref<16x128xf32, #tpu.memory_space<vmem>>, vector<16x128xf32>
    tpu.vector_store %arg5[%c0_11, %c0_12], %11 {strides = array<i32>} : memref<16x128xf32, #tpu.memory_space<vmem>>, vector<16x128xf32>,
    return
  }
  func.func @transform_0(%arg0: i32) -> (i32, i32) {
    %c0_i32 = arith.constant 0 : i32
    %c0_i32_0 = arith.constant 0 : i32
    return %arg0, %c0_i32 : i32, i32
  }
  func.func @transform_1(%arg0: i32) -> (i32, i32) {
    %c0_i32 = arith.constant 0 : i32
    %c0_i32_0 = arith.constant 0 : i32
    return %arg0, %c0_i32 : i32, i32
  }
  func.func @transform_2(%arg0: i32) -> (i32, i32, i32) {
    %c0_i32 = arith.constant 0 : i32
    %c0_i32_0 = arith.constant 0 : i32
    %c0_i32_1 = arith.constant 0 : i32
    %c0_i32_2 = arith.constant 0 : i32
    return %c0_i32, %c0_i32_0, %c0_i32_1 : i32, i32, i32
  }
  func.func @transform_3(%arg0: i32) -> (i32, i32) {
    %c0_i32 = arith.constant 0 : i32
    %c0_i32_0 = arith.constant 0 : i32
    %c0_i32_1 = arith.constant 0 : i32
    return %c0_i32, %c0_i32_0 : i32, i32
  }
  func.func @transform_4(%arg0: i32) -> (i32, i32) {
    %c0_i32 = arith.constant 0 : i32
    %c0_i32_0 = arith.constant 0 : i32
    return %arg0, %c0_i32 : i32, i32
  }
}

module attributes {stable_mosaic.version = 11 : i64} {
  func.func @_bilstm_recurrent_kernel(%arg0: i32, %arg1: memref<8x2x256xf32, #tpu.memory_space<vmem>>, %arg2: memref<2x32x128xbf16, #tpu.memory_space<vmem>>, %arg3: memref<8x2x32xbf16, #tpu.memory_space<vmem>>, %arg4: memref<8x2x32xbf16, #tpu.memory_space<vmem>>, %arg5: memref<2x32xf32, #tpu.memory_space<vmem>>, %arg6: memref<2x32xf32, #tpu.memory_space<vmem>>, %arg7: memref<2x32xf32, #tpu.memory_space<vmem>>, %arg8: memref<2x32xf32, #tpu.memory_space<vmem>>) attributes {dimension_semantics = [#tpu.dimension_semantics<arbitrary>], iteration_bounds = array<i64: 1>, scalar_prefetch = 0 : i64, scratch_operands = 4 : i64, tpu.core_type = #tpu.core_type<tc>, window_params = [{pipeline_mode = #tpu.pipeline_mode<synchronous>, transform_indices = @transform_0, window_bounds = array<i64: 8, 2, 256>}, {pipeline_mode = #tpu.pipeline_mode<synchronous>, transform_indices = @transform_1, window_bounds = array<i64: 2, 32, 128>}, {pipeline_mode = #tpu.pipeline_mode<synchronous>, transform_indices = @transform_2, window_bounds = array<i64: 8, 2, 32>}, {pipeline_mode = #tpu.pipeline_mode<synchronous>, transform_indices = @transform_3, window_bounds = array<i64: 8, 2, 32>}]} {
    %c0 = arith.constant 0 : index
    %c0_0 = arith.constant 0 : index
    %c0_1 = arith.constant 0 : index
    %0 = vector.load %arg2[%c0, %c0_0, %c0_1] : memref<2x32x128xbf16, #tpu.memory_space<vmem>>, vector<1x32x128xbf16>
    %1 = vector.shape_cast %0 : vector<1x32x128xbf16> to vector<32x128xbf16>
    %c1 = arith.constant 1 : index
    %c0_2 = arith.constant 0 : index
    %c0_3 = arith.constant 0 : index
    %2 = vector.load %arg2[%c1, %c0_2, %c0_3] : memref<2x32x128xbf16, #tpu.memory_space<vmem>>, vector<1x32x128xbf16>
    %3 = vector.shape_cast %2 : vector<1x32x128xbf16> to vector<32x128xbf16>
    %cst = arith.constant 0.000000e+00 : f32
    %4 = vector.broadcast %cst : f32 to vector<2x32xf32>
    %c0_4 = arith.constant 0 : index
    %c0_5 = arith.constant 0 : index
    %5 = vector.load %arg5[%c0_4, %c0_5] : memref<2x32xf32, #tpu.memory_space<vmem>>, vector<2x32xf32>
    tpu.vector_store %arg5[%c0_4, %c0_5], %4 {strides = array<i32>} : memref<2x32xf32, #tpu.memory_space<vmem>>, vector<2x32xf32>,
    %cst_6 = arith.constant 0.000000e+00 : f32
    %6 = vector.broadcast %cst_6 : f32 to vector<2x32xf32>
    %c0_7 = arith.constant 0 : index
    %c0_8 = arith.constant 0 : index
    %7 = vector.load %arg6[%c0_7, %c0_8] : memref<2x32xf32, #tpu.memory_space<vmem>>, vector<2x32xf32>
    tpu.vector_store %arg6[%c0_7, %c0_8], %6 {strides = array<i32>} : memref<2x32xf32, #tpu.memory_space<vmem>>, vector<2x32xf32>,
    %cst_9 = arith.constant 0.000000e+00 : f32
    %8 = vector.broadcast %cst_9 : f32 to vector<2x32xf32>
    %c0_10 = arith.constant 0 : index
    %c0_11 = arith.constant 0 : index
    %9 = vector.load %arg7[%c0_10, %c0_11] : memref<2x32xf32, #tpu.memory_space<vmem>>, vector<2x32xf32>
    tpu.vector_store %arg7[%c0_10, %c0_11], %8 {strides = array<i32>} : memref<2x32xf32, #tpu.memory_space<vmem>>, vector<2x32xf32>,
    %cst_12 = arith.constant 0.000000e+00 : f32
    %10 = vector.broadcast %cst_12 : f32 to vector<2x32xf32>
    %c0_13 = arith.constant 0 : index
    %c0_14 = arith.constant 0 : index
    %11 = vector.load %arg8[%c0_13, %c0_14] : memref<2x32xf32, #tpu.memory_space<vmem>>, vector<2x32xf32>
    tpu.vector_store %arg8[%c0_13, %c0_14], %10 {strides = array<i32>} : memref<2x32xf32, #tpu.memory_space<vmem>>, vector<2x32xf32>,
    %c0_i32 = arith.constant 0 : i32
    %c7_i32 = arith.constant 7 : i32
    %12 = arith.subi %c7_i32, %c0_i32 : i32
    %13 = arith.index_cast %c0_i32 : i32 to index
    %c0_15 = arith.constant 0 : index
    %c0_16 = arith.constant 0 : index
    %14 = vector.load %arg1[%13, %c0_15, %c0_16] : memref<8x2x256xf32, #tpu.memory_space<vmem>>, vector<1x2x256xf32>
    %15 = vector.shape_cast %14 : vector<1x2x256xf32> to vector<2x256xf32>
    %16 = vector.extract_strided_slice %15 {offsets = [0, 0], sizes = [2, 128], strides = [1, 1]} : vector<2x256xf32> to vector<2x128xf32>
    %c0_17 = arith.constant 0 : index
    %c0_18 = arith.constant 0 : index
    %17 = vector.load %arg5[%c0_17, %c0_18] : memref<2x32xf32, #tpu.memory_space<vmem>>, vector<2x32xf32>
    %18 = arith.truncf %17 : vector<2x32xf32> to vector<2x32xbf16>
    %cst_19 = arith.constant dense<0.000000e+00> : vector<2x128xf32>
    %19 = tpu.matmul %18, %1, %cst_19 {dimension_numbers = #tpu.dot_dimension_numbers<[1], [0], [0], [1], [0, 0, 1, 1], [], []>} : vector<2x32xbf16>, vector<32x128xbf16>, vector<2x128xf32> -> vector<2x128xf32>
    %20 = arith.addf %16, %19 : vector<2x128xf32>
    %21 = arith.index_cast %12 : i32 to index
    %c0_20 = arith.constant 0 : index
    %c0_21 = arith.constant 0 : index
    %22 = vector.load %arg1[%21, %c0_20, %c0_21] : memref<8x2x256xf32, #tpu.memory_space<vmem>>, vector<1x2x256xf32>
    %23 = vector.shape_cast %22 : vector<1x2x256xf32> to vector<2x256xf32>
    %24 = vector.extract_strided_slice %23 {offsets = [0, 128], sizes = [2, 128], strides = [1, 1]} : vector<2x256xf32> to vector<2x128xf32>
    %c0_22 = arith.constant 0 : index
    %c0_23 = arith.constant 0 : index
    %25 = vector.load %arg7[%c0_22, %c0_23] : memref<2x32xf32, #tpu.memory_space<vmem>>, vector<2x32xf32>
    %26 = arith.truncf %25 : vector<2x32xf32> to vector<2x32xbf16>
    %cst_24 = arith.constant dense<0.000000e+00> : vector<2x128xf32>
    %27 = tpu.matmul %26, %3, %cst_24 {dimension_numbers = #tpu.dot_dimension_numbers<[1], [0], [0], [1], [0, 0, 1, 1], [], []>} : vector<2x32xbf16>, vector<32x128xbf16>, vector<2x128xf32> -> vector<2x128xf32>
    %28 = arith.addf %24, %27 : vector<2x128xf32>
    %c0_25 = arith.constant 0 : index
    %c0_26 = arith.constant 0 : index
    %29 = vector.load %arg6[%c0_25, %c0_26] : memref<2x32xf32, #tpu.memory_space<vmem>>, vector<2x32xf32>
    %30 = vector.extract_strided_slice %20 {offsets = [0, 0], sizes = [2, 32], strides = [1, 1]} : vector<2x128xf32> to vector<2x32xf32>
    %31 = arith.negf %30 : vector<2x32xf32>
    %32 = math.exp %31 : vector<2x32xf32>
    %cst_27 = arith.constant 1.000000e+00 : f32
    %33 = vector.broadcast %cst_27 : f32 to vector<2x32xf32>
    %34 = arith.addf %33, %32 : vector<2x32xf32>
    %35 = arith.divf %33, %34 : vector<2x32xf32>
    %36 = vector.extract_strided_slice %20 {offsets = [0, 32], sizes = [2, 32], strides = [1, 1]} : vector<2x128xf32> to vector<2x32xf32>
    %37 = arith.negf %36 : vector<2x32xf32>
    %38 = math.exp %37 : vector<2x32xf32>
    %cst_28 = arith.constant 1.000000e+00 : f32
    %39 = vector.broadcast %cst_28 : f32 to vector<2x32xf32>
    %40 = arith.addf %39, %38 : vector<2x32xf32>
    %41 = arith.divf %39, %40 : vector<2x32xf32>
    %42 = vector.extract_strided_slice %20 {offsets = [0, 64], sizes = [2, 32], strides = [1, 1]} : vector<2x128xf32> to vector<2x32xf32>
    %43 = math.tanh %42 : vector<2x32xf32>
    %44 = vector.extract_strided_slice %20 {offsets = [0, 96], sizes = [2, 32], strides = [1, 1]} : vector<2x128xf32> to vector<2x32xf32>
    %45 = arith.negf %44 : vector<2x32xf32>
    %46 = math.exp %45 : vector<2x32xf32>
    %cst_29 = arith.constant 1.000000e+00 : f32
    %47 = vector.broadcast %cst_29 : f32 to vector<2x32xf32>
    %48 = arith.addf %47, %46 : vector<2x32xf32>
    %49 = arith.divf %47, %48 : vector<2x32xf32>
    %50 = arith.mulf %41, %29 : vector<2x32xf32>
    %51 = arith.mulf %35, %43 : vector<2x32xf32>
    %52 = arith.addf %50, %51 : vector<2x32xf32>
    %53 = math.tanh %52 : vector<2x32xf32>
    %54 = arith.mulf %49, %53 : vector<2x32xf32>
    %c0_30 = arith.constant 0 : index
    %c0_31 = arith.constant 0 : index
    %55 = vector.load %arg8[%c0_30, %c0_31] : memref<2x32xf32, #tpu.memory_space<vmem>>, vector<2x32xf32>
    %56 = vector.extract_strided_slice %28 {offsets = [0, 0], sizes = [2, 32], strides = [1, 1]} : vector<2x128xf32> to vector<2x32xf32>
    %57 = arith.negf %56 : vector<2x32xf32>
    %58 = math.exp %57 : vector<2x32xf32>
    %cst_32 = arith.constant 1.000000e+00 : f32
    %59 = vector.broadcast %cst_32 : f32 to vector<2x32xf32>
    %60 = arith.addf %59, %58 : vector<2x32xf32>
    %61 = arith.divf %59, %60 : vector<2x32xf32>
    %62 = vector.extract_strided_slice %28 {offsets = [0, 32], sizes = [2, 32], strides = [1, 1]} : vector<2x128xf32> to vector<2x32xf32>
    %63 = arith.negf %62 : vector<2x32xf32>
    %64 = math.exp %63 : vector<2x32xf32>
    %cst_33 = arith.constant 1.000000e+00 : f32
    %65 = vector.broadcast %cst_33 : f32 to vector<2x32xf32>
    %66 = arith.addf %65, %64 : vector<2x32xf32>
    %67 = arith.divf %65, %66 : vector<2x32xf32>
    %68 = vector.extract_strided_slice %28 {offsets = [0, 64], sizes = [2, 32], strides = [1, 1]} : vector<2x128xf32> to vector<2x32xf32>
    %69 = math.tanh %68 : vector<2x32xf32>
    %70 = vector.extract_strided_slice %28 {offsets = [0, 96], sizes = [2, 32], strides = [1, 1]} : vector<2x128xf32> to vector<2x32xf32>
    %71 = arith.negf %70 : vector<2x32xf32>
    %72 = math.exp %71 : vector<2x32xf32>
    %cst_34 = arith.constant 1.000000e+00 : f32
    %73 = vector.broadcast %cst_34 : f32 to vector<2x32xf32>
    %74 = arith.addf %73, %72 : vector<2x32xf32>
    %75 = arith.divf %73, %74 : vector<2x32xf32>
    %76 = arith.mulf %67, %55 : vector<2x32xf32>
    %77 = arith.mulf %61, %69 : vector<2x32xf32>
    %78 = arith.addf %76, %77 : vector<2x32xf32>
    %79 = math.tanh %78 : vector<2x32xf32>
    %80 = arith.mulf %75, %79 : vector<2x32xf32>
    %c0_35 = arith.constant 0 : index
    %c0_36 = arith.constant 0 : index
    %81 = vector.load %arg5[%c0_35, %c0_36] : memref<2x32xf32, #tpu.memory_space<vmem>>, vector<2x32xf32>
    tpu.vector_store %arg5[%c0_35, %c0_36], %54 {strides = array<i32>} : memref<2x32xf32, #tpu.memory_space<vmem>>, vector<2x32xf32>,
    %c0_37 = arith.constant 0 : index
    %c0_38 = arith.constant 0 : index
    %82 = vector.load %arg6[%c0_37, %c0_38] : memref<2x32xf32, #tpu.memory_space<vmem>>, vector<2x32xf32>
    tpu.vector_store %arg6[%c0_37, %c0_38], %52 {strides = array<i32>} : memref<2x32xf32, #tpu.memory_space<vmem>>, vector<2x32xf32>,
    %c0_39 = arith.constant 0 : index
    %c0_40 = arith.constant 0 : index
    %83 = vector.load %arg7[%c0_39, %c0_40] : memref<2x32xf32, #tpu.memory_space<vmem>>, vector<2x32xf32>
    tpu.vector_store %arg7[%c0_39, %c0_40], %80 {strides = array<i32>} : memref<2x32xf32, #tpu.memory_space<vmem>>, vector<2x32xf32>,
    %c0_41 = arith.constant 0 : index
    %c0_42 = arith.constant 0 : index
    %84 = vector.load %arg8[%c0_41, %c0_42] : memref<2x32xf32, #tpu.memory_space<vmem>>, vector<2x32xf32>
    tpu.vector_store %arg8[%c0_41, %c0_42], %78 {strides = array<i32>} : memref<2x32xf32, #tpu.memory_space<vmem>>, vector<2x32xf32>,
    %85 = arith.truncf %54 : vector<2x32xf32> to vector<2x32xbf16>
    %86 = arith.index_cast %c0_i32 : i32 to index
    %c0_43 = arith.constant 0 : index
    %c0_44 = arith.constant 0 : index
    %87 = vector.load %arg3[%86, %c0_43, %c0_44] : memref<8x2x32xbf16, #tpu.memory_space<vmem>>, vector<1x2x32xbf16>
    %88 = vector.shape_cast %87 : vector<1x2x32xbf16> to vector<2x32xbf16>
    %89 = vector.shape_cast %85 : vector<2x32xbf16> to vector<1x2x32xbf16>
    tpu.vector_store %arg3[%86, %c0_43, %c0_44], %89 {strides = array<i32>} : memref<8x2x32xbf16, #tpu.memory_space<vmem>>, vector<1x2x32xbf16>,
    %90 = arith.truncf %80 : vector<2x32xf32> to vector<2x32xbf16>
    %91 = arith.index_cast %12 : i32 to index
    %c0_45 = arith.constant 0 : index
    %c0_46 = arith.constant 0 : index
    %92 = vector.load %arg4[%91, %c0_45, %c0_46] : memref<8x2x32xbf16, #tpu.memory_space<vmem>>, vector<1x2x32xbf16>
    %93 = vector.shape_cast %92 : vector<1x2x32xbf16> to vector<2x32xbf16>
    %94 = vector.shape_cast %90 : vector<2x32xbf16> to vector<1x2x32xbf16>
    tpu.vector_store %arg4[%91, %c0_45, %c0_46], %94 {strides = array<i32>} : memref<8x2x32xbf16, #tpu.memory_space<vmem>>, vector<1x2x32xbf16>,
    %c1_i32 = arith.constant 1 : i32
    %c7_i32_47 = arith.constant 7 : i32
    %95 = arith.subi %c7_i32_47, %c1_i32 : i32
    %96 = arith.index_cast %c1_i32 : i32 to index
    %c0_48 = arith.constant 0 : index
    %c0_49 = arith.constant 0 : index
    %97 = vector.load %arg1[%96, %c0_48, %c0_49] : memref<8x2x256xf32, #tpu.memory_space<vmem>>, vector<1x2x256xf32>
    %98 = vector.shape_cast %97 : vector<1x2x256xf32> to vector<2x256xf32>
    %99 = vector.extract_strided_slice %98 {offsets = [0, 0], sizes = [2, 128], strides = [1, 1]} : vector<2x256xf32> to vector<2x128xf32>
    %c0_50 = arith.constant 0 : index
    %c0_51 = arith.constant 0 : index
    %100 = vector.load %arg5[%c0_50, %c0_51] : memref<2x32xf32, #tpu.memory_space<vmem>>, vector<2x32xf32>
    %101 = arith.truncf %100 : vector<2x32xf32> to vector<2x32xbf16>
    %cst_52 = arith.constant dense<0.000000e+00> : vector<2x128xf32>
    %102 = tpu.matmul %101, %1, %cst_52 {dimension_numbers = #tpu.dot_dimension_numbers<[1], [0], [0], [1], [0, 0, 1, 1], [], []>} : vector<2x32xbf16>, vector<32x128xbf16>, vector<2x128xf32> -> vector<2x128xf32>
    %103 = arith.addf %99, %102 : vector<2x128xf32>
    %104 = arith.index_cast %95 : i32 to index
    %c0_53 = arith.constant 0 : index
    %c0_54 = arith.constant 0 : index
    %105 = vector.load %arg1[%104, %c0_53, %c0_54] : memref<8x2x256xf32, #tpu.memory_space<vmem>>, vector<1x2x256xf32>
    %106 = vector.shape_cast %105 : vector<1x2x256xf32> to vector<2x256xf32>
    %107 = vector.extract_strided_slice %106 {offsets = [0, 128], sizes = [2, 128], strides = [1, 1]} : vector<2x256xf32> to vector<2x128xf32>
    %c0_55 = arith.constant 0 : index
    %c0_56 = arith.constant 0 : index
    %108 = vector.load %arg7[%c0_55, %c0_56] : memref<2x32xf32, #tpu.memory_space<vmem>>, vector<2x32xf32>
    %109 = arith.truncf %108 : vector<2x32xf32> to vector<2x32xbf16>
    %cst_57 = arith.constant dense<0.000000e+00> : vector<2x128xf32>
    %110 = tpu.matmul %109, %3, %cst_57 {dimension_numbers = #tpu.dot_dimension_numbers<[1], [0], [0], [1], [0, 0, 1, 1], [], []>} : vector<2x32xbf16>, vector<32x128xbf16>, vector<2x128xf32> -> vector<2x128xf32>
    %111 = arith.addf %107, %110 : vector<2x128xf32>
    %c0_58 = arith.constant 0 : index
    %c0_59 = arith.constant 0 : index
    %112 = vector.load %arg6[%c0_58, %c0_59] : memref<2x32xf32, #tpu.memory_space<vmem>>, vector<2x32xf32>
    %113 = vector.extract_strided_slice %103 {offsets = [0, 0], sizes = [2, 32], strides = [1, 1]} : vector<2x128xf32> to vector<2x32xf32>
    %114 = arith.negf %113 : vector<2x32xf32>
    %115 = math.exp %114 : vector<2x32xf32>
    %cst_60 = arith.constant 1.000000e+00 : f32
    %116 = vector.broadcast %cst_60 : f32 to vector<2x32xf32>
    %117 = arith.addf %116, %115 : vector<2x32xf32>
    %118 = arith.divf %116, %117 : vector<2x32xf32>
    %119 = vector.extract_strided_slice %103 {offsets = [0, 32], sizes = [2, 32], strides = [1, 1]} : vector<2x128xf32> to vector<2x32xf32>
    %120 = arith.negf %119 : vector<2x32xf32>
    %121 = math.exp %120 : vector<2x32xf32>
    %cst_61 = arith.constant 1.000000e+00 : f32
    %122 = vector.broadcast %cst_61 : f32 to vector<2x32xf32>
    %123 = arith.addf %122, %121 : vector<2x32xf32>
    %124 = arith.divf %122, %123 : vector<2x32xf32>
    %125 = vector.extract_strided_slice %103 {offsets = [0, 64], sizes = [2, 32], strides = [1, 1]} : vector<2x128xf32> to vector<2x32xf32>
    %126 = math.tanh %125 : vector<2x32xf32>
    %127 = vector.extract_strided_slice %103 {offsets = [0, 96], sizes = [2, 32], strides = [1, 1]} : vector<2x128xf32> to vector<2x32xf32>
    %128 = arith.negf %127 : vector<2x32xf32>
    %129 = math.exp %128 : vector<2x32xf32>
    %cst_62 = arith.constant 1.000000e+00 : f32
    %130 = vector.broadcast %cst_62 : f32 to vector<2x32xf32>
    %131 = arith.addf %130, %129 : vector<2x32xf32>
    %132 = arith.divf %130, %131 : vector<2x32xf32>
    %133 = arith.mulf %124, %112 : vector<2x32xf32>
    %134 = arith.mulf %118, %126 : vector<2x32xf32>
    %135 = arith.addf %133, %134 : vector<2x32xf32>
    %136 = math.tanh %135 : vector<2x32xf32>
    %137 = arith.mulf %132, %136 : vector<2x32xf32>
    %c0_63 = arith.constant 0 : index
    %c0_64 = arith.constant 0 : index
    %138 = vector.load %arg8[%c0_63, %c0_64] : memref<2x32xf32, #tpu.memory_space<vmem>>, vector<2x32xf32>
    %139 = vector.extract_strided_slice %111 {offsets = [0, 0], sizes = [2, 32], strides = [1, 1]} : vector<2x128xf32> to vector<2x32xf32>
    %140 = arith.negf %139 : vector<2x32xf32>
    %141 = math.exp %140 : vector<2x32xf32>
    %cst_65 = arith.constant 1.000000e+00 : f32
    %142 = vector.broadcast %cst_65 : f32 to vector<2x32xf32>
    %143 = arith.addf %142, %141 : vector<2x32xf32>
    %144 = arith.divf %142, %143 : vector<2x32xf32>
    %145 = vector.extract_strided_slice %111 {offsets = [0, 32], sizes = [2, 32], strides = [1, 1]} : vector<2x128xf32> to vector<2x32xf32>
    %146 = arith.negf %145 : vector<2x32xf32>
    %147 = math.exp %146 : vector<2x32xf32>
    %cst_66 = arith.constant 1.000000e+00 : f32
    %148 = vector.broadcast %cst_66 : f32 to vector<2x32xf32>
    %149 = arith.addf %148, %147 : vector<2x32xf32>
    %150 = arith.divf %148, %149 : vector<2x32xf32>
    %151 = vector.extract_strided_slice %111 {offsets = [0, 64], sizes = [2, 32], strides = [1, 1]} : vector<2x128xf32> to vector<2x32xf32>
    %152 = math.tanh %151 : vector<2x32xf32>
    %153 = vector.extract_strided_slice %111 {offsets = [0, 96], sizes = [2, 32], strides = [1, 1]} : vector<2x128xf32> to vector<2x32xf32>
    %154 = arith.negf %153 : vector<2x32xf32>
    %155 = math.exp %154 : vector<2x32xf32>
    %cst_67 = arith.constant 1.000000e+00 : f32
    %156 = vector.broadcast %cst_67 : f32 to vector<2x32xf32>
    %157 = arith.addf %156, %155 : vector<2x32xf32>
    %158 = arith.divf %156, %157 : vector<2x32xf32>
    %159 = arith.mulf %150, %138 : vector<2x32xf32>
    %160 = arith.mulf %144, %152 : vector<2x32xf32>
    %161 = arith.addf %159, %160 : vector<2x32xf32>
    %162 = math.tanh %161 : vector<2x32xf32>
    %163 = arith.mulf %158, %162 : vector<2x32xf32>
    %c0_68 = arith.constant 0 : index
    %c0_69 = arith.constant 0 : index
    %164 = vector.load %arg5[%c0_68, %c0_69] : memref<2x32xf32, #tpu.memory_space<vmem>>, vector<2x32xf32>
    tpu.vector_store %arg5[%c0_68, %c0_69], %137 {strides = array<i32>} : memref<2x32xf32, #tpu.memory_space<vmem>>, vector<2x32xf32>,
    %c0_70 = arith.constant 0 : index
    %c0_71 = arith.constant 0 : index
    %165 = vector.load %arg6[%c0_70, %c0_71] : memref<2x32xf32, #tpu.memory_space<vmem>>, vector<2x32xf32>
    tpu.vector_store %arg6[%c0_70, %c0_71], %135 {strides = array<i32>} : memref<2x32xf32, #tpu.memory_space<vmem>>, vector<2x32xf32>,
    %c0_72 = arith.constant 0 : index
    %c0_73 = arith.constant 0 : index
    %166 = vector.load %arg7[%c0_72, %c0_73] : memref<2x32xf32, #tpu.memory_space<vmem>>, vector<2x32xf32>
    tpu.vector_store %arg7[%c0_72, %c0_73], %163 {strides = array<i32>} : memref<2x32xf32, #tpu.memory_space<vmem>>, vector<2x32xf32>,
    %c0_74 = arith.constant 0 : index
    %c0_75 = arith.constant 0 : index
    %167 = vector.load %arg8[%c0_74, %c0_75] : memref<2x32xf32, #tpu.memory_space<vmem>>, vector<2x32xf32>
    tpu.vector_store %arg8[%c0_74, %c0_75], %161 {strides = array<i32>} : memref<2x32xf32, #tpu.memory_space<vmem>>, vector<2x32xf32>,
    %168 = arith.truncf %137 : vector<2x32xf32> to vector<2x32xbf16>
    %169 = arith.index_cast %c1_i32 : i32 to index
    %c0_76 = arith.constant 0 : index
    %c0_77 = arith.constant 0 : index
    %170 = vector.load %arg3[%169, %c0_76, %c0_77] : memref<8x2x32xbf16, #tpu.memory_space<vmem>>, vector<1x2x32xbf16>
    %171 = vector.shape_cast %170 : vector<1x2x32xbf16> to vector<2x32xbf16>
    %172 = vector.shape_cast %168 : vector<2x32xbf16> to vector<1x2x32xbf16>
    tpu.vector_store %arg3[%169, %c0_76, %c0_77], %172 {strides = array<i32>} : memref<8x2x32xbf16, #tpu.memory_space<vmem>>, vector<1x2x32xbf16>,
    %173 = arith.truncf %163 : vector<2x32xf32> to vector<2x32xbf16>
    %174 = arith.index_cast %95 : i32 to index
    %c0_78 = arith.constant 0 : index
    %c0_79 = arith.constant 0 : index
    %175 = vector.load %arg4[%174, %c0_78, %c0_79] : memref<8x2x32xbf16, #tpu.memory_space<vmem>>, vector<1x2x32xbf16>
    %176 = vector.shape_cast %175 : vector<1x2x32xbf16> to vector<2x32xbf16>
    %177 = vector.shape_cast %173 : vector<2x32xbf16> to vector<1x2x32xbf16>
    tpu.vector_store %arg4[%174, %c0_78, %c0_79], %177 {strides = array<i32>} : memref<8x2x32xbf16, #tpu.memory_space<vmem>>, vector<1x2x32xbf16>,
    %c2_i32 = arith.constant 2 : i32
    %c7_i32_80 = arith.constant 7 : i32
    %178 = arith.subi %c7_i32_80, %c2_i32 : i32
    %179 = arith.index_cast %c2_i32 : i32 to index
    %c0_81 = arith.constant 0 : index
    %c0_82 = arith.constant 0 : index
    %180 = vector.load %arg1[%179, %c0_81, %c0_82] : memref<8x2x256xf32, #tpu.memory_space<vmem>>, vector<1x2x256xf32>
    %181 = vector.shape_cast %180 : vector<1x2x256xf32> to vector<2x256xf32>
    %182 = vector.extract_strided_slice %181 {offsets = [0, 0], sizes = [2, 128], strides = [1, 1]} : vector<2x256xf32> to vector<2x128xf32>
    %c0_83 = arith.constant 0 : index
    %c0_84 = arith.constant 0 : index
    %183 = vector.load %arg5[%c0_83, %c0_84] : memref<2x32xf32, #tpu.memory_space<vmem>>, vector<2x32xf32>
    %184 = arith.truncf %183 : vector<2x32xf32> to vector<2x32xbf16>
    %cst_85 = arith.constant dense<0.000000e+00> : vector<2x128xf32>
    %185 = tpu.matmul %184, %1, %cst_85 {dimension_numbers = #tpu.dot_dimension_numbers<[1], [0], [0], [1], [0, 0, 1, 1], [], []>} : vector<2x32xbf16>, vector<32x128xbf16>, vector<2x128xf32> -> vector<2x128xf32>
    %186 = arith.addf %182, %185 : vector<2x128xf32>
    %187 = arith.index_cast %178 : i32 to index
    %c0_86 = arith.constant 0 : index
    %c0_87 = arith.constant 0 : index
    %188 = vector.load %arg1[%187, %c0_86, %c0_87] : memref<8x2x256xf32, #tpu.memory_space<vmem>>, vector<1x2x256xf32>
    %189 = vector.shape_cast %188 : vector<1x2x256xf32> to vector<2x256xf32>
    %190 = vector.extract_strided_slice %189 {offsets = [0, 128], sizes = [2, 128], strides = [1, 1]} : vector<2x256xf32> to vector<2x128xf32>
    %c0_88 = arith.constant 0 : index
    %c0_89 = arith.constant 0 : index
    %191 = vector.load %arg7[%c0_88, %c0_89] : memref<2x32xf32, #tpu.memory_space<vmem>>, vector<2x32xf32>
    %192 = arith.truncf %191 : vector<2x32xf32> to vector<2x32xbf16>
    %cst_90 = arith.constant dense<0.000000e+00> : vector<2x128xf32>
    %193 = tpu.matmul %192, %3, %cst_90 {dimension_numbers = #tpu.dot_dimension_numbers<[1], [0], [0], [1], [0, 0, 1, 1], [], []>} : vector<2x32xbf16>, vector<32x128xbf16>, vector<2x128xf32> -> vector<2x128xf32>
    %194 = arith.addf %190, %193 : vector<2x128xf32>
    %c0_91 = arith.constant 0 : index
    %c0_92 = arith.constant 0 : index
    %195 = vector.load %arg6[%c0_91, %c0_92] : memref<2x32xf32, #tpu.memory_space<vmem>>, vector<2x32xf32>
    %196 = vector.extract_strided_slice %186 {offsets = [0, 0], sizes = [2, 32], strides = [1, 1]} : vector<2x128xf32> to vector<2x32xf32>
    %197 = arith.negf %196 : vector<2x32xf32>
    %198 = math.exp %197 : vector<2x32xf32>
    %cst_93 = arith.constant 1.000000e+00 : f32
    %199 = vector.broadcast %cst_93 : f32 to vector<2x32xf32>
    %200 = arith.addf %199, %198 : vector<2x32xf32>
    %201 = arith.divf %199, %200 : vector<2x32xf32>
    %202 = vector.extract_strided_slice %186 {offsets = [0, 32], sizes = [2, 32], strides = [1, 1]} : vector<2x128xf32> to vector<2x32xf32>
    %203 = arith.negf %202 : vector<2x32xf32>
    %204 = math.exp %203 : vector<2x32xf32>
    %cst_94 = arith.constant 1.000000e+00 : f32
    %205 = vector.broadcast %cst_94 : f32 to vector<2x32xf32>
    %206 = arith.addf %205, %204 : vector<2x32xf32>
    %207 = arith.divf %205, %206 : vector<2x32xf32>
    %208 = vector.extract_strided_slice %186 {offsets = [0, 64], sizes = [2, 32], strides = [1, 1]} : vector<2x128xf32> to vector<2x32xf32>
    %209 = math.tanh %208 : vector<2x32xf32>
    %210 = vector.extract_strided_slice %186 {offsets = [0, 96], sizes = [2, 32], strides = [1, 1]} : vector<2x128xf32> to vector<2x32xf32>
    %211 = arith.negf %210 : vector<2x32xf32>
    %212 = math.exp %211 : vector<2x32xf32>
    %cst_95 = arith.constant 1.000000e+00 : f32
    %213 = vector.broadcast %cst_95 : f32 to vector<2x32xf32>
    %214 = arith.addf %213, %212 : vector<2x32xf32>
    %215 = arith.divf %213, %214 : vector<2x32xf32>
    %216 = arith.mulf %207, %195 : vector<2x32xf32>
    %217 = arith.mulf %201, %209 : vector<2x32xf32>
    %218 = arith.addf %216, %217 : vector<2x32xf32>
    %219 = math.tanh %218 : vector<2x32xf32>
    %220 = arith.mulf %215, %219 : vector<2x32xf32>
    %c0_96 = arith.constant 0 : index
    %c0_97 = arith.constant 0 : index
    %221 = vector.load %arg8[%c0_96, %c0_97] : memref<2x32xf32, #tpu.memory_space<vmem>>, vector<2x32xf32>
    %222 = vector.extract_strided_slice %194 {offsets = [0, 0], sizes = [2, 32], strides = [1, 1]} : vector<2x128xf32> to vector<2x32xf32>
    %223 = arith.negf %222 : vector<2x32xf32>
    %224 = math.exp %223 : vector<2x32xf32>
    %cst_98 = arith.constant 1.000000e+00 : f32
    %225 = vector.broadcast %cst_98 : f32 to vector<2x32xf32>
    %226 = arith.addf %225, %224 : vector<2x32xf32>
    %227 = arith.divf %225, %226 : vector<2x32xf32>
    %228 = vector.extract_strided_slice %194 {offsets = [0, 32], sizes = [2, 32], strides = [1, 1]} : vector<2x128xf32> to vector<2x32xf32>
    %229 = arith.negf %228 : vector<2x32xf32>
    %230 = math.exp %229 : vector<2x32xf32>
    %cst_99 = arith.constant 1.000000e+00 : f32
    %231 = vector.broadcast %cst_99 : f32 to vector<2x32xf32>
    %232 = arith.addf %231, %230 : vector<2x32xf32>
    %233 = arith.divf %231, %232 : vector<2x32xf32>
    %234 = vector.extract_strided_slice %194 {offsets = [0, 64], sizes = [2, 32], strides = [1, 1]} : vector<2x128xf32> to vector<2x32xf32>
    %235 = math.tanh %234 : vector<2x32xf32>
    %236 = vector.extract_strided_slice %194 {offsets = [0, 96], sizes = [2, 32], strides = [1, 1]} : vector<2x128xf32> to vector<2x32xf32>
    %237 = arith.negf %236 : vector<2x32xf32>
    %238 = math.exp %237 : vector<2x32xf32>
    %cst_100 = arith.constant 1.000000e+00 : f32
    %239 = vector.broadcast %cst_100 : f32 to vector<2x32xf32>
    %240 = arith.addf %239, %238 : vector<2x32xf32>
    %241 = arith.divf %239, %240 : vector<2x32xf32>
    %242 = arith.mulf %233, %221 : vector<2x32xf32>
    %243 = arith.mulf %227, %235 : vector<2x32xf32>
    %244 = arith.addf %242, %243 : vector<2x32xf32>
    %245 = math.tanh %244 : vector<2x32xf32>
    %246 = arith.mulf %241, %245 : vector<2x32xf32>
    %c0_101 = arith.constant 0 : index
    %c0_102 = arith.constant 0 : index
    %247 = vector.load %arg5[%c0_101, %c0_102] : memref<2x32xf32, #tpu.memory_space<vmem>>, vector<2x32xf32>
    tpu.vector_store %arg5[%c0_101, %c0_102], %220 {strides = array<i32>} : memref<2x32xf32, #tpu.memory_space<vmem>>, vector<2x32xf32>,
    %c0_103 = arith.constant 0 : index
    %c0_104 = arith.constant 0 : index
    %248 = vector.load %arg6[%c0_103, %c0_104] : memref<2x32xf32, #tpu.memory_space<vmem>>, vector<2x32xf32>
    tpu.vector_store %arg6[%c0_103, %c0_104], %218 {strides = array<i32>} : memref<2x32xf32, #tpu.memory_space<vmem>>, vector<2x32xf32>,
    %c0_105 = arith.constant 0 : index
    %c0_106 = arith.constant 0 : index
    %249 = vector.load %arg7[%c0_105, %c0_106] : memref<2x32xf32, #tpu.memory_space<vmem>>, vector<2x32xf32>
    tpu.vector_store %arg7[%c0_105, %c0_106], %246 {strides = array<i32>} : memref<2x32xf32, #tpu.memory_space<vmem>>, vector<2x32xf32>,
    %c0_107 = arith.constant 0 : index
    %c0_108 = arith.constant 0 : index
    %250 = vector.load %arg8[%c0_107, %c0_108] : memref<2x32xf32, #tpu.memory_space<vmem>>, vector<2x32xf32>
    tpu.vector_store %arg8[%c0_107, %c0_108], %244 {strides = array<i32>} : memref<2x32xf32, #tpu.memory_space<vmem>>, vector<2x32xf32>,
    %251 = arith.truncf %220 : vector<2x32xf32> to vector<2x32xbf16>
    %252 = arith.index_cast %c2_i32 : i32 to index
    %c0_109 = arith.constant 0 : index
    %c0_110 = arith.constant 0 : index
    %253 = vector.load %arg3[%252, %c0_109, %c0_110] : memref<8x2x32xbf16, #tpu.memory_space<vmem>>, vector<1x2x32xbf16>
    %254 = vector.shape_cast %253 : vector<1x2x32xbf16> to vector<2x32xbf16>
    %255 = vector.shape_cast %251 : vector<2x32xbf16> to vector<1x2x32xbf16>
    tpu.vector_store %arg3[%252, %c0_109, %c0_110], %255 {strides = array<i32>} : memref<8x2x32xbf16, #tpu.memory_space<vmem>>, vector<1x2x32xbf16>,
    %256 = arith.truncf %246 : vector<2x32xf32> to vector<2x32xbf16>
    %257 = arith.index_cast %178 : i32 to index
    %c0_111 = arith.constant 0 : index
    %c0_112 = arith.constant 0 : index
    %258 = vector.load %arg4[%257, %c0_111, %c0_112] : memref<8x2x32xbf16, #tpu.memory_space<vmem>>, vector<1x2x32xbf16>
    %259 = vector.shape_cast %258 : vector<1x2x32xbf16> to vector<2x32xbf16>
    %260 = vector.shape_cast %256 : vector<2x32xbf16> to vector<1x2x32xbf16>
    tpu.vector_store %arg4[%257, %c0_111, %c0_112], %260 {strides = array<i32>} : memref<8x2x32xbf16, #tpu.memory_space<vmem>>, vector<1x2x32xbf16>,
    %c3_i32 = arith.constant 3 : i32
    %c7_i32_113 = arith.constant 7 : i32
    %261 = arith.subi %c7_i32_113, %c3_i32 : i32
    %262 = arith.index_cast %c3_i32 : i32 to index
    %c0_114 = arith.constant 0 : index
    %c0_115 = arith.constant 0 : index
    %263 = vector.load %arg1[%262, %c0_114, %c0_115] : memref<8x2x256xf32, #tpu.memory_space<vmem>>, vector<1x2x256xf32>
    %264 = vector.shape_cast %263 : vector<1x2x256xf32> to vector<2x256xf32>
    %265 = vector.extract_strided_slice %264 {offsets = [0, 0], sizes = [2, 128], strides = [1, 1]} : vector<2x256xf32> to vector<2x128xf32>
    %c0_116 = arith.constant 0 : index
    %c0_117 = arith.constant 0 : index
    %266 = vector.load %arg5[%c0_116, %c0_117] : memref<2x32xf32, #tpu.memory_space<vmem>>, vector<2x32xf32>
    %267 = arith.truncf %266 : vector<2x32xf32> to vector<2x32xbf16>
    %cst_118 = arith.constant dense<0.000000e+00> : vector<2x128xf32>
    %268 = tpu.matmul %267, %1, %cst_118 {dimension_numbers = #tpu.dot_dimension_numbers<[1], [0], [0], [1], [0, 0, 1, 1], [], []>} : vector<2x32xbf16>, vector<32x128xbf16>, vector<2x128xf32> -> vector<2x128xf32>
    %269 = arith.addf %265, %268 : vector<2x128xf32>
    %270 = arith.index_cast %261 : i32 to index
    %c0_119 = arith.constant 0 : index
    %c0_120 = arith.constant 0 : index
    %271 = vector.load %arg1[%270, %c0_119, %c0_120] : memref<8x2x256xf32, #tpu.memory_space<vmem>>, vector<1x2x256xf32>
    %272 = vector.shape_cast %271 : vector<1x2x256xf32> to vector<2x256xf32>
    %273 = vector.extract_strided_slice %272 {offsets = [0, 128], sizes = [2, 128], strides = [1, 1]} : vector<2x256xf32> to vector<2x128xf32>
    %c0_121 = arith.constant 0 : index
    %c0_122 = arith.constant 0 : index
    %274 = vector.load %arg7[%c0_121, %c0_122] : memref<2x32xf32, #tpu.memory_space<vmem>>, vector<2x32xf32>
    %275 = arith.truncf %274 : vector<2x32xf32> to vector<2x32xbf16>
    %cst_123 = arith.constant dense<0.000000e+00> : vector<2x128xf32>
    %276 = tpu.matmul %275, %3, %cst_123 {dimension_numbers = #tpu.dot_dimension_numbers<[1], [0], [0], [1], [0, 0, 1, 1], [], []>} : vector<2x32xbf16>, vector<32x128xbf16>, vector<2x128xf32> -> vector<2x128xf32>
    %277 = arith.addf %273, %276 : vector<2x128xf32>
    %c0_124 = arith.constant 0 : index
    %c0_125 = arith.constant 0 : index
    %278 = vector.load %arg6[%c0_124, %c0_125] : memref<2x32xf32, #tpu.memory_space<vmem>>, vector<2x32xf32>
    %279 = vector.extract_strided_slice %269 {offsets = [0, 0], sizes = [2, 32], strides = [1, 1]} : vector<2x128xf32> to vector<2x32xf32>
    %280 = arith.negf %279 : vector<2x32xf32>
    %281 = math.exp %280 : vector<2x32xf32>
    %cst_126 = arith.constant 1.000000e+00 : f32
    %282 = vector.broadcast %cst_126 : f32 to vector<2x32xf32>
    %283 = arith.addf %282, %281 : vector<2x32xf32>
    %284 = arith.divf %282, %283 : vector<2x32xf32>
    %285 = vector.extract_strided_slice %269 {offsets = [0, 32], sizes = [2, 32], strides = [1, 1]} : vector<2x128xf32> to vector<2x32xf32>
    %286 = arith.negf %285 : vector<2x32xf32>
    %287 = math.exp %286 : vector<2x32xf32>
    %cst_127 = arith.constant 1.000000e+00 : f32
    %288 = vector.broadcast %cst_127 : f32 to vector<2x32xf32>
    %289 = arith.addf %288, %287 : vector<2x32xf32>
    %290 = arith.divf %288, %289 : vector<2x32xf32>
    %291 = vector.extract_strided_slice %269 {offsets = [0, 64], sizes = [2, 32], strides = [1, 1]} : vector<2x128xf32> to vector<2x32xf32>
    %292 = math.tanh %291 : vector<2x32xf32>
    %293 = vector.extract_strided_slice %269 {offsets = [0, 96], sizes = [2, 32], strides = [1, 1]} : vector<2x128xf32> to vector<2x32xf32>
    %294 = arith.negf %293 : vector<2x32xf32>
    %295 = math.exp %294 : vector<2x32xf32>
    %cst_128 = arith.constant 1.000000e+00 : f32
    %296 = vector.broadcast %cst_128 : f32 to vector<2x32xf32>
    %297 = arith.addf %296, %295 : vector<2x32xf32>
    %298 = arith.divf %296, %297 : vector<2x32xf32>
    %299 = arith.mulf %290, %278 : vector<2x32xf32>
    %300 = arith.mulf %284, %292 : vector<2x32xf32>
    %301 = arith.addf %299, %300 : vector<2x32xf32>
    %302 = math.tanh %301 : vector<2x32xf32>
    %303 = arith.mulf %298, %302 : vector<2x32xf32>
    %c0_129 = arith.constant 0 : index
    %c0_130 = arith.constant 0 : index
    %304 = vector.load %arg8[%c0_129, %c0_130] : memref<2x32xf32, #tpu.memory_space<vmem>>, vector<2x32xf32>
    %305 = vector.extract_strided_slice %277 {offsets = [0, 0], sizes = [2, 32], strides = [1, 1]} : vector<2x128xf32> to vector<2x32xf32>
    %306 = arith.negf %305 : vector<2x32xf32>
    %307 = math.exp %306 : vector<2x32xf32>
    %cst_131 = arith.constant 1.000000e+00 : f32
    %308 = vector.broadcast %cst_131 : f32 to vector<2x32xf32>
    %309 = arith.addf %308, %307 : vector<2x32xf32>
    %310 = arith.divf %308, %309 : vector<2x32xf32>
    %311 = vector.extract_strided_slice %277 {offsets = [0, 32], sizes = [2, 32], strides = [1, 1]} : vector<2x128xf32> to vector<2x32xf32>
    %312 = arith.negf %311 : vector<2x32xf32>
    %313 = math.exp %312 : vector<2x32xf32>
    %cst_132 = arith.constant 1.000000e+00 : f32
    %314 = vector.broadcast %cst_132 : f32 to vector<2x32xf32>
    %315 = arith.addf %314, %313 : vector<2x32xf32>
    %316 = arith.divf %314, %315 : vector<2x32xf32>
    %317 = vector.extract_strided_slice %277 {offsets = [0, 64], sizes = [2, 32], strides = [1, 1]} : vector<2x128xf32> to vector<2x32xf32>
    %318 = math.tanh %317 : vector<2x32xf32>
    %319 = vector.extract_strided_slice %277 {offsets = [0, 96], sizes = [2, 32], strides = [1, 1]} : vector<2x128xf32> to vector<2x32xf32>
    %320 = arith.negf %319 : vector<2x32xf32>
    %321 = math.exp %320 : vector<2x32xf32>
    %cst_133 = arith.constant 1.000000e+00 : f32
    %322 = vector.broadcast %cst_133 : f32 to vector<2x32xf32>
    %323 = arith.addf %322, %321 : vector<2x32xf32>
    %324 = arith.divf %322, %323 : vector<2x32xf32>
    %325 = arith.mulf %316, %304 : vector<2x32xf32>
    %326 = arith.mulf %310, %318 : vector<2x32xf32>
    %327 = arith.addf %325, %326 : vector<2x32xf32>
    %328 = math.tanh %327 : vector<2x32xf32>
    %329 = arith.mulf %324, %328 : vector<2x32xf32>
    %c0_134 = arith.constant 0 : index
    %c0_135 = arith.constant 0 : index
    %330 = vector.load %arg5[%c0_134, %c0_135] : memref<2x32xf32, #tpu.memory_space<vmem>>, vector<2x32xf32>
    tpu.vector_store %arg5[%c0_134, %c0_135], %303 {strides = array<i32>} : memref<2x32xf32, #tpu.memory_space<vmem>>, vector<2x32xf32>,
    %c0_136 = arith.constant 0 : index
    %c0_137 = arith.constant 0 : index
    %331 = vector.load %arg6[%c0_136, %c0_137] : memref<2x32xf32, #tpu.memory_space<vmem>>, vector<2x32xf32>
    tpu.vector_store %arg6[%c0_136, %c0_137], %301 {strides = array<i32>} : memref<2x32xf32, #tpu.memory_space<vmem>>, vector<2x32xf32>,
    %c0_138 = arith.constant 0 : index
    %c0_139 = arith.constant 0 : index
    %332 = vector.load %arg7[%c0_138, %c0_139] : memref<2x32xf32, #tpu.memory_space<vmem>>, vector<2x32xf32>
    tpu.vector_store %arg7[%c0_138, %c0_139], %329 {strides = array<i32>} : memref<2x32xf32, #tpu.memory_space<vmem>>, vector<2x32xf32>,
    %c0_140 = arith.constant 0 : index
    %c0_141 = arith.constant 0 : index
    %333 = vector.load %arg8[%c0_140, %c0_141] : memref<2x32xf32, #tpu.memory_space<vmem>>, vector<2x32xf32>
    tpu.vector_store %arg8[%c0_140, %c0_141], %327 {strides = array<i32>} : memref<2x32xf32, #tpu.memory_space<vmem>>, vector<2x32xf32>,
    %334 = arith.truncf %303 : vector<2x32xf32> to vector<2x32xbf16>
    %335 = arith.index_cast %c3_i32 : i32 to index
    %c0_142 = arith.constant 0 : index
    %c0_143 = arith.constant 0 : index
    %336 = vector.load %arg3[%335, %c0_142, %c0_143] : memref<8x2x32xbf16, #tpu.memory_space<vmem>>, vector<1x2x32xbf16>
    %337 = vector.shape_cast %336 : vector<1x2x32xbf16> to vector<2x32xbf16>
    %338 = vector.shape_cast %334 : vector<2x32xbf16> to vector<1x2x32xbf16>
    tpu.vector_store %arg3[%335, %c0_142, %c0_143], %338 {strides = array<i32>} : memref<8x2x32xbf16, #tpu.memory_space<vmem>>, vector<1x2x32xbf16>,
    %339 = arith.truncf %329 : vector<2x32xf32> to vector<2x32xbf16>
    %340 = arith.index_cast %261 : i32 to index
    %c0_144 = arith.constant 0 : index
    %c0_145 = arith.constant 0 : index
    %341 = vector.load %arg4[%340, %c0_144, %c0_145] : memref<8x2x32xbf16, #tpu.memory_space<vmem>>, vector<1x2x32xbf16>
    %342 = vector.shape_cast %341 : vector<1x2x32xbf16> to vector<2x32xbf16>
    %343 = vector.shape_cast %339 : vector<2x32xbf16> to vector<1x2x32xbf16>
    tpu.vector_store %arg4[%340, %c0_144, %c0_145], %343 {strides = array<i32>} : memref<8x2x32xbf16, #tpu.memory_space<vmem>>, vector<1x2x32xbf16>,
    %c4_i32 = arith.constant 4 : i32
    %c7_i32_146 = arith.constant 7 : i32
    %344 = arith.subi %c7_i32_146, %c4_i32 : i32
    %345 = arith.index_cast %c4_i32 : i32 to index
    %c0_147 = arith.constant 0 : index
    %c0_148 = arith.constant 0 : index
    %346 = vector.load %arg1[%345, %c0_147, %c0_148] : memref<8x2x256xf32, #tpu.memory_space<vmem>>, vector<1x2x256xf32>
    %347 = vector.shape_cast %346 : vector<1x2x256xf32> to vector<2x256xf32>
    %348 = vector.extract_strided_slice %347 {offsets = [0, 0], sizes = [2, 128], strides = [1, 1]} : vector<2x256xf32> to vector<2x128xf32>
    %c0_149 = arith.constant 0 : index
    %c0_150 = arith.constant 0 : index
    %349 = vector.load %arg5[%c0_149, %c0_150] : memref<2x32xf32, #tpu.memory_space<vmem>>, vector<2x32xf32>
    %350 = arith.truncf %349 : vector<2x32xf32> to vector<2x32xbf16>
    %cst_151 = arith.constant dense<0.000000e+00> : vector<2x128xf32>
    %351 = tpu.matmul %350, %1, %cst_151 {dimension_numbers = #tpu.dot_dimension_numbers<[1], [0], [0], [1], [0, 0, 1, 1], [], []>} : vector<2x32xbf16>, vector<32x128xbf16>, vector<2x128xf32> -> vector<2x128xf32>
    %352 = arith.addf %348, %351 : vector<2x128xf32>
    %353 = arith.index_cast %344 : i32 to index
    %c0_152 = arith.constant 0 : index
    %c0_153 = arith.constant 0 : index
    %354 = vector.load %arg1[%353, %c0_152, %c0_153] : memref<8x2x256xf32, #tpu.memory_space<vmem>>, vector<1x2x256xf32>
    %355 = vector.shape_cast %354 : vector<1x2x256xf32> to vector<2x256xf32>
    %356 = vector.extract_strided_slice %355 {offsets = [0, 128], sizes = [2, 128], strides = [1, 1]} : vector<2x256xf32> to vector<2x128xf32>
    %c0_154 = arith.constant 0 : index
    %c0_155 = arith.constant 0 : index
    %357 = vector.load %arg7[%c0_154, %c0_155] : memref<2x32xf32, #tpu.memory_space<vmem>>, vector<2x32xf32>
    %358 = arith.truncf %357 : vector<2x32xf32> to vector<2x32xbf16>
    %cst_156 = arith.constant dense<0.000000e+00> : vector<2x128xf32>
    %359 = tpu.matmul %358, %3, %cst_156 {dimension_numbers = #tpu.dot_dimension_numbers<[1], [0], [0], [1], [0, 0, 1, 1], [], []>} : vector<2x32xbf16>, vector<32x128xbf16>, vector<2x128xf32> -> vector<2x128xf32>
    %360 = arith.addf %356, %359 : vector<2x128xf32>
    %c0_157 = arith.constant 0 : index
    %c0_158 = arith.constant 0 : index
    %361 = vector.load %arg6[%c0_157, %c0_158] : memref<2x32xf32, #tpu.memory_space<vmem>>, vector<2x32xf32>
    %362 = vector.extract_strided_slice %352 {offsets = [0, 0], sizes = [2, 32], strides = [1, 1]} : vector<2x128xf32> to vector<2x32xf32>
    %363 = arith.negf %362 : vector<2x32xf32>
    %364 = math.exp %363 : vector<2x32xf32>
    %cst_159 = arith.constant 1.000000e+00 : f32
    %365 = vector.broadcast %cst_159 : f32 to vector<2x32xf32>
    %366 = arith.addf %365, %364 : vector<2x32xf32>
    %367 = arith.divf %365, %366 : vector<2x32xf32>
    %368 = vector.extract_strided_slice %352 {offsets = [0, 32], sizes = [2, 32], strides = [1, 1]} : vector<2x128xf32> to vector<2x32xf32>
    %369 = arith.negf %368 : vector<2x32xf32>
    %370 = math.exp %369 : vector<2x32xf32>
    %cst_160 = arith.constant 1.000000e+00 : f32
    %371 = vector.broadcast %cst_160 : f32 to vector<2x32xf32>
    %372 = arith.addf %371, %370 : vector<2x32xf32>
    %373 = arith.divf %371, %372 : vector<2x32xf32>
    %374 = vector.extract_strided_slice %352 {offsets = [0, 64], sizes = [2, 32], strides = [1, 1]} : vector<2x128xf32> to vector<2x32xf32>
    %375 = math.tanh %374 : vector<2x32xf32>
    %376 = vector.extract_strided_slice %352 {offsets = [0, 96], sizes = [2, 32], strides = [1, 1]} : vector<2x128xf32> to vector<2x32xf32>
    %377 = arith.negf %376 : vector<2x32xf32>
    %378 = math.exp %377 : vector<2x32xf32>
    %cst_161 = arith.constant 1.000000e+00 : f32
    %379 = vector.broadcast %cst_161 : f32 to vector<2x32xf32>
    %380 = arith.addf %379, %378 : vector<2x32xf32>
    %381 = arith.divf %379, %380 : vector<2x32xf32>
    %382 = arith.mulf %373, %361 : vector<2x32xf32>
    %383 = arith.mulf %367, %375 : vector<2x32xf32>
    %384 = arith.addf %382, %383 : vector<2x32xf32>
    %385 = math.tanh %384 : vector<2x32xf32>
    %386 = arith.mulf %381, %385 : vector<2x32xf32>
    %c0_162 = arith.constant 0 : index
    %c0_163 = arith.constant 0 : index
    %387 = vector.load %arg8[%c0_162, %c0_163] : memref<2x32xf32, #tpu.memory_space<vmem>>, vector<2x32xf32>
    %388 = vector.extract_strided_slice %360 {offsets = [0, 0], sizes = [2, 32], strides = [1, 1]} : vector<2x128xf32> to vector<2x32xf32>
    %389 = arith.negf %388 : vector<2x32xf32>
    %390 = math.exp %389 : vector<2x32xf32>
    %cst_164 = arith.constant 1.000000e+00 : f32
    %391 = vector.broadcast %cst_164 : f32 to vector<2x32xf32>
    %392 = arith.addf %391, %390 : vector<2x32xf32>
    %393 = arith.divf %391, %392 : vector<2x32xf32>
    %394 = vector.extract_strided_slice %360 {offsets = [0, 32], sizes = [2, 32], strides = [1, 1]} : vector<2x128xf32> to vector<2x32xf32>
    %395 = arith.negf %394 : vector<2x32xf32>
    %396 = math.exp %395 : vector<2x32xf32>
    %cst_165 = arith.constant 1.000000e+00 : f32
    %397 = vector.broadcast %cst_165 : f32 to vector<2x32xf32>
    %398 = arith.addf %397, %396 : vector<2x32xf32>
    %399 = arith.divf %397, %398 : vector<2x32xf32>
    %400 = vector.extract_strided_slice %360 {offsets = [0, 64], sizes = [2, 32], strides = [1, 1]} : vector<2x128xf32> to vector<2x32xf32>
    %401 = math.tanh %400 : vector<2x32xf32>
    %402 = vector.extract_strided_slice %360 {offsets = [0, 96], sizes = [2, 32], strides = [1, 1]} : vector<2x128xf32> to vector<2x32xf32>
    %403 = arith.negf %402 : vector<2x32xf32>
    %404 = math.exp %403 : vector<2x32xf32>
    %cst_166 = arith.constant 1.000000e+00 : f32
    %405 = vector.broadcast %cst_166 : f32 to vector<2x32xf32>
    %406 = arith.addf %405, %404 : vector<2x32xf32>
    %407 = arith.divf %405, %406 : vector<2x32xf32>
    %408 = arith.mulf %399, %387 : vector<2x32xf32>
    %409 = arith.mulf %393, %401 : vector<2x32xf32>
    %410 = arith.addf %408, %409 : vector<2x32xf32>
    %411 = math.tanh %410 : vector<2x32xf32>
    %412 = arith.mulf %407, %411 : vector<2x32xf32>
    %c0_167 = arith.constant 0 : index
    %c0_168 = arith.constant 0 : index
    %413 = vector.load %arg5[%c0_167, %c0_168] : memref<2x32xf32, #tpu.memory_space<vmem>>, vector<2x32xf32>
    tpu.vector_store %arg5[%c0_167, %c0_168], %386 {strides = array<i32>} : memref<2x32xf32, #tpu.memory_space<vmem>>, vector<2x32xf32>,
    %c0_169 = arith.constant 0 : index
    %c0_170 = arith.constant 0 : index
    %414 = vector.load %arg6[%c0_169, %c0_170] : memref<2x32xf32, #tpu.memory_space<vmem>>, vector<2x32xf32>
    tpu.vector_store %arg6[%c0_169, %c0_170], %384 {strides = array<i32>} : memref<2x32xf32, #tpu.memory_space<vmem>>, vector<2x32xf32>,
    %c0_171 = arith.constant 0 : index
    %c0_172 = arith.constant 0 : index
    %415 = vector.load %arg7[%c0_171, %c0_172] : memref<2x32xf32, #tpu.memory_space<vmem>>, vector<2x32xf32>
    tpu.vector_store %arg7[%c0_171, %c0_172], %412 {strides = array<i32>} : memref<2x32xf32, #tpu.memory_space<vmem>>, vector<2x32xf32>,
    %c0_173 = arith.constant 0 : index
    %c0_174 = arith.constant 0 : index
    %416 = vector.load %arg8[%c0_173, %c0_174] : memref<2x32xf32, #tpu.memory_space<vmem>>, vector<2x32xf32>
    tpu.vector_store %arg8[%c0_173, %c0_174], %410 {strides = array<i32>} : memref<2x32xf32, #tpu.memory_space<vmem>>, vector<2x32xf32>,
    %417 = arith.truncf %386 : vector<2x32xf32> to vector<2x32xbf16>
    %418 = arith.index_cast %c4_i32 : i32 to index
    %c0_175 = arith.constant 0 : index
    %c0_176 = arith.constant 0 : index
    %419 = vector.load %arg3[%418, %c0_175, %c0_176] : memref<8x2x32xbf16, #tpu.memory_space<vmem>>, vector<1x2x32xbf16>
    %420 = vector.shape_cast %419 : vector<1x2x32xbf16> to vector<2x32xbf16>
    %421 = vector.shape_cast %417 : vector<2x32xbf16> to vector<1x2x32xbf16>
    tpu.vector_store %arg3[%418, %c0_175, %c0_176], %421 {strides = array<i32>} : memref<8x2x32xbf16, #tpu.memory_space<vmem>>, vector<1x2x32xbf16>,
    %422 = arith.truncf %412 : vector<2x32xf32> to vector<2x32xbf16>
    %423 = arith.index_cast %344 : i32 to index
    %c0_177 = arith.constant 0 : index
    %c0_178 = arith.constant 0 : index
    %424 = vector.load %arg4[%423, %c0_177, %c0_178] : memref<8x2x32xbf16, #tpu.memory_space<vmem>>, vector<1x2x32xbf16>
    %425 = vector.shape_cast %424 : vector<1x2x32xbf16> to vector<2x32xbf16>
    %426 = vector.shape_cast %422 : vector<2x32xbf16> to vector<1x2x32xbf16>
    tpu.vector_store %arg4[%423, %c0_177, %c0_178], %426 {strides = array<i32>} : memref<8x2x32xbf16, #tpu.memory_space<vmem>>, vector<1x2x32xbf16>,
    %c5_i32 = arith.constant 5 : i32
    %c7_i32_179 = arith.constant 7 : i32
    %427 = arith.subi %c7_i32_179, %c5_i32 : i32
    %428 = arith.index_cast %c5_i32 : i32 to index
    %c0_180 = arith.constant 0 : index
    %c0_181 = arith.constant 0 : index
    %429 = vector.load %arg1[%428, %c0_180, %c0_181] : memref<8x2x256xf32, #tpu.memory_space<vmem>>, vector<1x2x256xf32>
    %430 = vector.shape_cast %429 : vector<1x2x256xf32> to vector<2x256xf32>
    %431 = vector.extract_strided_slice %430 {offsets = [0, 0], sizes = [2, 128], strides = [1, 1]} : vector<2x256xf32> to vector<2x128xf32>
    %c0_182 = arith.constant 0 : index
    %c0_183 = arith.constant 0 : index
    %432 = vector.load %arg5[%c0_182, %c0_183] : memref<2x32xf32, #tpu.memory_space<vmem>>, vector<2x32xf32>
    %433 = arith.truncf %432 : vector<2x32xf32> to vector<2x32xbf16>
    %cst_184 = arith.constant dense<0.000000e+00> : vector<2x128xf32>
    %434 = tpu.matmul %433, %1, %cst_184 {dimension_numbers = #tpu.dot_dimension_numbers<[1], [0], [0], [1], [0, 0, 1, 1], [], []>} : vector<2x32xbf16>, vector<32x128xbf16>, vector<2x128xf32> -> vector<2x128xf32>
    %435 = arith.addf %431, %434 : vector<2x128xf32>
    %436 = arith.index_cast %427 : i32 to index
    %c0_185 = arith.constant 0 : index
    %c0_186 = arith.constant 0 : index
    %437 = vector.load %arg1[%436, %c0_185, %c0_186] : memref<8x2x256xf32, #tpu.memory_space<vmem>>, vector<1x2x256xf32>
    %438 = vector.shape_cast %437 : vector<1x2x256xf32> to vector<2x256xf32>
    %439 = vector.extract_strided_slice %438 {offsets = [0, 128], sizes = [2, 128], strides = [1, 1]} : vector<2x256xf32> to vector<2x128xf32>
    %c0_187 = arith.constant 0 : index
    %c0_188 = arith.constant 0 : index
    %440 = vector.load %arg7[%c0_187, %c0_188] : memref<2x32xf32, #tpu.memory_space<vmem>>, vector<2x32xf32>
    %441 = arith.truncf %440 : vector<2x32xf32> to vector<2x32xbf16>
    %cst_189 = arith.constant dense<0.000000e+00> : vector<2x128xf32>
    %442 = tpu.matmul %441, %3, %cst_189 {dimension_numbers = #tpu.dot_dimension_numbers<[1], [0], [0], [1], [0, 0, 1, 1], [], []>} : vector<2x32xbf16>, vector<32x128xbf16>, vector<2x128xf32> -> vector<2x128xf32>
    %443 = arith.addf %439, %442 : vector<2x128xf32>
    %c0_190 = arith.constant 0 : index
    %c0_191 = arith.constant 0 : index
    %444 = vector.load %arg6[%c0_190, %c0_191] : memref<2x32xf32, #tpu.memory_space<vmem>>, vector<2x32xf32>
    %445 = vector.extract_strided_slice %435 {offsets = [0, 0], sizes = [2, 32], strides = [1, 1]} : vector<2x128xf32> to vector<2x32xf32>
    %446 = arith.negf %445 : vector<2x32xf32>
    %447 = math.exp %446 : vector<2x32xf32>
    %cst_192 = arith.constant 1.000000e+00 : f32
    %448 = vector.broadcast %cst_192 : f32 to vector<2x32xf32>
    %449 = arith.addf %448, %447 : vector<2x32xf32>
    %450 = arith.divf %448, %449 : vector<2x32xf32>
    %451 = vector.extract_strided_slice %435 {offsets = [0, 32], sizes = [2, 32], strides = [1, 1]} : vector<2x128xf32> to vector<2x32xf32>
    %452 = arith.negf %451 : vector<2x32xf32>
    %453 = math.exp %452 : vector<2x32xf32>
    %cst_193 = arith.constant 1.000000e+00 : f32
    %454 = vector.broadcast %cst_193 : f32 to vector<2x32xf32>
    %455 = arith.addf %454, %453 : vector<2x32xf32>
    %456 = arith.divf %454, %455 : vector<2x32xf32>
    %457 = vector.extract_strided_slice %435 {offsets = [0, 64], sizes = [2, 32], strides = [1, 1]} : vector<2x128xf32> to vector<2x32xf32>
    %458 = math.tanh %457 : vector<2x32xf32>
    %459 = vector.extract_strided_slice %435 {offsets = [0, 96], sizes = [2, 32], strides = [1, 1]} : vector<2x128xf32> to vector<2x32xf32>
    %460 = arith.negf %459 : vector<2x32xf32>
    %461 = math.exp %460 : vector<2x32xf32>
    %cst_194 = arith.constant 1.000000e+00 : f32
    %462 = vector.broadcast %cst_194 : f32 to vector<2x32xf32>
    %463 = arith.addf %462, %461 : vector<2x32xf32>
    %464 = arith.divf %462, %463 : vector<2x32xf32>
    %465 = arith.mulf %456, %444 : vector<2x32xf32>
    %466 = arith.mulf %450, %458 : vector<2x32xf32>
    %467 = arith.addf %465, %466 : vector<2x32xf32>
    %468 = math.tanh %467 : vector<2x32xf32>
    %469 = arith.mulf %464, %468 : vector<2x32xf32>
    %c0_195 = arith.constant 0 : index
    %c0_196 = arith.constant 0 : index
    %470 = vector.load %arg8[%c0_195, %c0_196] : memref<2x32xf32, #tpu.memory_space<vmem>>, vector<2x32xf32>
    %471 = vector.extract_strided_slice %443 {offsets = [0, 0], sizes = [2, 32], strides = [1, 1]} : vector<2x128xf32> to vector<2x32xf32>
    %472 = arith.negf %471 : vector<2x32xf32>
    %473 = math.exp %472 : vector<2x32xf32>
    %cst_197 = arith.constant 1.000000e+00 : f32
    %474 = vector.broadcast %cst_197 : f32 to vector<2x32xf32>
    %475 = arith.addf %474, %473 : vector<2x32xf32>
    %476 = arith.divf %474, %475 : vector<2x32xf32>
    %477 = vector.extract_strided_slice %443 {offsets = [0, 32], sizes = [2, 32], strides = [1, 1]} : vector<2x128xf32> to vector<2x32xf32>
    %478 = arith.negf %477 : vector<2x32xf32>
    %479 = math.exp %478 : vector<2x32xf32>
    %cst_198 = arith.constant 1.000000e+00 : f32
    %480 = vector.broadcast %cst_198 : f32 to vector<2x32xf32>
    %481 = arith.addf %480, %479 : vector<2x32xf32>
    %482 = arith.divf %480, %481 : vector<2x32xf32>
    %483 = vector.extract_strided_slice %443 {offsets = [0, 64], sizes = [2, 32], strides = [1, 1]} : vector<2x128xf32> to vector<2x32xf32>
    %484 = math.tanh %483 : vector<2x32xf32>
    %485 = vector.extract_strided_slice %443 {offsets = [0, 96], sizes = [2, 32], strides = [1, 1]} : vector<2x128xf32> to vector<2x32xf32>
    %486 = arith.negf %485 : vector<2x32xf32>
    %487 = math.exp %486 : vector<2x32xf32>
    %cst_199 = arith.constant 1.000000e+00 : f32
    %488 = vector.broadcast %cst_199 : f32 to vector<2x32xf32>
    %489 = arith.addf %488, %487 : vector<2x32xf32>
    %490 = arith.divf %488, %489 : vector<2x32xf32>
    %491 = arith.mulf %482, %470 : vector<2x32xf32>
    %492 = arith.mulf %476, %484 : vector<2x32xf32>
    %493 = arith.addf %491, %492 : vector<2x32xf32>
    %494 = math.tanh %493 : vector<2x32xf32>
    %495 = arith.mulf %490, %494 : vector<2x32xf32>
    %c0_200 = arith.constant 0 : index
    %c0_201 = arith.constant 0 : index
    %496 = vector.load %arg5[%c0_200, %c0_201] : memref<2x32xf32, #tpu.memory_space<vmem>>, vector<2x32xf32>
    tpu.vector_store %arg5[%c0_200, %c0_201], %469 {strides = array<i32>} : memref<2x32xf32, #tpu.memory_space<vmem>>, vector<2x32xf32>,
    %c0_202 = arith.constant 0 : index
    %c0_203 = arith.constant 0 : index
    %497 = vector.load %arg6[%c0_202, %c0_203] : memref<2x32xf32, #tpu.memory_space<vmem>>, vector<2x32xf32>
    tpu.vector_store %arg6[%c0_202, %c0_203], %467 {strides = array<i32>} : memref<2x32xf32, #tpu.memory_space<vmem>>, vector<2x32xf32>,
    %c0_204 = arith.constant 0 : index
    %c0_205 = arith.constant 0 : index
    %498 = vector.load %arg7[%c0_204, %c0_205] : memref<2x32xf32, #tpu.memory_space<vmem>>, vector<2x32xf32>
    tpu.vector_store %arg7[%c0_204, %c0_205], %495 {strides = array<i32>} : memref<2x32xf32, #tpu.memory_space<vmem>>, vector<2x32xf32>,
    %c0_206 = arith.constant 0 : index
    %c0_207 = arith.constant 0 : index
    %499 = vector.load %arg8[%c0_206, %c0_207] : memref<2x32xf32, #tpu.memory_space<vmem>>, vector<2x32xf32>
    tpu.vector_store %arg8[%c0_206, %c0_207], %493 {strides = array<i32>} : memref<2x32xf32, #tpu.memory_space<vmem>>, vector<2x32xf32>,
    %500 = arith.truncf %469 : vector<2x32xf32> to vector<2x32xbf16>
    %501 = arith.index_cast %c5_i32 : i32 to index
    %c0_208 = arith.constant 0 : index
    %c0_209 = arith.constant 0 : index
    %502 = vector.load %arg3[%501, %c0_208, %c0_209] : memref<8x2x32xbf16, #tpu.memory_space<vmem>>, vector<1x2x32xbf16>
    %503 = vector.shape_cast %502 : vector<1x2x32xbf16> to vector<2x32xbf16>
    %504 = vector.shape_cast %500 : vector<2x32xbf16> to vector<1x2x32xbf16>
    tpu.vector_store %arg3[%501, %c0_208, %c0_209], %504 {strides = array<i32>} : memref<8x2x32xbf16, #tpu.memory_space<vmem>>, vector<1x2x32xbf16>,
    %505 = arith.truncf %495 : vector<2x32xf32> to vector<2x32xbf16>
    %506 = arith.index_cast %427 : i32 to index
    %c0_210 = arith.constant 0 : index
    %c0_211 = arith.constant 0 : index
    %507 = vector.load %arg4[%506, %c0_210, %c0_211] : memref<8x2x32xbf16, #tpu.memory_space<vmem>>, vector<1x2x32xbf16>
    %508 = vector.shape_cast %507 : vector<1x2x32xbf16> to vector<2x32xbf16>
    %509 = vector.shape_cast %505 : vector<2x32xbf16> to vector<1x2x32xbf16>
    tpu.vector_store %arg4[%506, %c0_210, %c0_211], %509 {strides = array<i32>} : memref<8x2x32xbf16, #tpu.memory_space<vmem>>, vector<1x2x32xbf16>,
    %c6_i32 = arith.constant 6 : i32
    %c7_i32_212 = arith.constant 7 : i32
    %510 = arith.subi %c7_i32_212, %c6_i32 : i32
    %511 = arith.index_cast %c6_i32 : i32 to index
    %c0_213 = arith.constant 0 : index
    %c0_214 = arith.constant 0 : index
    %512 = vector.load %arg1[%511, %c0_213, %c0_214] : memref<8x2x256xf32, #tpu.memory_space<vmem>>, vector<1x2x256xf32>
    %513 = vector.shape_cast %512 : vector<1x2x256xf32> to vector<2x256xf32>
    %514 = vector.extract_strided_slice %513 {offsets = [0, 0], sizes = [2, 128], strides = [1, 1]} : vector<2x256xf32> to vector<2x128xf32>
    %c0_215 = arith.constant 0 : index
    %c0_216 = arith.constant 0 : index
    %515 = vector.load %arg5[%c0_215, %c0_216] : memref<2x32xf32, #tpu.memory_space<vmem>>, vector<2x32xf32>
    %516 = arith.truncf %515 : vector<2x32xf32> to vector<2x32xbf16>
    %cst_217 = arith.constant dense<0.000000e+00> : vector<2x128xf32>
    %517 = tpu.matmul %516, %1, %cst_217 {dimension_numbers = #tpu.dot_dimension_numbers<[1], [0], [0], [1], [0, 0, 1, 1], [], []>} : vector<2x32xbf16>, vector<32x128xbf16>, vector<2x128xf32> -> vector<2x128xf32>
    %518 = arith.addf %514, %517 : vector<2x128xf32>
    %519 = arith.index_cast %510 : i32 to index
    %c0_218 = arith.constant 0 : index
    %c0_219 = arith.constant 0 : index
    %520 = vector.load %arg1[%519, %c0_218, %c0_219] : memref<8x2x256xf32, #tpu.memory_space<vmem>>, vector<1x2x256xf32>
    %521 = vector.shape_cast %520 : vector<1x2x256xf32> to vector<2x256xf32>
    %522 = vector.extract_strided_slice %521 {offsets = [0, 128], sizes = [2, 128], strides = [1, 1]} : vector<2x256xf32> to vector<2x128xf32>
    %c0_220 = arith.constant 0 : index
    %c0_221 = arith.constant 0 : index
    %523 = vector.load %arg7[%c0_220, %c0_221] : memref<2x32xf32, #tpu.memory_space<vmem>>, vector<2x32xf32>
    %524 = arith.truncf %523 : vector<2x32xf32> to vector<2x32xbf16>
    %cst_222 = arith.constant dense<0.000000e+00> : vector<2x128xf32>
    %525 = tpu.matmul %524, %3, %cst_222 {dimension_numbers = #tpu.dot_dimension_numbers<[1], [0], [0], [1], [0, 0, 1, 1], [], []>} : vector<2x32xbf16>, vector<32x128xbf16>, vector<2x128xf32> -> vector<2x128xf32>
    %526 = arith.addf %522, %525 : vector<2x128xf32>
    %c0_223 = arith.constant 0 : index
    %c0_224 = arith.constant 0 : index
    %527 = vector.load %arg6[%c0_223, %c0_224] : memref<2x32xf32, #tpu.memory_space<vmem>>, vector<2x32xf32>
    %528 = vector.extract_strided_slice %518 {offsets = [0, 0], sizes = [2, 32], strides = [1, 1]} : vector<2x128xf32> to vector<2x32xf32>
    %529 = arith.negf %528 : vector<2x32xf32>
    %530 = math.exp %529 : vector<2x32xf32>
    %cst_225 = arith.constant 1.000000e+00 : f32
    %531 = vector.broadcast %cst_225 : f32 to vector<2x32xf32>
    %532 = arith.addf %531, %530 : vector<2x32xf32>
    %533 = arith.divf %531, %532 : vector<2x32xf32>
    %534 = vector.extract_strided_slice %518 {offsets = [0, 32], sizes = [2, 32], strides = [1, 1]} : vector<2x128xf32> to vector<2x32xf32>
    %535 = arith.negf %534 : vector<2x32xf32>
    %536 = math.exp %535 : vector<2x32xf32>
    %cst_226 = arith.constant 1.000000e+00 : f32
    %537 = vector.broadcast %cst_226 : f32 to vector<2x32xf32>
    %538 = arith.addf %537, %536 : vector<2x32xf32>
    %539 = arith.divf %537, %538 : vector<2x32xf32>
    %540 = vector.extract_strided_slice %518 {offsets = [0, 64], sizes = [2, 32], strides = [1, 1]} : vector<2x128xf32> to vector<2x32xf32>
    %541 = math.tanh %540 : vector<2x32xf32>
    %542 = vector.extract_strided_slice %518 {offsets = [0, 96], sizes = [2, 32], strides = [1, 1]} : vector<2x128xf32> to vector<2x32xf32>
    %543 = arith.negf %542 : vector<2x32xf32>
    %544 = math.exp %543 : vector<2x32xf32>
    %cst_227 = arith.constant 1.000000e+00 : f32
    %545 = vector.broadcast %cst_227 : f32 to vector<2x32xf32>
    %546 = arith.addf %545, %544 : vector<2x32xf32>
    %547 = arith.divf %545, %546 : vector<2x32xf32>
    %548 = arith.mulf %539, %527 : vector<2x32xf32>
    %549 = arith.mulf %533, %541 : vector<2x32xf32>
    %550 = arith.addf %548, %549 : vector<2x32xf32>
    %551 = math.tanh %550 : vector<2x32xf32>
    %552 = arith.mulf %547, %551 : vector<2x32xf32>
    %c0_228 = arith.constant 0 : index
    %c0_229 = arith.constant 0 : index
    %553 = vector.load %arg8[%c0_228, %c0_229] : memref<2x32xf32, #tpu.memory_space<vmem>>, vector<2x32xf32>
    %554 = vector.extract_strided_slice %526 {offsets = [0, 0], sizes = [2, 32], strides = [1, 1]} : vector<2x128xf32> to vector<2x32xf32>
    %555 = arith.negf %554 : vector<2x32xf32>
    %556 = math.exp %555 : vector<2x32xf32>
    %cst_230 = arith.constant 1.000000e+00 : f32
    %557 = vector.broadcast %cst_230 : f32 to vector<2x32xf32>
    %558 = arith.addf %557, %556 : vector<2x32xf32>
    %559 = arith.divf %557, %558 : vector<2x32xf32>
    %560 = vector.extract_strided_slice %526 {offsets = [0, 32], sizes = [2, 32], strides = [1, 1]} : vector<2x128xf32> to vector<2x32xf32>
    %561 = arith.negf %560 : vector<2x32xf32>
    %562 = math.exp %561 : vector<2x32xf32>
    %cst_231 = arith.constant 1.000000e+00 : f32
    %563 = vector.broadcast %cst_231 : f32 to vector<2x32xf32>
    %564 = arith.addf %563, %562 : vector<2x32xf32>
    %565 = arith.divf %563, %564 : vector<2x32xf32>
    %566 = vector.extract_strided_slice %526 {offsets = [0, 64], sizes = [2, 32], strides = [1, 1]} : vector<2x128xf32> to vector<2x32xf32>
    %567 = math.tanh %566 : vector<2x32xf32>
    %568 = vector.extract_strided_slice %526 {offsets = [0, 96], sizes = [2, 32], strides = [1, 1]} : vector<2x128xf32> to vector<2x32xf32>
    %569 = arith.negf %568 : vector<2x32xf32>
    %570 = math.exp %569 : vector<2x32xf32>
    %cst_232 = arith.constant 1.000000e+00 : f32
    %571 = vector.broadcast %cst_232 : f32 to vector<2x32xf32>
    %572 = arith.addf %571, %570 : vector<2x32xf32>
    %573 = arith.divf %571, %572 : vector<2x32xf32>
    %574 = arith.mulf %565, %553 : vector<2x32xf32>
    %575 = arith.mulf %559, %567 : vector<2x32xf32>
    %576 = arith.addf %574, %575 : vector<2x32xf32>
    %577 = math.tanh %576 : vector<2x32xf32>
    %578 = arith.mulf %573, %577 : vector<2x32xf32>
    %c0_233 = arith.constant 0 : index
    %c0_234 = arith.constant 0 : index
    %579 = vector.load %arg5[%c0_233, %c0_234] : memref<2x32xf32, #tpu.memory_space<vmem>>, vector<2x32xf32>
    tpu.vector_store %arg5[%c0_233, %c0_234], %552 {strides = array<i32>} : memref<2x32xf32, #tpu.memory_space<vmem>>, vector<2x32xf32>,
    %c0_235 = arith.constant 0 : index
    %c0_236 = arith.constant 0 : index
    %580 = vector.load %arg6[%c0_235, %c0_236] : memref<2x32xf32, #tpu.memory_space<vmem>>, vector<2x32xf32>
    tpu.vector_store %arg6[%c0_235, %c0_236], %550 {strides = array<i32>} : memref<2x32xf32, #tpu.memory_space<vmem>>, vector<2x32xf32>,
    %c0_237 = arith.constant 0 : index
    %c0_238 = arith.constant 0 : index
    %581 = vector.load %arg7[%c0_237, %c0_238] : memref<2x32xf32, #tpu.memory_space<vmem>>, vector<2x32xf32>
    tpu.vector_store %arg7[%c0_237, %c0_238], %578 {strides = array<i32>} : memref<2x32xf32, #tpu.memory_space<vmem>>, vector<2x32xf32>,
    %c0_239 = arith.constant 0 : index
    %c0_240 = arith.constant 0 : index
    %582 = vector.load %arg8[%c0_239, %c0_240] : memref<2x32xf32, #tpu.memory_space<vmem>>, vector<2x32xf32>
    tpu.vector_store %arg8[%c0_239, %c0_240], %576 {strides = array<i32>} : memref<2x32xf32, #tpu.memory_space<vmem>>, vector<2x32xf32>,
    %583 = arith.truncf %552 : vector<2x32xf32> to vector<2x32xbf16>
    %584 = arith.index_cast %c6_i32 : i32 to index
    %c0_241 = arith.constant 0 : index
    %c0_242 = arith.constant 0 : index
    %585 = vector.load %arg3[%584, %c0_241, %c0_242] : memref<8x2x32xbf16, #tpu.memory_space<vmem>>, vector<1x2x32xbf16>
    %586 = vector.shape_cast %585 : vector<1x2x32xbf16> to vector<2x32xbf16>
    %587 = vector.shape_cast %583 : vector<2x32xbf16> to vector<1x2x32xbf16>
    tpu.vector_store %arg3[%584, %c0_241, %c0_242], %587 {strides = array<i32>} : memref<8x2x32xbf16, #tpu.memory_space<vmem>>, vector<1x2x32xbf16>,
    %588 = arith.truncf %578 : vector<2x32xf32> to vector<2x32xbf16>
    %589 = arith.index_cast %510 : i32 to index
    %c0_243 = arith.constant 0 : index
    %c0_244 = arith.constant 0 : index
    %590 = vector.load %arg4[%589, %c0_243, %c0_244] : memref<8x2x32xbf16, #tpu.memory_space<vmem>>, vector<1x2x32xbf16>
    %591 = vector.shape_cast %590 : vector<1x2x32xbf16> to vector<2x32xbf16>
    %592 = vector.shape_cast %588 : vector<2x32xbf16> to vector<1x2x32xbf16>
    tpu.vector_store %arg4[%589, %c0_243, %c0_244], %592 {strides = array<i32>} : memref<8x2x32xbf16, #tpu.memory_space<vmem>>, vector<1x2x32xbf16>,
    %c7_i32_245 = arith.constant 7 : i32
    %c7_i32_246 = arith.constant 7 : i32
    %593 = arith.subi %c7_i32_246, %c7_i32_245 : i32
    %594 = arith.index_cast %c7_i32_245 : i32 to index
    %c0_247 = arith.constant 0 : index
    %c0_248 = arith.constant 0 : index
    %595 = vector.load %arg1[%594, %c0_247, %c0_248] : memref<8x2x256xf32, #tpu.memory_space<vmem>>, vector<1x2x256xf32>
    %596 = vector.shape_cast %595 : vector<1x2x256xf32> to vector<2x256xf32>
    %597 = vector.extract_strided_slice %596 {offsets = [0, 0], sizes = [2, 128], strides = [1, 1]} : vector<2x256xf32> to vector<2x128xf32>
    %c0_249 = arith.constant 0 : index
    %c0_250 = arith.constant 0 : index
    %598 = vector.load %arg5[%c0_249, %c0_250] : memref<2x32xf32, #tpu.memory_space<vmem>>, vector<2x32xf32>
    %599 = arith.truncf %598 : vector<2x32xf32> to vector<2x32xbf16>
    %cst_251 = arith.constant dense<0.000000e+00> : vector<2x128xf32>
    %600 = tpu.matmul %599, %1, %cst_251 {dimension_numbers = #tpu.dot_dimension_numbers<[1], [0], [0], [1], [0, 0, 1, 1], [], []>} : vector<2x32xbf16>, vector<32x128xbf16>, vector<2x128xf32> -> vector<2x128xf32>
    %601 = arith.addf %597, %600 : vector<2x128xf32>
    %602 = arith.index_cast %593 : i32 to index
    %c0_252 = arith.constant 0 : index
    %c0_253 = arith.constant 0 : index
    %603 = vector.load %arg1[%602, %c0_252, %c0_253] : memref<8x2x256xf32, #tpu.memory_space<vmem>>, vector<1x2x256xf32>
    %604 = vector.shape_cast %603 : vector<1x2x256xf32> to vector<2x256xf32>
    %605 = vector.extract_strided_slice %604 {offsets = [0, 128], sizes = [2, 128], strides = [1, 1]} : vector<2x256xf32> to vector<2x128xf32>
    %c0_254 = arith.constant 0 : index
    %c0_255 = arith.constant 0 : index
    %606 = vector.load %arg7[%c0_254, %c0_255] : memref<2x32xf32, #tpu.memory_space<vmem>>, vector<2x32xf32>
    %607 = arith.truncf %606 : vector<2x32xf32> to vector<2x32xbf16>
    %cst_256 = arith.constant dense<0.000000e+00> : vector<2x128xf32>
    %608 = tpu.matmul %607, %3, %cst_256 {dimension_numbers = #tpu.dot_dimension_numbers<[1], [0], [0], [1], [0, 0, 1, 1], [], []>} : vector<2x32xbf16>, vector<32x128xbf16>, vector<2x128xf32> -> vector<2x128xf32>
    %609 = arith.addf %605, %608 : vector<2x128xf32>
    %c0_257 = arith.constant 0 : index
    %c0_258 = arith.constant 0 : index
    %610 = vector.load %arg6[%c0_257, %c0_258] : memref<2x32xf32, #tpu.memory_space<vmem>>, vector<2x32xf32>
    %611 = vector.extract_strided_slice %601 {offsets = [0, 0], sizes = [2, 32], strides = [1, 1]} : vector<2x128xf32> to vector<2x32xf32>
    %612 = arith.negf %611 : vector<2x32xf32>
    %613 = math.exp %612 : vector<2x32xf32>
    %cst_259 = arith.constant 1.000000e+00 : f32
    %614 = vector.broadcast %cst_259 : f32 to vector<2x32xf32>
    %615 = arith.addf %614, %613 : vector<2x32xf32>
    %616 = arith.divf %614, %615 : vector<2x32xf32>
    %617 = vector.extract_strided_slice %601 {offsets = [0, 32], sizes = [2, 32], strides = [1, 1]} : vector<2x128xf32> to vector<2x32xf32>
    %618 = arith.negf %617 : vector<2x32xf32>
    %619 = math.exp %618 : vector<2x32xf32>
    %cst_260 = arith.constant 1.000000e+00 : f32
    %620 = vector.broadcast %cst_260 : f32 to vector<2x32xf32>
    %621 = arith.addf %620, %619 : vector<2x32xf32>
    %622 = arith.divf %620, %621 : vector<2x32xf32>
    %623 = vector.extract_strided_slice %601 {offsets = [0, 64], sizes = [2, 32], strides = [1, 1]} : vector<2x128xf32> to vector<2x32xf32>
    %624 = math.tanh %623 : vector<2x32xf32>
    %625 = vector.extract_strided_slice %601 {offsets = [0, 96], sizes = [2, 32], strides = [1, 1]} : vector<2x128xf32> to vector<2x32xf32>
    %626 = arith.negf %625 : vector<2x32xf32>
    %627 = math.exp %626 : vector<2x32xf32>
    %cst_261 = arith.constant 1.000000e+00 : f32
    %628 = vector.broadcast %cst_261 : f32 to vector<2x32xf32>
    %629 = arith.addf %628, %627 : vector<2x32xf32>
    %630 = arith.divf %628, %629 : vector<2x32xf32>
    %631 = arith.mulf %622, %610 : vector<2x32xf32>
    %632 = arith.mulf %616, %624 : vector<2x32xf32>
    %633 = arith.addf %631, %632 : vector<2x32xf32>
    %634 = math.tanh %633 : vector<2x32xf32>
    %635 = arith.mulf %630, %634 : vector<2x32xf32>
    %c0_262 = arith.constant 0 : index
    %c0_263 = arith.constant 0 : index
    %636 = vector.load %arg8[%c0_262, %c0_263] : memref<2x32xf32, #tpu.memory_space<vmem>>, vector<2x32xf32>
    %637 = vector.extract_strided_slice %609 {offsets = [0, 0], sizes = [2, 32], strides = [1, 1]} : vector<2x128xf32> to vector<2x32xf32>
    %638 = arith.negf %637 : vector<2x32xf32>
    %639 = math.exp %638 : vector<2x32xf32>
    %cst_264 = arith.constant 1.000000e+00 : f32
    %640 = vector.broadcast %cst_264 : f32 to vector<2x32xf32>
    %641 = arith.addf %640, %639 : vector<2x32xf32>
    %642 = arith.divf %640, %641 : vector<2x32xf32>
    %643 = vector.extract_strided_slice %609 {offsets = [0, 32], sizes = [2, 32], strides = [1, 1]} : vector<2x128xf32> to vector<2x32xf32>
    %644 = arith.negf %643 : vector<2x32xf32>
    %645 = math.exp %644 : vector<2x32xf32>
    %cst_265 = arith.constant 1.000000e+00 : f32
    %646 = vector.broadcast %cst_265 : f32 to vector<2x32xf32>
    %647 = arith.addf %646, %645 : vector<2x32xf32>
    %648 = arith.divf %646, %647 : vector<2x32xf32>
    %649 = vector.extract_strided_slice %609 {offsets = [0, 64], sizes = [2, 32], strides = [1, 1]} : vector<2x128xf32> to vector<2x32xf32>
    %650 = math.tanh %649 : vector<2x32xf32>
    %651 = vector.extract_strided_slice %609 {offsets = [0, 96], sizes = [2, 32], strides = [1, 1]} : vector<2x128xf32> to vector<2x32xf32>
    %652 = arith.negf %651 : vector<2x32xf32>
    %653 = math.exp %652 : vector<2x32xf32>
    %cst_266 = arith.constant 1.000000e+00 : f32
    %654 = vector.broadcast %cst_266 : f32 to vector<2x32xf32>
    %655 = arith.addf %654, %653 : vector<2x32xf32>
    %656 = arith.divf %654, %655 : vector<2x32xf32>
    %657 = arith.mulf %648, %636 : vector<2x32xf32>
    %658 = arith.mulf %642, %650 : vector<2x32xf32>
    %659 = arith.addf %657, %658 : vector<2x32xf32>
    %660 = math.tanh %659 : vector<2x32xf32>
    %661 = arith.mulf %656, %660 : vector<2x32xf32>
    %c0_267 = arith.constant 0 : index
    %c0_268 = arith.constant 0 : index
    %662 = vector.load %arg5[%c0_267, %c0_268] : memref<2x32xf32, #tpu.memory_space<vmem>>, vector<2x32xf32>
    tpu.vector_store %arg5[%c0_267, %c0_268], %635 {strides = array<i32>} : memref<2x32xf32, #tpu.memory_space<vmem>>, vector<2x32xf32>,
    %c0_269 = arith.constant 0 : index
    %c0_270 = arith.constant 0 : index
    %663 = vector.load %arg6[%c0_269, %c0_270] : memref<2x32xf32, #tpu.memory_space<vmem>>, vector<2x32xf32>
    tpu.vector_store %arg6[%c0_269, %c0_270], %633 {strides = array<i32>} : memref<2x32xf32, #tpu.memory_space<vmem>>, vector<2x32xf32>,
    %c0_271 = arith.constant 0 : index
    %c0_272 = arith.constant 0 : index
    %664 = vector.load %arg7[%c0_271, %c0_272] : memref<2x32xf32, #tpu.memory_space<vmem>>, vector<2x32xf32>
    tpu.vector_store %arg7[%c0_271, %c0_272], %661 {strides = array<i32>} : memref<2x32xf32, #tpu.memory_space<vmem>>, vector<2x32xf32>,
    %c0_273 = arith.constant 0 : index
    %c0_274 = arith.constant 0 : index
    %665 = vector.load %arg8[%c0_273, %c0_274] : memref<2x32xf32, #tpu.memory_space<vmem>>, vector<2x32xf32>
    tpu.vector_store %arg8[%c0_273, %c0_274], %659 {strides = array<i32>} : memref<2x32xf32, #tpu.memory_space<vmem>>, vector<2x32xf32>,
    %666 = arith.truncf %635 : vector<2x32xf32> to vector<2x32xbf16>
    %667 = arith.index_cast %c7_i32_245 : i32 to index
    %c0_275 = arith.constant 0 : index
    %c0_276 = arith.constant 0 : index
    %668 = vector.load %arg3[%667, %c0_275, %c0_276] : memref<8x2x32xbf16, #tpu.memory_space<vmem>>, vector<1x2x32xbf16>
    %669 = vector.shape_cast %668 : vector<1x2x32xbf16> to vector<2x32xbf16>
    %670 = vector.shape_cast %666 : vector<2x32xbf16> to vector<1x2x32xbf16>
    tpu.vector_store %arg3[%667, %c0_275, %c0_276], %670 {strides = array<i32>} : memref<8x2x32xbf16, #tpu.memory_space<vmem>>, vector<1x2x32xbf16>,
    %671 = arith.truncf %661 : vector<2x32xf32> to vector<2x32xbf16>
    %672 = arith.index_cast %593 : i32 to index
    %c0_277 = arith.constant 0 : index
    %c0_278 = arith.constant 0 : index
    %673 = vector.load %arg4[%672, %c0_277, %c0_278] : memref<8x2x32xbf16, #tpu.memory_space<vmem>>, vector<1x2x32xbf16>
    %674 = vector.shape_cast %673 : vector<1x2x32xbf16> to vector<2x32xbf16>
    %675 = vector.shape_cast %671 : vector<2x32xbf16> to vector<1x2x32xbf16>
    tpu.vector_store %arg4[%672, %c0_277, %c0_278], %675 {strides = array<i32>} : memref<8x2x32xbf16, #tpu.memory_space<vmem>>, vector<1x2x32xbf16>,
    %c8_i32 = arith.constant 8 : i32
    return
  }
  func.func @transform_0(%arg0: i32) -> (i32, i32, i32) {
    %c0_i32 = arith.constant 0 : i32
    %c0_i32_0 = arith.constant 0 : i32
    %c0_i32_1 = arith.constant 0 : i32
    %c0_i32_2 = arith.constant 0 : i32
    return %c0_i32, %c0_i32_0, %c0_i32_1 : i32, i32, i32
  }
  func.func @transform_1(%arg0: i32) -> (i32, i32, i32) {
    %c0_i32 = arith.constant 0 : i32
    %c0_i32_0 = arith.constant 0 : i32
    %c0_i32_1 = arith.constant 0 : i32
    %c0_i32_2 = arith.constant 0 : i32
    return %c0_i32, %c0_i32_0, %c0_i32_1 : i32, i32, i32
  }
  func.func @transform_2(%arg0: i32) -> (i32, i32, i32) {
    %c0_i32 = arith.constant 0 : i32
    %c0_i32_0 = arith.constant 0 : i32
    %c0_i32_1 = arith.constant 0 : i32
    %c0_i32_2 = arith.constant 0 : i32
    return %c0_i32, %c0_i32_0, %c0_i32_1 : i32, i32, i32
  }
  func.func @transform_3(%arg0: i32) -> (i32, i32, i32) {
    %c0_i32 = arith.constant 0 : i32
    %c0_i32_0 = arith.constant 0 : i32
    %c0_i32_1 = arith.constant 0 : i32
    %c0_i32_2 = arith.constant 0 : i32
    return %c0_i32, %c0_i32_0, %c0_i32_1 : i32, i32, i32
  }
}

module attributes {stable_mosaic.version = 11 : i64} {
  func.func @_viterbi_kernel(%arg0: i32, %arg1: memref<8x2x128xf32, #tpu.memory_space<vmem>>, %arg2: memref<128x128xf32, #tpu.memory_space<vmem>>, %arg3: memref<1x128xf32, #tpu.memory_space<vmem>>, %arg4: memref<1x128xf32, #tpu.memory_space<vmem>>, %arg5: memref<8x2x128xi32, #tpu.memory_space<vmem>>, %arg6: memref<2x128xf32, #tpu.memory_space<vmem>>, %arg7: memref<2x128xf32, #tpu.memory_space<vmem>>) attributes {dimension_semantics = [#tpu.dimension_semantics<arbitrary>], iteration_bounds = array<i64: 1>, scalar_prefetch = 0 : i64, scratch_operands = 1 : i64, tpu.core_type = #tpu.core_type<tc>, window_params = [{transform_indices = @transform_0, window_bounds = array<i64: 8, 2, 128>}, {pipeline_mode = #tpu.pipeline_mode<synchronous>, transform_indices = @transform_1, window_bounds = array<i64: 128, 128>}, {pipeline_mode = #tpu.pipeline_mode<synchronous>, transform_indices = @transform_2, window_bounds = array<i64: 1, 128>}, {pipeline_mode = #tpu.pipeline_mode<synchronous>, transform_indices = @transform_3, window_bounds = array<i64: 1, 128>}, {transform_indices = @transform_4, window_bounds = array<i64: 8, 2, 128>}, {pipeline_mode = #tpu.pipeline_mode<synchronous>, transform_indices = @transform_5, window_bounds = array<i64: 2, 128>}]} {
    %c0 = arith.constant 0 : index
    %c0_0 = arith.constant 0 : index
    %0 = vector.load %arg2[%c0, %c0_0] : memref<128x128xf32, #tpu.memory_space<vmem>>, vector<128x128xf32>
    %c0_i32 = arith.constant 0 : i32
    %c0_i32_1 = arith.constant 0 : i32
    %1 = arith.cmpi eq, %arg0, %c0_i32_1 : i32
    %c0_i32_2 = arith.constant 0 : i32
    %2 = arith.cmpi eq, %c0_i32, %c0_i32_2 : i32
    %3 = arith.andi %1, %2 : i1
    %4 = arith.extui %3 : i1 to i32
    %c0_i32_3 = arith.constant 0 : i32
    %5 = arith.cmpi ne, %4, %c0_i32_3 : i32
    scf.if %5 {
      %c0_46 = arith.constant 0 : index
      %c0_47 = arith.constant 0 : index
      %70 = vector.load %arg3[%c0_46, %c0_47] : memref<1x128xf32, #tpu.memory_space<vmem>>, vector<1x128xf32>
      %c0_48 = arith.constant 0 : index
      %c0_49 = arith.constant 0 : index
      %c0_50 = arith.constant 0 : index
      %71 = vector.load %arg1[%c0_48, %c0_49, %c0_50] : memref<8x2x128xf32, #tpu.memory_space<vmem>>, vector<1x2x128xf32>
      %72 = vector.shape_cast %71 : vector<1x2x128xf32> to vector<2x128xf32>
      %73 = vector.broadcast %70 : vector<1x128xf32> to vector<2x128xf32>
      %74 = arith.addf %73, %72 : vector<2x128xf32>
      %c0_51 = arith.constant 0 : index
      %c0_52 = arith.constant 0 : index
      %75 = vector.load %arg7[%c0_51, %c0_52] : memref<2x128xf32, #tpu.memory_space<vmem>>, vector<2x128xf32>
      tpu.vector_store %arg7[%c0_51, %c0_52], %74 {strides = array<i32>} : memref<2x128xf32, #tpu.memory_space<vmem>>, vector<2x128xf32>,
      %c0_i32_53 = arith.constant 0 : i32
      %76 = vector.broadcast %c0_i32_53 : i32 to vector<2x128xi32>
      %c0_54 = arith.constant 0 : index
      %c0_55 = arith.constant 0 : index
      %c0_56 = arith.constant 0 : index
      %77 = vector.load %arg5[%c0_54, %c0_55, %c0_56] : memref<8x2x128xi32, #tpu.memory_space<vmem>>, vector<1x2x128xi32>
      %78 = vector.shape_cast %77 : vector<1x2x128xi32> to vector<2x128xi32>
      %79 = vector.shape_cast %76 : vector<2x128xi32> to vector<1x2x128xi32>
      tpu.vector_store %arg5[%c0_54, %c0_55, %c0_56], %79 {strides = array<i32>} : memref<8x2x128xi32, #tpu.memory_space<vmem>>, vector<1x2x128xi32>,
    } else {
    }
    %true = arith.constant true
    %6 = arith.xori %3, %true : i1
    %7 = arith.extui %6 : i1 to i32
    %c0_i32_4 = arith.constant 0 : i32
    %8 = arith.cmpi ne, %7, %c0_i32_4 : i32
    scf.if %8 {
      %c0_46 = arith.constant 0 : index
      %c0_47 = arith.constant 0 : index
      %70 = vector.load %arg7[%c0_46, %c0_47] : memref<2x128xf32, #tpu.memory_space<vmem>>, vector<2x128xf32>
      %71 = vector.shape_cast %70 : vector<2x128xf32> to vector<2x1x128xf32>
      %72 = vector.shape_cast %0 : vector<128x128xf32> to vector<1x128x128xf32>
      %73 = vector.broadcast %71 : vector<2x1x128xf32> to vector<2x128x128xf32>
      %74 = vector.broadcast %72 : vector<1x128x128xf32> to vector<2x128x128xf32>
      %75 = arith.addf %73, %74 : vector<2x128x128xf32>
      %cst = arith.constant dense<0xFF800000> : vector<2x128xf32>
      %76 = vector.multi_reduction <maximumf>, %75, %cst [2] : vector<2x128x128xf32> to vector<2x128xf32>
      %77 = arith.index_cast %c0_i32 : i32 to index
      %c0_48 = arith.constant 0 : index
      %c0_49 = arith.constant 0 : index
      %78 = vector.load %arg1[%77, %c0_48, %c0_49] : memref<8x2x128xf32, #tpu.memory_space<vmem>>, vector<1x2x128xf32>
      %79 = vector.shape_cast %78 : vector<1x2x128xf32> to vector<2x128xf32>
      %80 = arith.addf %76, %79 : vector<2x128xf32>
      %c0_50 = arith.constant 0 : index
      %c0_51 = arith.constant 0 : index
      %81 = vector.load %arg7[%c0_50, %c0_51] : memref<2x128xf32, #tpu.memory_space<vmem>>, vector<2x128xf32>
      tpu.vector_store %arg7[%c0_50, %c0_51], %80 {strides = array<i32>} : memref<2x128xf32, #tpu.memory_space<vmem>>, vector<2x128xf32>,
      %82 = tpu.reduce_index %75 {axis = 2 : i32, kind = #tpu.reduction_kind<arg_max>} : vector<2x128x128xf32> -> vector<2x128xi32>
      %83 = arith.index_cast %c0_i32 : i32 to index
      %c0_52 = arith.constant 0 : index
      %c0_53 = arith.constant 0 : index
      %84 = vector.load %arg5[%83, %c0_52, %c0_53] : memref<8x2x128xi32, #tpu.memory_space<vmem>>, vector<1x2x128xi32>
      %85 = vector.shape_cast %84 : vector<1x2x128xi32> to vector<2x128xi32>
      %86 = vector.shape_cast %82 : vector<2x128xi32> to vector<1x2x128xi32>
      tpu.vector_store %arg5[%83, %c0_52, %c0_53], %86 {strides = array<i32>} : memref<8x2x128xi32, #tpu.memory_space<vmem>>, vector<1x2x128xi32>,
    } else {
    }
    %c1_i32 = arith.constant 1 : i32
    %c0_i32_5 = arith.constant 0 : i32
    %9 = arith.cmpi eq, %arg0, %c0_i32_5 : i32
    %c0_i32_6 = arith.constant 0 : i32
    %10 = arith.cmpi eq, %c1_i32, %c0_i32_6 : i32
    %11 = arith.andi %9, %10 : i1
    %12 = arith.extui %11 : i1 to i32
    %c0_i32_7 = arith.constant 0 : i32
    %13 = arith.cmpi ne, %12, %c0_i32_7 : i32
    scf.if %13 {
      %c0_46 = arith.constant 0 : index
      %c0_47 = arith.constant 0 : index
      %70 = vector.load %arg3[%c0_46, %c0_47] : memref<1x128xf32, #tpu.memory_space<vmem>>, vector<1x128xf32>
      %c0_48 = arith.constant 0 : index
      %c0_49 = arith.constant 0 : index
      %c0_50 = arith.constant 0 : index
      %71 = vector.load %arg1[%c0_48, %c0_49, %c0_50] : memref<8x2x128xf32, #tpu.memory_space<vmem>>, vector<1x2x128xf32>
      %72 = vector.shape_cast %71 : vector<1x2x128xf32> to vector<2x128xf32>
      %73 = vector.broadcast %70 : vector<1x128xf32> to vector<2x128xf32>
      %74 = arith.addf %73, %72 : vector<2x128xf32>
      %c0_51 = arith.constant 0 : index
      %c0_52 = arith.constant 0 : index
      %75 = vector.load %arg7[%c0_51, %c0_52] : memref<2x128xf32, #tpu.memory_space<vmem>>, vector<2x128xf32>
      tpu.vector_store %arg7[%c0_51, %c0_52], %74 {strides = array<i32>} : memref<2x128xf32, #tpu.memory_space<vmem>>, vector<2x128xf32>,
      %c0_i32_53 = arith.constant 0 : i32
      %76 = vector.broadcast %c0_i32_53 : i32 to vector<2x128xi32>
      %c0_54 = arith.constant 0 : index
      %c0_55 = arith.constant 0 : index
      %c0_56 = arith.constant 0 : index
      %77 = vector.load %arg5[%c0_54, %c0_55, %c0_56] : memref<8x2x128xi32, #tpu.memory_space<vmem>>, vector<1x2x128xi32>
      %78 = vector.shape_cast %77 : vector<1x2x128xi32> to vector<2x128xi32>
      %79 = vector.shape_cast %76 : vector<2x128xi32> to vector<1x2x128xi32>
      tpu.vector_store %arg5[%c0_54, %c0_55, %c0_56], %79 {strides = array<i32>} : memref<8x2x128xi32, #tpu.memory_space<vmem>>, vector<1x2x128xi32>,
    } else {
    }
    %true_8 = arith.constant true
    %14 = arith.xori %11, %true_8 : i1
    %15 = arith.extui %14 : i1 to i32
    %c0_i32_9 = arith.constant 0 : i32
    %16 = arith.cmpi ne, %15, %c0_i32_9 : i32
    scf.if %16 {
      %c0_46 = arith.constant 0 : index
      %c0_47 = arith.constant 0 : index
      %70 = vector.load %arg7[%c0_46, %c0_47] : memref<2x128xf32, #tpu.memory_space<vmem>>, vector<2x128xf32>
      %71 = vector.shape_cast %70 : vector<2x128xf32> to vector<2x1x128xf32>
      %72 = vector.shape_cast %0 : vector<128x128xf32> to vector<1x128x128xf32>
      %73 = vector.broadcast %71 : vector<2x1x128xf32> to vector<2x128x128xf32>
      %74 = vector.broadcast %72 : vector<1x128x128xf32> to vector<2x128x128xf32>
      %75 = arith.addf %73, %74 : vector<2x128x128xf32>
      %cst = arith.constant dense<0xFF800000> : vector<2x128xf32>
      %76 = vector.multi_reduction <maximumf>, %75, %cst [2] : vector<2x128x128xf32> to vector<2x128xf32>
      %77 = arith.index_cast %c1_i32 : i32 to index
      %c0_48 = arith.constant 0 : index
      %c0_49 = arith.constant 0 : index
      %78 = vector.load %arg1[%77, %c0_48, %c0_49] : memref<8x2x128xf32, #tpu.memory_space<vmem>>, vector<1x2x128xf32>
      %79 = vector.shape_cast %78 : vector<1x2x128xf32> to vector<2x128xf32>
      %80 = arith.addf %76, %79 : vector<2x128xf32>
      %c0_50 = arith.constant 0 : index
      %c0_51 = arith.constant 0 : index
      %81 = vector.load %arg7[%c0_50, %c0_51] : memref<2x128xf32, #tpu.memory_space<vmem>>, vector<2x128xf32>
      tpu.vector_store %arg7[%c0_50, %c0_51], %80 {strides = array<i32>} : memref<2x128xf32, #tpu.memory_space<vmem>>, vector<2x128xf32>,
      %82 = tpu.reduce_index %75 {axis = 2 : i32, kind = #tpu.reduction_kind<arg_max>} : vector<2x128x128xf32> -> vector<2x128xi32>
      %83 = arith.index_cast %c1_i32 : i32 to index
      %c0_52 = arith.constant 0 : index
      %c0_53 = arith.constant 0 : index
      %84 = vector.load %arg5[%83, %c0_52, %c0_53] : memref<8x2x128xi32, #tpu.memory_space<vmem>>, vector<1x2x128xi32>
      %85 = vector.shape_cast %84 : vector<1x2x128xi32> to vector<2x128xi32>
      %86 = vector.shape_cast %82 : vector<2x128xi32> to vector<1x2x128xi32>
      tpu.vector_store %arg5[%83, %c0_52, %c0_53], %86 {strides = array<i32>} : memref<8x2x128xi32, #tpu.memory_space<vmem>>, vector<1x2x128xi32>,
    } else {
    }
    %c2_i32 = arith.constant 2 : i32
    %c0_i32_10 = arith.constant 0 : i32
    %17 = arith.cmpi eq, %arg0, %c0_i32_10 : i32
    %c0_i32_11 = arith.constant 0 : i32
    %18 = arith.cmpi eq, %c2_i32, %c0_i32_11 : i32
    %19 = arith.andi %17, %18 : i1
    %20 = arith.extui %19 : i1 to i32
    %c0_i32_12 = arith.constant 0 : i32
    %21 = arith.cmpi ne, %20, %c0_i32_12 : i32
    scf.if %21 {
      %c0_46 = arith.constant 0 : index
      %c0_47 = arith.constant 0 : index
      %70 = vector.load %arg3[%c0_46, %c0_47] : memref<1x128xf32, #tpu.memory_space<vmem>>, vector<1x128xf32>
      %c0_48 = arith.constant 0 : index
      %c0_49 = arith.constant 0 : index
      %c0_50 = arith.constant 0 : index
      %71 = vector.load %arg1[%c0_48, %c0_49, %c0_50] : memref<8x2x128xf32, #tpu.memory_space<vmem>>, vector<1x2x128xf32>
      %72 = vector.shape_cast %71 : vector<1x2x128xf32> to vector<2x128xf32>
      %73 = vector.broadcast %70 : vector<1x128xf32> to vector<2x128xf32>
      %74 = arith.addf %73, %72 : vector<2x128xf32>
      %c0_51 = arith.constant 0 : index
      %c0_52 = arith.constant 0 : index
      %75 = vector.load %arg7[%c0_51, %c0_52] : memref<2x128xf32, #tpu.memory_space<vmem>>, vector<2x128xf32>
      tpu.vector_store %arg7[%c0_51, %c0_52], %74 {strides = array<i32>} : memref<2x128xf32, #tpu.memory_space<vmem>>, vector<2x128xf32>,
      %c0_i32_53 = arith.constant 0 : i32
      %76 = vector.broadcast %c0_i32_53 : i32 to vector<2x128xi32>
      %c0_54 = arith.constant 0 : index
      %c0_55 = arith.constant 0 : index
      %c0_56 = arith.constant 0 : index
      %77 = vector.load %arg5[%c0_54, %c0_55, %c0_56] : memref<8x2x128xi32, #tpu.memory_space<vmem>>, vector<1x2x128xi32>
      %78 = vector.shape_cast %77 : vector<1x2x128xi32> to vector<2x128xi32>
      %79 = vector.shape_cast %76 : vector<2x128xi32> to vector<1x2x128xi32>
      tpu.vector_store %arg5[%c0_54, %c0_55, %c0_56], %79 {strides = array<i32>} : memref<8x2x128xi32, #tpu.memory_space<vmem>>, vector<1x2x128xi32>,
    } else {
    }
    %true_13 = arith.constant true
    %22 = arith.xori %19, %true_13 : i1
    %23 = arith.extui %22 : i1 to i32
    %c0_i32_14 = arith.constant 0 : i32
    %24 = arith.cmpi ne, %23, %c0_i32_14 : i32
    scf.if %24 {
      %c0_46 = arith.constant 0 : index
      %c0_47 = arith.constant 0 : index
      %70 = vector.load %arg7[%c0_46, %c0_47] : memref<2x128xf32, #tpu.memory_space<vmem>>, vector<2x128xf32>
      %71 = vector.shape_cast %70 : vector<2x128xf32> to vector<2x1x128xf32>
      %72 = vector.shape_cast %0 : vector<128x128xf32> to vector<1x128x128xf32>
      %73 = vector.broadcast %71 : vector<2x1x128xf32> to vector<2x128x128xf32>
      %74 = vector.broadcast %72 : vector<1x128x128xf32> to vector<2x128x128xf32>
      %75 = arith.addf %73, %74 : vector<2x128x128xf32>
      %cst = arith.constant dense<0xFF800000> : vector<2x128xf32>
      %76 = vector.multi_reduction <maximumf>, %75, %cst [2] : vector<2x128x128xf32> to vector<2x128xf32>
      %77 = arith.index_cast %c2_i32 : i32 to index
      %c0_48 = arith.constant 0 : index
      %c0_49 = arith.constant 0 : index
      %78 = vector.load %arg1[%77, %c0_48, %c0_49] : memref<8x2x128xf32, #tpu.memory_space<vmem>>, vector<1x2x128xf32>
      %79 = vector.shape_cast %78 : vector<1x2x128xf32> to vector<2x128xf32>
      %80 = arith.addf %76, %79 : vector<2x128xf32>
      %c0_50 = arith.constant 0 : index
      %c0_51 = arith.constant 0 : index
      %81 = vector.load %arg7[%c0_50, %c0_51] : memref<2x128xf32, #tpu.memory_space<vmem>>, vector<2x128xf32>
      tpu.vector_store %arg7[%c0_50, %c0_51], %80 {strides = array<i32>} : memref<2x128xf32, #tpu.memory_space<vmem>>, vector<2x128xf32>,
      %82 = tpu.reduce_index %75 {axis = 2 : i32, kind = #tpu.reduction_kind<arg_max>} : vector<2x128x128xf32> -> vector<2x128xi32>
      %83 = arith.index_cast %c2_i32 : i32 to index
      %c0_52 = arith.constant 0 : index
      %c0_53 = arith.constant 0 : index
      %84 = vector.load %arg5[%83, %c0_52, %c0_53] : memref<8x2x128xi32, #tpu.memory_space<vmem>>, vector<1x2x128xi32>
      %85 = vector.shape_cast %84 : vector<1x2x128xi32> to vector<2x128xi32>
      %86 = vector.shape_cast %82 : vector<2x128xi32> to vector<1x2x128xi32>
      tpu.vector_store %arg5[%83, %c0_52, %c0_53], %86 {strides = array<i32>} : memref<8x2x128xi32, #tpu.memory_space<vmem>>, vector<1x2x128xi32>,
    } else {
    }
    %c3_i32 = arith.constant 3 : i32
    %c0_i32_15 = arith.constant 0 : i32
    %25 = arith.cmpi eq, %arg0, %c0_i32_15 : i32
    %c0_i32_16 = arith.constant 0 : i32
    %26 = arith.cmpi eq, %c3_i32, %c0_i32_16 : i32
    %27 = arith.andi %25, %26 : i1
    %28 = arith.extui %27 : i1 to i32
    %c0_i32_17 = arith.constant 0 : i32
    %29 = arith.cmpi ne, %28, %c0_i32_17 : i32
    scf.if %29 {
      %c0_46 = arith.constant 0 : index
      %c0_47 = arith.constant 0 : index
      %70 = vector.load %arg3[%c0_46, %c0_47] : memref<1x128xf32, #tpu.memory_space<vmem>>, vector<1x128xf32>
      %c0_48 = arith.constant 0 : index
      %c0_49 = arith.constant 0 : index
      %c0_50 = arith.constant 0 : index
      %71 = vector.load %arg1[%c0_48, %c0_49, %c0_50] : memref<8x2x128xf32, #tpu.memory_space<vmem>>, vector<1x2x128xf32>
      %72 = vector.shape_cast %71 : vector<1x2x128xf32> to vector<2x128xf32>
      %73 = vector.broadcast %70 : vector<1x128xf32> to vector<2x128xf32>
      %74 = arith.addf %73, %72 : vector<2x128xf32>
      %c0_51 = arith.constant 0 : index
      %c0_52 = arith.constant 0 : index
      %75 = vector.load %arg7[%c0_51, %c0_52] : memref<2x128xf32, #tpu.memory_space<vmem>>, vector<2x128xf32>
      tpu.vector_store %arg7[%c0_51, %c0_52], %74 {strides = array<i32>} : memref<2x128xf32, #tpu.memory_space<vmem>>, vector<2x128xf32>,
      %c0_i32_53 = arith.constant 0 : i32
      %76 = vector.broadcast %c0_i32_53 : i32 to vector<2x128xi32>
      %c0_54 = arith.constant 0 : index
      %c0_55 = arith.constant 0 : index
      %c0_56 = arith.constant 0 : index
      %77 = vector.load %arg5[%c0_54, %c0_55, %c0_56] : memref<8x2x128xi32, #tpu.memory_space<vmem>>, vector<1x2x128xi32>
      %78 = vector.shape_cast %77 : vector<1x2x128xi32> to vector<2x128xi32>
      %79 = vector.shape_cast %76 : vector<2x128xi32> to vector<1x2x128xi32>
      tpu.vector_store %arg5[%c0_54, %c0_55, %c0_56], %79 {strides = array<i32>} : memref<8x2x128xi32, #tpu.memory_space<vmem>>, vector<1x2x128xi32>,
    } else {
    }
    %true_18 = arith.constant true
    %30 = arith.xori %27, %true_18 : i1
    %31 = arith.extui %30 : i1 to i32
    %c0_i32_19 = arith.constant 0 : i32
    %32 = arith.cmpi ne, %31, %c0_i32_19 : i32
    scf.if %32 {
      %c0_46 = arith.constant 0 : index
      %c0_47 = arith.constant 0 : index
      %70 = vector.load %arg7[%c0_46, %c0_47] : memref<2x128xf32, #tpu.memory_space<vmem>>, vector<2x128xf32>
      %71 = vector.shape_cast %70 : vector<2x128xf32> to vector<2x1x128xf32>
      %72 = vector.shape_cast %0 : vector<128x128xf32> to vector<1x128x128xf32>
      %73 = vector.broadcast %71 : vector<2x1x128xf32> to vector<2x128x128xf32>
      %74 = vector.broadcast %72 : vector<1x128x128xf32> to vector<2x128x128xf32>
      %75 = arith.addf %73, %74 : vector<2x128x128xf32>
      %cst = arith.constant dense<0xFF800000> : vector<2x128xf32>
      %76 = vector.multi_reduction <maximumf>, %75, %cst [2] : vector<2x128x128xf32> to vector<2x128xf32>
      %77 = arith.index_cast %c3_i32 : i32 to index
      %c0_48 = arith.constant 0 : index
      %c0_49 = arith.constant 0 : index
      %78 = vector.load %arg1[%77, %c0_48, %c0_49] : memref<8x2x128xf32, #tpu.memory_space<vmem>>, vector<1x2x128xf32>
      %79 = vector.shape_cast %78 : vector<1x2x128xf32> to vector<2x128xf32>
      %80 = arith.addf %76, %79 : vector<2x128xf32>
      %c0_50 = arith.constant 0 : index
      %c0_51 = arith.constant 0 : index
      %81 = vector.load %arg7[%c0_50, %c0_51] : memref<2x128xf32, #tpu.memory_space<vmem>>, vector<2x128xf32>
      tpu.vector_store %arg7[%c0_50, %c0_51], %80 {strides = array<i32>} : memref<2x128xf32, #tpu.memory_space<vmem>>, vector<2x128xf32>,
      %82 = tpu.reduce_index %75 {axis = 2 : i32, kind = #tpu.reduction_kind<arg_max>} : vector<2x128x128xf32> -> vector<2x128xi32>
      %83 = arith.index_cast %c3_i32 : i32 to index
      %c0_52 = arith.constant 0 : index
      %c0_53 = arith.constant 0 : index
      %84 = vector.load %arg5[%83, %c0_52, %c0_53] : memref<8x2x128xi32, #tpu.memory_space<vmem>>, vector<1x2x128xi32>
      %85 = vector.shape_cast %84 : vector<1x2x128xi32> to vector<2x128xi32>
      %86 = vector.shape_cast %82 : vector<2x128xi32> to vector<1x2x128xi32>
      tpu.vector_store %arg5[%83, %c0_52, %c0_53], %86 {strides = array<i32>} : memref<8x2x128xi32, #tpu.memory_space<vmem>>, vector<1x2x128xi32>,
    } else {
    }
    %c4_i32 = arith.constant 4 : i32
    %c0_i32_20 = arith.constant 0 : i32
    %33 = arith.cmpi eq, %arg0, %c0_i32_20 : i32
    %c0_i32_21 = arith.constant 0 : i32
    %34 = arith.cmpi eq, %c4_i32, %c0_i32_21 : i32
    %35 = arith.andi %33, %34 : i1
    %36 = arith.extui %35 : i1 to i32
    %c0_i32_22 = arith.constant 0 : i32
    %37 = arith.cmpi ne, %36, %c0_i32_22 : i32
    scf.if %37 {
      %c0_46 = arith.constant 0 : index
      %c0_47 = arith.constant 0 : index
      %70 = vector.load %arg3[%c0_46, %c0_47] : memref<1x128xf32, #tpu.memory_space<vmem>>, vector<1x128xf32>
      %c0_48 = arith.constant 0 : index
      %c0_49 = arith.constant 0 : index
      %c0_50 = arith.constant 0 : index
      %71 = vector.load %arg1[%c0_48, %c0_49, %c0_50] : memref<8x2x128xf32, #tpu.memory_space<vmem>>, vector<1x2x128xf32>
      %72 = vector.shape_cast %71 : vector<1x2x128xf32> to vector<2x128xf32>
      %73 = vector.broadcast %70 : vector<1x128xf32> to vector<2x128xf32>
      %74 = arith.addf %73, %72 : vector<2x128xf32>
      %c0_51 = arith.constant 0 : index
      %c0_52 = arith.constant 0 : index
      %75 = vector.load %arg7[%c0_51, %c0_52] : memref<2x128xf32, #tpu.memory_space<vmem>>, vector<2x128xf32>
      tpu.vector_store %arg7[%c0_51, %c0_52], %74 {strides = array<i32>} : memref<2x128xf32, #tpu.memory_space<vmem>>, vector<2x128xf32>,
      %c0_i32_53 = arith.constant 0 : i32
      %76 = vector.broadcast %c0_i32_53 : i32 to vector<2x128xi32>
      %c0_54 = arith.constant 0 : index
      %c0_55 = arith.constant 0 : index
      %c0_56 = arith.constant 0 : index
      %77 = vector.load %arg5[%c0_54, %c0_55, %c0_56] : memref<8x2x128xi32, #tpu.memory_space<vmem>>, vector<1x2x128xi32>
      %78 = vector.shape_cast %77 : vector<1x2x128xi32> to vector<2x128xi32>
      %79 = vector.shape_cast %76 : vector<2x128xi32> to vector<1x2x128xi32>
      tpu.vector_store %arg5[%c0_54, %c0_55, %c0_56], %79 {strides = array<i32>} : memref<8x2x128xi32, #tpu.memory_space<vmem>>, vector<1x2x128xi32>,
    } else {
    }
    %true_23 = arith.constant true
    %38 = arith.xori %35, %true_23 : i1
    %39 = arith.extui %38 : i1 to i32
    %c0_i32_24 = arith.constant 0 : i32
    %40 = arith.cmpi ne, %39, %c0_i32_24 : i32
    scf.if %40 {
      %c0_46 = arith.constant 0 : index
      %c0_47 = arith.constant 0 : index
      %70 = vector.load %arg7[%c0_46, %c0_47] : memref<2x128xf32, #tpu.memory_space<vmem>>, vector<2x128xf32>
      %71 = vector.shape_cast %70 : vector<2x128xf32> to vector<2x1x128xf32>
      %72 = vector.shape_cast %0 : vector<128x128xf32> to vector<1x128x128xf32>
      %73 = vector.broadcast %71 : vector<2x1x128xf32> to vector<2x128x128xf32>
      %74 = vector.broadcast %72 : vector<1x128x128xf32> to vector<2x128x128xf32>
      %75 = arith.addf %73, %74 : vector<2x128x128xf32>
      %cst = arith.constant dense<0xFF800000> : vector<2x128xf32>
      %76 = vector.multi_reduction <maximumf>, %75, %cst [2] : vector<2x128x128xf32> to vector<2x128xf32>
      %77 = arith.index_cast %c4_i32 : i32 to index
      %c0_48 = arith.constant 0 : index
      %c0_49 = arith.constant 0 : index
      %78 = vector.load %arg1[%77, %c0_48, %c0_49] : memref<8x2x128xf32, #tpu.memory_space<vmem>>, vector<1x2x128xf32>
      %79 = vector.shape_cast %78 : vector<1x2x128xf32> to vector<2x128xf32>
      %80 = arith.addf %76, %79 : vector<2x128xf32>
      %c0_50 = arith.constant 0 : index
      %c0_51 = arith.constant 0 : index
      %81 = vector.load %arg7[%c0_50, %c0_51] : memref<2x128xf32, #tpu.memory_space<vmem>>, vector<2x128xf32>
      tpu.vector_store %arg7[%c0_50, %c0_51], %80 {strides = array<i32>} : memref<2x128xf32, #tpu.memory_space<vmem>>, vector<2x128xf32>,
      %82 = tpu.reduce_index %75 {axis = 2 : i32, kind = #tpu.reduction_kind<arg_max>} : vector<2x128x128xf32> -> vector<2x128xi32>
      %83 = arith.index_cast %c4_i32 : i32 to index
      %c0_52 = arith.constant 0 : index
      %c0_53 = arith.constant 0 : index
      %84 = vector.load %arg5[%83, %c0_52, %c0_53] : memref<8x2x128xi32, #tpu.memory_space<vmem>>, vector<1x2x128xi32>
      %85 = vector.shape_cast %84 : vector<1x2x128xi32> to vector<2x128xi32>
      %86 = vector.shape_cast %82 : vector<2x128xi32> to vector<1x2x128xi32>
      tpu.vector_store %arg5[%83, %c0_52, %c0_53], %86 {strides = array<i32>} : memref<8x2x128xi32, #tpu.memory_space<vmem>>, vector<1x2x128xi32>,
    } else {
    }
    %c5_i32 = arith.constant 5 : i32
    %c0_i32_25 = arith.constant 0 : i32
    %41 = arith.cmpi eq, %arg0, %c0_i32_25 : i32
    %c0_i32_26 = arith.constant 0 : i32
    %42 = arith.cmpi eq, %c5_i32, %c0_i32_26 : i32
    %43 = arith.andi %41, %42 : i1
    %44 = arith.extui %43 : i1 to i32
    %c0_i32_27 = arith.constant 0 : i32
    %45 = arith.cmpi ne, %44, %c0_i32_27 : i32
    scf.if %45 {
      %c0_46 = arith.constant 0 : index
      %c0_47 = arith.constant 0 : index
      %70 = vector.load %arg3[%c0_46, %c0_47] : memref<1x128xf32, #tpu.memory_space<vmem>>, vector<1x128xf32>
      %c0_48 = arith.constant 0 : index
      %c0_49 = arith.constant 0 : index
      %c0_50 = arith.constant 0 : index
      %71 = vector.load %arg1[%c0_48, %c0_49, %c0_50] : memref<8x2x128xf32, #tpu.memory_space<vmem>>, vector<1x2x128xf32>
      %72 = vector.shape_cast %71 : vector<1x2x128xf32> to vector<2x128xf32>
      %73 = vector.broadcast %70 : vector<1x128xf32> to vector<2x128xf32>
      %74 = arith.addf %73, %72 : vector<2x128xf32>
      %c0_51 = arith.constant 0 : index
      %c0_52 = arith.constant 0 : index
      %75 = vector.load %arg7[%c0_51, %c0_52] : memref<2x128xf32, #tpu.memory_space<vmem>>, vector<2x128xf32>
      tpu.vector_store %arg7[%c0_51, %c0_52], %74 {strides = array<i32>} : memref<2x128xf32, #tpu.memory_space<vmem>>, vector<2x128xf32>,
      %c0_i32_53 = arith.constant 0 : i32
      %76 = vector.broadcast %c0_i32_53 : i32 to vector<2x128xi32>
      %c0_54 = arith.constant 0 : index
      %c0_55 = arith.constant 0 : index
      %c0_56 = arith.constant 0 : index
      %77 = vector.load %arg5[%c0_54, %c0_55, %c0_56] : memref<8x2x128xi32, #tpu.memory_space<vmem>>, vector<1x2x128xi32>
      %78 = vector.shape_cast %77 : vector<1x2x128xi32> to vector<2x128xi32>
      %79 = vector.shape_cast %76 : vector<2x128xi32> to vector<1x2x128xi32>
      tpu.vector_store %arg5[%c0_54, %c0_55, %c0_56], %79 {strides = array<i32>} : memref<8x2x128xi32, #tpu.memory_space<vmem>>, vector<1x2x128xi32>,
    } else {
    }
    %true_28 = arith.constant true
    %46 = arith.xori %43, %true_28 : i1
    %47 = arith.extui %46 : i1 to i32
    %c0_i32_29 = arith.constant 0 : i32
    %48 = arith.cmpi ne, %47, %c0_i32_29 : i32
    scf.if %48 {
      %c0_46 = arith.constant 0 : index
      %c0_47 = arith.constant 0 : index
      %70 = vector.load %arg7[%c0_46, %c0_47] : memref<2x128xf32, #tpu.memory_space<vmem>>, vector<2x128xf32>
      %71 = vector.shape_cast %70 : vector<2x128xf32> to vector<2x1x128xf32>
      %72 = vector.shape_cast %0 : vector<128x128xf32> to vector<1x128x128xf32>
      %73 = vector.broadcast %71 : vector<2x1x128xf32> to vector<2x128x128xf32>
      %74 = vector.broadcast %72 : vector<1x128x128xf32> to vector<2x128x128xf32>
      %75 = arith.addf %73, %74 : vector<2x128x128xf32>
      %cst = arith.constant dense<0xFF800000> : vector<2x128xf32>
      %76 = vector.multi_reduction <maximumf>, %75, %cst [2] : vector<2x128x128xf32> to vector<2x128xf32>
      %77 = arith.index_cast %c5_i32 : i32 to index
      %c0_48 = arith.constant 0 : index
      %c0_49 = arith.constant 0 : index
      %78 = vector.load %arg1[%77, %c0_48, %c0_49] : memref<8x2x128xf32, #tpu.memory_space<vmem>>, vector<1x2x128xf32>
      %79 = vector.shape_cast %78 : vector<1x2x128xf32> to vector<2x128xf32>
      %80 = arith.addf %76, %79 : vector<2x128xf32>
      %c0_50 = arith.constant 0 : index
      %c0_51 = arith.constant 0 : index
      %81 = vector.load %arg7[%c0_50, %c0_51] : memref<2x128xf32, #tpu.memory_space<vmem>>, vector<2x128xf32>
      tpu.vector_store %arg7[%c0_50, %c0_51], %80 {strides = array<i32>} : memref<2x128xf32, #tpu.memory_space<vmem>>, vector<2x128xf32>,
      %82 = tpu.reduce_index %75 {axis = 2 : i32, kind = #tpu.reduction_kind<arg_max>} : vector<2x128x128xf32> -> vector<2x128xi32>
      %83 = arith.index_cast %c5_i32 : i32 to index
      %c0_52 = arith.constant 0 : index
      %c0_53 = arith.constant 0 : index
      %84 = vector.load %arg5[%83, %c0_52, %c0_53] : memref<8x2x128xi32, #tpu.memory_space<vmem>>, vector<1x2x128xi32>
      %85 = vector.shape_cast %84 : vector<1x2x128xi32> to vector<2x128xi32>
      %86 = vector.shape_cast %82 : vector<2x128xi32> to vector<1x2x128xi32>
      tpu.vector_store %arg5[%83, %c0_52, %c0_53], %86 {strides = array<i32>} : memref<8x2x128xi32, #tpu.memory_space<vmem>>, vector<1x2x128xi32>,
    } else {
    }
    %c6_i32 = arith.constant 6 : i32
    %c0_i32_30 = arith.constant 0 : i32
    %49 = arith.cmpi eq, %arg0, %c0_i32_30 : i32
    %c0_i32_31 = arith.constant 0 : i32
    %50 = arith.cmpi eq, %c6_i32, %c0_i32_31 : i32
    %51 = arith.andi %49, %50 : i1
    %52 = arith.extui %51 : i1 to i32
    %c0_i32_32 = arith.constant 0 : i32
    %53 = arith.cmpi ne, %52, %c0_i32_32 : i32
    scf.if %53 {
      %c0_46 = arith.constant 0 : index
      %c0_47 = arith.constant 0 : index
      %70 = vector.load %arg3[%c0_46, %c0_47] : memref<1x128xf32, #tpu.memory_space<vmem>>, vector<1x128xf32>
      %c0_48 = arith.constant 0 : index
      %c0_49 = arith.constant 0 : index
      %c0_50 = arith.constant 0 : index
      %71 = vector.load %arg1[%c0_48, %c0_49, %c0_50] : memref<8x2x128xf32, #tpu.memory_space<vmem>>, vector<1x2x128xf32>
      %72 = vector.shape_cast %71 : vector<1x2x128xf32> to vector<2x128xf32>
      %73 = vector.broadcast %70 : vector<1x128xf32> to vector<2x128xf32>
      %74 = arith.addf %73, %72 : vector<2x128xf32>
      %c0_51 = arith.constant 0 : index
      %c0_52 = arith.constant 0 : index
      %75 = vector.load %arg7[%c0_51, %c0_52] : memref<2x128xf32, #tpu.memory_space<vmem>>, vector<2x128xf32>
      tpu.vector_store %arg7[%c0_51, %c0_52], %74 {strides = array<i32>} : memref<2x128xf32, #tpu.memory_space<vmem>>, vector<2x128xf32>,
      %c0_i32_53 = arith.constant 0 : i32
      %76 = vector.broadcast %c0_i32_53 : i32 to vector<2x128xi32>
      %c0_54 = arith.constant 0 : index
      %c0_55 = arith.constant 0 : index
      %c0_56 = arith.constant 0 : index
      %77 = vector.load %arg5[%c0_54, %c0_55, %c0_56] : memref<8x2x128xi32, #tpu.memory_space<vmem>>, vector<1x2x128xi32>
      %78 = vector.shape_cast %77 : vector<1x2x128xi32> to vector<2x128xi32>
      %79 = vector.shape_cast %76 : vector<2x128xi32> to vector<1x2x128xi32>
      tpu.vector_store %arg5[%c0_54, %c0_55, %c0_56], %79 {strides = array<i32>} : memref<8x2x128xi32, #tpu.memory_space<vmem>>, vector<1x2x128xi32>,
    } else {
    }
    %true_33 = arith.constant true
    %54 = arith.xori %51, %true_33 : i1
    %55 = arith.extui %54 : i1 to i32
    %c0_i32_34 = arith.constant 0 : i32
    %56 = arith.cmpi ne, %55, %c0_i32_34 : i32
    scf.if %56 {
      %c0_46 = arith.constant 0 : index
      %c0_47 = arith.constant 0 : index
      %70 = vector.load %arg7[%c0_46, %c0_47] : memref<2x128xf32, #tpu.memory_space<vmem>>, vector<2x128xf32>
      %71 = vector.shape_cast %70 : vector<2x128xf32> to vector<2x1x128xf32>
      %72 = vector.shape_cast %0 : vector<128x128xf32> to vector<1x128x128xf32>
      %73 = vector.broadcast %71 : vector<2x1x128xf32> to vector<2x128x128xf32>
      %74 = vector.broadcast %72 : vector<1x128x128xf32> to vector<2x128x128xf32>
      %75 = arith.addf %73, %74 : vector<2x128x128xf32>
      %cst = arith.constant dense<0xFF800000> : vector<2x128xf32>
      %76 = vector.multi_reduction <maximumf>, %75, %cst [2] : vector<2x128x128xf32> to vector<2x128xf32>
      %77 = arith.index_cast %c6_i32 : i32 to index
      %c0_48 = arith.constant 0 : index
      %c0_49 = arith.constant 0 : index
      %78 = vector.load %arg1[%77, %c0_48, %c0_49] : memref<8x2x128xf32, #tpu.memory_space<vmem>>, vector<1x2x128xf32>
      %79 = vector.shape_cast %78 : vector<1x2x128xf32> to vector<2x128xf32>
      %80 = arith.addf %76, %79 : vector<2x128xf32>
      %c0_50 = arith.constant 0 : index
      %c0_51 = arith.constant 0 : index
      %81 = vector.load %arg7[%c0_50, %c0_51] : memref<2x128xf32, #tpu.memory_space<vmem>>, vector<2x128xf32>
      tpu.vector_store %arg7[%c0_50, %c0_51], %80 {strides = array<i32>} : memref<2x128xf32, #tpu.memory_space<vmem>>, vector<2x128xf32>,
      %82 = tpu.reduce_index %75 {axis = 2 : i32, kind = #tpu.reduction_kind<arg_max>} : vector<2x128x128xf32> -> vector<2x128xi32>
      %83 = arith.index_cast %c6_i32 : i32 to index
      %c0_52 = arith.constant 0 : index
      %c0_53 = arith.constant 0 : index
      %84 = vector.load %arg5[%83, %c0_52, %c0_53] : memref<8x2x128xi32, #tpu.memory_space<vmem>>, vector<1x2x128xi32>
      %85 = vector.shape_cast %84 : vector<1x2x128xi32> to vector<2x128xi32>
      %86 = vector.shape_cast %82 : vector<2x128xi32> to vector<1x2x128xi32>
      tpu.vector_store %arg5[%83, %c0_52, %c0_53], %86 {strides = array<i32>} : memref<8x2x128xi32, #tpu.memory_space<vmem>>, vector<1x2x128xi32>,
    } else {
    }
    %c7_i32 = arith.constant 7 : i32
    %c0_i32_35 = arith.constant 0 : i32
    %57 = arith.cmpi eq, %arg0, %c0_i32_35 : i32
    %c0_i32_36 = arith.constant 0 : i32
    %58 = arith.cmpi eq, %c7_i32, %c0_i32_36 : i32
    %59 = arith.andi %57, %58 : i1
    %60 = arith.extui %59 : i1 to i32
    %c0_i32_37 = arith.constant 0 : i32
    %61 = arith.cmpi ne, %60, %c0_i32_37 : i32
    scf.if %61 {
      %c0_46 = arith.constant 0 : index
      %c0_47 = arith.constant 0 : index
      %70 = vector.load %arg3[%c0_46, %c0_47] : memref<1x128xf32, #tpu.memory_space<vmem>>, vector<1x128xf32>
      %c0_48 = arith.constant 0 : index
      %c0_49 = arith.constant 0 : index
      %c0_50 = arith.constant 0 : index
      %71 = vector.load %arg1[%c0_48, %c0_49, %c0_50] : memref<8x2x128xf32, #tpu.memory_space<vmem>>, vector<1x2x128xf32>
      %72 = vector.shape_cast %71 : vector<1x2x128xf32> to vector<2x128xf32>
      %73 = vector.broadcast %70 : vector<1x128xf32> to vector<2x128xf32>
      %74 = arith.addf %73, %72 : vector<2x128xf32>
      %c0_51 = arith.constant 0 : index
      %c0_52 = arith.constant 0 : index
      %75 = vector.load %arg7[%c0_51, %c0_52] : memref<2x128xf32, #tpu.memory_space<vmem>>, vector<2x128xf32>
      tpu.vector_store %arg7[%c0_51, %c0_52], %74 {strides = array<i32>} : memref<2x128xf32, #tpu.memory_space<vmem>>, vector<2x128xf32>,
      %c0_i32_53 = arith.constant 0 : i32
      %76 = vector.broadcast %c0_i32_53 : i32 to vector<2x128xi32>
      %c0_54 = arith.constant 0 : index
      %c0_55 = arith.constant 0 : index
      %c0_56 = arith.constant 0 : index
      %77 = vector.load %arg5[%c0_54, %c0_55, %c0_56] : memref<8x2x128xi32, #tpu.memory_space<vmem>>, vector<1x2x128xi32>
      %78 = vector.shape_cast %77 : vector<1x2x128xi32> to vector<2x128xi32>
      %79 = vector.shape_cast %76 : vector<2x128xi32> to vector<1x2x128xi32>
      tpu.vector_store %arg5[%c0_54, %c0_55, %c0_56], %79 {strides = array<i32>} : memref<8x2x128xi32, #tpu.memory_space<vmem>>, vector<1x2x128xi32>,
    } else {
    }
    %true_38 = arith.constant true
    %62 = arith.xori %59, %true_38 : i1
    %63 = arith.extui %62 : i1 to i32
    %c0_i32_39 = arith.constant 0 : i32
    %64 = arith.cmpi ne, %63, %c0_i32_39 : i32
    scf.if %64 {
      %c0_46 = arith.constant 0 : index
      %c0_47 = arith.constant 0 : index
      %70 = vector.load %arg7[%c0_46, %c0_47] : memref<2x128xf32, #tpu.memory_space<vmem>>, vector<2x128xf32>
      %71 = vector.shape_cast %70 : vector<2x128xf32> to vector<2x1x128xf32>
      %72 = vector.shape_cast %0 : vector<128x128xf32> to vector<1x128x128xf32>
      %73 = vector.broadcast %71 : vector<2x1x128xf32> to vector<2x128x128xf32>
      %74 = vector.broadcast %72 : vector<1x128x128xf32> to vector<2x128x128xf32>
      %75 = arith.addf %73, %74 : vector<2x128x128xf32>
      %cst = arith.constant dense<0xFF800000> : vector<2x128xf32>
      %76 = vector.multi_reduction <maximumf>, %75, %cst [2] : vector<2x128x128xf32> to vector<2x128xf32>
      %77 = arith.index_cast %c7_i32 : i32 to index
      %c0_48 = arith.constant 0 : index
      %c0_49 = arith.constant 0 : index
      %78 = vector.load %arg1[%77, %c0_48, %c0_49] : memref<8x2x128xf32, #tpu.memory_space<vmem>>, vector<1x2x128xf32>
      %79 = vector.shape_cast %78 : vector<1x2x128xf32> to vector<2x128xf32>
      %80 = arith.addf %76, %79 : vector<2x128xf32>
      %c0_50 = arith.constant 0 : index
      %c0_51 = arith.constant 0 : index
      %81 = vector.load %arg7[%c0_50, %c0_51] : memref<2x128xf32, #tpu.memory_space<vmem>>, vector<2x128xf32>
      tpu.vector_store %arg7[%c0_50, %c0_51], %80 {strides = array<i32>} : memref<2x128xf32, #tpu.memory_space<vmem>>, vector<2x128xf32>,
      %82 = tpu.reduce_index %75 {axis = 2 : i32, kind = #tpu.reduction_kind<arg_max>} : vector<2x128x128xf32> -> vector<2x128xi32>
      %83 = arith.index_cast %c7_i32 : i32 to index
      %c0_52 = arith.constant 0 : index
      %c0_53 = arith.constant 0 : index
      %84 = vector.load %arg5[%83, %c0_52, %c0_53] : memref<8x2x128xi32, #tpu.memory_space<vmem>>, vector<1x2x128xi32>
      %85 = vector.shape_cast %84 : vector<1x2x128xi32> to vector<2x128xi32>
      %86 = vector.shape_cast %82 : vector<2x128xi32> to vector<1x2x128xi32>
      tpu.vector_store %arg5[%83, %c0_52, %c0_53], %86 {strides = array<i32>} : memref<8x2x128xi32, #tpu.memory_space<vmem>>, vector<1x2x128xi32>,
    } else {
    }
    %c8_i32 = arith.constant 8 : i32
    %c0_40 = arith.constant 0 : index
    %c0_41 = arith.constant 0 : index
    %65 = vector.load %arg7[%c0_40, %c0_41] : memref<2x128xf32, #tpu.memory_space<vmem>>, vector<2x128xf32>
    %c0_42 = arith.constant 0 : index
    %c0_43 = arith.constant 0 : index
    %66 = vector.load %arg4[%c0_42, %c0_43] : memref<1x128xf32, #tpu.memory_space<vmem>>, vector<1x128xf32>
    %67 = vector.broadcast %66 : vector<1x128xf32> to vector<2x128xf32>
    %68 = arith.addf %65, %67 : vector<2x128xf32>
    %c0_44 = arith.constant 0 : index
    %c0_45 = arith.constant 0 : index
    %69 = vector.load %arg6[%c0_44, %c0_45] : memref<2x128xf32, #tpu.memory_space<vmem>>, vector<2x128xf32>
    tpu.vector_store %arg6[%c0_44, %c0_45], %68 {strides = array<i32>} : memref<2x128xf32, #tpu.memory_space<vmem>>, vector<2x128xf32>,
    return
  }
  func.func @transform_0(%arg0: i32) -> (i32, i32, i32) {
    %c0_i32 = arith.constant 0 : i32
    %c0_i32_0 = arith.constant 0 : i32
    %c0_i32_1 = arith.constant 0 : i32
    return %arg0, %c0_i32, %c0_i32_0 : i32, i32, i32
  }
  func.func @transform_1(%arg0: i32) -> (i32, i32) {
    %c0_i32 = arith.constant 0 : i32
    %c0_i32_0 = arith.constant 0 : i32
    %c0_i32_1 = arith.constant 0 : i32
    return %c0_i32, %c0_i32_0 : i32, i32
  }
  func.func @transform_2(%arg0: i32) -> (i32, i32) {
    %c0_i32 = arith.constant 0 : i32
    %c0_i32_0 = arith.constant 0 : i32
    %c0_i32_1 = arith.constant 0 : i32
    return %c0_i32, %c0_i32_0 : i32, i32
  }
  func.func @transform_3(%arg0: i32) -> (i32, i32) {
    %c0_i32 = arith.constant 0 : i32
    %c0_i32_0 = arith.constant 0 : i32
    %c0_i32_1 = arith.constant 0 : i32
    return %c0_i32, %c0_i32_0 : i32, i32
  }
  func.func @transform_4(%arg0: i32) -> (i32, i32, i32) {
    %c0_i32 = arith.constant 0 : i32
    %c0_i32_0 = arith.constant 0 : i32
    %c0_i32_1 = arith.constant 0 : i32
    return %arg0, %c0_i32, %c0_i32_0 : i32, i32, i32
  }
  func.func @transform_5(%arg0: i32) -> (i32, i32) {
    %c0_i32 = arith.constant 0 : i32
    %c0_i32_0 = arith.constant 0 : i32
    %c0_i32_1 = arith.constant 0 : i32
    return %c0_i32, %c0_i32_0 : i32, i32
  }
}

</mosaic_0001>

<bundles_post_ra>
// kernel: ner_lstm_crf_forward.4
= control target key start
LH: loop header
LB: loop body
LE: loop exit
PB: predicated region body
PF: predicated region fallthrough
CT: control target
= control target key end

     0   :  { %8 = vsyncpa [#allocation3], 0  ;;  %s347_s0 = inlined_call_operand.hbm [shape: bf16[16,16], index: 0, kind: input, shape index: {}]   ;;  %s348_s1 = inlined_call_operand.hbm [shape: bf16[16,256], index: 1, kind: input, shape index: {}]   ;;  %s349_s2 = inlined_call_operand.hbm [shape: f32[1,256], index: 2, kind: input, shape index: {}]   ;;  %s350_s3 = inlined_call_operand.hbm [shape: f32[16,256], index: 3, kind: output, shape index: {}]  }
   0x1   :  { %9 = vsyncpa [#allocation6], 0 }
   0x2   :  { %10 = vsyncpa [#allocation4], 0  ;;  %s268_s12 = smov [#allocation5]   ;;  %s174_s16 = scalar_lea.hbm %s348_s1, 256 }
   0x3   :  { %s28_s13 = sshll.u32 %s268_s12, 4  ;;  %p175_p0 = scmp.ne.s32.totalorder %s348_s1, %s174_s16  ;;  %s29_s13 = int_to_ptr.vmem [resolvable:$true] %s28_s13 }
   0x4   :  { %p178_p1 = scmp.lt.u32.totalorder %s174_s16, %s348_s1 }
   0x6   :  { %p180_p2 = pnand %p178_p1, %p175_p0 }
   0x8   :  { %183 = shalt.err (!%p180_p2)
}
   0x9   :  { %s184_s21 = scalar_lea.vmem %s29_s13, 256  ;;  %p189_p4 = scmp.lt.s32.totalorder %s29_s13, %s29_s13 }
   0xa   :  { %p185_p3 = scmp.ne.s32.totalorder %s29_s13, %s184_s21  ;;  %p190_p5 = scmp.lt.s32.totalorder %s184_s21, %s184_s21 }
   0xc   :  { %p191_p6 = por %p190_p5, %p189_p4 }
   0xe   :  { %p192_p7 = pnand %p191_p6, %p185_p3 }
  0x10   :  { %195 = shalt.err (!%p192_p7)
}
  0x11   :  { %s269_s22 = smov 128   ;;  %s270_s23 = smov 8  }
  0x12   :  { %34 = dma.hbm_to_vmem [thread:$0]  %s348_s1, 256, %s29_s13, [#allocation6], %s269_s22, %s269_s22, %s270_s23  }
  0x13   :  { %s271_s26 = smov [#allocation2]   ;;  %s196_s30 = scalar_lea.hbm %s347_s0, 128 }
  0x14   :  { %s16_s27 = sshll.u32 %s271_s26, 4  ;;  %p197_p8 = scmp.ne.s32.totalorder %s347_s0, %s196_s30  ;;  %s17_s27 = int_to_ptr.vmem [resolvable:$true] %s16_s27 }
  0x15   :  { %p200_p9 = scmp.lt.u32.totalorder %s196_s30, %s347_s0 }
  0x17   :  { %p202_p10 = pnand %p200_p9, %p197_p8 }
  0x19   :  { %205 = shalt.err (!%p202_p10)
}
  0x1a   :  { %s206_s8 = scalar_lea.vmem %s17_s27, 128  ;;  %p211_p12 = scmp.lt.s32.totalorder %s17_s27, %s17_s27 }
  0x1b   :  { %p207_p11 = scmp.ne.s32.totalorder %s17_s27, %s206_s8  ;;  %p212_p13 = scmp.lt.s32.totalorder %s206_s8, %s206_s8 }
  0x1d   :  { %p213_p0 = por %p212_p13, %p211_p12 }
  0x1f   :  { %p214_p1 = pnand %p213_p0, %p207_p11 }
  0x21   :  { %217 = shalt.err (!%p214_p1)
}
  0x22   :  { %s272_s1 = smov 64   ;;  %s273_s9 = smov 4  }
  0x23   :  { %22 = dma.hbm_to_vmem [thread:$0]  %s347_s0, 128, %s17_s27, [#allocation3], %s272_s1, %s272_s1, %s273_s9  }
  0x24   :  { %s274_s12 = smov [#allocation7]   ;;  %s218_s16 = scalar_lea.hbm %s349_s2, 32 }
  0x25   :  { %s41_s13 = sshll.u32 %s274_s12, 4  ;;  %p219_p2 = scmp.ne.s32.totalorder %s349_s2, %s218_s16  ;;  %s42_s13 = int_to_ptr.vmem [resolvable:$true] %s41_s13 }
  0x26   :  { %p222_p3 = scmp.lt.u32.totalorder %s218_s16, %s349_s2 }
  0x28   :  { %p224_p4 = pnand %p222_p3, %p219_p2 }
  0x2a   :  { %227 = shalt.err (!%p224_p4)
}
  0x2b   :  { %s228_s21 = scalar_lea.vmem %s42_s13, 32  ;;  %p233_p6 = scmp.lt.s32.totalorder %s42_s13, %s42_s13 }
  0x2c   :  { %p229_p5 = scmp.ne.s32.totalorder %s42_s13, %s228_s21  ;;  %p234_p7 = scmp.lt.s32.totalorder %s228_s21, %s228_s21 }
  0x2e   :  { %p235_p8 = por %p234_p7, %p233_p6 }
  0x30   :  { %p236_p9 = pnand %p235_p8, %p229_p5 }
  0x32   :  { %239 = shalt.err (!%p236_p9)
}
  0x33   :  { %44 = dma.hbm_to_vmem [thread:$0]  %s349_s2, 32, %s42_s13, [#allocation6]  }
  0x34   :  { %262 = dma.done.wait [#allocation3], 128  }
  0x35   :  { %263 = vsyncadd [#allocation3], 4294967168 }
  0x36   :  { %264 = dma.done.wait [#allocation6], 288  }
  0x37   :  { %265 = vsyncadd [#allocation6], 4294967008  ;;  %v275_v0 = vmov 0   ;;  %v170_v1 = vld [vmem:[#allocation5 + $0x4] ss:$8 sps:$4 sm:$0xff]   ;;  %v173_v3 = vld [vmem:[#allocation2] sm:$0xff]   ;;  %v61_v4 = vlaneseq }
  0x38   :  { %122 = vmatprep.mubr.bf16.mxu0 %v275_v0  ;;  %v172_v2 = vld [vmem:[#allocation5] ss:$8 sps:$4 sm:$0xff]   ;;  %90 = vmatprep.subr.bf16.mxu0 %v170_v1  ;;  %vm86_vm0 = vcmask 130048   ;;  %v59_v7 = vld [vmem:[#allocation7] sm:$0x3]  ;;  %s276_s2 = smov [#allocation8]  }
  0x39   :  { %91 = vmatpush1.bf16.msra.mxu0 %v172_v2  ;;  %v62_v5 = vshrl.u32 %v61_v4, 7  ;;  %s142_s23 = sshll.u32 %s276_s2, 4  ;;  %s143_s23 = int_to_ptr.vmem [resolvable:$true] %s142_s23 }
  0x3a   :  { %s240_s24 = scalar_lea.vmem %s143_s23, 512  ;;  %p245_p11 = scmp.lt.s32.totalorder %s143_s23, %s143_s23 }
  0x3b   :  { %v63_v6 = vsub.s32 0, %v62_v5  ;;  %v67_v8 = vsub.s32 1, %v62_v5  ;;  %p241_p10 = scmp.ne.s32.totalorder %s143_s23, %s240_s24  ;;  %p246_p12 = scmp.lt.s32.totalorder %s240_s24, %s240_s24 }
  0x3c   :  { %158 = vmatmul.mubr.msk.bf16.vlgmr.msra.gmra.mrb[0].mxu0 %vm86_vm0, %v173_v3 }
  0x3d   :  { %v64_v9 = vrot.slane %v59_v7, %v63_v6  ;;  %v68_v10 = vrot.slane %v59_v7, %v67_v8  ;;  %p247_p13 = por %p246_p12, %p245_p11 }
  0x3f   :  { %p248_p0 = pnand %p247_p13, %p241_p10 }
 0x10f   :  { %v124_v11 = vpop.f32.mrb[0].mxu0 }
 0x110   :  { %v125_v12 = vadd.f32 %v124_v11, %v64_v9  ;;  %v126_v13 = vpop.f32.mrb[1].mxu0 }
 0x111   :  { %v127_v14 = vadd.f32 %v126_v13, %v68_v10  ;;  %v128_v15 = vpop.f32.mrb[2].mxu0 }
 0x112   :  { %133 = vst [vmem:[#allocation8] sm:$0xff] %v125_v12  ;;  %v129_v16 = vadd.f32 %v128_v15, %v64_v9  ;;  %v130_v17 = vpop.f32.mrb[3].mxu0 }
 0x113   :  { %134 = vst [vmem:[#allocation8 + $0x8] sm:$0xff] %v127_v14  ;;  %v131_v18 = vadd.f32 %v130_v17, %v68_v10 }
 0x114   :  { %135 = vst [vmem:[#allocation8 + $0x10] sm:$0xff] %v129_v16 }
 0x115   :  { %136 = vst [vmem:[#allocation8 + $0x18] sm:$0xff] %v131_v18 }
 0x116   :  { %251 = shalt.err (!%p248_p0)
}
 0x117   :  { %s252_s27 = scalar_lea.hbm %s350_s3, 512 }
 0x118   :  { %p253_p1 = scmp.ne.s32.totalorder %s350_s3, %s252_s27  ;;  %p256_p2 = scmp.lt.u32.totalorder %s252_s27, %s350_s3 }
 0x11a   :  { %p258_p3 = pnand %p256_p2, %p253_p1 }
 0x11c   :  { %261 = shalt.err (!%p258_p3)
}
 0x11d   :  { %s277_s5 = smov 256   ;;  %s278_s6 = smov 16  }
 0x11e   :  { %148 = dma.vmem_to_hbm [thread:$0]  %s143_s23, 512, %s350_s3, [#allocation4], %s277_s5, %s277_s5, %s278_s6  }
 0x11f   :  { %266 = dma.done.wait [#allocation4], 512  }
 0x120   :  { %267 = vsyncadd [#allocation4], 4294966784 }
 0x121   :  { %152 = vsyncpa [#allocation3], 1 }
 0x122   :  { %153 = vsyncpa [#allocation6], 1 }
 0x123   :  { %154 = vsyncpa [#allocation4], 1 }

// kernel: ner_lstm_crf_forward.6
= control target key start
LH: loop header
LB: loop body
LE: loop exit
PB: predicated region body
PF: predicated region fallthrough
CT: control target
= control target key end

     0   :  { %9 = vsyncpa [#allocation3], 0  ;;  %s516_s0 = inlined_call_operand.hbm [shape: bf16[16,32], index: 0, kind: input, shape index: {}]   ;;  %s517_s1 = inlined_call_operand.hbm [shape: bf16[16,32], index: 1, kind: input, shape index: {}]   ;;  %s518_s2 = inlined_call_operand.hbm [shape: bf16[2,32,128], index: 2, kind: input, shape index: {}]   ;;  %s519_s3 = inlined_call_operand.hbm [shape: f32[1,128], index: 3, kind: input, shape index: {}]   ;;  %s520_s4 = inlined_call_operand.hbm [shape: f32[16,128], index: 4, kind: output, shape index: {}]  }
   0x1   :  { %10 = vsyncpa [#allocation6], 0 }
   0x2   :  { %11 = vsyncpa [#allocation9], 0 }
   0x3   :  { %12 = vsyncpa [#allocation4], 0  ;;  %s404_s15 = smov [#allocation5]   ;;  %s405_s17 = smov [#allocation2]  }
   0x4   :  { %s30_s16 = sshll.u32 %s404_s15, 4  ;;  %s18_s18 = sshll.u32 %s405_s17, 4  ;;  %s31_s16 = int_to_ptr.vmem [resolvable:$true] %s30_s16  ;;  %s440_s18 = int_to_ptr.vmem [resolvable:$true] %s18_s18 }
   0x5   :  { %s286_s21 = scalar_lea.hbm %s517_s1, 128 }
   0x6   :  { %p287_p0 = scmp.ne.s32.totalorder %s517_s1, %s286_s21  ;;  %p290_p1 = scmp.lt.u32.totalorder %s286_s21, %s517_s1 }
   0x8   :  { %p292_p2 = pnand %p290_p1, %p287_p0 }
   0xa   :  { %295 = shalt.err (!%p292_p2)
}
   0xb   :  { %s296_s26 = scalar_lea.vmem %s31_s16, 128  ;;  %p301_p4 = scmp.lt.s32.totalorder %s31_s16, %s31_s16 }
   0xc   :  { %p297_p3 = scmp.ne.s32.totalorder %s31_s16, %s296_s26  ;;  %p302_p5 = scmp.lt.s32.totalorder %s296_s26, %s296_s26 }
   0xe   :  { %p303_p6 = por %p302_p5, %p301_p4 }
  0x10   :  { %p304_p7 = pnand %p303_p6, %p297_p3 }
  0x12   :  { %307 = shalt.err (!%p304_p7)
}
  0x13   :  { %s406_s27 = smov 64   ;;  %s407_s28 = smov 4  }
  0x14   :  { %36 = dma.hbm_to_vmem [thread:$0]  %s517_s1, 128, %s31_s16, [#allocation6], %s406_s27, %s406_s27, %s407_s28  }
  0x15   :  { %s308_s7 = scalar_lea.hbm %s516_s0, 128 }
  0x16   :  { %p309_p8 = scmp.ne.s32.totalorder %s516_s0, %s308_s7  ;;  %p312_p9 = scmp.lt.u32.totalorder %s308_s7, %s516_s0 }
  0x18   :  { %p314_p10 = pnand %p312_p9, %p309_p8 }
  0x1a   :  { %317 = shalt.err (!%p314_p10)
}
  0x1b   :  { %s318_s12 = scalar_lea.vmem %s440_s18, 128  ;;  %p323_p12 = scmp.lt.s32.totalorder %s440_s18, %s440_s18 }
  0x1c   :  { %p319_p11 = scmp.ne.s32.totalorder %s440_s18, %s318_s12  ;;  %p324_p13 = scmp.lt.s32.totalorder %s318_s12, %s318_s12 }
  0x1e   :  { %p325_p0 = por %p324_p13, %p323_p12 }
  0x20   :  { %p326_p1 = pnand %p325_p0, %p319_p11 }
  0x22   :  { %329 = shalt.err (!%p326_p1)
}
  0x23   :  { %24 = dma.hbm_to_vmem [thread:$0]  %s516_s0, 128, %s440_s18, [#allocation3], %s406_s27, %s406_s27, %s407_s28  }
  0x24   :  { %s408_s14 = smov [#allocation7]   ;;  %s409_s16 = smov [#allocation8]  }
  0x25   :  { %s42_s15 = sshll.u32 %s408_s14, 4  ;;  %s55_s17 = sshll.u32 %s409_s16, 4  ;;  %s43_s15 = int_to_ptr.vmem [resolvable:$true] %s42_s15  ;;  %s56_s17 = int_to_ptr.vmem [resolvable:$true] %s55_s17 }
  0x26   :  { %s330_s21 = scalar_lea.hbm %s518_s2, 512 }
  0x27   :  { %p331_p2 = scmp.ne.s32.totalorder %s518_s2, %s330_s21  ;;  %p334_p3 = scmp.lt.u32.totalorder %s330_s21, %s518_s2 }
  0x29   :  { %p336_p4 = pnand %p334_p3, %p331_p2 }
  0x2b   :  { %339 = shalt.err (!%p336_p4)
}
  0x2c   :  { %s340_s0 = scalar_lea.vmem %s43_s15, 512  ;;  %p345_p6 = scmp.lt.s32.totalorder %s43_s15, %s43_s15 }
  0x2d   :  { %p341_p5 = scmp.ne.s32.totalorder %s43_s15, %s340_s0  ;;  %p346_p7 = scmp.lt.s32.totalorder %s340_s0, %s340_s0 }
  0x2f   :  { %p347_p8 = por %p346_p7, %p345_p6 }
  0x31   :  { %p348_p9 = pnand %p347_p8, %p341_p5 }
  0x33   :  { %351 = shalt.err (!%p348_p9)
}
  0x34   :  { %48 = dma.hbm_to_vmem [thread:$0]  %s518_s2, 512, %s43_s15, [#allocation6], %s406_s27, %s406_s27, %s407_s28  }
  0x35   :  { %s352_s5 = scalar_lea.hbm %s519_s3, 16 }
  0x36   :  { %p353_p10 = scmp.ne.s32.totalorder %s519_s3, %s352_s5  ;;  %p356_p11 = scmp.lt.u32.totalorder %s352_s5, %s519_s3 }
  0x38   :  { %p358_p12 = pnand %p356_p11, %p353_p10 }
  0x3a   :  { %361 = shalt.err (!%p358_p12)
}
  0x3b   :  { %s362_s10 = scalar_lea.vmem %s56_s17, 16  ;;  %s366_s11 = scalar_lea.vmem %s56_s17, 32 }
  0x3c   :  { %p363_p13 = scmp.ne.s32.totalorder %s56_s17, %s362_s10  ;;  %p367_p0 = scmp.lt.s32.totalorder %s56_s17, %s56_s17 }
  0x3d   :  { %p368_p1 = scmp.lt.s32.totalorder %s366_s11, %s362_s10 }
  0x3f   :  { %p369_p2 = por %p368_p1, %p367_p0 }
  0x41   :  { %p370_p3 = pnand %p369_p2, %p363_p13 }
  0x43   :  { %373 = shalt.err (!%p370_p3)
}
  0x44   :  { %58 = dma.hbm_to_vmem [thread:$0]  %s519_s3, 16, %s56_s17, [#allocation9]  }
  0x45   :  { %396 = dma.done.wait [#allocation3], 128  }
  0x46   :  { %397 = vsyncadd [#allocation3], 4294967168 }
  0x47   :  { %398 = dma.done.wait [#allocation6], 640  }
  0x48   :  { %399 = vsyncadd [#allocation6], 4294966656 }
  0x49   :  { %400 = dma.done.wait [#allocation9], 16  }
  0x4a   :  { %401 = vsyncadd [#allocation9], 4294967280  ;;  %v410_v0 = vmov 0.0   ;;  %vm411_vm0 = vmmov 0   ;;  %v280_v1 = vld [vmem:[#allocation7 + $0x10] sm:$0xff]   ;;  %v281_v2 = vld [vmem:[#allocation7] sm:$0xff]  }
  0x4b   :  { %253 = vmatprep.subr.bf16.mxu0 %v410_v0  ;;  %261 = vmatprep.subr.bf16.mxu1 %v410_v0  ;;  %v282_v3 = vld [vmem:[#allocation7 + $0x18] sm:$0xff]   ;;  %v283_v4 = vld [vmem:[#allocation7 + $0x8] sm:$0xff]   ;;  %vm102_vm1 = vcmask 261120   ;;  %v285_v6 = vld [vmem:[#allocation2] sm:$0xff]   ;;  %s412_s3 = smov [#allocation10]  }
  0x4c   :  { %257 = vmatprep.mubr.msk.bf16.mxu0 %vm411_vm0, %v410_v0  ;;  %265 = vmatprep.mubr.msk.bf16.mxu1 %vm411_vm0, %v410_v0  ;;  %v284_v5 = vld [vmem:[#allocation5] sm:$0xff]   ;;  %v246_v9 = vld [vmem:[#allocation8] ss:$0 sm:$0xff]  ;;  %s224_s28 = sshll.u32 %s412_s3, 4  ;;  %s225_s28 = int_to_ptr.vmem [resolvable:$true] %s224_s28 }
  0x4d   :  { %254 = vmatpush3.bf16.msra.mxu0 %v280_v1  ;;  %262 = vmatpush3.bf16.msra.mxu1 %v281_v2  ;;  %s374_s12 = scalar_lea.vmem %s225_s28, 256  ;;  %p379_p5 = scmp.lt.s32.totalorder %s225_s28, %s225_s28 }
  0x4e   :  { %255 = vmatprep.subr.bf16.mxu0 %v410_v0  ;;  %263 = vmatprep.subr.bf16.mxu1 %v410_v0  ;;  %p375_p4 = scmp.ne.s32.totalorder %s225_s28, %s374_s12  ;;  %p380_p6 = scmp.lt.s32.totalorder %s374_s12, %s374_s12 }
  0x50   :  { %p381_p7 = por %p380_p6, %p379_p5 }
  0x51   :  { %256 = vmatpush3.bf16.msra.mxu0 %v282_v3  ;;  %264 = vmatpush3.bf16.msra.mxu1 %v283_v4 }
  0x52   :  { %p382_p8 = pnand %p381_p7, %p375_p4 }
  0x54   :  { %258 = vmatmul.mubr.msk.bf16.vlgmr.msra.gmra.mrb[0].mxu0 %vm102_vm1, %v284_v5  ;;  %266 = vmatmul.mubr.msk.bf16.vlgmr.msra.gmra.mrb[0].mxu1 %vm102_vm1, %v285_v6 }
 0x127   :  { %v140_v7 = vpop.f32.mrb[0].mxu0  ;;  %v201_v8 = vpop.f32.mrb[0].mxu1 }
 0x128   :  { %v259_v10 = vpop.f32.mrb[1].mxu0  ;;  %v202_v11 = vadd.f32 %v201_v8, %v140_v7  ;;  %v267_v12 = vpop.f32.mrb[1].mxu1 }
 0x129   :  { %v143_v13 = vpop.f32.mrb[2].mxu0  ;;  %v204_v14 = vpop.f32.mrb[2].mxu1 }
 0x12a   :  { %v260_v15 = vpop.f32.mrb[3].mxu0  ;;  %v215_v16 = vadd.f32 %v246_v9, %v202_v11  ;;  %v205_v17 = vadd.f32 %v204_v14, %v143_v13  ;;  %v268_v18 = vpop.f32.mrb[3].mxu1 }
 0x12c   :  { %217 = vst [vmem:[#allocation10] sm:$0xff] %v215_v16  ;;  %v216_v19 = vadd.f32 %v246_v9, %v205_v17 }
 0x12e   :  { %218 = vst [vmem:[#allocation10 + $0x8] sm:$0xff] %v216_v19 }
 0x12f   :  { %385 = shalt.err (!%p382_p8)
}
 0x130   :  { %s386_s14 = scalar_lea.hbm %s520_s4, 256 }
 0x131   :  { %p387_p9 = scmp.ne.s32.totalorder %s520_s4, %s386_s14  ;;  %p390_p10 = scmp.lt.u32.totalorder %s386_s14, %s520_s4 }
 0x133   :  { %p392_p11 = pnand %p390_p10, %p387_p9 }
 0x135   :  { %395 = shalt.err (!%p392_p11)
}
 0x136   :  { %s413_s20 = smov 128   ;;  %s414_s21 = smov 8  }
 0x137   :  { %230 = dma.vmem_to_hbm [thread:$0]  %s225_s28, 256, %s520_s4, [#allocation4], %s413_s20, %s413_s20, %s414_s21  }
 0x138   :  { %402 = dma.done.wait [#allocation4], 256  }
 0x139   :  { %403 = vsyncadd [#allocation4], 4294967040 }
 0x13a   :  { %234 = vsyncpa [#allocation3], 1 }
 0x13b   :  { %235 = vsyncpa [#allocation6], 1 }
 0x13c   :  { %236 = vsyncpa [#allocation9], 1 }
 0x13d   :  { %237 = vsyncpa [#allocation4], 1 }

// kernel: custom-call.4
= control target key start
LH: loop header
LB: loop body
LE: loop exit
PB: predicated region body
PF: predicated region fallthrough
CT: control target
= control target key end

     0   :  { %s6_s0 = inlined_call_operand.vmem [shape: s32[7,2], index: 0, kind: output, shape index: {}]  }

// kernel: ner_lstm_crf_forward.5
= control target key start
LH: loop header
LB: loop body
LE: loop exit
PB: predicated region body
PF: predicated region fallthrough
CT: control target
= control target key end

     0   :  { %9 = vsyncpa [#allocation7], 0  ;;  %s3199_s0 = inlined_call_operand.hbm [shape: f32[8,2,256], index: 0, kind: input, shape index: {}]   ;;  %s3200_s1 = inlined_call_operand.hbm [shape: bf16[2,32,128], index: 1, kind: input, shape index: {}]   ;;  %s3201_s2 = inlined_call_operand.hbm [shape: bf16[8,2,32], index: 2, kind: output, shape index: {0}]   ;;  %s3202_s3 = inlined_call_operand.hbm [shape: bf16[8,2,32], index: 3, kind: output, shape index: {1}]  }
   0x1   :  { %10 = vsyncpa [#allocation10], 0 }
   0x2   :  { %11 = vsyncpa [#allocation8], 0 }
   0x3   :  { %12 = vsyncpa [#allocation13], 0  ;;  %s2669_s12 = smov [#allocation6]   ;;  %s2573_s16 = scalar_lea.hbm %s3199_s0, 512 }
   0x4   :  { %s18_s13 = sshll.u32 %s2669_s12, 4  ;;  %p2574_p0 = scmp.ne.s32.totalorder %s3199_s0, %s2573_s16  ;;  %s19_s13 = int_to_ptr.vmem [resolvable:$true] %s18_s13 }
   0x5   :  { %p2577_p1 = scmp.lt.u32.totalorder %s2573_s16, %s3199_s0 }
   0x7   :  { %p2579_p2 = pnand %p2577_p1, %p2574_p0 }
   0x9   :  { %2582 = shalt.err (!%p2579_p2)
}
   0xa   :  { %s2583_s21 = scalar_lea.vmem %s19_s13, 512  ;;  %p2588_p4 = scmp.lt.s32.totalorder %s19_s13, %s19_s13 }
   0xb   :  { %p2584_p3 = scmp.ne.s32.totalorder %s19_s13, %s2583_s21  ;;  %p2589_p5 = scmp.lt.s32.totalorder %s2583_s21, %s2583_s21 }
   0xd   :  { %p2590_p6 = por %p2589_p5, %p2588_p4 }
   0xf   :  { %p2591_p7 = pnand %p2590_p6, %p2584_p3 }
  0x11   :  { %2594 = shalt.err (!%p2591_p7)
}
  0x12   :  { %s2670_s22 = smov 64   ;;  %s2671_s23 = smov 4  }
  0x13   :  { %24 = dma.hbm_to_vmem [thread:$0]  %s3199_s0, 512, %s19_s13, [#allocation7], %s2670_s22, %s2670_s22, %s2671_s23  }
  0x14   :  { %s2672_s26 = smov [#allocation9]   ;;  %s2595_s30 = scalar_lea.hbm %s3200_s1, 512 }
  0x15   :  { %s30_s27 = sshll.u32 %s2672_s26, 4  ;;  %p2596_p8 = scmp.ne.s32.totalorder %s3200_s1, %s2595_s30  ;;  %s31_s27 = int_to_ptr.vmem [resolvable:$true] %s30_s27 }
  0x16   :  { %p2599_p9 = scmp.lt.u32.totalorder %s2595_s30, %s3200_s1 }
  0x18   :  { %p2601_p10 = pnand %p2599_p9, %p2596_p8 }
  0x1a   :  { %2604 = shalt.err (!%p2601_p10)
}
  0x1b   :  { %s2605_s8 = scalar_lea.vmem %s31_s27, 512  ;;  %p2610_p12 = scmp.lt.s32.totalorder %s31_s27, %s31_s27 }
  0x1c   :  { %p2606_p11 = scmp.ne.s32.totalorder %s31_s27, %s2605_s8  ;;  %p2611_p13 = scmp.lt.s32.totalorder %s2605_s8, %s2605_s8 }
  0x1e   :  { %p2612_p0 = por %p2611_p13, %p2610_p12 }
  0x20   :  { %p2613_p1 = pnand %p2612_p0, %p2606_p11 }
  0x22   :  { %2616 = shalt.err (!%p2613_p1)
}
  0x23   :  { %36 = dma.hbm_to_vmem [thread:$0]  %s3200_s1, 512, %s31_s27, [#allocation10], %s2670_s22, %s2670_s22, %s2671_s23  }
  0x24   :  { %2661 = dma.done.wait [#allocation7], 512  }
  0x25   :  { %2662 = vsyncadd [#allocation7], 4294966784 }
  0x26   :  { %2663 = dma.done.wait [#allocation10], 512  }
  0x27   :  { %2664 = vsyncadd [#allocation10], 4294966784  ;;  %vm53_vm0 = vcmask 254976   ;;  %v2673_v0 = vmov 0.0   ;;  %vm2674_vm1 = vmmov 0   ;;  %v2745_v1 = vld [vmem:[#allocation9] sm:$0xff]   ;;  %v257_v50 = vlaneseq }
  0x28   :  { %2295 = vmatprep.subr.bf16.mxu0 %v2673_v0  ;;  %2303 = vmatprep.subr.bf16.mxu1 %v2673_v0  ;;  %54 = vst.msk [vmem:[#allocation2] sm:$0x3] %vm53_vm0, %v2673_v0  ;;  %55 = vst.msk [vmem:[#allocation3] sm:$0x3] %vm53_vm0, %v2673_v0  ;;  %v2747_v2 = vld [vmem:[#allocation9 + $0x10] sm:$0xff]   ;;  %v2750_v3 = vld [vmem:[#allocation9 + $0x8] sm:$0xff]  }
  0x29   :  { %56 = vst.msk [vmem:[#allocation4] sm:$0x3] %vm53_vm0, %v2673_v0  ;;  %57 = vst.msk [vmem:[#allocation5] sm:$0x3] %vm53_vm0, %v2673_v0  ;;  %2299 = vmatprep.mubr.msk.bf16.mxu0 %vm2674_vm1, %v2673_v0  ;;  %2307 = vmatprep.mubr.msk.bf16.mxu1 %vm2674_vm1, %v2673_v0  ;;  %v2754_v4 = vld [vmem:[#allocation9 + $0x18] sm:$0xff]   ;;  %vm73_vm2 = vcmask 261120  }
  0x2a   :  { %2296 = vmatpush3.bf16.msra.mxu0 %v2745_v1  ;;  %2304 = vmatpush3.bf16.msra.mxu1 %v2747_v2  ;;  %s2675_s1 = smov 32   ;;  %v119_v11 = vld [vmem:[#allocation6 + $0x1c] sm:$0xf]  ;;  %v58_v12 = vld [vmem:[#allocation6] sm:$0xf]  ;;  %v2783_v52 = vshrl.u32 %v257_v50, 7 }
  0x2b   :  { %2297 = vmatprep.subr.bf16.mxu0 %v2673_v0  ;;  %2305 = vmatprep.subr.bf16.mxu1 %v2673_v0  ;;  %v178_v13 = vrot.slane %v119_v11, 2  ;;  %v2676_v48 = vmov 1983009808   ;;  %s2677_s10 = smov 96   ;;  %v344_v11 = vld [vmem:[#allocation6 + $0x4] sm:$0xf] }
  0x2c   :  { %v255_v49 = vunpack.c.l.s4 %v2676_v48  ;;  %vm320_vm3 = vcmask 253952   ;;  %s2679_s11 = smov [#allocation11]   ;;  %s2680_s13 = smov [#allocation12]  }
  0x2d   :  { %s2166_s12 = sshll.u32 %s2679_s11, 4  ;;  %s2178_s14 = sshll.u32 %s2680_s13, 4  ;;  %s2167_s12 = int_to_ptr.vmem [resolvable:$true] %s2166_s12  ;;  %s2179_s14 = int_to_ptr.vmem [resolvable:$true] %s2178_s14 }
  0x2e   :  { %2298 = vmatpush3.bf16.msra.mxu0 %v2750_v3  ;;  %2306 = vmatpush3.bf16.msra.mxu1 %v2754_v4  ;;  %v256_v51 = vunpack.c.0.s8 %v255_v49  ;;  %s2617_s15 = scalar_lea.vmem %s2167_s12, 128  ;;  %p2622_p3 = scmp.lt.s32.totalorder %s2167_s12, %s2167_s12 }
  0x2f   :  { %v59_v5 = vld [vmem:[#allocation2] sm:$0x3]  ;;  %v2202_v8 = vld.sshfl [vmem:[#allocation3] sm:$0x3 pattern:$0x76325410]  ;;  %2311 = vmatprep.subr.bf16.mxu0 %v2673_v0  ;;  %2319 = vmatprep.subr.bf16.mxu1 %v2673_v0  ;;  %p2618_p2 = scmp.ne.s32.totalorder %s2167_s12, %s2617_s15  ;;  %p2623_p4 = scmp.lt.s32.totalorder %s2617_s15, %s2617_s15 }
  0x30   :  { %v120_v6 = vld [vmem:[#allocation4] sm:$0x3]  ;;  %v60_v7 = vpack.c.bf16 %v59_v5, %v59_v5  ;;  %197 = vrot.lane.b32.xlu1 %v2202_v8, %s2675_s1  ;;  %v2204_v10 = vld.sshfl [vmem:[#allocation5] sm:$0x3 pattern:$0x76325410]  ;;  %v2786_v54 = vsub.s32 %v256_v51, %v2783_v52 }
  0x31   :  { %v121_v9 = vpack.c.bf16 %v120_v6, %v120_v6  ;;  %p2624_p5 = por %p2623_p4, %p2622_p3 }
  0x32   :  { %2300 = vmatmul.mubr.msk.bf16.vlgmr.msra.gmra.mrb[0].mxu0 %vm73_vm2, %v60_v7 }
  0x33   :  { %2308 = vmatmul.mubr.msk.bf16.vlgmr.msra.gmra.mrb[0].mxu1 %vm73_vm2, %v121_v9  ;;  %2312 = vmatpush3.bf16.msra.mxu0 %v2745_v1  ;;  %p2625_p6 = pnand %p2624_p5, %p2618_p2 }
  0x34   :  { %233 = vrot.lane.b32.xlu1 %v2204_v10, %s2675_s1  ;;  %2320 = vmatpush3.bf16.msra.mxu1 %v2747_v2 }
  0x35   :  { %2313 = vmatprep.subr.bf16.mxu0 %v2673_v0  ;;  %2315 = vmatprep.mubr.msk.bf16.mxu0 %vm2674_vm1, %v2673_v0 }
  0x36   :  { %2321 = vmatprep.subr.bf16.mxu1 %v2673_v0  ;;  %2323 = vmatprep.mubr.msk.bf16.mxu1 %vm2674_vm1, %v2673_v0 }
  0x37   :  { %2314 = vmatpush3.bf16.msra.mxu0 %v2750_v3 }
  0x38   :  { %2322 = vmatpush3.bf16.msra.mxu1 %v2754_v4  ;;  %2327 = vmatprep.subr.bf16.mxu0 %v2673_v0 }
  0x39   :  { %2335 = vmatprep.subr.bf16.mxu1 %v2673_v0 }
  0xa2   :  { %v198_v38 = vpop.permute.xlu1 %197 }
  0xa6   :  { %v234_v40 = vpop.permute.xlu1 %233 }
 0x105   :  { %v111_v14 = vpop.f32.mrb[0].mxu0 }
 0x106   :  { %v117_v15 = vadd.f32 %v111_v14, %v58_v12  ;;  %v2301_v16 = vpop.f32.mrb[1].mxu0  ;;  %v171_v17 = vpop.f32.mrb[0].mxu1  ;;  %v392_v12 = vld [vmem:[#allocation6 + $0x18] sm:$0xf] }
 0x107   :  { %v180_v18 = vadd.f32 %v178_v13, %v171_v17  ;;  %v114_v19 = vpop.f32.mrb[2].mxu0  ;;  %v2309_v20 = vpop.f32.mrb[1].mxu1  ;;  %v439_v16 = vrot.slane %v392_v12, 2  ;;  %v653_v12 = vld [vmem:[#allocation6 + $0x14] sm:$0xf] }
 0x108   :  { %v2302_v21 = vpop.f32.mrb[3].mxu0  ;;  %v174_v22 = vpop.f32.mrb[2].mxu1  ;;  %2441 = vtanh.f32 %v117_v15  ;;  %v2201_v26 = vmul.f32 -1.442695, %v117_v15 }
 0x109   :  { %v2310_v23 = vpop.f32.mrb[3].mxu1  ;;  %2443 = vtanh.f32 %v180_v18  ;;  %v2203_v27 = vmul.f32 -1.442695, %v180_v18 }
 0x10a   :  { %2445 = vpow2.f32 %v2201_v26 }
 0x10b   :  { %2447 = vpow2.f32 %v2203_v27 }
 0x112   :  { %v2442_v24 = vpop.eup %2441 }
 0x113   :  { %202 = vrot.lane.b32.xlu0 %v2442_v24, %s2670_s22  ;;  %v2444_v25 = vpop.eup %2443 }
 0x114   :  { %v2446_v28 = vpop.eup %2445 }
 0x115   :  { %v185_v29 = vadd.f32 1.0, %v2446_v28  ;;  %v2448_v30 = vpop.eup %2447 }
 0x116   :  { %v221_v31 = vadd.f32 1.0, %v2448_v30 }
 0x117   :  { %238 = vrot.lane.b32.xlu0 %v2444_v25, %s2670_s22  ;;  %2449 = vrcp.f32 %v185_v29 }
 0x118   :  { %2451 = vrcp.f32 %v221_v31 }
 0x121   :  { %v2450_v32 = vpop.eup %2449 }
 0x122   :  { %v2452_v35 = vpop.eup %2451  ;;  %v200_v39 = vmul.f32 %v2450_v32, %v198_v38 }
 0x123   :  { %v236_v43 = vmul.f32 %v2452_v35, %v234_v40 }
 0x185   :  { %v203_v33 = vpop.permute.xlu0 %202 }
 0x186   :  { %v205_v34 = vmul.f32 %v2450_v32, %v203_v33 }
 0x188   :  { %207 = vrot.lane.b32.xlu0 %v205_v34, %s2675_s1 }
 0x189   :  { %v239_v36 = vpop.permute.xlu0 %238 }
 0x18a   :  { %v241_v37 = vmul.f32 %v2452_v35, %v239_v36 }
 0x18c   :  { %243 = vrot.lane.b32.xlu1 %v241_v37, %s2675_s1 }
 0x1fa   :  { %v208_v41 = vpop.permute.xlu0 %207 }
 0x1fb   :  { %v210_v42 = vadd.f32 %v208_v41, %v200_v39 }
 0x1fd   :  { %2453 = vtanh.f32 %v210_v42  ;;  %v272_v59 = vrot.slane %v210_v42, %v2786_v54 }
 0x1fe   :  { %v244_v44 = vpop.permute.xlu1 %243 }
 0x1ff   :  { %v246_v45 = vadd.f32 %v244_v44, %v236_v43 }
 0x201   :  { %2455 = vtanh.f32 %v246_v45  ;;  %v296_v61 = vrot.slane %v246_v45, %v2786_v54 }
 0x207   :  { %v2454_v46 = vpop.eup %2453 }
 0x208   :  { %213 = vrot.lane.b32.xlu0 %v2454_v46, %s2670_s22 }
 0x20b   :  { %v2456_v47 = vpop.eup %2455 }
 0x20c   :  { %249 = vrot.lane.b32.xlu1 %v2456_v47, %s2670_s22 }
 0x27a   :  { %v214_v53 = vpop.permute.xlu0 %213 }
 0x27b   :  { %v2788_v55 = vmul.f32 %v2450_v32, %v214_v53 }
 0x27d   :  { %v260_v56 = vrot.slane %v2788_v55, %v2786_v54 }
 0x27e   :  { %v250_v57 = vpop.permute.xlu1 %249 }
 0x27f   :  { %v2792_v58 = vmul.f32 %v2452_v35, %v250_v57  ;;  %261 = vrot.lane.b32.xlu0 %v260_v56, %s2675_s1 }
 0x281   :  { %v284_v60 = vrot.slane %v2792_v58, %v2786_v54 }
 0x283   :  { %285 = vrot.lane.b32.xlu1 %v284_v60, %s2675_s1  ;;  %273 = vrot.lane.b32.xlu0 %v272_v59, %s2677_s10 }
 0x287   :  { %297 = vrot.lane.b32.xlu1 %v296_v61, %s2677_s10 }
 0x2f1   :  { %v262_v62 = vpop.permute.xlu0 %261 }
 0x2f2   :  { %264 = vst.msk [vmem:[#allocation2] sm:$0x3] %vm53_vm0, %v262_v62 }
 0x2f5   :  { %v286_v63 = vpop.permute.xlu1 %285  ;;  %v274_v5 = vpop.permute.xlu0 %273 }
 0x2f6   :  { %288 = vst.msk [vmem:[#allocation4] sm:$0x3] %vm53_vm0, %v286_v63  ;;  %276 = vst.msk [vmem:[#allocation3] sm:$0x3] %vm53_vm0, %v274_v5 }
 0x2f9   :  { %v298_v6 = vpop.permute.xlu1 %297  ;;  %v345_v7 = vld [vmem:[#allocation2] sm:$0x3] }
 0x2fa   :  { %300 = vst.msk [vmem:[#allocation5] sm:$0x3] %vm53_vm0, %v298_v6  ;;  %v346_v8 = vpack.c.bf16 %v345_v7, %v345_v7 }
 0x2fc   :  { %2316 = vmatmul.mubr.msk.bf16.vlgmr.msra.gmra.mrb[4].mxu0 %vm73_vm2, %v346_v8 }
 0x2fd   :  { %v393_v9 = vld [vmem:[#allocation4] sm:$0x3]  ;;  %2328 = vmatpush3.bf16.msra.mxu0 %v2745_v1  ;;  %2331 = vmatprep.mubr.msk.bf16.mxu0 %vm2674_vm1, %v2673_v0  ;;  %v2208_v26 = vld.sshfl [vmem:[#allocation3] sm:$0x3 pattern:$0x76325410] }
 0x2fe   :  { %v394_v10 = vpack.c.bf16 %v393_v9, %v393_v9  ;;  %2329 = vmatprep.subr.bf16.mxu0 %v2673_v0 }
 0x300   :  { %2324 = vmatmul.mubr.msk.bf16.vlgmr.msra.gmra.mrb[4].mxu1 %vm73_vm2, %v394_v10 }
 0x301   :  { %2336 = vmatpush3.bf16.msra.mxu1 %v2747_v2  ;;  %2330 = vmatpush3.bf16.msra.mxu0 %v2750_v3  ;;  %v2210_v27 = vld.sshfl [vmem:[#allocation5] sm:$0x3 pattern:$0x76325410] }
 0x302   :  { %2337 = vmatprep.subr.bf16.mxu1 %v2673_v0  ;;  %2339 = vmatprep.mubr.msk.bf16.mxu1 %vm2674_vm1, %v2673_v0 }
 0x303   :  { %2343 = vmatprep.subr.bf16.mxu0 %v2673_v0 }
 0x305   :  { %2338 = vmatpush3.bf16.msra.mxu1 %v2754_v4 }
 0x306   :  { %2351 = vmatprep.subr.bf16.mxu1 %v2673_v0 }
 0x3cf   :  { %v384_v13 = vpop.f32.mrb[4].mxu0 }
 0x3d0   :  { %v390_v14 = vadd.f32 %v384_v13, %v344_v11  ;;  %v2317_v15 = vpop.f32.mrb[5].mxu0  ;;  %v605_v11 = vld [vmem:[#allocation6 + $0x8] sm:$0xf] }
 0x3d1   :  { %v387_v17 = vpop.f32.mrb[6].mxu0 }
 0x3d2   :  { %2457 = vtanh.f32 %v390_v14  ;;  %v2318_v18 = vpop.f32.mrb[7].mxu0  ;;  %v2207_v28 = vmul.f32 -1.442695, %v390_v14 }
 0x3d3   :  { %v432_v19 = vpop.f32.mrb[4].mxu1 }
 0x3d4   :  { %v441_v20 = vadd.f32 %v439_v16, %v432_v19  ;;  %v2325_v21 = vpop.f32.mrb[5].mxu1  ;;  %v700_v16 = vrot.slane %v653_v12, 2 }
 0x3d5   :  { %v435_v22 = vpop.f32.mrb[6].mxu1 }
 0x3d6   :  { %2459 = vtanh.f32 %v441_v20  ;;  %v2326_v23 = vpop.f32.mrb[7].mxu1  ;;  %v2209_v29 = vmul.f32 -1.442695, %v441_v20 }
 0x3d7   :  { %2461 = vpow2.f32 %v2207_v28 }
 0x3d8   :  { %2463 = vpow2.f32 %v2209_v29 }
 0x3dc   :  { %v2458_v24 = vpop.eup %2457 }
 0x3dd   :  { %463 = vrot.lane.b32.xlu0 %v2458_v24, %s2670_s22 }
 0x3e0   :  { %v2460_v25 = vpop.eup %2459 }
 0x3e1   :  { %499 = vrot.lane.b32.xlu1 %v2460_v25, %s2670_s22  ;;  %458 = vrot.lane.b32.xlu0 %v2208_v26, %s2675_s1  ;;  %v2462_v30 = vpop.eup %2461 }
 0x3e2   :  { %v446_v31 = vadd.f32 1.0, %v2462_v30  ;;  %v2464_v32 = vpop.eup %2463 }
 0x3e3   :  { %v482_v33 = vadd.f32 1.0, %v2464_v32 }
 0x3e4   :  { %2465 = vrcp.f32 %v446_v31 }
 0x3e5   :  { %494 = vrot.lane.b32.xlu1 %v2210_v27, %s2675_s1  ;;  %2467 = vrcp.f32 %v482_v33 }
 0x3ee   :  { %v2466_v34 = vpop.eup %2465 }
 0x3ef   :  { %v2468_v37 = vpop.eup %2467 }
 0x44f   :  { %v464_v35 = vpop.permute.xlu0 %463 }
 0x450   :  { %v466_v36 = vmul.f32 %v2466_v34, %v464_v35 }
 0x452   :  { %468 = vrot.lane.b32.xlu0 %v466_v36, %s2675_s1 }
 0x453   :  { %v500_v38 = vpop.permute.xlu1 %499  ;;  %v459_v40 = vpop.permute.xlu0 %458 }
 0x454   :  { %v502_v39 = vmul.f32 %v2468_v37, %v500_v38  ;;  %v461_v41 = vmul.f32 %v2466_v34, %v459_v40 }
 0x456   :  { %504 = vrot.lane.b32.xlu1 %v502_v39, %s2675_s1 }
 0x457   :  { %v495_v42 = vpop.permute.xlu1 %494 }
 0x458   :  { %v497_v45 = vmul.f32 %v2468_v37, %v495_v42 }
 0x4c4   :  { %v469_v43 = vpop.permute.xlu0 %468 }
 0x4c5   :  { %v471_v44 = vadd.f32 %v469_v43, %v461_v41 }
 0x4c7   :  { %2469 = vtanh.f32 %v471_v44  ;;  %v533_v59 = vrot.slane %v471_v44, %v2786_v54 }
 0x4c8   :  { %v505_v46 = vpop.permute.xlu1 %504 }
 0x4c9   :  { %v507_v47 = vadd.f32 %v505_v46, %v497_v45 }
 0x4cb   :  { %2471 = vtanh.f32 %v507_v47  ;;  %v557_v61 = vrot.slane %v507_v47, %v2786_v54 }
 0x4d1   :  { %v2470_v48 = vpop.eup %2469 }
 0x4d2   :  { %474 = vrot.lane.b32.xlu0 %v2470_v48, %s2670_s22 }
 0x4d5   :  { %v2472_v49 = vpop.eup %2471 }
 0x4d6   :  { %510 = vrot.lane.b32.xlu1 %v2472_v49, %s2670_s22 }
 0x544   :  { %v475_v50 = vpop.permute.xlu0 %474 }
 0x545   :  { %v2828_v51 = vmul.f32 %v2466_v34, %v475_v50 }
 0x547   :  { %v521_v53 = vrot.slane %v2828_v51, %v2786_v54 }
 0x548   :  { %v511_v56 = vpop.permute.xlu1 %510 }
 0x549   :  { %v2832_v57 = vmul.f32 %v2468_v37, %v511_v56  ;;  %522 = vrot.lane.b32.xlu0 %v521_v53, %s2675_s1 }
 0x54b   :  { %v545_v60 = vrot.slane %v2832_v57, %v2786_v54 }
 0x54d   :  { %546 = vrot.lane.b32.xlu1 %v545_v60, %s2675_s1  ;;  %534 = vrot.lane.b32.xlu0 %v533_v59, %s2677_s10 }
 0x551   :  { %558 = vrot.lane.b32.xlu1 %v557_v61, %s2677_s10 }
 0x5bb   :  { %v523_v62 = vpop.permute.xlu0 %522 }
 0x5bc   :  { %525 = vst.msk [vmem:[#allocation2] sm:$0x3] %vm53_vm0, %v523_v62 }
 0x5bf   :  { %v547_v63 = vpop.permute.xlu1 %546  ;;  %v535_v5 = vpop.permute.xlu0 %534 }
 0x5c0   :  { %549 = vst.msk [vmem:[#allocation4] sm:$0x3] %vm53_vm0, %v547_v63  ;;  %537 = vst.msk [vmem:[#allocation3] sm:$0x3] %vm53_vm0, %v535_v5 }
 0x5c3   :  { %v559_v6 = vpop.permute.xlu1 %558  ;;  %v606_v7 = vld [vmem:[#allocation2] sm:$0x3] }
 0x5c4   :  { %561 = vst.msk [vmem:[#allocation5] sm:$0x3] %vm53_vm0, %v559_v6  ;;  %v607_v8 = vpack.c.bf16 %v606_v7, %v606_v7 }
 0x5c6   :  { %2332 = vmatmul.mubr.msk.bf16.vlgmr.msra.gmra.mrb[8].mxu0 %vm73_vm2, %v607_v8 }
 0x5c7   :  { %v654_v9 = vld [vmem:[#allocation4] sm:$0x3]  ;;  %2344 = vmatpush3.bf16.msra.mxu0 %v2745_v1  ;;  %2347 = vmatprep.mubr.msk.bf16.mxu0 %vm2674_vm1, %v2673_v0  ;;  %v2214_v26 = vld.sshfl [vmem:[#allocation3] sm:$0x3 pattern:$0x76325410] }
 0x5c8   :  { %v655_v10 = vpack.c.bf16 %v654_v9, %v654_v9  ;;  %2345 = vmatprep.subr.bf16.mxu0 %v2673_v0 }
 0x5ca   :  { %2340 = vmatmul.mubr.msk.bf16.vlgmr.msra.gmra.mrb[8].mxu1 %vm73_vm2, %v655_v10 }
 0x5cb   :  { %2352 = vmatpush3.bf16.msra.mxu1 %v2747_v2  ;;  %2346 = vmatpush3.bf16.msra.mxu0 %v2750_v3  ;;  %v2216_v27 = vld.sshfl [vmem:[#allocation5] sm:$0x3 pattern:$0x76325410] }
 0x5cc   :  { %2353 = vmatprep.subr.bf16.mxu1 %v2673_v0  ;;  %2355 = vmatprep.mubr.msk.bf16.mxu1 %vm2674_vm1, %v2673_v0 }
 0x5cd   :  { %2359 = vmatprep.subr.bf16.mxu0 %v2673_v0 }
 0x5cf   :  { %2354 = vmatpush3.bf16.msra.mxu1 %v2754_v4 }
 0x5d0   :  { %2367 = vmatprep.subr.bf16.mxu1 %v2673_v0 }
 0x699   :  { %v645_v13 = vpop.f32.mrb[8].mxu0 }
 0x69a   :  { %v651_v14 = vadd.f32 %v645_v13, %v605_v11  ;;  %v2333_v15 = vpop.f32.mrb[9].mxu0  ;;  %v866_v13 = vld [vmem:[#allocation6 + $0xc] sm:$0xf] }
 0x69b   :  { %v648_v17 = vpop.f32.mrb[10].mxu0 }
 0x69c   :  { %2473 = vtanh.f32 %v651_v14  ;;  %v2334_v18 = vpop.f32.mrb[11].mxu0  ;;  %v2213_v28 = vmul.f32 -1.442695, %v651_v14  ;;  %v914_v14 = vld [vmem:[#allocation6 + $0x10] sm:$0xf] }
 0x69d   :  { %v693_v19 = vpop.f32.mrb[8].mxu1  ;;  %v961_v18 = vrot.slane %v914_v14, 2 }
 0x69e   :  { %v702_v20 = vadd.f32 %v700_v16, %v693_v19  ;;  %v2341_v21 = vpop.f32.mrb[9].mxu1 }
 0x69f   :  { %v696_v22 = vpop.f32.mrb[10].mxu1 }
 0x6a0   :  { %2475 = vtanh.f32 %v702_v20  ;;  %v2342_v23 = vpop.f32.mrb[11].mxu1  ;;  %v2215_v29 = vmul.f32 -1.442695, %v702_v20 }
 0x6a1   :  { %2477 = vpow2.f32 %v2213_v28 }
 0x6a2   :  { %2479 = vpow2.f32 %v2215_v29 }
 0x6a6   :  { %v2474_v24 = vpop.eup %2473 }
 0x6a7   :  { %724 = vrot.lane.b32.xlu0 %v2474_v24, %s2670_s22 }
 0x6aa   :  { %v2476_v25 = vpop.eup %2475 }
 0x6ab   :  { %760 = vrot.lane.b32.xlu1 %v2476_v25, %s2670_s22  ;;  %719 = vrot.lane.b32.xlu0 %v2214_v26, %s2675_s1  ;;  %v2478_v30 = vpop.eup %2477 }
 0x6ac   :  { %v707_v31 = vadd.f32 1.0, %v2478_v30  ;;  %v2480_v32 = vpop.eup %2479 }
 0x6ad   :  { %v743_v33 = vadd.f32 1.0, %v2480_v32 }
 0x6ae   :  { %2481 = vrcp.f32 %v707_v31 }
 0x6af   :  { %755 = vrot.lane.b32.xlu1 %v2216_v27, %s2675_s1  ;;  %2483 = vrcp.f32 %v743_v33 }
 0x6b8   :  { %v2482_v34 = vpop.eup %2481 }
 0x6b9   :  { %v2484_v37 = vpop.eup %2483 }
 0x719   :  { %v725_v35 = vpop.permute.xlu0 %724 }
 0x71a   :  { %v727_v36 = vmul.f32 %v2482_v34, %v725_v35 }
 0x71c   :  { %729 = vrot.lane.b32.xlu0 %v727_v36, %s2675_s1 }
 0x71d   :  { %v761_v38 = vpop.permute.xlu1 %760  ;;  %v720_v40 = vpop.permute.xlu0 %719 }
 0x71e   :  { %v763_v39 = vmul.f32 %v2484_v37, %v761_v38  ;;  %v722_v41 = vmul.f32 %v2482_v34, %v720_v40 }
 0x720   :  { %765 = vrot.lane.b32.xlu1 %v763_v39, %s2675_s1 }
 0x721   :  { %v756_v42 = vpop.permute.xlu1 %755 }
 0x722   :  { %v758_v45 = vmul.f32 %v2484_v37, %v756_v42 }
 0x78e   :  { %v730_v43 = vpop.permute.xlu0 %729 }
 0x78f   :  { %v732_v44 = vadd.f32 %v730_v43, %v722_v41 }
 0x791   :  { %2485 = vtanh.f32 %v732_v44  ;;  %v794_v61 = vrot.slane %v732_v44, %v2786_v54 }
 0x792   :  { %v766_v46 = vpop.permute.xlu1 %765 }
 0x793   :  { %v768_v47 = vadd.f32 %v766_v46, %v758_v45 }
 0x795   :  { %2487 = vtanh.f32 %v768_v47  ;;  %v818_v63 = vrot.slane %v768_v47, %v2786_v54 }
 0x79b   :  { %v2486_v48 = vpop.eup %2485 }
 0x79c   :  { %735 = vrot.lane.b32.xlu0 %v2486_v48, %s2670_s22 }
 0x79f   :  { %v2488_v49 = vpop.eup %2487 }
 0x7a0   :  { %771 = vrot.lane.b32.xlu1 %v2488_v49, %s2670_s22 }
 0x80e   :  { %v736_v50 = vpop.permute.xlu0 %735 }
 0x80f   :  { %v2868_v53 = vmul.f32 %v2482_v34, %v736_v50 }
 0x811   :  { %v782_v56 = vrot.slane %v2868_v53, %v2786_v54 }
 0x812   :  { %v772_v59 = vpop.permute.xlu1 %771 }
 0x813   :  { %v2872_v60 = vmul.f32 %v2484_v37, %v772_v59  ;;  %783 = vrot.lane.b32.xlu0 %v782_v56, %s2675_s1 }
 0x815   :  { %v806_v62 = vrot.slane %v2872_v60, %v2786_v54 }
 0x817   :  { %807 = vrot.lane.b32.xlu1 %v806_v62, %s2675_s1  ;;  %795 = vrot.lane.b32.xlu0 %v794_v61, %s2677_s10 }
 0x81b   :  { %819 = vrot.lane.b32.xlu1 %v818_v63, %s2677_s10 }
 0x885   :  { %v784_v5 = vpop.permute.xlu0 %783 }
 0x886   :  { %786 = vst.msk [vmem:[#allocation2] sm:$0x3] %vm53_vm0, %v784_v5 }
 0x889   :  { %v808_v6 = vpop.permute.xlu1 %807  ;;  %v796_v7 = vpop.permute.xlu0 %795 }
 0x88a   :  { %810 = vst.msk [vmem:[#allocation4] sm:$0x3] %vm53_vm0, %v808_v6  ;;  %798 = vst.msk [vmem:[#allocation3] sm:$0x3] %vm53_vm0, %v796_v7 }
 0x88d   :  { %v820_v8 = vpop.permute.xlu1 %819  ;;  %v867_v9 = vld [vmem:[#allocation2] sm:$0x3] }
 0x88e   :  { %822 = vst.msk [vmem:[#allocation5] sm:$0x3] %vm53_vm0, %v820_v8  ;;  %v868_v10 = vpack.c.bf16 %v867_v9, %v867_v9 }
 0x890   :  { %2348 = vmatmul.mubr.msk.bf16.vlgmr.msra.gmra.mrb[12].mxu0 %vm73_vm2, %v868_v10 }
 0x891   :  { %v915_v11 = vld [vmem:[#allocation4] sm:$0x3]  ;;  %2360 = vmatpush3.bf16.msra.mxu0 %v2745_v1  ;;  %2363 = vmatprep.mubr.msk.bf16.mxu0 %vm2674_vm1, %v2673_v0  ;;  %v2220_v28 = vld.sshfl [vmem:[#allocation3] sm:$0x3 pattern:$0x76325410] }
 0x892   :  { %v916_v12 = vpack.c.bf16 %v915_v11, %v915_v11  ;;  %2361 = vmatprep.subr.bf16.mxu0 %v2673_v0 }
 0x894   :  { %2356 = vmatmul.mubr.msk.bf16.vlgmr.msra.gmra.mrb[12].mxu1 %vm73_vm2, %v916_v12 }
 0x895   :  { %2368 = vmatpush3.bf16.msra.mxu1 %v2747_v2  ;;  %2362 = vmatpush3.bf16.msra.mxu0 %v2750_v3  ;;  %v2222_v29 = vld.sshfl [vmem:[#allocation5] sm:$0x3 pattern:$0x76325410] }
 0x896   :  { %2369 = vmatprep.subr.bf16.mxu1 %v2673_v0  ;;  %2371 = vmatprep.mubr.msk.bf16.mxu1 %vm2674_vm1, %v2673_v0 }
 0x897   :  { %2375 = vmatprep.subr.bf16.mxu0 %v2673_v0 }
 0x899   :  { %2370 = vmatpush3.bf16.msra.mxu1 %v2754_v4 }
 0x89a   :  { %2383 = vmatprep.subr.bf16.mxu1 %v2673_v0 }
 0x963   :  { %v906_v15 = vpop.f32.mrb[12].mxu0 }
 0x964   :  { %v912_v16 = vadd.f32 %v906_v15, %v866_v13  ;;  %v2349_v17 = vpop.f32.mrb[13].mxu0 }
 0x965   :  { %v909_v19 = vpop.f32.mrb[14].mxu0  ;;  %v1126_v17 = vld [vmem:[#allocation6 + $0x10] sm:$0xf] }
 0x966   :  { %2489 = vtanh.f32 %v912_v16  ;;  %v2350_v20 = vpop.f32.mrb[15].mxu0  ;;  %v2219_v30 = vmul.f32 -1.442695, %v912_v16 }
 0x967   :  { %v954_v21 = vpop.f32.mrb[12].mxu1 }
 0x968   :  { %v963_v22 = vadd.f32 %v961_v18, %v954_v21  ;;  %v2357_v23 = vpop.f32.mrb[13].mxu1  ;;  %v1173_v18 = vld [vmem:[#allocation6 + $0xc] sm:$0xf] }
 0x969   :  { %v957_v24 = vpop.f32.mrb[14].mxu1 }
 0x96a   :  { %2491 = vtanh.f32 %v963_v22  ;;  %v2358_v25 = vpop.f32.mrb[15].mxu1  ;;  %v2221_v31 = vmul.f32 -1.442695, %v963_v22  ;;  %v1220_v22 = vrot.slane %v1173_v18, 2 }
 0x96b   :  { %2493 = vpow2.f32 %v2219_v30 }
 0x96c   :  { %2495 = vpow2.f32 %v2221_v31 }
 0x970   :  { %v2490_v26 = vpop.eup %2489 }
 0x971   :  { %985 = vrot.lane.b32.xlu0 %v2490_v26, %s2670_s22 }
 0x974   :  { %v2492_v27 = vpop.eup %2491 }
 0x975   :  { %1021 = vrot.lane.b32.xlu1 %v2492_v27, %s2670_s22  ;;  %980 = vrot.lane.b32.xlu0 %v2220_v28, %s2675_s1  ;;  %v2494_v32 = vpop.eup %2493 }
 0x976   :  { %v968_v33 = vadd.f32 1.0, %v2494_v32  ;;  %v2496_v34 = vpop.eup %2495 }
 0x977   :  { %v1004_v35 = vadd.f32 1.0, %v2496_v34 }
 0x978   :  { %2497 = vrcp.f32 %v968_v33 }
 0x979   :  { %1016 = vrot.lane.b32.xlu1 %v2222_v29, %s2675_s1  ;;  %2499 = vrcp.f32 %v1004_v35 }
 0x982   :  { %v2498_v36 = vpop.eup %2497 }
 0x983   :  { %v2500_v39 = vpop.eup %2499 }
 0x9e3   :  { %v986_v37 = vpop.permute.xlu0 %985 }
 0x9e4   :  { %v988_v38 = vmul.f32 %v2498_v36, %v986_v37 }
 0x9e6   :  { %990 = vrot.lane.b32.xlu0 %v988_v38, %s2675_s1 }
 0x9e7   :  { %v1022_v40 = vpop.permute.xlu1 %1021  ;;  %v981_v42 = vpop.permute.xlu0 %980 }
 0x9e8   :  { %v1024_v41 = vmul.f32 %v2500_v39, %v1022_v40  ;;  %v983_v43 = vmul.f32 %v2498_v36, %v981_v42 }
 0x9ea   :  { %1026 = vrot.lane.b32.xlu1 %v1024_v41, %s2675_s1 }
 0x9eb   :  { %v1017_v44 = vpop.permute.xlu1 %1016 }
 0x9ec   :  { %v1019_v47 = vmul.f32 %v2500_v39, %v1017_v44 }
 0xa58   :  { %v991_v45 = vpop.permute.xlu0 %990 }
 0xa59   :  { %v993_v46 = vadd.f32 %v991_v45, %v983_v43 }
 0xa5b   :  { %2501 = vtanh.f32 %v993_v46  ;;  %v1055_v6 = vrot.slane %v993_v46, %v2786_v54 }
 0xa5c   :  { %v1027_v48 = vpop.permute.xlu1 %1026 }
 0xa5d   :  { %v1029_v49 = vadd.f32 %v1027_v48, %v1019_v47 }
 0xa5f   :  { %2503 = vtanh.f32 %v1029_v49  ;;  %v1079_v8 = vrot.slane %v1029_v49, %v2786_v54 }
 0xa65   :  { %v2502_v50 = vpop.eup %2501 }
 0xa66   :  { %996 = vrot.lane.b32.xlu0 %v2502_v50, %s2670_s22 }
 0xa69   :  { %v2504_v56 = vpop.eup %2503 }
 0xa6a   :  { %1032 = vrot.lane.b32.xlu1 %v2504_v56, %s2670_s22 }
 0xad8   :  { %v997_v59 = vpop.permute.xlu0 %996 }
 0xad9   :  { %v2908_v61 = vmul.f32 %v2498_v36, %v997_v59 }
 0xadb   :  { %v1043_v62 = vrot.slane %v2908_v61, %v2786_v54 }
 0xadc   :  { %v1033_v63 = vpop.permute.xlu1 %1032 }
 0xadd   :  { %v2912_v5 = vmul.f32 %v2500_v39, %v1033_v63  ;;  %1044 = vrot.lane.b32.xlu0 %v1043_v62, %s2675_s1 }
 0xadf   :  { %v1067_v7 = vrot.slane %v2912_v5, %v2786_v54 }
 0xae1   :  { %1068 = vrot.lane.b32.xlu1 %v1067_v7, %s2675_s1  ;;  %1056 = vrot.lane.b32.xlu0 %v1055_v6, %s2677_s10 }
 0xae5   :  { %1080 = vrot.lane.b32.xlu1 %v1079_v8, %s2677_s10 }
 0xb4f   :  { %v1045_v9 = vpop.permute.xlu0 %1044 }
 0xb50   :  { %1047 = vst.msk [vmem:[#allocation2] sm:$0x3] %vm53_vm0, %v1045_v9 }
 0xb53   :  { %v1069_v10 = vpop.permute.xlu1 %1068  ;;  %v1057_v11 = vpop.permute.xlu0 %1056 }
 0xb54   :  { %1071 = vst.msk [vmem:[#allocation4] sm:$0x3] %vm53_vm0, %v1069_v10  ;;  %1059 = vst.msk [vmem:[#allocation3] sm:$0x3] %vm53_vm0, %v1057_v11 }
 0xb57   :  { %v1081_v12 = vpop.permute.xlu1 %1080  ;;  %v1127_v13 = vld [vmem:[#allocation2] sm:$0x3] }
 0xb58   :  { %1083 = vst.msk [vmem:[#allocation5] sm:$0x3] %vm53_vm0, %v1081_v12  ;;  %v1128_v14 = vpack.c.bf16 %v1127_v13, %v1127_v13 }
 0xb5a   :  { %2364 = vmatmul.mubr.msk.bf16.vlgmr.msra.gmra.mrb[16].mxu0 %vm73_vm2, %v1128_v14 }
 0xb5b   :  { %v1174_v15 = vld [vmem:[#allocation4] sm:$0x3]  ;;  %2376 = vmatpush3.bf16.msra.mxu0 %v2745_v1  ;;  %2379 = vmatprep.mubr.msk.bf16.mxu0 %vm2674_vm1, %v2673_v0  ;;  %v2226_v32 = vld.sshfl [vmem:[#allocation3] sm:$0x3 pattern:$0x76325410] }
 0xb5c   :  { %v1175_v16 = vpack.c.bf16 %v1174_v15, %v1174_v15  ;;  %2377 = vmatprep.subr.bf16.mxu0 %v2673_v0 }
 0xb5e   :  { %2372 = vmatmul.mubr.msk.bf16.vlgmr.msra.gmra.mrb[16].mxu1 %vm73_vm2, %v1175_v16 }
 0xb5f   :  { %2384 = vmatpush3.bf16.msra.mxu1 %v2747_v2  ;;  %2378 = vmatpush3.bf16.msra.mxu0 %v2750_v3  ;;  %v2228_v33 = vld.sshfl [vmem:[#allocation5] sm:$0x3 pattern:$0x76325410] }
 0xb60   :  { %2385 = vmatprep.subr.bf16.mxu1 %v2673_v0  ;;  %2387 = vmatprep.mubr.msk.bf16.mxu1 %vm2674_vm1, %v2673_v0 }
 0xb61   :  { %2391 = vmatprep.subr.bf16.mxu0 %v2673_v0 }
 0xb63   :  { %2386 = vmatpush3.bf16.msra.mxu1 %v2754_v4 }
 0xb64   :  { %2399 = vmatprep.subr.bf16.mxu1 %v2673_v0 }
 0xc2d   :  { %v1166_v19 = vpop.f32.mrb[16].mxu0 }
 0xc2e   :  { %v1172_v20 = vadd.f32 %v1166_v19, %v1126_v17  ;;  %v2365_v21 = vpop.f32.mrb[17].mxu0 }
 0xc2f   :  { %v1169_v23 = vpop.f32.mrb[18].mxu0 }
 0xc30   :  { %2505 = vtanh.f32 %v1172_v20  ;;  %v2366_v24 = vpop.f32.mrb[19].mxu0  ;;  %v2225_v34 = vmul.f32 -1.442695, %v1172_v20  ;;  %v1432_v23 = vld [vmem:[#allocation6 + $0x8] sm:$0xf] }
 0xc31   :  { %v1213_v25 = vpop.f32.mrb[16].mxu1 }
 0xc32   :  { %v1222_v26 = vadd.f32 %v1220_v22, %v1213_v25  ;;  %v2373_v27 = vpop.f32.mrb[17].mxu1 }
 0xc33   :  { %v1216_v28 = vpop.f32.mrb[18].mxu1  ;;  %v1479_v27 = vrot.slane %v1432_v23, 2 }
 0xc34   :  { %2507 = vtanh.f32 %v1222_v26  ;;  %v2374_v29 = vpop.f32.mrb[19].mxu1  ;;  %v2227_v35 = vmul.f32 -1.442695, %v1222_v26 }
 0xc35   :  { %2509 = vpow2.f32 %v2225_v34 }
 0xc36   :  { %2511 = vpow2.f32 %v2227_v35 }
 0xc3a   :  { %v2506_v30 = vpop.eup %2505 }
 0xc3b   :  { %1244 = vrot.lane.b32.xlu0 %v2506_v30, %s2670_s22 }
 0xc3e   :  { %v2508_v31 = vpop.eup %2507 }
 0xc3f   :  { %1280 = vrot.lane.b32.xlu1 %v2508_v31, %s2670_s22  ;;  %1239 = vrot.lane.b32.xlu0 %v2226_v32, %s2675_s1  ;;  %v2510_v36 = vpop.eup %2509 }
 0xc40   :  { %v1227_v37 = vadd.f32 1.0, %v2510_v36  ;;  %v2512_v38 = vpop.eup %2511 }
 0xc41   :  { %v1263_v39 = vadd.f32 1.0, %v2512_v38 }
 0xc42   :  { %2513 = vrcp.f32 %v1227_v37 }
 0xc43   :  { %1275 = vrot.lane.b32.xlu1 %v2228_v33, %s2675_s1  ;;  %2515 = vrcp.f32 %v1263_v39 }
 0xc4c   :  { %v2514_v40 = vpop.eup %2513 }
 0xc4d   :  { %v2516_v43 = vpop.eup %2515 }
 0xcad   :  { %v1245_v41 = vpop.permute.xlu0 %1244 }
 0xcae   :  { %v1247_v42 = vmul.f32 %v2514_v40, %v1245_v41 }
 0xcb0   :  { %1249 = vrot.lane.b32.xlu0 %v1247_v42, %s2675_s1 }
 0xcb1   :  { %v1281_v44 = vpop.permute.xlu1 %1280  ;;  %v1240_v46 = vpop.permute.xlu0 %1239 }
 0xcb2   :  { %v1283_v45 = vmul.f32 %v2516_v43, %v1281_v44  ;;  %v1242_v47 = vmul.f32 %v2514_v40, %v1240_v46 }
 0xcb4   :  { %1285 = vrot.lane.b32.xlu1 %v1283_v45, %s2675_s1 }
 0xcb5   :  { %v1276_v48 = vpop.permute.xlu1 %1275 }
 0xcb6   :  { %v1278_v56 = vmul.f32 %v2516_v43, %v1276_v48 }
 0xd22   :  { %v1250_v49 = vpop.permute.xlu0 %1249 }
 0xd23   :  { %v1252_v50 = vadd.f32 %v1250_v49, %v1242_v47 }
 0xd25   :  { %2517 = vtanh.f32 %v1252_v50  ;;  %v1314_v12 = vrot.slane %v1252_v50, %v2786_v54 }
 0xd26   :  { %v1286_v59 = vpop.permute.xlu1 %1285 }
 0xd27   :  { %v1288_v62 = vadd.f32 %v1286_v59, %v1278_v56 }
 0xd29   :  { %2519 = vtanh.f32 %v1288_v62  ;;  %v1338_v14 = vrot.slane %v1288_v62, %v2786_v54 }
 0xd2f   :  { %v2518_v63 = vpop.eup %2517 }
 0xd30   :  { %1255 = vrot.lane.b32.xlu0 %v2518_v63, %s2670_s22 }
 0xd33   :  { %v2520_v6 = vpop.eup %2519 }
 0xd34   :  { %1291 = vrot.lane.b32.xlu1 %v2520_v6, %s2670_s22 }
 0xda2   :  { %v1256_v7 = vpop.permute.xlu0 %1255 }
 0xda3   :  { %v2948_v8 = vmul.f32 %v2514_v40, %v1256_v7 }
 0xda5   :  { %v1302_v9 = vrot.slane %v2948_v8, %v2786_v54 }
 0xda6   :  { %v1292_v10 = vpop.permute.xlu1 %1291 }
 0xda7   :  { %v2952_v11 = vmul.f32 %v2516_v43, %v1292_v10  ;;  %1303 = vrot.lane.b32.xlu0 %v1302_v9, %s2675_s1 }
 0xda9   :  { %v1326_v13 = vrot.slane %v2952_v11, %v2786_v54 }
 0xdab   :  { %1327 = vrot.lane.b32.xlu1 %v1326_v13, %s2675_s1  ;;  %1315 = vrot.lane.b32.xlu0 %v1314_v12, %s2677_s10 }
 0xdaf   :  { %1339 = vrot.lane.b32.xlu1 %v1338_v14, %s2677_s10 }
 0xe19   :  { %v1304_v15 = vpop.permute.xlu0 %1303 }
 0xe1a   :  { %1306 = vst.msk [vmem:[#allocation2] sm:$0x3] %vm53_vm0, %v1304_v15 }
 0xe1d   :  { %v1328_v16 = vpop.permute.xlu1 %1327  ;;  %v1316_v17 = vpop.permute.xlu0 %1315 }
 0xe1e   :  { %1330 = vst.msk [vmem:[#allocation4] sm:$0x3] %vm53_vm0, %v1328_v16  ;;  %1318 = vst.msk [vmem:[#allocation3] sm:$0x3] %vm53_vm0, %v1316_v17 }
 0xe21   :  { %v1340_v18 = vpop.permute.xlu1 %1339  ;;  %v1386_v19 = vld [vmem:[#allocation2] sm:$0x3] }
 0xe22   :  { %1342 = vst.msk [vmem:[#allocation5] sm:$0x3] %vm53_vm0, %v1340_v18  ;;  %v1387_v20 = vpack.c.bf16 %v1386_v19, %v1386_v19 }
 0xe24   :  { %2380 = vmatmul.mubr.msk.bf16.vlgmr.msra.gmra.mrb[20].mxu0 %vm73_vm2, %v1387_v20 }
 0xe25   :  { %v1433_v21 = vld [vmem:[#allocation4] sm:$0x3]  ;;  %2392 = vmatpush3.bf16.msra.mxu0 %v2745_v1  ;;  %2395 = vmatprep.mubr.msk.bf16.mxu0 %vm2674_vm1, %v2673_v0  ;;  %v1385_v1 = vld [vmem:[#allocation6 + $0x14] sm:$0xf] }
 0xe26   :  { %v1434_v22 = vpack.c.bf16 %v1433_v21, %v1433_v21  ;;  %2393 = vmatprep.subr.bf16.mxu0 %v2673_v0  ;;  %v2232_v34 = vld.sshfl [vmem:[#allocation3] sm:$0x3 pattern:$0x76325410] }
 0xe28   :  { %2388 = vmatmul.mubr.msk.bf16.vlgmr.msra.gmra.mrb[20].mxu1 %vm73_vm2, %v1434_v22 }
 0xe29   :  { %2400 = vmatpush3.bf16.msra.mxu1 %v2747_v2  ;;  %2394 = vmatpush3.bf16.msra.mxu0 %v2750_v3  ;;  %v2234_v35 = vld.sshfl [vmem:[#allocation5] sm:$0x3 pattern:$0x76325410] }
 0xe2a   :  { %2401 = vmatprep.subr.bf16.mxu1 %v2673_v0  ;;  %2403 = vmatprep.mubr.msk.bf16.mxu1 %vm2674_vm1, %v2673_v0 }
 0xe2b   :  { %2407 = vmatprep.subr.bf16.mxu0 %v2673_v0 }
 0xe2d   :  { %2402 = vmatpush3.bf16.msra.mxu1 %v2754_v4 }
 0xe2e   :  { %2415 = vmatprep.subr.bf16.mxu1 %v2673_v0 }
 0xef7   :  { %v1425_v24 = vpop.f32.mrb[20].mxu0 }
 0xef8   :  { %v1431_v25 = vadd.f32 %v1425_v24, %v1385_v1  ;;  %v2381_v26 = vpop.f32.mrb[21].mxu0 }
 0xef9   :  { %v1428_v2 = vpop.f32.mrb[22].mxu0 }
 0xefa   :  { %2521 = vtanh.f32 %v1431_v25  ;;  %v2382_v3 = vpop.f32.mrb[23].mxu0  ;;  %v2231_v36 = vmul.f32 -1.442695, %v1431_v25  ;;  %v2569_v25 = vld [vmem:[#allocation9] sm:$0xff]   ;;  %v2571_v2 = vld [vmem:[#allocation9 + $0x8] sm:$0xff]  }
 0xefb   :  { %v1472_v28 = vpop.f32.mrb[20].mxu1  ;;  %v2572_v3 = vld [vmem:[#allocation9 + $0x18] sm:$0xff]  }
 0xefc   :  { %v1481_v29 = vadd.f32 %v1479_v27, %v1472_v28  ;;  %v2389_v30 = vpop.f32.mrb[21].mxu1  ;;  %v2570_v27 = vld [vmem:[#allocation9 + $0x10] sm:$0xff]   ;;  %v1644_v28 = vld [vmem:[#allocation6 + $0x18] sm:$0xf] }
 0xefd   :  { %v1475_v31 = vpop.f32.mrb[22].mxu1 }
 0xefe   :  { %2523 = vtanh.f32 %v1481_v29  ;;  %v2390_v32 = vpop.f32.mrb[23].mxu1  ;;  %v2233_v37 = vmul.f32 -1.442695, %v1481_v29  ;;  %v1691_v29 = vld [vmem:[#allocation6 + $0x4] sm:$0xf] }
 0xeff   :  { %2525 = vpow2.f32 %v2231_v36 }
 0xf00   :  { %2527 = vpow2.f32 %v2233_v37 }
 0xf04   :  { %v2522_v33 = vpop.eup %2521 }
 0xf05   :  { %1503 = vrot.lane.b32.xlu0 %v2522_v33, %s2670_s22  ;;  %v1738_v33 = vrot.slane %v1691_v29, 2 }
 0xf08   :  { %v2524_v4 = vpop.eup %2523 }
 0xf09   :  { %1539 = vrot.lane.b32.xlu1 %v2524_v4, %s2670_s22  ;;  %1498 = vrot.lane.b32.xlu0 %v2232_v34, %s2675_s1  ;;  %v2526_v38 = vpop.eup %2525 }
 0xf0a   :  { %v1486_v39 = vadd.f32 1.0, %v2526_v38  ;;  %v2528_v40 = vpop.eup %2527 }
 0xf0b   :  { %v1522_v41 = vadd.f32 1.0, %v2528_v40 }
 0xf0c   :  { %2529 = vrcp.f32 %v1486_v39 }
 0xf0d   :  { %1534 = vrot.lane.b32.xlu1 %v2234_v35, %s2675_s1  ;;  %2531 = vrcp.f32 %v1522_v41 }
 0xf16   :  { %v2530_v42 = vpop.eup %2529 }
 0xf17   :  { %v2532_v45 = vpop.eup %2531 }
 0xf77   :  { %v1504_v43 = vpop.permute.xlu0 %1503 }
 0xf78   :  { %v1506_v44 = vmul.f32 %v2530_v42, %v1504_v43 }
 0xf7a   :  { %1508 = vrot.lane.b32.xlu0 %v1506_v44, %s2675_s1 }
 0xf7b   :  { %v1540_v46 = vpop.permute.xlu1 %1539  ;;  %v1499_v48 = vpop.permute.xlu0 %1498 }
 0xf7c   :  { %v1542_v47 = vmul.f32 %v2532_v45, %v1540_v46  ;;  %v1501_v49 = vmul.f32 %v2530_v42, %v1499_v48 }
 0xf7e   :  { %1544 = vrot.lane.b32.xlu1 %v1542_v47, %s2675_s1 }
 0xf7f   :  { %v1535_v50 = vpop.permute.xlu1 %1534 }
 0xf80   :  { %v1537_v62 = vmul.f32 %v2532_v45, %v1535_v50 }
 0xfec   :  { %v1509_v56 = vpop.permute.xlu0 %1508 }
 0xfed   :  { %v1511_v59 = vadd.f32 %v1509_v56, %v1501_v49 }
 0xfef   :  { %2533 = vtanh.f32 %v1511_v59  ;;  %v1573_v16 = vrot.slane %v1511_v59, %v2786_v54 }
 0xff0   :  { %v1545_v63 = vpop.permute.xlu1 %1544 }
 0xff1   :  { %v1547_v6 = vadd.f32 %v1545_v63, %v1537_v62 }
 0xff3   :  { %2535 = vtanh.f32 %v1547_v6  ;;  %v1597_v18 = vrot.slane %v1547_v6, %v2786_v54 }
 0xff9   :  { %v2534_v7 = vpop.eup %2533 }
 0xffa   :  { %1514 = vrot.lane.b32.xlu0 %v2534_v7, %s2670_s22 }
 0xffd   :  { %v2536_v9 = vpop.eup %2535 }
 0xffe   :  { %1550 = vrot.lane.b32.xlu1 %v2536_v9, %s2670_s22 }
0x106c   :  { %v1515_v10 = vpop.permute.xlu0 %1514 }
0x106d   :  { %v2988_v12 = vmul.f32 %v2530_v42, %v1515_v10 }
0x106f   :  { %v1561_v13 = vrot.slane %v2988_v12, %v2786_v54 }
0x1070   :  { %v1551_v14 = vpop.permute.xlu1 %1550 }
0x1071   :  { %v2992_v15 = vmul.f32 %v2532_v45, %v1551_v14  ;;  %1562 = vrot.lane.b32.xlu0 %v1561_v13, %s2675_s1 }
0x1073   :  { %v1585_v17 = vrot.slane %v2992_v15, %v2786_v54 }
0x1075   :  { %1586 = vrot.lane.b32.xlu1 %v1585_v17, %s2675_s1  ;;  %1574 = vrot.lane.b32.xlu0 %v1573_v16, %s2677_s10 }
0x1079   :  { %1598 = vrot.lane.b32.xlu1 %v1597_v18, %s2677_s10 }
0x10e3   :  { %v1563_v19 = vpop.permute.xlu0 %1562 }
0x10e4   :  { %1565 = vst.msk [vmem:[#allocation2] sm:$0x3] %vm53_vm0, %v1563_v19 }
0x10e7   :  { %v1587_v20 = vpop.permute.xlu1 %1586  ;;  %v1575_v21 = vpop.permute.xlu0 %1574 }
0x10e8   :  { %1589 = vst.msk [vmem:[#allocation4] sm:$0x3] %vm53_vm0, %v1587_v20  ;;  %1577 = vst.msk [vmem:[#allocation3] sm:$0x3] %vm53_vm0, %v1575_v21 }
0x10eb   :  { %v1599_v22 = vpop.permute.xlu1 %1598  ;;  %v1645_v1 = vld [vmem:[#allocation2] sm:$0x3] }
0x10ec   :  { %1601 = vst.msk [vmem:[#allocation5] sm:$0x3] %vm53_vm0, %v1599_v22  ;;  %v1646_v23 = vpack.c.bf16 %v1645_v1, %v1645_v1 }
0x10ee   :  { %2396 = vmatmul.mubr.msk.bf16.vlgmr.msra.gmra.mrb[24].mxu0 %vm73_vm2, %v1646_v23 }
0x10ef   :  { %v1692_v24 = vld [vmem:[#allocation4] sm:$0x3]  ;;  %2408 = vmatpush3.bf16.msra.mxu0 %v2569_v25  ;;  %2411 = vmatprep.mubr.msk.bf16.mxu0 %vm2674_vm1, %v2673_v0  ;;  %v2238_v41 = vld.sshfl [vmem:[#allocation3] sm:$0x3 pattern:$0x76325410] }
0x10f0   :  { %v1693_v26 = vpack.c.bf16 %v1692_v24, %v1692_v24  ;;  %2409 = vmatprep.subr.bf16.mxu0 %v2673_v0 }
0x10f2   :  { %2404 = vmatmul.mubr.msk.bf16.vlgmr.msra.gmra.mrb[24].mxu1 %vm73_vm2, %v1693_v26 }
0x10f3   :  { %2416 = vmatpush3.bf16.msra.mxu1 %v2570_v27  ;;  %2410 = vmatpush3.bf16.msra.mxu0 %v2571_v2  ;;  %v2240_v42 = vld.sshfl [vmem:[#allocation5] sm:$0x3 pattern:$0x76325410] }
0x10f4   :  { %2417 = vmatprep.subr.bf16.mxu1 %v2673_v0  ;;  %2419 = vmatprep.mubr.msk.bf16.mxu1 %vm2674_vm1, %v2673_v0 }
0x10f7   :  { %2418 = vmatpush3.bf16.msra.mxu1 %v2572_v3 }
0x11c1   :  { %v1684_v30 = vpop.f32.mrb[24].mxu0 }
0x11c2   :  { %v1690_v31 = vadd.f32 %v1684_v30, %v1644_v28  ;;  %v2397_v32 = vpop.f32.mrb[25].mxu0 }
0x11c3   :  { %v1687_v4 = vpop.f32.mrb[26].mxu0 }
0x11c4   :  { %2537 = vtanh.f32 %v1690_v31  ;;  %v2398_v34 = vpop.f32.mrb[27].mxu0  ;;  %v2237_v43 = vmul.f32 -1.442695, %v1690_v31  ;;  %v1950_v4 = vld [vmem:[#allocation6] sm:$0xf] }
0x11c5   :  { %v1731_v35 = vpop.f32.mrb[24].mxu1 }
0x11c6   :  { %v1740_v36 = vadd.f32 %v1738_v33, %v1731_v35  ;;  %v2405_v37 = vpop.f32.mrb[25].mxu1  ;;  %v1903_v33 = vld [vmem:[#allocation6 + $0x1c] sm:$0xf] }
0x11c7   :  { %v1734_v38 = vpop.f32.mrb[26].mxu1  ;;  %v1997_v37 = vrot.slane %v1950_v4, 2 }
0x11c8   :  { %2539 = vtanh.f32 %v1740_v36  ;;  %v2406_v39 = vpop.f32.mrb[27].mxu1  ;;  %v2239_v44 = vmul.f32 -1.442695, %v1740_v36 }
0x11c9   :  { %2541 = vpow2.f32 %v2237_v43 }
0x11ca   :  { %2543 = vpow2.f32 %v2239_v44 }
0x11ce   :  { %v2538_v40 = vpop.eup %2537 }
0x11cf   :  { %1762 = vrot.lane.b32.xlu0 %v2538_v40, %s2670_s22 }
0x11d2   :  { %v2540_v0 = vpop.eup %2539 }
0x11d3   :  { %1798 = vrot.lane.b32.xlu1 %v2540_v0, %s2670_s22  ;;  %1757 = vrot.lane.b32.xlu0 %v2238_v41, %s2675_s1  ;;  %v2542_v45 = vpop.eup %2541 }
0x11d4   :  { %v1745_v46 = vadd.f32 1.0, %v2542_v45  ;;  %v2544_v47 = vpop.eup %2543 }
0x11d5   :  { %v1781_v48 = vadd.f32 1.0, %v2544_v47 }
0x11d6   :  { %2545 = vrcp.f32 %v1745_v46 }
0x11d7   :  { %1793 = vrot.lane.b32.xlu1 %v2240_v42, %s2675_s1  ;;  %2547 = vrcp.f32 %v1781_v48 }
0x11e0   :  { %v2546_v49 = vpop.eup %2545 }
0x11e1   :  { %v2548_v59 = vpop.eup %2547 }
0x1241   :  { %v1763_v50 = vpop.permute.xlu0 %1762 }
0x1242   :  { %v1765_v56 = vmul.f32 %v2546_v49, %v1763_v50 }
0x1244   :  { %1767 = vrot.lane.b32.xlu0 %v1765_v56, %s2675_s1 }
0x1245   :  { %v1799_v62 = vpop.permute.xlu1 %1798  ;;  %v1758_v6 = vpop.permute.xlu0 %1757 }
0x1246   :  { %v1801_v63 = vmul.f32 %v2548_v59, %v1799_v62  ;;  %v1760_v7 = vmul.f32 %v2546_v49, %v1758_v6 }
0x1248   :  { %1803 = vrot.lane.b32.xlu1 %v1801_v63, %s2675_s1 }
0x1249   :  { %v1794_v9 = vpop.permute.xlu1 %1793 }
0x124a   :  { %v1796_v14 = vmul.f32 %v2548_v59, %v1794_v9 }
0x12b6   :  { %v1768_v10 = vpop.permute.xlu0 %1767 }
0x12b7   :  { %v1770_v13 = vadd.f32 %v1768_v10, %v1760_v7 }
0x12b9   :  { %2549 = vtanh.f32 %v1770_v13  ;;  %v1832_v24 = vrot.slane %v1770_v13, %v2786_v54 }
0x12ba   :  { %v1804_v16 = vpop.permute.xlu1 %1803 }
0x12bb   :  { %v1806_v17 = vadd.f32 %v1804_v16, %v1796_v14 }
0x12bd   :  { %2551 = vtanh.f32 %v1806_v17  ;;  %v1856_v26 = vrot.slane %v1806_v17, %v2786_v54  ;;  %v2678_v17 = vmov 1966171168  }
0x12c3   :  { %v2550_v18 = vpop.eup %2549 }
0x12c4   :  { %1773 = vrot.lane.b32.xlu0 %v2550_v18, %s2670_s22  ;;  %v304_v18 = vunpack.c.l.s4 %v2678_v17 }
0x12c7   :  { %v2552_v19 = vpop.eup %2551 }
0x12c8   :  { %1809 = vrot.lane.b32.xlu1 %v2552_v19, %s2670_s22 }
0x1336   :  { %v1774_v20 = vpop.permute.xlu0 %1773 }
0x1337   :  { %v3022_v21 = vmul.f32 %v2546_v49, %v1774_v20 }
0x1339   :  { %v1820_v22 = vrot.slane %v3022_v21, %v2786_v54 }
0x133a   :  { %v1810_v1 = vpop.permute.xlu1 %1809 }
0x133b   :  { %v3026_v23 = vmul.f32 %v2548_v59, %v1810_v1  ;;  %1821 = vrot.lane.b32.xlu0 %v1820_v22, %s2675_s1 }
0x133d   :  { %v1844_v25 = vrot.slane %v3026_v23, %v2786_v54 }
0x133f   :  { %1845 = vrot.lane.b32.xlu1 %v1844_v25, %s2675_s1  ;;  %1833 = vrot.lane.b32.xlu0 %v1832_v24, %s2677_s10  ;;  %v305_v24 = vunpack.c.0.s8 %v304_v18 }
0x1343   :  { %1857 = vrot.lane.b32.xlu1 %v1856_v26, %s2677_s10 }
0x13ad   :  { %v1822_v27 = vpop.permute.xlu0 %1821 }
0x13ae   :  { %1824 = vst.msk [vmem:[#allocation2] sm:$0x3] %vm53_vm0, %v1822_v27  ;;  %v3063_v27 = vsub.s32 %v305_v24, %v2783_v52  ;;  %v583_v52 = vpack.c.bf16 %v2832_v57, %v2832_v57  ;;  %v844_v57 = vpack.c.bf16 %v2872_v60, %v2872_v60  ;;  %v1343_v60 = vpack.c.bf16 %v2948_v8, %v2948_v8 }
0x13b1   :  { %v1846_v2 = vpop.permute.xlu1 %1845  ;;  %v1834_v3 = vpop.permute.xlu0 %1833 }
0x13b2   :  { %1848 = vst.msk [vmem:[#allocation4] sm:$0x3] %vm53_vm0, %v1846_v2  ;;  %1836 = vst.msk [vmem:[#allocation3] sm:$0x3] %vm53_vm0, %v1834_v3  ;;  %v301_v2 = vpack.c.bf16 %v2788_v55, %v2788_v55  ;;  %v322_v3 = vpack.c.bf16 %v2792_v58, %v2792_v58  ;;  %v823_v55 = vpack.c.bf16 %v2868_v53, %v2868_v53 }
0x13b5   :  { %v1858_v28 = vpop.permute.xlu1 %1857  ;;  %v1904_v29 = vld [vmem:[#allocation2] sm:$0x3] }
0x13b6   :  { %1860 = vst.msk [vmem:[#allocation5] sm:$0x3] %vm53_vm0, %v1858_v28  ;;  %v1905_v30 = vpack.c.bf16 %v1904_v29, %v1904_v29  ;;  %v309_v28 = vrot.slane %v301_v2, %v3063_v27  ;;  %v562_v29 = vpack.c.bf16 %v2828_v51, %v2828_v51  ;;  %v591_v51 = vrot.slane %v583_v52, %v3063_v27 }
0x13b8   :  { %2412 = vmatmul.mubr.msk.bf16.vlgmr.msra.gmra.mrb[28].mxu0 %vm73_vm2, %v1905_v30  ;;  %v316_v58 = vrot.slane %v309_v28, %v3063_v27 }
0x13b9   :  { %v1951_v31 = vld [vmem:[#allocation4] sm:$0x3]  ;;  %v2244_v46 = vld.sshfl [vmem:[#allocation3] sm:$0x3 pattern:$0x76325410] }
0x13ba   :  { %v1952_v32 = vpack.c.bf16 %v1951_v31, %v1951_v31  ;;  %v330_v31 = vrot.slane %v322_v3, %v3063_v27 }
0x13bc   :  { %2420 = vmatmul.mubr.msk.bf16.vlgmr.msra.gmra.mrb[28].mxu1 %vm73_vm2, %v1952_v32  ;;  %v570_v32 = vrot.slane %v562_v29, %v3063_v27  ;;  %v337_v4 = vrot.slane %v330_v31, %v3063_v27 }
0x13bd   :  { %v2246_v47 = vld.sshfl [vmem:[#allocation5] sm:$0x3 pattern:$0x76325410] }
0x13be   :  { %v577_v53 = vrot.slane %v570_v32, %v3063_v27 }
0x148b   :  { %v1943_v34 = vpop.f32.mrb[28].mxu0 }
0x148c   :  { %v1949_v35 = vadd.f32 %v1943_v34, %v1903_v33  ;;  %v2413_v36 = vpop.f32.mrb[29].mxu0  ;;  %v831_v34 = vrot.slane %v823_v55, %v3063_v27 }
0x148d   :  { %v1946_v38 = vpop.f32.mrb[30].mxu0  ;;  %v1105_v36 = vpack.c.bf16 %v2912_v5, %v2912_v5  ;;  %v1364_v5 = vpack.c.bf16 %v2952_v11, %v2952_v11 }
0x148e   :  { %2553 = vtanh.f32 %v1949_v35  ;;  %v2414_v39 = vpop.f32.mrb[31].mxu0  ;;  %v2243_v48 = vmul.f32 -1.442695, %v1949_v35  ;;  %v1084_v35 = vpack.c.bf16 %v2908_v61, %v2908_v61  ;;  %v852_v38 = vrot.slane %v844_v57, %v3063_v27 }
0x148f   :  { %v1990_v40 = vpop.f32.mrb[28].mxu1  ;;  %v838_v61 = vrot.slane %v831_v34, %v3063_v27 }
0x1490   :  { %v1999_v0 = vadd.f32 %v1997_v37, %v1990_v40  ;;  %v2421_v41 = vpop.f32.mrb[29].mxu1  ;;  %v598_v37 = vrot.slane %v591_v51, %v3063_v27  ;;  %v1092_v39 = vrot.slane %v1084_v35, %v3063_v27  ;;  %v1113_v40 = vrot.slane %v1105_v36, %v3063_v27 }
0x1491   :  { %v1993_v42 = vpop.f32.mrb[30].mxu1  ;;  %v1351_v41 = vrot.slane %v1343_v60, %v3063_v27  ;;  %v859_v8 = vrot.slane %v852_v38, %v3063_v27 }
0x1492   :  { %2555 = vtanh.f32 %v1999_v0  ;;  %v2422_v43 = vpop.f32.mrb[31].mxu1  ;;  %v2245_v49 = vmul.f32 -1.442695, %v1999_v0  ;;  %v1099_v0 = vrot.slane %v1092_v39, %v3063_v27  ;;  %v1602_v42 = vpack.c.bf16 %v2988_v12, %v2988_v12 }
0x1493   :  { %2557 = vpow2.f32 %v2243_v48  ;;  %v1120_v43 = vrot.slane %v1113_v40, %v3063_v27  ;;  %v1861_v12 = vpack.c.bf16 %v3022_v21, %v3022_v21 }
0x1494   :  { %2559 = vpow2.f32 %v2245_v49  ;;  %v1610_v11 = vrot.slane %v1602_v42, %v3063_v27 }
0x1496   :  { %v1617_v48 = vrot.slane %v1610_v11, %v3063_v27 }
0x1498   :  { %v2554_v44 = vpop.eup %2553 }
0x1499   :  { %2021 = vrot.lane.b32.xlu0 %v2554_v44, %s2670_s22  ;;  %v1372_v44 = vrot.slane %v1364_v5, %v3063_v27 }
0x149c   :  { %v2556_v45 = vpop.eup %2555 }
0x149d   :  { %2057 = vrot.lane.b32.xlu1 %v2556_v45, %s2670_s22  ;;  %2016 = vrot.lane.b32.xlu0 %v2244_v46, %s2675_s1  ;;  %v2558_v50 = vpop.eup %2557  ;;  %v1358_v45 = vrot.slane %v1351_v41, %v3063_v27  ;;  %v1623_v46 = vpack.c.bf16 %v2992_v15, %v2992_v15 }
0x149e   :  { %v2004_v56 = vadd.f32 1.0, %v2558_v50  ;;  %v2560_v59 = vpop.eup %2559  ;;  %v1869_v50 = vrot.slane %v1861_v12, %v3063_v27 }
0x149f   :  { %v2040_v62 = vadd.f32 1.0, %v2560_v59  ;;  %v1631_v49 = vrot.slane %v1623_v46, %v3063_v27 }
0x14a0   :  { %2561 = vrcp.f32 %v2004_v56  ;;  %v1882_v56 = vpack.c.bf16 %v3026_v23, %v3026_v23  ;;  %v1876_v21 = vrot.slane %v1869_v50, %v3063_v27 }
0x14a1   :  { %2052 = vrot.lane.b32.xlu1 %v2246_v47, %s2675_s1  ;;  %2563 = vrcp.f32 %v2040_v62  ;;  %v1379_v47 = vrot.slane %v1372_v44, %v3063_v27  ;;  %v1638_v15 = vrot.slane %v1631_v49, %v3063_v27 }
0x14a2   :  { %v1890_v59 = vrot.slane %v1882_v56, %v3063_v27 }
0x14a4   :  { %v1897_v62 = vrot.slane %v1890_v59, %v3063_v27 }
0x14aa   :  { %v3046_v63 = vpop.eup %2561 }
0x14ab   :  { %v3050_v9 = vpop.eup %2563 }
0x150b   :  { %v2022_v6 = vpop.permute.xlu0 %2021 }
0x150c   :  { %v2024_v7 = vmul.f32 %v3046_v63, %v2022_v6 }
0x150e   :  { %2026 = vrot.lane.b32.xlu0 %v2024_v7, %s2675_s1 }
0x150f   :  { %v2058_v10 = vpop.permute.xlu1 %2057  ;;  %v2017_v14 = vpop.permute.xlu0 %2016 }
0x1510   :  { %v2060_v13 = vmul.f32 %v3050_v9, %v2058_v10  ;;  %v2019_v16 = vmul.f32 %v3046_v63, %v2017_v14 }
0x1512   :  { %2062 = vrot.lane.b32.xlu1 %v2060_v13, %s2675_s1 }
0x1513   :  { %v2053_v19 = vpop.permute.xlu1 %2052 }
0x1514   :  { %v2055_v1 = vmul.f32 %v3050_v9, %v2053_v19 }
0x1580   :  { %v2027_v20 = vpop.permute.xlu0 %2026 }
0x1581   :  { %v3055_v22 = vadd.f32 %v2027_v20, %v2019_v16 }
0x1583   :  { %2565 = vtanh.f32 %v3055_v22  ;;  %v2091_v23 = vrot.slane %v3055_v22, %v2786_v54 }
0x1584   :  { %v2063_v25 = vpop.permute.xlu1 %2062 }
0x1585   :  { %v3059_v26 = vadd.f32 %v2063_v25, %v2055_v1 }
0x1587   :  { %2567 = vtanh.f32 %v3059_v26  ;;  %v2115_v3 = vrot.slane %v3059_v26, %v2786_v54 }
0x158d   :  { %v2566_v30 = vpop.eup %2565 }
0x158e   :  { %2032 = vrot.lane.b32.xlu0 %v2566_v30, %s2670_s22 }
0x1591   :  { %v2568_v33 = vpop.eup %2567 }
0x1592   :  { %2068 = vrot.lane.b32.xlu1 %v2568_v33, %s2670_s22  ;;  %317 = vrot.lane.b32.xlu0 %v316_v58, %s2675_s1 }
0x1596   :  { %338 = vrot.lane.b32.xlu1 %v337_v4, %s2675_s1  ;;  %578 = vrot.lane.b32.xlu0 %v577_v53, %s2675_s1 }
0x159a   :  { %599 = vrot.lane.b32.xlu1 %v598_v37, %s2675_s1  ;;  %839 = vrot.lane.b32.xlu0 %v838_v61, %s2675_s1 }
0x159e   :  { %860 = vrot.lane.b32.xlu1 %v859_v8, %s2675_s1  ;;  %1100 = vrot.lane.b32.xlu0 %v1099_v0, %s2675_s1 }
0x15a2   :  { %1121 = vrot.lane.b32.xlu1 %v1120_v43, %s2675_s1  ;;  %1359 = vrot.lane.b32.xlu0 %v1358_v45, %s2675_s1 }
0x15a6   :  { %1380 = vrot.lane.b32.xlu1 %v1379_v47, %s2675_s1  ;;  %1618 = vrot.lane.b32.xlu0 %v1617_v48, %s2675_s1 }
0x15aa   :  { %1639 = vrot.lane.b32.xlu1 %v1638_v15, %s2675_s1  ;;  %1877 = vrot.lane.b32.xlu0 %v1876_v21, %s2675_s1 }
0x15ae   :  { %1898 = vrot.lane.b32.xlu1 %v1897_v62, %s2675_s1 }
0x15b2   :  { %2092 = vrot.lane.b32.xlu1 %v2091_v23, %s2677_s10 }
0x1600   :  { %v2033_v6 = vpop.permute.xlu0 %2032 }
0x1601   :  { %v2035_v7 = vmul.f32 %v3046_v63, %v2033_v6 }
0x1603   :  { %v2079_v10 = vrot.slane %v2035_v7, %v2786_v54  ;;  %v2120_v13 = vpack.c.bf16 %v2035_v7, %v2035_v7 }
0x1604   :  { %v2069_v14 = vpop.permute.xlu1 %2068  ;;  %v318_v16 = vpop.permute.xlu0 %317 }
0x1605   :  { %v2128_v17 = vrot.slane %v2120_v13, %v3063_v27  ;;  %v2071_v18 = vmul.f32 %v3050_v9, %v2069_v14  ;;  %321 = vst.msk [vmem:[#allocation11] sm:$0x1] %vm320_vm3, %v318_v16  ;;  %2080 = vrot.lane.b32.xlu0 %v2079_v10, %s2675_s1 }
0x1607   :  { %v2135_v19 = vrot.slane %v2128_v17, %v3063_v27  ;;  %v2141_v20 = vpack.c.bf16 %v2071_v18, %v2071_v18  ;;  %v2103_v24 = vrot.slane %v2071_v18, %v2786_v54 }
0x1608   :  { %v339_v22 = vpop.permute.xlu1 %338  ;;  %v579_v1 = vpop.permute.xlu0 %578 }
0x1609   :  { %v2149_v63 = vrot.slane %v2141_v20, %v3063_v27  ;;  %342 = vst.msk [vmem:[#allocation12 + $0x7] sm:$0x1] %vm320_vm3, %v339_v22  ;;  %582 = vst.msk [vmem:[#allocation11 + $0x1] sm:$0x1] %vm320_vm3, %v579_v1  ;;  %2136 = vrot.lane.b32.xlu0 %v2135_v19, %s2675_s1 }
0x160b   :  { %v2156_v9 = vrot.slane %v2149_v63, %v3063_v27 }
0x160c   :  { %v600_v25 = vpop.permute.xlu1 %599  ;;  %v840_v2 = vpop.permute.xlu0 %839 }
0x160d   :  { %603 = vst.msk [vmem:[#allocation12 + $0x6] sm:$0x1] %vm320_vm3, %v600_v25  ;;  %843 = vst.msk [vmem:[#allocation11 + $0x2] sm:$0x1] %vm320_vm3, %v840_v2  ;;  %2157 = vrot.lane.b32.xlu1 %v2156_v9, %s2675_s1  ;;  %2104 = vrot.lane.b32.xlu0 %v2103_v24, %s2675_s1 }
0x1610   :  { %v861_v28 = vpop.permute.xlu1 %860  ;;  %v1101_v29 = vpop.permute.xlu0 %1100 }
0x1611   :  { %864 = vst.msk [vmem:[#allocation12 + $0x5] sm:$0x1] %vm320_vm3, %v861_v28  ;;  %1104 = vst.msk [vmem:[#allocation11 + $0x3] sm:$0x1] %vm320_vm3, %v1101_v29  ;;  %2116 = vrot.lane.b32.xlu1 %v2115_v3, %s2677_s10 }
0x1614   :  { %v1122_v27 = vpop.permute.xlu1 %1121  ;;  %v1360_v30 = vpop.permute.xlu0 %1359 }
0x1615   :  { %1125 = vst.msk [vmem:[#allocation12 + $0x4] sm:$0x1] %vm320_vm3, %v1122_v27  ;;  %1363 = vst.msk [vmem:[#allocation11 + $0x4] sm:$0x1] %vm320_vm3, %v1360_v30 }
0x1618   :  { %v1381_v31 = vpop.permute.xlu1 %1380  ;;  %v1619_v52 = vpop.permute.xlu0 %1618 }
0x1619   :  { %1384 = vst.msk [vmem:[#allocation12 + $0x3] sm:$0x1] %vm320_vm3, %v1381_v31  ;;  %1622 = vst.msk [vmem:[#allocation11 + $0x5] sm:$0x1] %vm320_vm3, %v1619_v52 }
0x161c   :  { %v1640_v54 = vpop.permute.xlu1 %1639  ;;  %v1878_v26 = vpop.permute.xlu0 %1877 }
0x161d   :  { %1643 = vst.msk [vmem:[#allocation12 + $0x2] sm:$0x1] %vm320_vm3, %v1640_v54  ;;  %1881 = vst.msk [vmem:[#allocation11 + $0x6] sm:$0x1] %vm320_vm3, %v1878_v26 }
0x1620   :  { %v1899_v32 = vpop.permute.xlu1 %1898 }
0x1621   :  { %1902 = vst.msk [vmem:[#allocation12 + $0x1] sm:$0x1] %vm320_vm3, %v1899_v32 }
0x1624   :  { %v2093_v55 = vpop.permute.xlu1 %2092 }
0x1625   :  { %2095 = vst.msk [vmem:[#allocation3] sm:$0x3] %vm53_vm0, %v2093_v55 }
0x1677   :  { %v2081_v58 = vpop.permute.xlu0 %2080 }
0x1678   :  { %2083 = vst.msk [vmem:[#allocation2] sm:$0x3] %vm53_vm0, %v2081_v58 }
0x167b   :  { %v2137_v33 = vpop.permute.xlu0 %2136 }
0x167c   :  { %2140 = vst.msk [vmem:[#allocation11 + $0x7] sm:$0x1] %vm320_vm3, %v2137_v33 }
0x167d   :  { %2628 = shalt.err (!%p2625_p6)
}
0x167e   :  { %s2629_s18 = scalar_lea.hbm %s3201_s2, 128 }
0x167f   :  { %p2630_p7 = scmp.ne.s32.totalorder %s3201_s2, %s2629_s18  ;;  %p2633_p8 = scmp.lt.u32.totalorder %s2629_s18, %s3201_s2 }
0x1681   :  { %p2635_p9 = pnand %p2633_p8, %p2630_p7 }
0x1683   :  { %2638 = shalt.err (!%p2635_p9)
}
0x1684   :  { %s2681_s23 = smov 16   ;;  %s2682_s24 = smov 1   ;;  %v2158_v51 = vpop.permute.xlu1 %2157  ;;  %v2105_v4 = vpop.permute.xlu0 %2104 }
0x1685   :  { %2172 = dma.vmem_to_hbm [thread:$0]  %s2167_s12, 128, %s3201_s2, [#allocation8], %s2681_s23, %s2681_s23, %s2682_s24   ;;  %2160 = vst.msk [vmem:[#allocation12] sm:$0x1] %vm320_vm3, %v2158_v51 }
0x1686   :  { %2107 = vst.msk [vmem:[#allocation4] sm:$0x3] %vm53_vm0, %v2105_v4  ;;  %s2639_s27 = scalar_lea.vmem %s2179_s14, 128  ;;  %p2644_p11 = scmp.lt.s32.totalorder %s2179_s14, %s2179_s14 }
0x1687   :  { %p2640_p10 = scmp.ne.s32.totalorder %s2179_s14, %s2639_s27  ;;  %p2645_p12 = scmp.lt.s32.totalorder %s2639_s27, %s2639_s27 }
0x1689   :  { %p2646_p13 = por %p2645_p12, %p2644_p11 }
0x168b   :  { %p2647_p0 = pnand %p2646_p13, %p2640_p10 }
0x168d   :  { %2650 = shalt.err (!%p2647_p0)
}
0x168e   :  { %s2651_s30 = scalar_lea.hbm %s3202_s3, 128 }
0x168f   :  { %p2652_p1 = scmp.ne.s32.totalorder %s3202_s3, %s2651_s30  ;;  %p2655_p2 = scmp.lt.u32.totalorder %s2651_s30, %s3202_s3 }
0x1691   :  { %p2657_p3 = pnand %p2655_p2, %p2652_p1 }
0x1693   :  { %2660 = shalt.err (!%p2657_p3)
}
0x1694   :  { %2184 = dma.vmem_to_hbm [thread:$0]  %s2179_s14, 128, %s3202_s3, [#allocation13], %s2681_s23, %s2681_s23, %s2682_s24   ;;  %v2117_v34 = vpop.permute.xlu1 %2116 }
0x1695   :  { %2119 = vst.msk [vmem:[#allocation5] sm:$0x3] %vm53_vm0, %v2117_v34 }
0x1696   :  { %2665 = dma.done.wait [#allocation8], 128  }
0x1697   :  { %2666 = vsyncadd [#allocation8], 4294967168 }
0x1698   :  { %2667 = dma.done.wait [#allocation13], 128  }
0x1699   :  { %2668 = vsyncadd [#allocation13], 4294967168 }
0x169a   :  { %2191 = vsyncpa [#allocation7], 1 }
0x169b   :  { %2192 = vsyncpa [#allocation10], 1 }
0x169c   :  { %2193 = vsyncpa [#allocation8], 1 }
0x169d   :  { %2194 = vsyncpa [#allocation13], 1 }

// kernel: ner_lstm_crf_forward.7
= control target key start
LH: loop header
LB: loop body
LE: loop exit
PB: predicated region body
PF: predicated region fallthrough
CT: control target
= control target key end

     0   :  { %11 = vsyncpa [#allocation4], 0  ;;  %s10385_s0 = inlined_call_operand.hbm [shape: f32[8,2,128], index: 0, kind: input, shape index: {}]   ;;  %s10386_s1 = inlined_call_operand.hbm [shape: f32[128,128], index: 1, kind: input, shape index: {}]   ;;  %s10387_s2 = inlined_call_operand.hbm [shape: f32[1,128], index: 2, kind: input, shape index: {}]   ;;  %s10388_s3 = inlined_call_operand.hbm [shape: f32[1,128], index: 3, kind: input, shape index: {}]   ;;  %s10389_s4 = inlined_call_operand.hbm [shape: s32[8,2,128], index: 4, kind: output, shape index: {0}]   ;;  %s10390_s5 = inlined_call_operand.hbm [shape: f32[2,128], index: 5, kind: output, shape index: {1}]  }
   0x1   :  { %12 = vsyncpa [#allocation7], 0 }
   0x2   :  { %13 = vsyncpa [#allocation10], 0 }
   0x3   :  { %14 = vsyncpa [#allocation5], 0 }
   0x4   :  { %15 = vsyncpa [#allocation13], 0  ;;  %s7188_s18 = smov [#allocation6]   ;;  %s7046_s22 = scalar_lea.hbm %s10386_s1, 2048 }
   0x5   :  { %s33_s19 = sshll.u32 %s7188_s18, 4  ;;  %p7047_p0 = scmp.ne.s32.totalorder %s10386_s1, %s7046_s22  ;;  %s34_s19 = int_to_ptr.vmem [resolvable:$true] %s33_s19 }
   0x6   :  { %p7050_p1 = scmp.lt.u32.totalorder %s7046_s22, %s10386_s1 }
   0x8   :  { %p7052_p2 = pnand %p7050_p1, %p7047_p0 }
   0xa   :  { %7055 = shalt.err (!%p7052_p2)
}
   0xb   :  { %s7056_s27 = scalar_lea.vmem %s34_s19, 2048  ;;  %p7061_p4 = scmp.lt.s32.totalorder %s34_s19, %s34_s19 }
   0xc   :  { %p7057_p3 = scmp.ne.s32.totalorder %s34_s19, %s7056_s27  ;;  %p7062_p5 = scmp.lt.s32.totalorder %s7056_s27, %s7056_s27 }
   0xe   :  { %p7063_p6 = por %p7062_p5, %p7061_p4 }
  0x10   :  { %p7064_p7 = pnand %p7063_p6, %p7057_p3 }
  0x12   :  { %7067 = shalt.err (!%p7064_p7)
}
  0x13   :  { %s7189_s28 = smov 128   ;;  %s7190_s29 = smov 8  }
  0x14   :  { %39 = dma.hbm_to_vmem [thread:$0]  %s10386_s1, 2048, %s34_s19, [#allocation7], %s7189_s28, %s7189_s28, %s7190_s29  }
  0x15   :  { %s7191_s7 = smov [#allocation3]   ;;  %s7068_s11 = scalar_lea.hbm %s10385_s0, 256 }
  0x16   :  { %s21_s8 = sshll.u32 %s7191_s7, 4  ;;  %p7069_p8 = scmp.ne.s32.totalorder %s10385_s0, %s7068_s11  ;;  %s22_s8 = int_to_ptr.vmem [resolvable:$true] %s21_s8 }
  0x17   :  { %p7072_p9 = scmp.lt.u32.totalorder %s7068_s11, %s10385_s0 }
  0x19   :  { %p7074_p10 = pnand %p7072_p9, %p7069_p8 }
  0x1b   :  { %7077 = shalt.err (!%p7074_p10)
}
  0x1c   :  { %s7078_s16 = scalar_lea.vmem %s22_s8, 256  ;;  %p7083_p12 = scmp.lt.s32.totalorder %s22_s8, %s22_s8 }
  0x1d   :  { %p7079_p11 = scmp.ne.s32.totalorder %s22_s8, %s7078_s16  ;;  %p7084_p13 = scmp.lt.s32.totalorder %s7078_s16, %s7078_s16 }
  0x1f   :  { %p7085_p0 = por %p7084_p13, %p7083_p12 }
  0x21   :  { %p7086_p1 = pnand %p7085_p0, %p7079_p11 }
  0x23   :  { %7089 = shalt.err (!%p7086_p1)
}
  0x24   :  { %s7192_s1 = smov 32   ;;  %s7193_s17 = smov 2  }
  0x25   :  { %27 = dma.hbm_to_vmem [thread:$0]  %s10385_s0, 256, %s22_s8, [#allocation4], %s7192_s1, %s7192_s1, %s7193_s17  }
  0x26   :  { %s7194_s20 = smov [#allocation8]   ;;  %s7195_s22 = smov [#allocation9]  }
  0x27   :  { %s46_s21 = sshll.u32 %s7194_s20, 4  ;;  %s56_s23 = sshll.u32 %s7195_s22, 4  ;;  %s47_s21 = int_to_ptr.vmem [resolvable:$true] %s46_s21  ;;  %s57_s23 = int_to_ptr.vmem [resolvable:$true] %s56_s23 }
  0x28   :  { %s7090_s26 = scalar_lea.hbm %s10387_s2, 16 }
  0x29   :  { %p7091_p2 = scmp.ne.s32.totalorder %s10387_s2, %s7090_s26  ;;  %p7094_p3 = scmp.lt.u32.totalorder %s7090_s26, %s10387_s2 }
  0x2b   :  { %p7096_p4 = pnand %p7094_p3, %p7091_p2 }
  0x2d   :  { %7099 = shalt.err (!%p7096_p4)
}
  0x2e   :  { %s7100_s0 = scalar_lea.vmem %s47_s21, 16  ;;  %s7104_s6 = scalar_lea.vmem %s47_s21, 32 }
  0x2f   :  { %p7101_p5 = scmp.ne.s32.totalorder %s47_s21, %s7100_s0  ;;  %p7105_p6 = scmp.lt.s32.totalorder %s47_s21, %s47_s21 }
  0x30   :  { %p7106_p7 = scmp.lt.s32.totalorder %s7104_s6, %s7100_s0 }
  0x32   :  { %p7107_p8 = por %p7106_p7, %p7105_p6 }
  0x34   :  { %p7108_p9 = pnand %p7107_p8, %p7101_p5 }
  0x36   :  { %7111 = shalt.err (!%p7108_p9)
}
  0x37   :  { %49 = dma.hbm_to_vmem [thread:$0]  %s10387_s2, 16, %s47_s21, [#allocation7]  }
  0x38   :  { %s7112_s11 = scalar_lea.hbm %s10388_s3, 16 }
  0x39   :  { %p7113_p10 = scmp.ne.s32.totalorder %s10388_s3, %s7112_s11  ;;  %p7116_p11 = scmp.lt.u32.totalorder %s7112_s11, %s10388_s3 }
  0x3b   :  { %p7118_p12 = pnand %p7116_p11, %p7113_p10 }
  0x3d   :  { %7121 = shalt.err (!%p7118_p12)
}
  0x3e   :  { %s7122_s16 = scalar_lea.vmem %s57_s23, 16  ;;  %s7126_s18 = scalar_lea.vmem %s57_s23, 32 }
  0x3f   :  { %p7123_p13 = scmp.ne.s32.totalorder %s57_s23, %s7122_s16  ;;  %p7127_p0 = scmp.lt.s32.totalorder %s57_s23, %s57_s23 }
  0x40   :  { %p7128_p1 = scmp.lt.s32.totalorder %s7126_s18, %s7122_s16 }
  0x42   :  { %p7129_p2 = por %p7128_p1, %p7127_p0 }
  0x44   :  { %p7130_p3 = pnand %p7129_p2, %p7123_p13 }
  0x46   :  { %7133 = shalt.err (!%p7130_p3)
}
  0x47   :  { %59 = dma.hbm_to_vmem [thread:$0]  %s10388_s3, 16, %s57_s23, [#allocation10]  }
  0x48   :  { %7178 = dma.done.wait [#allocation4], 256  }
  0x49   :  { %7179 = vsyncadd [#allocation4], 4294967040 }
  0x4a   :  { %7180 = dma.done.wait [#allocation7], 2064  }
  0x4b   :  { %7181 = vsyncadd [#allocation7], 4294965232 }
  0x4c   :  { %7182 = dma.done.wait [#allocation10], 16  }
  0x4d   :  { %7183 = vsyncadd [#allocation10], 4294967280  ;;  %v7196_v0 = vmov 1966171168   ;;  %v10391_v2 = vlaneseq  ;;  %v6974_v3 = vld [vmem:[#allocation8] ss:$0 sm:$0xff] }
  0x4e   :  { %v994_v1 = vunpack.c.l.s4 %v7196_v0  ;;  %v93_v4 = vld [vmem:[#allocation3] sm:$0x3]  ;;  %v7293_v13 = vld [vmem:[#allocation6] sm:$0xff]  ;;  %v7296_v15 = vld [vmem:[#allocation6 + $0x18] sm:$0xff]  ;;  %vm1453_vm0 = vcmask 130112   ;;  %vm1460_vm1 = vcmask 195712  }
  0x4f   :  { %v100_v5 = vadd.f32 %v6974_v3, %v93_v4  ;;  %v7282_v7 = vshrl.u32 %v10391_v2, 7  ;;  %v7291_v12 = vld [vmem:[#allocation6 + $0x10] sm:$0xff]  ;;  %10722 = vst [vmem:[#allocation23_spill] sm:$0xff] %v7293_v13  ;;  %10723 = vst [vmem:[#allocation24_spill] sm:$0xff] %v7296_v15  ;;  %v7298_v16 = vld [vmem:[#allocation6 + $0x8] sm:$0xff]  ;;  %v7197_v3 = vmov 0  }
  0x50   :  { %v995_v6 = vunpack.c.0.s8 %v994_v1  ;;  %10721 = vst [vmem:[#allocation22_spill] sm:$0xff] %v7291_v12  ;;  %10724 = vst [vmem:[#allocation25_spill] sm:$0xff] %v7298_v16  ;;  %v7314_v21 = vld [vmem:[#allocation6 + $0x28] sm:$0xff]  ;;  %v7316_v22 = vld [vmem:[#allocation6 + $0x20] sm:$0xff]  ;;  %6997 = vset.pattern.permute.xlu1 %v7197_v3  ;;  %6996 = vset.pattern.permute.xlu0 %v7197_v3  ;;  %vm1467_vm2 = vcmask 261312   ;;  %vm1474_vm3 = vcmask 326912  }
  0x51   :  { %101 = vst [vmem:[#allocation2] sm:$0x3] %v100_v5  ;;  %10718 = vst [vmem:[#allocation19_spill] sm:$0xff] %v7282_v7  ;;  %v7288_v9 = vsub.s32 0, %v7282_v7  ;;  %v7326_v25 = vld [vmem:[#allocation6 + $0x38] sm:$0xff]  ;;  %v7328_v26 = vld [vmem:[#allocation6 + $0x30] sm:$0xff] }
  0x52   :  { %v7285_v8 = vsub.s32 %v995_v6, %v7282_v7  ;;  %10725 = vst [vmem:[#allocation26_spill] sm:$0xff] %v7314_v21  ;;  %10726 = vst [vmem:[#allocation27_spill] sm:$0xff] %v7316_v22  ;;  %v7338_v29 = vld [vmem:[#allocation6 + $0x48] sm:$0xff]  ;;  %v7340_v30 = vld [vmem:[#allocation6 + $0x40] sm:$0xff]  ;;  %v7456_v4 = vsub.s32 1, %v7282_v7  ;;  %vm1481_vm4 = vcmask 392512  }
  0x53   :  { %10720 = vst [vmem:[#allocation21_spill] sm:$0xff] %v7288_v9  ;;  %10727 = vst [vmem:[#allocation28_spill] sm:$0xff] %v7326_v25  ;;  %v7350_v33 = vld [vmem:[#allocation6 + $0x58] sm:$0xff]  ;;  %v7352_v34 = vld [vmem:[#allocation6 + $0x50] sm:$0xff]  ;;  %vm1488_vm5 = vcmask 458112   ;;  %vm1495_vm6 = vcmask 523712  }
  0x54   :  { %10719 = vst [vmem:[#allocation20_spill] sm:$0xff] %v7285_v8  ;;  %10728 = vst [vmem:[#allocation29_spill] sm:$0xff] %v7328_v26  ;;  %v7362_v38 = vld [vmem:[#allocation6 + $0x68] sm:$0xff]  ;;  %v7364_v39 = vld [vmem:[#allocation6 + $0x60] sm:$0xff]  ;;  %vm1502_vm7 = vcmask 589312   ;;  %vm1509_vm8 = vcmask 654912  }
  0x55   :  { %10729 = vst [vmem:[#allocation30_spill] sm:$0xff] %v7338_v29  ;;  %10730 = vst [vmem:[#allocation31_spill] sm:$0xff] %v7340_v30  ;;  %v7375_v43 = vld [vmem:[#allocation6 + $0x78] sm:$0xff]  ;;  %v7377_v44 = vld [vmem:[#allocation6 + $0x70] sm:$0xff]  ;;  %vm1516_vm9 = vcmask 720512   ;;  %vm1523_vm10 = vcmask 786112  }
  0x56   :  { %10731 = vst [vmem:[#allocation32_spill] sm:$0xff] %v7350_v33  ;;  %10732 = vst [vmem:[#allocation33_spill] sm:$0xff] %v7352_v34  ;;  %v1114_v0 = vld [vmem:[#allocation3 + $0x2] sm:$0x3]  ;;  %vm1530_vm11 = vcmask 851712   ;;  %vm1537_vm12 = vcmask 917312  }
  0x57   :  { %10733 = vst [vmem:[#allocation34_spill] sm:$0xff] %v7362_v38  ;;  %10734 = vst [vmem:[#allocation35_spill] sm:$0xff] %v7364_v39  ;;  %v1119_v1 = vrot.slane %v1114_v0, %v7288_v9  ;;  %v1186_v5 = vrot.slane %v1114_v0, %v7456_v4  ;;  %vm1544_vm13 = vcmask 982912   ;;  %vm1551_vm14 = vcmask 1048512   ;;  %s7198_s3 = smov [#allocation12]  }
  0x58   :  { %v6976_v10 = vld.sshfl [vmem:[#allocation2] sm:$0x11 pattern:$0x75316420]  ;;  %10735 = vst [vmem:[#allocation36_spill] sm:$0xff] %v7375_v43  ;;  %10736 = vst [vmem:[#allocation37_spill] sm:$0xff] %v7377_v44 }
  0x59   :  { %v999_v11 = vrot.slane %v6976_v10, %v7285_v8  ;;  %v992_v37 = vcombine.high %v6976_v10, %v6976_v10  ;;  %102 = vst [vmem:[#allocation11] sm:$0x3] %v7197_v3  ;;  %10752 = vst [vmem:[#allocation53_spill] sm:$0xff] %v7456_v4  ;;  %vm1632_vm15 = vcmask 1041409   ;;  %s6959_s20 = sshll.u32 %s7198_s3, 4  ;;  %s6960_s20 = int_to_ptr.vmem [resolvable:$true] %s6959_s20 }
  0x5a   :  { %s7134_s21 = scalar_lea.vmem %s6960_s20, 32  ;;  %p7139_p5 = scmp.lt.s32.totalorder %s6960_s20, %s6960_s20 }
  0x5b   :  { %v1010_v14 = vrot.slane %v999_v11, %v7288_v9  ;;  %v1006_v42 = vrot.slane %v992_v37, %v7285_v8  ;;  %p7135_p4 = scmp.ne.s32.totalorder %s6960_s20, %s7134_s21  ;;  %p7140_p6 = scmp.lt.s32.totalorder %s7134_s21, %s7134_s21 }
  0x5d   :  { %v7301_v17 = vadd.f32 %v1010_v14, %v7291_v12  ;;  %v7304_v18 = vadd.f32 %v1010_v14, %v7293_v13  ;;  %v7309_v19 = vadd.f32 %v1010_v14, %v7296_v15  ;;  %v7312_v20 = vadd.f32 %v1010_v14, %v7298_v16  ;;  %p7141_p7 = por %p7140_p6, %p7139_p5 }
  0x5e   :  { %v7321_v23 = vadd.f32 %v1010_v14, %v7314_v21  ;;  %v7324_v24 = vadd.f32 %v1010_v14, %v7316_v22  ;;  %v7333_v27 = vadd.f32 %v1010_v14, %v7326_v25  ;;  %v7336_v28 = vadd.f32 %v1010_v14, %v7328_v26 }
  0x5f   :  { %1053 = vmax.xlane.f32.xlu1 %v7301_v17  ;;  %1049 = vmax.xlane.f32.xlu0 %v7304_v18  ;;  %v7345_v31 = vadd.f32 %v1010_v14, %v7338_v29  ;;  %v7348_v32 = vadd.f32 %v1010_v14, %v7340_v30  ;;  %v7357_v35 = vadd.f32 %v1010_v14, %v7350_v33  ;;  %p7142_p8 = pnand %p7141_p7, %p7135_p4 }
  0x60   :  { %v7360_v36 = vadd.f32 %v1010_v14, %v7352_v34  ;;  %v7369_v40 = vadd.f32 %v1010_v14, %v7362_v38  ;;  %v7372_v41 = vadd.f32 %v1010_v14, %v7364_v39  ;;  %v7382_v45 = vadd.f32 %v1010_v14, %v7375_v43 }
  0x61   :  { %v7385_v46 = vadd.f32 %v1010_v14, %v7377_v44  ;;  %v1014_v47 = vrot.slane %v1006_v42, %v7288_v9 }
  0x63   :  { %1055 = vmax.xlane.f32.xlu1 %v7309_v19  ;;  %1051 = vmax.xlane.f32.xlu0 %v7312_v20  ;;  %v7391_v48 = vadd.f32 %v1014_v47, %v7298_v16  ;;  %v7394_v49 = vadd.f32 %v1014_v47, %v7293_v13  ;;  %v7399_v50 = vadd.f32 %v1014_v47, %v7296_v15 }
  0x64   :  { %v7402_v51 = vadd.f32 %v1014_v47, %v7291_v12  ;;  %v7407_v52 = vadd.f32 %v1014_v47, %v7314_v21  ;;  %v7410_v53 = vadd.f32 %v1014_v47, %v7316_v22  ;;  %v7415_v54 = vadd.f32 %v1014_v47, %v7326_v25 }
  0x65   :  { %10737 = vst [vmem:[#allocation38_spill] sm:$0xff] %v7391_v48  ;;  %10738 = vst [vmem:[#allocation39_spill] sm:$0xff] %v7399_v50  ;;  %v7418_v55 = vadd.f32 %v1014_v47, %v7328_v26  ;;  %v7423_v56 = vadd.f32 %v1014_v47, %v7338_v29  ;;  %v7426_v57 = vadd.f32 %v1014_v47, %v7340_v30 }
  0x66   :  { %10739 = vst [vmem:[#allocation40_spill] sm:$0xff] %v7402_v51  ;;  %10740 = vst [vmem:[#allocation41_spill] sm:$0xff] %v7407_v52  ;;  %v7431_v58 = vadd.f32 %v1014_v47, %v7350_v33  ;;  %v7434_v59 = vadd.f32 %v1014_v47, %v7352_v34  ;;  %v7439_v60 = vadd.f32 %v1014_v47, %v7362_v38 }
  0x67   :  { %1059 = vmax.xlane.f32.xlu1 %v7321_v23  ;;  %1057 = vmax.xlane.f32.xlu0 %v7324_v24  ;;  %10741 = vst [vmem:[#allocation42_spill] sm:$0xff] %v7410_v53  ;;  %10742 = vst [vmem:[#allocation43_spill] sm:$0xff] %v7415_v54  ;;  %v7442_v61 = vadd.f32 %v1014_v47, %v7364_v39  ;;  %v7447_v62 = vadd.f32 %v1014_v47, %v7375_v43 }
  0x68   :  { %10743 = vst [vmem:[#allocation44_spill] sm:$0xff] %v7418_v55  ;;  %10744 = vst [vmem:[#allocation45_spill] sm:$0xff] %v7423_v56  ;;  %v7450_v63 = vadd.f32 %v1014_v47, %v7377_v44 }
  0x69   :  { %10745 = vst [vmem:[#allocation46_spill] sm:$0xff] %v7426_v57  ;;  %10746 = vst [vmem:[#allocation47_spill] sm:$0xff] %v7431_v58 }
  0x6a   :  { %10747 = vst [vmem:[#allocation48_spill] sm:$0xff] %v7434_v59  ;;  %10748 = vst [vmem:[#allocation49_spill] sm:$0xff] %v7439_v60 }
  0x6b   :  { %1063 = vmax.xlane.f32.xlu1 %v7333_v27  ;;  %1061 = vmax.xlane.f32.xlu0 %v7336_v28  ;;  %10749 = vst [vmem:[#allocation50_spill] sm:$0xff] %v7442_v61  ;;  %10750 = vst [vmem:[#allocation51_spill] sm:$0xff] %v7447_v62 }
  0x6c   :  { %10751 = vst [vmem:[#allocation52_spill] sm:$0xff] %v7450_v63 }
  0x6f   :  { %1067 = vmax.xlane.f32.xlu1 %v7345_v31  ;;  %1065 = vmax.xlane.f32.xlu0 %v7348_v32 }
  0x73   :  { %1071 = vmax.xlane.f32.xlu1 %v7357_v35  ;;  %1069 = vmax.xlane.f32.xlu0 %v7360_v36 }
  0x77   :  { %1075 = vmax.xlane.f32.xlu1 %v7369_v40  ;;  %1073 = vmax.xlane.f32.xlu0 %v7372_v41 }
  0x7b   :  { %1079 = vmax.xlane.f32.xlu1 %v7382_v45  ;;  %1077 = vmax.xlane.f32.xlu0 %v7385_v46 }
  0x7f   :  { %1083 = vmax.xlane.f32.xlu1 %v7391_v48  ;;  %1081 = vmax.xlane.f32.xlu0 %v7394_v49 }
  0x83   :  { %1087 = vmax.xlane.f32.xlu1 %v7399_v50  ;;  %1085 = vmax.xlane.f32.xlu0 %v7402_v51 }
  0x87   :  { %1091 = vmax.xlane.f32.xlu1 %v7407_v52  ;;  %1089 = vmax.xlane.f32.xlu0 %v7410_v53 }
  0x8b   :  { %1095 = vmax.xlane.f32.xlu1 %v7415_v54  ;;  %1093 = vmax.xlane.f32.xlu0 %v7418_v55 }
  0x8f   :  { %1099 = vmax.xlane.f32.xlu1 %v7423_v56  ;;  %1097 = vmax.xlane.f32.xlu0 %v7426_v57 }
  0x93   :  { %1103 = vmax.xlane.f32.xlu1 %v7431_v58  ;;  %1101 = vmax.xlane.f32.xlu0 %v7434_v59 }
  0x97   :  { %1107 = vmax.xlane.f32.xlu1 %v7439_v60  ;;  %1105 = vmax.xlane.f32.xlu0 %v7442_v61 }
  0x9b   :  { %1111 = vmax.xlane.f32.xlu1 %v7447_v62  ;;  %1109 = vmax.xlane.f32.xlu0 %v7450_v63 }
  0xac   :  { %1125 = vbcast.lane.b32.xlu1 %v1119_v1, 264 }
  0xb0   :  { %1129 = vbcast.lane.b32.xlu1 %v1119_v1, 272 }
  0xb1   :  { %1121 = vbcast.lane.b32.xlu0 %v1119_v1, 256 }
  0xb4   :  { %1133 = vbcast.lane.b32.xlu1 %v1119_v1, 280 }
  0xb5   :  { %1137 = vbcast.lane.b32.xlu0 %v1119_v1, 288 }
  0xb8   :  { %1141 = vbcast.lane.b32.xlu1 %v1119_v1, 296 }
  0xb9   :  { %1145 = vbcast.lane.b32.xlu0 %v1119_v1, 304 }
  0xbc   :  { %1149 = vbcast.lane.b32.xlu1 %v1119_v1, 312 }
  0xbd   :  { %1153 = vbcast.lane.b32.xlu0 %v1119_v1, 320 }
  0xc0   :  { %1157 = vbcast.lane.b32.xlu1 %v1119_v1, 328 }
  0xc1   :  { %1161 = vbcast.lane.b32.xlu0 %v1119_v1, 336 }
  0xc4   :  { %1165 = vbcast.lane.b32.xlu1 %v1119_v1, 344 }
  0xc5   :  { %1169 = vbcast.lane.b32.xlu0 %v1119_v1, 352 }
  0xc8   :  { %1173 = vbcast.lane.b32.xlu1 %v1119_v1, 360 }
  0xc9   :  { %1177 = vbcast.lane.b32.xlu0 %v1119_v1, 368 }
  0xcc   :  { %1181 = vbcast.lane.b32.xlu1 %v1119_v1, 376 }
  0xcd   :  { %1188 = vbcast.lane.b32.xlu0 %v1186_v5, 256 }
  0xd0   :  { %1192 = vbcast.lane.b32.xlu1 %v1186_v5, 264 }
  0xd1   :  { %1196 = vbcast.lane.b32.xlu0 %v1186_v5, 272 }
  0xd4   :  { %1200 = vbcast.lane.b32.xlu1 %v1186_v5, 280 }
  0xd5   :  { %1204 = vbcast.lane.b32.xlu0 %v1186_v5, 288 }
  0xd8   :  { %1208 = vbcast.lane.b32.xlu1 %v1186_v5, 296 }
  0xd9   :  { %1212 = vbcast.lane.b32.xlu0 %v1186_v5, 304 }
  0xdc   :  { %1216 = vbcast.lane.b32.xlu1 %v1186_v5, 312 }
  0xdd   :  { %1220 = vbcast.lane.b32.xlu0 %v1186_v5, 320 }
  0xe0   :  { %1224 = vbcast.lane.b32.xlu1 %v1186_v5, 328 }
  0xe1   :  { %1228 = vbcast.lane.b32.xlu0 %v1186_v5, 336 }
  0xe4   :  { %1232 = vbcast.lane.b32.xlu1 %v1186_v5, 344 }
  0xe5   :  { %1236 = vbcast.lane.b32.xlu0 %v1186_v5, 352 }
  0xe8   :  { %1240 = vbcast.lane.b32.xlu1 %v1186_v5, 360 }
  0xe9   :  { %1244 = vbcast.lane.b32.xlu0 %v1186_v5, 368 }
  0xec   :  { %v1054_v6 = vpop.xlane.xlu1 %1053  ;;  %v1050_v10 = vpop.xlane.xlu0 %1049  ;;  %1248 = vbcast.lane.b32.xlu1 %v1186_v5, 376 }
  0xf0   :  { %v1056_v11 = vpop.xlane.xlu1 %1055  ;;  %v1052_v14 = vpop.xlane.xlu0 %1051 }
  0xf4   :  { %v1060_v37 = vpop.xlane.xlu1 %1059  ;;  %v1058_v42 = vpop.xlane.xlu0 %1057 }
  0xf8   :  { %v1064_v47 = vpop.xlane.xlu1 %1063  ;;  %v1062_v0 = vpop.xlane.xlu0 %1061 }
  0xfc   :  { %v1068_v1 = vpop.xlane.xlu1 %1067  ;;  %v1066_v3 = vpop.xlane.xlu0 %1065 }
 0x100   :  { %v1072_v2 = vpop.xlane.xlu1 %1071  ;;  %v1070_v4 = vpop.xlane.xlu0 %1069 }
 0x104   :  { %v7459_v44 = vpop.xlane.xlu1 %1075  ;;  %v1074_v43 = vpop.xlane.xlu0 %1073 }
 0x108   :  { %v7461_v39 = vpop.xlane.xlu1 %1079  ;;  %v1078_v38 = vpop.xlane.xlu0 %1077 }
 0x10c   :  { %v7463_v34 = vpop.xlane.xlu1 %1083  ;;  %v7465_v33 = vpop.xlane.xlu0 %1081 }
 0x110   :  { %v7467_v5 = vpop.xlane.xlu1 %1087  ;;  %v7469_v30 = vpop.xlane.xlu0 %1085 }
 0x114   :  { %v7471_v29 = vpop.xlane.xlu1 %1091  ;;  %v7473_v26 = vpop.xlane.xlu0 %1089 }
 0x118   :  { %v7475_v25 = vpop.xlane.xlu1 %1095  ;;  %v7477_v22 = vpop.xlane.xlu0 %1093 }
 0x11c   :  { %v7479_v21 = vpop.xlane.xlu1 %1099  ;;  %v7481_v12 = vpop.xlane.xlu0 %1097 }
 0x120   :  { %v7483_v15 = vpop.xlane.xlu1 %1103  ;;  %v7485_v13 = vpop.xlane.xlu0 %1101 }
 0x124   :  { %v7487_v16 = vpop.xlane.xlu1 %1107  ;;  %v7489_v9 = vpop.xlane.xlu0 %1105 }
 0x128   :  { %v7491_v8 = vpop.xlane.xlu1 %1111  ;;  %v7493_v7 = vpop.xlane.xlu0 %1109 }
 0x12c   :  { %v1126_v62 = vpop.permute.xlu1 %1125  ;;  %v1122_v60 = vpop.permute.xlu0 %1121 }
 0x12d   :  { %v1283_v63 = vadd.f32 %v1126_v62, %v1052_v14  ;;  %v1282_v58 = vadd.f32 %v1122_v60, %v1050_v10 }
 0x12f   :  { %1350 = vperm.xlu1 %6997, %v1283_v63   ;;  %1347 = vperm.xlu0 %6996, %v1282_v58  }
 0x130   :  { %v1130_v61 = vpop.permute.xlu1 %1129  ;;  %v1138_v56 = vpop.permute.xlu0 %1137 }
 0x131   :  { %v1284_v59 = vadd.f32 %v1130_v61, %v1054_v6  ;;  %v1286_v52 = vadd.f32 %v1138_v56, %v1058_v42 }
 0x133   :  { %1353 = vperm.xlu1 %6997, %v1284_v59  }
 0x134   :  { %v1134_v54 = vpop.permute.xlu1 %1133  ;;  %v1146_v57 = vpop.permute.xlu0 %1145 }
 0x135   :  { %v1285_v55 = vadd.f32 %v1134_v54, %v1056_v11  ;;  %v1288_v48 = vadd.f32 %v1146_v57, %v1062_v0 }
 0x137   :  { %1356 = vperm.xlu0 %6996, %v1285_v55   ;;  %1359 = vperm.xlu1 %6997, %v1286_v52  }
 0x138   :  { %v1142_v50 = vpop.permute.xlu1 %1141  ;;  %v1154_v53 = vpop.permute.xlu0 %1153 }
 0x139   :  { %v1287_v51 = vadd.f32 %v1142_v50, %v1060_v37  ;;  %v1290_v63 = vadd.f32 %v1154_v53, %v1066_v3 }
 0x13b   :  { %1362 = vperm.xlu0 %6996, %v1287_v51   ;;  %1365 = vperm.xlu1 %6997, %v1288_v48  }
 0x13c   :  { %v1150_v62 = vpop.permute.xlu1 %1149  ;;  %v1162_v60 = vpop.permute.xlu0 %1161 }
 0x13d   :  { %v1289_v58 = vadd.f32 %v1150_v62, %v1064_v47  ;;  %v1292_v6 = vadd.f32 %v1162_v60, %v1070_v4 }
 0x13f   :  { %1368 = vperm.xlu0 %6996, %v1289_v58   ;;  %1371 = vperm.xlu1 %6997, %v1290_v63  }
 0x140   :  { %v1158_v61 = vpop.permute.xlu1 %1157  ;;  %v1170_v59 = vpop.permute.xlu0 %1169 }
 0x141   :  { %v1291_v10 = vadd.f32 %v1158_v61, %v1068_v1  ;;  %v1294_v55 = vadd.f32 %v1170_v59, %v1074_v43 }
 0x143   :  { %1374 = vperm.xlu0 %6996, %v1291_v10   ;;  %1377 = vperm.xlu1 %6997, %v1292_v6  }
 0x144   :  { %v1166_v54 = vpop.permute.xlu1 %1165  ;;  %v1178_v52 = vpop.permute.xlu0 %1177 }
 0x145   :  { %v1293_v56 = vadd.f32 %v1166_v54, %v1072_v2  ;;  %v1296_v51 = vadd.f32 %v1178_v52, %v1078_v38  ;;  %v10764_v52 = vld [vmem:[#allocation47_spill] sm:$0xff] }
 0x147   :  { %1380 = vperm.xlu0 %6996, %v1293_v56   ;;  %1383 = vperm.xlu1 %6997, %v1294_v55   ;;  %v10765_v55 = vlaneseq }
 0x148   :  { %v1174_v50 = vpop.permute.xlu1 %1173  ;;  %v1189_v48 = vpop.permute.xlu0 %1188 }
 0x149   :  { %v1295_v53 = vadd.f32 %v1174_v50, %v7459_v44  ;;  %v1298_v4 = vadd.f32 %v1189_v48, %v7465_v33  ;;  %v7569_v56 = vand.u32 127, %v10765_v55  ;;  %v10766_v50 = vld [vmem:[#allocation52_spill] sm:$0xff] }
 0x14b   :  { %1386 = vperm.xlu0 %6996, %v1295_v53   ;;  %1389 = vperm.xlu1 %6997, %v1296_v51   ;;  %v10767_v53 = vld [vmem:[#allocation49_spill] sm:$0xff] }
 0x14c   :  { %v1182_v57 = vpop.permute.xlu1 %1181  ;;  %v1197_v11 = vpop.permute.xlu0 %1196 }
 0x14d   :  { %v1297_v14 = vadd.f32 %v1182_v57, %v7461_v39  ;;  %v1300_v2 = vadd.f32 %v1197_v11, %v7469_v30  ;;  %v1448_v57 = vadd.s32 4294967288, %v7569_v56  ;;  %v1455_v11 = vadd.s32 4294967280, %v7569_v56 }
 0x14f   :  { %1392 = vperm.xlu0 %6996, %v1297_v14   ;;  %1395 = vperm.xlu1 %6997, %v1298_v4   ;;  %v1462_v4 = vadd.s32 4294967272, %v7569_v56 }
 0x150   :  { %v1193_v37 = vpop.permute.xlu1 %1192  ;;  %v1205_v43 = vpop.permute.xlu0 %1204 }
 0x151   :  { %v1299_v42 = vadd.f32 %v1193_v37, %v7463_v34  ;;  %v1302_v47 = vadd.f32 %v1205_v43, %v7473_v26  ;;  %v10768_v43 = vld [vmem:[#allocation51_spill] sm:$0xff] }
 0x153   :  { %1398 = vperm.xlu0 %6996, %v1299_v42   ;;  %1401 = vperm.xlu1 %6997, %v1300_v2   ;;  %v10769_v2 = vld [vmem:[#allocation19_spill] sm:$0xff] }
 0x154   :  { %v1201_v38 = vpop.permute.xlu1 %1200  ;;  %v1213_v44 = vpop.permute.xlu0 %1212  ;;  %v7584_v42 = vsub.s32 %v1448_v57, %v10769_v2 }
 0x155   :  { %v1301_v0 = vadd.f32 %v1201_v38, %v7467_v5  ;;  %v1304_v1 = vadd.f32 %v1213_v44, %v7477_v22  ;;  %v7588_v38 = vsub.s32 %v7569_v56, %v10769_v2  ;;  %v1469_v44 = vadd.s32 4294967264, %v7569_v56 }
 0x157   :  { %1404 = vperm.xlu0 %6996, %v1301_v0   ;;  %1407 = vperm.xlu1 %6997, %v1302_v47   ;;  %v7592_v47 = vsub.s32 %v1455_v11, %v10769_v2  ;;  %v1476_v0 = vadd.s32 4294967256, %v7569_v56 }
 0x158   :  { %v1209_v33 = vpop.permute.xlu1 %1208  ;;  %v1221_v39 = vpop.permute.xlu0 %1220 }
 0x159   :  { %v1303_v3 = vadd.f32 %v1209_v33, %v7471_v29  ;;  %v1306_v62 = vadd.f32 %v1221_v39, %v7481_v12  ;;  %v7596_v33 = vsub.s32 %v1462_v4, %v10769_v2  ;;  %v1483_v39 = vadd.s32 4294967248, %v7569_v56 }
 0x15a   :  { %v1525_v4 = vadd.s32 4294967200, %v7569_v56 }
 0x15b   :  { %1410 = vperm.xlu0 %6996, %v1303_v3   ;;  %1413 = vperm.xlu1 %6997, %v1304_v1   ;;  %v1490_v1 = vadd.s32 4294967240, %v7569_v56 }
 0x15c   :  { %v1217_v30 = vpop.permute.xlu1 %1216  ;;  %v1229_v34 = vpop.permute.xlu0 %1228 }
 0x15d   :  { %v1305_v60 = vadd.f32 %v1217_v30, %v7475_v25  ;;  %v1308_v63 = vadd.f32 %v1229_v34, %v7485_v13 }
 0x15f   :  { %1416 = vperm.xlu0 %6996, %v1305_v60   ;;  %1419 = vperm.xlu1 %6997, %v1306_v62  }
 0x160   :  { %v1225_v26 = vpop.permute.xlu1 %1224  ;;  %v1237_v5 = vpop.permute.xlu0 %1236 }
 0x161   :  { %v1307_v58 = vadd.f32 %v1225_v26, %v7479_v21  ;;  %v1310_v29 = vadd.f32 %v1237_v5, %v7489_v9 }
 0x163   :  { %1422 = vperm.xlu0 %6996, %v1307_v58   ;;  %1425 = vperm.xlu1 %6997, %v1308_v63   ;;  %v7609_v63 = vsub.s32 %v1469_v44, %v10769_v2 }
 0x164   :  { %v1233_v22 = vpop.permute.xlu1 %1232  ;;  %v1245_v59 = vpop.permute.xlu0 %1244 }
 0x165   :  { %v1309_v61 = vadd.f32 %v1233_v22, %v7483_v15  ;;  %v1312_v25 = vadd.f32 %v1245_v59, %v7493_v7  ;;  %v1497_v59 = vadd.s32 4294967232, %v7569_v56 }
 0x167   :  { %1428 = vperm.xlu0 %6996, %v1309_v61   ;;  %1431 = vperm.xlu1 %6997, %v1310_v29   ;;  %v7615_v29 = vsub.s32 %v1476_v0, %v10769_v2 }
 0x168   :  { %v1241_v12 = vpop.permute.xlu1 %1240 }
 0x169   :  { %v1311_v6 = vadd.f32 %v1241_v12, %v7487_v16  ;;  %v10754_v16 = vld [vmem:[#allocation38_spill] sm:$0xff]  ;;  %v1504_v12 = vadd.s32 4294967224, %v7569_v56 }
 0x16a   :  { %10771 = vst [vmem:[#allocation38_spill] sm:$0xff] %v7588_v38 }
 0x16b   :  { %1434 = vperm.xlu0 %6996, %v1311_v6   ;;  %1437 = vperm.xlu1 %6997, %v1312_v25   ;;  %v7652_v57 = vsub.s32 %v1504_v12, %v10769_v2 }
 0x16c   :  { %v1249_v13 = vpop.permute.xlu1 %1248 }
 0x16d   :  { %v1313_v21 = vadd.f32 %v1249_v13, %v7491_v8  ;;  %v10753_v8 = vld [vmem:[#allocation40_spill] sm:$0xff] }
 0x16e   :  { %10770 = vst [vmem:[#allocation40_spill] sm:$0xff] %v7584_v42 }
 0x16f   :  { %1440 = vperm.xlu0 %6996, %v1313_v21   ;;  %v7622_v21 = vsub.s32 %v1483_v39, %v10769_v2 }
 0x18e   :  { %1638 = vmax.index.xlane.f32.xlu0 %v7312_v20  ;;  %v10756_v20 = vld [vmem:[#allocation39_spill] sm:$0xff] }
 0x18f   :  { %1636 = vmax.index.xlane.f32.xlu1 %v7304_v18  ;;  %10773 = vst [vmem:[#allocation39_spill] sm:$0xff] %v7596_v33 }
 0x192   :  { %1640 = vmax.index.xlane.f32.xlu0 %v7301_v17  ;;  %v10755_v17 = vld [vmem:[#allocation42_spill] sm:$0xff] }
 0x193   :  { %1644 = vmax.index.xlane.f32.xlu1 %v7324_v24  ;;  %10772 = vst [vmem:[#allocation42_spill] sm:$0xff] %v7592_v47 }
 0x196   :  { %1642 = vmax.index.xlane.f32.xlu0 %v7309_v19 }
 0x197   :  { %1648 = vmax.index.xlane.f32.xlu1 %v7336_v28  ;;  %v10758_v28 = vld [vmem:[#allocation41_spill] sm:$0xff] }
 0x198   :  { %10775 = vst [vmem:[#allocation41_spill] sm:$0xff] %v7615_v29 }
 0x19a   :  { %1646 = vmax.index.xlane.f32.xlu0 %v7321_v23  ;;  %v10757_v23 = vld [vmem:[#allocation44_spill] sm:$0xff] }
 0x19b   :  { %1652 = vmax.index.xlane.f32.xlu1 %v7348_v32  ;;  %10774 = vst [vmem:[#allocation44_spill] sm:$0xff] %v7609_v63 }
 0x19e   :  { %1650 = vmax.index.xlane.f32.xlu0 %v7333_v27 }
 0x19f   :  { %1656 = vmax.index.xlane.f32.xlu1 %v7360_v36  ;;  %v10760_v36 = vld [vmem:[#allocation43_spill] sm:$0xff] }
 0x1a2   :  { %1654 = vmax.index.xlane.f32.xlu0 %v7345_v31  ;;  %v10759_v31 = vld [vmem:[#allocation46_spill] sm:$0xff] }
 0x1a3   :  { %1660 = vmax.index.xlane.f32.xlu1 %v7372_v41  ;;  %10776 = vst [vmem:[#allocation46_spill] sm:$0xff] %v7622_v21 }
 0x1a6   :  { %1658 = vmax.index.xlane.f32.xlu0 %v7357_v35 }
 0x1a7   :  { %1664 = vmax.index.xlane.f32.xlu1 %v7385_v46  ;;  %v10762_v46 = vld [vmem:[#allocation45_spill] sm:$0xff] }
 0x1a8   :  { %10779 = vst [vmem:[#allocation45_spill] sm:$0xff] %v7652_v57 }
 0x1aa   :  { %1662 = vmax.index.xlane.f32.xlu0 %v7369_v40  ;;  %v10761_v40 = vld [vmem:[#allocation48_spill] sm:$0xff] }
 0x1ab   :  { %1668 = vmax.index.xlane.f32.xlu1 %v7394_v49  ;;  %v10763_v49 = vld [vmem:[#allocation50_spill] sm:$0xff] }
 0x1ae   :  { %v7529_v7 = vpop.permute.xlu1 %1350  ;;  %1666 = vmax.index.xlane.f32.xlu0 %v7382_v45  ;;  %v7533_v9 = vpop.permute.xlu0 %1347 }
 0x1af   :  { %1672 = vmax.index.xlane.f32.xlu1 %v10753_v8  ;;  %v1452_v34 = vrot.slane %v7529_v7, %v7584_v42  ;;  %v1447_v62 = vrot.slane %v7533_v9, %v7588_v38 }
 0x1b1   :  { %v1454_v13 = vsel %vm1453_vm0, %v1452_v34, %v1447_v62 }
 0x1b2   :  { %v7535_v15 = vpop.permute.xlu1 %1353  ;;  %1670 = vmax.index.xlane.f32.xlu0 %v10754_v16 }
 0x1b3   :  { %1676 = vmax.index.xlane.f32.xlu1 %v10755_v17  ;;  %v1459_v5 = vrot.slane %v7535_v15, %v7592_v47 }
 0x1b5   :  { %v1461_v8 = vsel %vm1460_vm1, %v1459_v5, %v1454_v13 }
 0x1b6   :  { %v7539_v18 = vpop.permute.xlu1 %1359  ;;  %v7541_v19 = vpop.permute.xlu0 %1356  ;;  %1674 = vmax.index.xlane.f32.xlu0 %v10756_v20  ;;  %v7634_v20 = vsub.s32 %v1490_v1, %v10769_v2 }
 0x1b7   :  { %1680 = vmax.index.xlane.f32.xlu1 %v10757_v23  ;;  %v1466_v22 = vrot.slane %v7541_v19, %v7596_v33  ;;  %v1473_v9 = vrot.slane %v7539_v18, %v7609_v63  ;;  %v1518_v18 = vadd.s32 4294967208, %v7569_v56 }
 0x1b8   :  { %10777 = vst [vmem:[#allocation43_spill] sm:$0xff] %v7634_v20 }
 0x1b9   :  { %v1468_v17 = vsel %vm1467_vm2, %v1466_v22, %v1461_v8  ;;  %v7670_v62 = vsub.s32 %v1518_v18, %v10769_v2  ;;  %v7676_v22 = vsub.s32 %v1525_v4, %v10769_v2 }
 0x1ba   :  { %v7545_v24 = vpop.permute.xlu1 %1365  ;;  %v7547_v27 = vpop.permute.xlu0 %1362  ;;  %1678 = vmax.index.xlane.f32.xlu0 %v10758_v28  ;;  %v1511_v28 = vadd.s32 4294967216, %v7569_v56 }
 0x1bb   :  { %1684 = vmax.index.xlane.f32.xlu1 %v10759_v31  ;;  %v1480_v19 = vrot.slane %v7547_v27, %v7615_v29  ;;  %v1487_v27 = vrot.slane %v7545_v24, %v7622_v21  ;;  %10781 = vst [vmem:[#allocation47_spill] sm:$0xff] %v7670_v62  ;;  %10782 = vst [vmem:[#allocation52_spill] sm:$0xff] %v7676_v22 }
 0x1bc   :  { %v7658_v44 = vsub.s32 %v1511_v28, %v10769_v2 }
 0x1be   :  { %v7551_v32 = vpop.permute.xlu1 %1371  ;;  %v7553_v35 = vpop.permute.xlu0 %1368  ;;  %1682 = vmax.index.xlane.f32.xlu0 %v10760_v36  ;;  %10780 = vst [vmem:[#allocation50_spill] sm:$0xff] %v7658_v44 }
 0x1bf   :  { %1688 = vmax.index.xlane.f32.xlu1 %v10761_v40  ;;  %v7640_v40 = vsub.s32 %v1497_v59, %v10769_v2 }
 0x1c1   :  { %10778 = vst [vmem:[#allocation48_spill] sm:$0xff] %v7640_v40 }
 0x1c2   :  { %v7557_v41 = vpop.permute.xlu1 %1377  ;;  %v7559_v45 = vpop.permute.xlu0 %1374  ;;  %1686 = vmax.index.xlane.f32.xlu0 %v10762_v46 }
 0x1c3   :  { %1692 = vmax.index.xlane.f32.xlu1 %v10763_v49  ;;  %v1475_v49 = vsel %vm1474_vm3, %v1473_v9, %v1468_v17  ;;  %v1508_v34 = vrot.slane %v7559_v45, %v7652_v57  ;;  %v1515_v45 = vrot.slane %v7557_v41, %v7658_v44 }
 0x1c6   :  { %v7563_v10 = vpop.permute.xlu1 %1383  ;;  %v7565_v54 = vpop.permute.xlu0 %1380  ;;  %1690 = vmax.index.xlane.f32.xlu0 %v10764_v52 }
 0x1c7   :  { %1696 = vmax.index.xlane.f32.xlu1 %v10766_v50  ;;  %v1482_v50 = vsel %vm1481_vm4, %v1480_v19, %v1475_v49 }
 0x1c8   :  { %v1489_v39 = vsel %vm1488_vm5, %v1487_v27, %v1482_v50 }
 0x1ca   :  { %v7572_v48 = vpop.permute.xlu1 %1389  ;;  %v7574_v51 = vpop.permute.xlu0 %1386  ;;  %1694 = vmax.index.xlane.f32.xlu0 %v10767_v53  ;;  %v1494_v53 = vrot.slane %v7553_v35, %v7634_v20  ;;  %v1501_v35 = vrot.slane %v7551_v32, %v7640_v40 }
 0x1ce   :  { %v1396_v14 = vpop.permute.xlu1 %1395  ;;  %v7580_v37 = vpop.permute.xlu0 %1392  ;;  %1698 = vmax.index.xlane.f32.xlu0 %v10768_v43  ;;  %v1532_v43 = vadd.s32 4294967192, %v7569_v56 }
 0x1cf   :  { %v1556_v60 = vrot.slane %v1396_v14, %v7588_v38 }
 0x1d0   :  { %v7688_v13 = vsub.s32 %v1532_v43, %v10769_v2 }
 0x1d2   :  { %v1402_v3 = vpop.permute.xlu1 %1401  ;;  %v1399_v30 = vpop.permute.xlu0 %1398  ;;  %10783 = vst [vmem:[#allocation49_spill] sm:$0xff] %v7688_v13  ;;  %v1536_v28 = vrot.slane %v7574_v51, %v7688_v13 }
 0x1d3   :  { %v1560_v26 = vrot.slane %v1399_v30, %v7584_v42  ;;  %v1565_v58 = vrot.slane %v1402_v3, %v7592_v47  ;;  %v1496_v30 = vsel %vm1495_vm6, %v1494_v53, %v1489_v39  ;;  %v10787_v39 = vld [vmem:[#allocation21_spill] sm:$0xff] }
 0x1d4   :  { %v1503_v59 = vsel %vm1502_vm7, %v1501_v35, %v1496_v30 }
 0x1d5   :  { %v1561_v61 = vsel %vm1453_vm0, %v1560_v26, %v1556_v60  ;;  %v1539_v26 = vadd.s32 4294967184, %v7569_v56 }
 0x1d6   :  { %v1408_v25 = vpop.permute.xlu1 %1407  ;;  %v1405_v6 = vpop.permute.xlu0 %1404  ;;  %v1566_v16 = vsel %vm1460_vm1, %v1565_v58, %v1561_v61  ;;  %v1546_v58 = vadd.s32 4294967176, %v7569_v56  ;;  %v1522_v56 = vrot.slane %v7565_v54, %v7670_v62 }
 0x1d7   :  { %v1570_v7 = vrot.slane %v1405_v6, %v7596_v33  ;;  %v1575_v15 = vrot.slane %v1408_v25, %v7609_v63  ;;  %v1510_v6 = vsel %vm1509_vm8, %v1508_v34, %v1503_v59  ;;  %v7692_v41 = vsub.s32 %v1539_v26, %v10769_v2  ;;  %v10789_v34 = vld [vmem:[#allocation23_spill] sm:$0xff]  ;;  %v10790_v26 = vld [vmem:[#allocation24_spill] sm:$0xff] }
 0x1d8   :  { %v1517_v17 = vsel %vm1516_vm9, %v1515_v45, %v1510_v6  ;;  %v10793_v59 = vld [vmem:[#allocation27_spill] sm:$0xff] }
 0x1d9   :  { %v1571_v23 = vsel %vm1467_vm2, %v1570_v7, %v1566_v16  ;;  %10784 = vst [vmem:[#allocation51_spill] sm:$0xff] %v7692_v41  ;;  %v1529_v16 = vrot.slane %v7563_v10, %v7676_v22  ;;  %v1543_v27 = vrot.slane %v7572_v48, %v7692_v41 }
 0x1da   :  { %v1414_v31 = vpop.permute.xlu1 %1413  ;;  %v1411_v36 = vpop.permute.xlu0 %1410  ;;  %v1576_v55 = vsel %vm1474_vm3, %v1575_v15, %v1571_v23  ;;  %v1524_v23 = vsel %vm1523_vm10, %v1522_v56, %v1517_v17  ;;  %v10795_v56 = vld [vmem:[#allocation29_spill] sm:$0xff] }
 0x1db   :  { %v1580_v46 = vrot.slane %v1411_v36, %v7615_v29  ;;  %v1585_v52 = vrot.slane %v1414_v31, %v7622_v21  ;;  %v7704_v31 = vsub.s32 %v1546_v58, %v10769_v2  ;;  %v1531_v49 = vsel %vm1530_vm11, %v1529_v16, %v1524_v23  ;;  %v10799_v23 = vld [vmem:[#allocation33_spill] sm:$0xff] }
 0x1dc   :  { %v1538_v51 = vsel %vm1537_vm12, %v1536_v28, %v1531_v49 }
 0x1dd   :  { %v1581_v11 = vsel %vm1481_vm4, %v1580_v46, %v1576_v55  ;;  %10785 = vst [vmem:[#allocation19_spill] sm:$0xff] %v7704_v31  ;;  %v1550_v2 = vrot.slane %v7580_v37, %v7704_v31  ;;  %v1545_v48 = vsel %vm1544_vm13, %v1543_v27, %v1538_v51  ;;  %v10786_v37 = vld [vmem:[#allocation20_spill] sm:$0xff]  ;;  %v10803_v51 = vld [vmem:[#allocation37_spill] sm:$0xff] }
 0x1de   :  { %v1420_v24 = vpop.permute.xlu1 %1419  ;;  %v1417_v14 = vpop.permute.xlu0 %1416  ;;  %v1586_v3 = vsel %vm1488_vm5, %v1585_v52, %v1581_v11 }
 0x1df   :  { %v1590_v0 = vrot.slane %v1417_v14, %v7634_v20  ;;  %v1595_v1 = vrot.slane %v1420_v24, %v7640_v40  ;;  %v1552_v24 = vsel %vm1551_vm14, %v1550_v2, %v1545_v48 }
 0x1e1   :  { %v1591_v60 = vsel %vm1495_vm6, %v1590_v0, %v1586_v3  ;;  %v10788_v3 = vld [vmem:[#allocation25_spill] sm:$0xff] }
 0x1e2   :  { %v1426_v32 = vpop.permute.xlu1 %1425  ;;  %v1423_v5 = vpop.permute.xlu0 %1422  ;;  %v1596_v25 = vsel %vm1502_vm7, %v1595_v1, %v1591_v60 }
 0x1e3   :  { %v1600_v61 = vrot.slane %v1423_v5, %v7652_v57  ;;  %v1605_v12 = vrot.slane %v1426_v32, %v7658_v44  ;;  %v10791_v5 = vld [vmem:[#allocation22_spill] sm:$0xff] }
 0x1e5   :  { %v1601_v7 = vsel %vm1509_vm8, %v1600_v61, %v1596_v25  ;;  %v10792_v61 = vld [vmem:[#allocation26_spill] sm:$0xff]  ;;  %v10794_v25 = vld [vmem:[#allocation28_spill] sm:$0xff] }
 0x1e6   :  { %v1432_v8 = vpop.permute.xlu1 %1431  ;;  %v1429_v9 = vpop.permute.xlu0 %1428  ;;  %v1606_v19 = vsel %vm1516_vm9, %v1605_v12, %v1601_v7 }
 0x1e7   :  { %v1610_v15 = vrot.slane %v1429_v9, %v7670_v62  ;;  %v1615_v54 = vrot.slane %v1432_v8, %v7676_v22  ;;  %v10796_v8 = vld [vmem:[#allocation30_spill] sm:$0xff] }
 0x1e9   :  { %v1611_v36 = vsel %vm1523_vm10, %v1610_v15, %v1606_v19  ;;  %v10797_v15 = vld [vmem:[#allocation31_spill] sm:$0xff] }
 0x1ea   :  { %v1438_v18 = vpop.permute.xlu1 %1437  ;;  %v1435_v46 = vpop.permute.xlu0 %1434  ;;  %v1616_v55 = vsel %vm1530_vm11, %v1615_v54, %v1611_v36  ;;  %v10798_v54 = vld [vmem:[#allocation32_spill] sm:$0xff] }
 0x1eb   :  { %v1620_v10 = vrot.slane %v1435_v46, %v7688_v13  ;;  %v1625_v52 = vrot.slane %v1438_v18, %v7692_v41  ;;  %v10800_v18 = vld [vmem:[#allocation34_spill] sm:$0xff] }
 0x1ed   :  { %v1621_v50 = vsel %vm1537_vm12, %v1620_v10, %v1616_v55  ;;  %v10801_v10 = vld [vmem:[#allocation35_spill] sm:$0xff] }
 0x1ee   :  { %v1441_v53 = vpop.permute.xlu0 %1440  ;;  %v1626_v4 = vsel %vm1544_vm13, %v1625_v52, %v1621_v50  ;;  %v10802_v52 = vld [vmem:[#allocation36_spill] sm:$0xff] }
 0x1ef   :  { %v1630_v11 = vrot.slane %v1441_v53, %v7704_v31 }
 0x1f1   :  { %v1631_v14 = vsel %vm1551_vm14, %v1630_v11, %v1626_v4 }
 0x1f2   :  { %v1633_v43 = vsel %vm1632_vm15, %v1631_v14, %v1552_v24 }
 0x1f3   :  { %1635 = vst [vmem:[#allocation2] sm:$0x3] %v1633_v43 }
 0x1fa   :  { %v6977_v0 = vld.sshfl [vmem:[#allocation2] sm:$0x11 pattern:$0x75316420] }
 0x1fb   :  { %v1877_v35 = vrot.slane %v6977_v0, %v10786_v37  ;;  %v1870_v17 = vcombine.high %v6977_v0, %v6977_v0 }
 0x1fd   :  { %v1888_v1 = vrot.slane %v1877_v35, %v10787_v39  ;;  %v1884_v36 = vrot.slane %v1870_v17, %v10786_v37 }
 0x1ff   :  { %v7726_v30 = vadd.f32 %v1888_v1, %v10788_v3  ;;  %v7729_v60 = vadd.f32 %v1888_v1, %v10789_v34  ;;  %v7734_v32 = vadd.f32 %v1888_v1, %v10790_v26  ;;  %v7737_v58 = vadd.f32 %v1888_v1, %v10791_v5 }
 0x200   :  { %v7742_v45 = vadd.f32 %v1888_v1, %v10792_v61  ;;  %v7745_v12 = vadd.f32 %v1888_v1, %v10793_v59  ;;  %v7750_v6 = vadd.f32 %v1888_v1, %v10794_v25  ;;  %v7753_v7 = vadd.f32 %v1888_v1, %v10795_v56 }
 0x201   :  { %1929 = vmax.xlane.f32.xlu0 %v7726_v30  ;;  %1927 = vmax.xlane.f32.xlu1 %v7729_v60  ;;  %v7758_v9 = vadd.f32 %v1888_v1, %v10796_v8  ;;  %v7761_v16 = vadd.f32 %v1888_v1, %v10797_v15  ;;  %v7766_v19 = vadd.f32 %v1888_v1, %v10798_v54 }
 0x202   :  { %v7769_v28 = vadd.f32 %v1888_v1, %v10799_v23  ;;  %v7775_v46 = vadd.f32 %v1888_v1, %v10800_v18  ;;  %v7778_v27 = vadd.f32 %v1888_v1, %v10801_v10  ;;  %v1892_v49 = vrot.slane %v1884_v36, %v10787_v39 }
 0x203   :  { %v7784_v55 = vadd.f32 %v1888_v1, %v10802_v52  ;;  %v7787_v2 = vadd.f32 %v1888_v1, %v10803_v51 }
 0x204   :  { %v7792_v11 = vadd.f32 %v1892_v49, %v10788_v3  ;;  %v7795_v48 = vadd.f32 %v1892_v49, %v10789_v34  ;;  %v7800_v14 = vadd.f32 %v1892_v49, %v10790_v26  ;;  %v7803_v43 = vadd.f32 %v1892_v49, %v10791_v5 }
 0x205   :  { %1933 = vmax.xlane.f32.xlu0 %v7734_v32  ;;  %1931 = vmax.xlane.f32.xlu1 %v7737_v58  ;;  %v7808_v1 = vadd.f32 %v1892_v49, %v10792_v61  ;;  %v7811_v3 = vadd.f32 %v1892_v49, %v10793_v59  ;;  %v7818_v26 = vadd.f32 %v1892_v49, %v10794_v25 }
 0x206   :  { %10804 = vst [vmem:[#allocation25_spill] sm:$0xff] %v7792_v11  ;;  %10805 = vst [vmem:[#allocation23_spill] sm:$0xff] %v7795_v48  ;;  %v7821_v5 = vadd.f32 %v1892_v49, %v10795_v56  ;;  %v7833_v25 = vadd.f32 %v1892_v49, %v10797_v15 }
 0x207   :  { %10806 = vst [vmem:[#allocation24_spill] sm:$0xff] %v7800_v14  ;;  %10807 = vst [vmem:[#allocation22_spill] sm:$0xff] %v7803_v43 }
 0x208   :  { %10808 = vst [vmem:[#allocation26_spill] sm:$0xff] %v7808_v1  ;;  %10809 = vst [vmem:[#allocation27_spill] sm:$0xff] %v7811_v3 }
 0x209   :  { %1937 = vmax.xlane.f32.xlu0 %v7742_v45  ;;  %1935 = vmax.xlane.f32.xlu1 %v7745_v12  ;;  %10810 = vst [vmem:[#allocation28_spill] sm:$0xff] %v7818_v26  ;;  %10811 = vst [vmem:[#allocation29_spill] sm:$0xff] %v7821_v5 }
 0x20a   :  { %10813 = vst [vmem:[#allocation31_spill] sm:$0xff] %v7833_v25 }
 0x20d   :  { %1941 = vmax.xlane.f32.xlu0 %v7750_v6  ;;  %1939 = vmax.xlane.f32.xlu1 %v7753_v7 }
 0x211   :  { %1945 = vmax.xlane.f32.xlu0 %v7758_v9  ;;  %1943 = vmax.xlane.f32.xlu1 %v7761_v16 }
 0x215   :  { %1949 = vmax.xlane.f32.xlu0 %v7766_v19  ;;  %1947 = vmax.xlane.f32.xlu1 %v7769_v28 }
 0x219   :  { %1953 = vmax.xlane.f32.xlu0 %v7775_v46  ;;  %1951 = vmax.xlane.f32.xlu1 %v7778_v27 }
 0x21b   :  { %v1639_v50 = vpop.xlane.xlu0 %1638 }
 0x21c   :  { %v1637_v53 = vpop.xlane.xlu1 %1636  ;;  %v1707_v61 = vrot.slane %v1639_v50, %v7584_v42  ;;  %v7842_v50 = vadd.f32 %v1892_v49, %v10798_v54  ;;  %v7857_v54 = vadd.f32 %v1892_v49, %v10800_v18  ;;  %v7873_v18 = vadd.f32 %v1892_v49, %v10803_v51 }
 0x21d   :  { %1957 = vmax.xlane.f32.xlu0 %v7784_v55  ;;  %1955 = vmax.xlane.f32.xlu1 %v7787_v2  ;;  %v1703_v59 = vrot.slane %v1637_v53, %v7588_v38 }
 0x21e   :  { %10814 = vst [vmem:[#allocation32_spill] sm:$0xff] %v7842_v50  ;;  %10816 = vst [vmem:[#allocation34_spill] sm:$0xff] %v7857_v54 }
 0x21f   :  { %v1641_v4 = vpop.xlane.xlu0 %1640  ;;  %10819 = vst [vmem:[#allocation37_spill] sm:$0xff] %v7873_v18 }
 0x220   :  { %v1645_v24 = vpop.xlane.xlu1 %1644 }
 0x221   :  { %1961 = vmax.xlane.f32.xlu0 %v7792_v11  ;;  %1959 = vmax.xlane.f32.xlu1 %v7795_v48 }
 0x223   :  { %v1643_v0 = vpop.xlane.xlu0 %1642 }
 0x224   :  { %v1649_v35 = vpop.xlane.xlu1 %1648  ;;  %v1717_v15 = vrot.slane %v1643_v0, %v7596_v33 }
 0x225   :  { %1965 = vmax.xlane.f32.xlu0 %v7800_v14  ;;  %1963 = vmax.xlane.f32.xlu1 %v7803_v43  ;;  %v1712_v14 = vrot.slane %v1641_v4, %v7592_v47 }
 0x227   :  { %v1647_v34 = vpop.xlane.xlu0 %1646 }
 0x228   :  { %v7813_v17 = vpop.xlane.xlu1 %1652 }
 0x229   :  { %1969 = vmax.xlane.f32.xlu0 %v7808_v1  ;;  %1967 = vmax.xlane.f32.xlu1 %v7811_v3  ;;  %v7830_v1 = vadd.f32 %v1892_v49, %v10796_v8  ;;  %v7845_v8 = vadd.f32 %v1892_v49, %v10799_v23  ;;  %v7860_v23 = vadd.f32 %v1892_v49, %v10801_v10 }
 0x22b   :  { %v1651_v36 = vpop.xlane.xlu0 %1650  ;;  %10812 = vst [vmem:[#allocation30_spill] sm:$0xff] %v7830_v1  ;;  %10815 = vst [vmem:[#allocation33_spill] sm:$0xff] %v7845_v8 }
 0x22c   :  { %v7823_v37 = vpop.xlane.xlu1 %1656  ;;  %10817 = vst [vmem:[#allocation35_spill] sm:$0xff] %v7860_v23 }
 0x22d   :  { %1973 = vmax.xlane.f32.xlu0 %v7818_v26  ;;  %1971 = vmax.xlane.f32.xlu1 %v7821_v5  ;;  %v1708_v26 = vsel %vm1453_vm0, %v1707_v61, %v1703_v59  ;;  %v1722_v61 = vrot.slane %v1645_v24, %v7609_v63  ;;  %v7870_v24 = vadd.f32 %v1892_v49, %v10802_v52 }
 0x22e   :  { %v1713_v4 = vsel %vm1460_vm1, %v1712_v14, %v1708_v26  ;;  %v1727_v14 = vrot.slane %v1647_v34, %v7615_v29 }
 0x22f   :  { %v1655_v3 = vpop.xlane.xlu0 %1654  ;;  %v1718_v0 = vsel %vm1467_vm2, %v1717_v15, %v1713_v4  ;;  %10818 = vst [vmem:[#allocation36_spill] sm:$0xff] %v7870_v24  ;;  %v1732_v15 = vrot.slane %v1649_v35, %v7622_v21 }
 0x230   :  { %v7835_v56 = vpop.xlane.xlu1 %1660  ;;  %v1723_v26 = vsel %vm1474_vm3, %v1722_v61, %v1718_v0  ;;  %v1737_v0 = vrot.slane %v1651_v36, %v7634_v20 }
 0x231   :  { %1977 = vmax.xlane.f32.xlu0 %v7830_v1  ;;  %1975 = vmax.xlane.f32.xlu1 %v7833_v25  ;;  %v1728_v4 = vsel %vm1481_vm4, %v1727_v14, %v1723_v26 }
 0x233   :  { %v7847_v53 = vpop.xlane.xlu0 %1658 }
 0x234   :  { %v7850_v5 = vpop.xlane.xlu1 %1664 }
 0x235   :  { %1981 = vmax.xlane.f32.xlu0 %v7842_v50  ;;  %1979 = vmax.xlane.f32.xlu1 %v7845_v8 }
 0x237   :  { %v7862_v59 = vpop.xlane.xlu0 %1662 }
 0x238   :  { %v1669_v1 = vpop.xlane.xlu1 %1668 }
 0x239   :  { %1985 = vmax.xlane.f32.xlu0 %v7857_v54  ;;  %1983 = vmax.xlane.f32.xlu1 %v7860_v23  ;;  %v1782_v34 = vrot.slane %v1669_v1, %v7588_v38  ;;  %v1733_v54 = vsel %vm1488_vm5, %v1732_v15, %v1728_v4 }
 0x23a   :  { %v1738_v26 = vsel %vm1495_vm6, %v1737_v0, %v1733_v54  ;;  %v1752_v54 = vrot.slane %v7823_v37, %v7658_v44 }
 0x23b   :  { %v7875_v10 = vpop.xlane.xlu0 %1666 }
 0x23c   :  { %v1673_v50 = vpop.xlane.xlu1 %1672 }
 0x23d   :  { %1989 = vmax.xlane.f32.xlu0 %v7870_v24  ;;  %1987 = vmax.xlane.f32.xlu1 %v7873_v18  ;;  %v1791_v52 = vrot.slane %v1673_v50, %v7592_v47  ;;  %v1742_v24 = vrot.slane %v7813_v17, %v7640_v40 }
 0x23f   :  { %v1671_v61 = vpop.xlane.xlu0 %1670  ;;  %v1743_v15 = vsel %vm1502_vm7, %v1742_v24, %v1738_v26 }
 0x240   :  { %v1786_v49 = vrot.slane %v1671_v61, %v7584_v42  ;;  %v1677_v51 = vpop.xlane.xlu1 %1676  ;;  %v1747_v61 = vrot.slane %v1655_v3, %v7652_v57 }
 0x241   :  { %v1801_v1 = vrot.slane %v1677_v51, %v7609_v63 }
 0x242   :  { %v1787_v35 = vsel %vm1453_vm0, %v1786_v49, %v1782_v34  ;;  %v1748_v0 = vsel %vm1509_vm8, %v1747_v61, %v1743_v15 }
 0x243   :  { %v1792_v18 = vsel %vm1460_vm1, %v1791_v52, %v1787_v35  ;;  %v1675_v14 = vpop.xlane.xlu0 %1674  ;;  %v1992_v52 = vld [vmem:[#allocation3 + $0x4] sm:$0x3] }
 0x244   :  { %v1796_v50 = vrot.slane %v1675_v14, %v7596_v33  ;;  %v1681_v36 = vpop.xlane.xlu1 %1680  ;;  %v1757_v14 = vrot.slane %v7847_v53, %v7670_v62 }
 0x245   :  { %v1811_v17 = vrot.slane %v1681_v36, %v7622_v21  ;;  %v1762_v36 = vrot.slane %v7835_v56, %v7676_v22 }
 0x246   :  { %v1797_v47 = vsel %vm1467_vm2, %v1796_v50, %v1792_v18  ;;  %v1997_v18 = vrot.slane %v1992_v52, %v10787_v39  ;;  %v1753_v50 = vsel %vm1516_vm9, %v1752_v54, %v1748_v0 }
 0x247   :  { %v1802_v4 = vsel %vm1474_vm3, %v1801_v1, %v1797_v47  ;;  %v1679_v34 = vpop.xlane.xlu0 %1678 }
 0x248   :  { %v1806_v49 = vrot.slane %v1679_v34, %v7615_v29  ;;  %v1685_v51 = vpop.xlane.xlu1 %1684  ;;  %v1758_v34 = vsel %vm1523_vm10, %v1757_v14, %v1753_v50 }
 0x249   :  { %v1821_v47 = vrot.slane %v1685_v51, %v7640_v40  ;;  %v1763_v54 = vsel %vm1530_vm11, %v1762_v36, %v1758_v34 }
 0x24a   :  { %v1807_v3 = vsel %vm1481_vm4, %v1806_v49, %v1802_v4  ;;  %v1767_v49 = vrot.slane %v7862_v59, %v7688_v13 }
 0x24b   :  { %v1812_v24 = vsel %vm1488_vm5, %v1811_v17, %v1807_v3  ;;  %v1683_v35 = vpop.xlane.xlu0 %1682 }
 0x24c   :  { %v1816_v1 = vrot.slane %v1683_v35, %v7634_v20  ;;  %v1689_v26 = vpop.xlane.xlu1 %1688  ;;  %v1768_v14 = vsel %vm1537_vm12, %v1767_v49, %v1763_v54  ;;  %v10820_v49 = vld [vmem:[#allocation53_spill] sm:$0xff] }
 0x24d   :  { %v1831_v4 = vrot.slane %v1689_v26, %v7658_v44 }
 0x24e   :  { %v1817_v37 = vsel %vm1495_vm6, %v1816_v1, %v1812_v24  ;;  %1999 = vbcast.lane.b32.xlu1 %v1997_v18, 256 }
 0x24f   :  { %v1822_v61 = vsel %vm1502_vm7, %v1821_v47, %v1817_v37  ;;  %v1687_v15 = vpop.xlane.xlu0 %1686  ;;  %v1772_v47 = vrot.slane %v7850_v5, %v7692_v41  ;;  %v1777_v37 = vrot.slane %v7875_v10, %v7704_v31 }
 0x250   :  { %v1826_v53 = vrot.slane %v1687_v15, %v7652_v57  ;;  %v1693_v17 = vpop.xlane.xlu1 %1692 }
 0x251   :  { %v1841_v3 = vrot.slane %v1693_v17, %v7676_v22 }
 0x252   :  { %v1827_v51 = vsel %vm1509_vm8, %v1826_v53, %v1822_v61  ;;  %2007 = vbcast.lane.b32.xlu1 %v1997_v18, 272  ;;  %v1773_v61 = vsel %vm1544_vm13, %v1772_v47, %v1768_v14 }
 0x253   :  { %v1832_v56 = vsel %vm1516_vm9, %v1831_v4, %v1827_v51  ;;  %v1691_v0 = vpop.xlane.xlu0 %1690  ;;  %2003 = vbcast.lane.b32.xlu0 %v1997_v18, 264  ;;  %v1778_v34 = vsel %vm1551_vm14, %v1777_v37, %v1773_v61  ;;  %v2064_v51 = vrot.slane %v1992_v52, %v10820_v49 }
 0x254   :  { %v1836_v24 = vrot.slane %v1691_v0, %v7670_v62  ;;  %v1697_v35 = vpop.xlane.xlu1 %1696 }
 0x255   :  { %v1851_v50 = vrot.slane %v1697_v35, %v7692_v41 }
 0x256   :  { %v1837_v59 = vsel %vm1523_vm10, %v1836_v24, %v1832_v56  ;;  %2011 = vbcast.lane.b32.xlu1 %v1997_v18, 280 }
 0x257   :  { %v1842_v1 = vsel %vm1530_vm11, %v1841_v3, %v1837_v59  ;;  %v1695_v26 = vpop.xlane.xlu0 %1694  ;;  %2019 = vbcast.lane.b32.xlu0 %v1997_v18, 296 }
 0x258   :  { %v1846_v36 = vrot.slane %v1695_v26, %v7688_v13 }
 0x25a   :  { %v1847_v5 = vsel %vm1537_vm12, %v1846_v36, %v1842_v1  ;;  %2015 = vbcast.lane.b32.xlu1 %v1997_v18, 288 }
 0x25b   :  { %v1852_v15 = vsel %vm1544_vm13, %v1851_v50, %v1847_v5  ;;  %v1699_v4 = vpop.xlane.xlu0 %1698  ;;  %2027 = vbcast.lane.b32.xlu0 %v1997_v18, 312 }
 0x25c   :  { %v1856_v53 = vrot.slane %v1699_v4, %v7704_v31 }
 0x25e   :  { %v1857_v17 = vsel %vm1551_vm14, %v1856_v53, %v1852_v15  ;;  %2023 = vbcast.lane.b32.xlu1 %v1997_v18, 304 }
 0x25f   :  { %v1858_v10 = vsel %vm1632_vm15, %v1857_v17, %v1778_v34  ;;  %2035 = vbcast.lane.b32.xlu0 %v1997_v18, 328 }
 0x260   :  { %1860 = vst [vmem:[#allocation11 + $0x2] sm:$0x3] %v1858_v10 }
 0x262   :  { %2031 = vbcast.lane.b32.xlu1 %v1997_v18, 320 }
 0x263   :  { %2043 = vbcast.lane.b32.xlu0 %v1997_v18, 344 }
 0x266   :  { %2039 = vbcast.lane.b32.xlu1 %v1997_v18, 336 }
 0x267   :  { %2051 = vbcast.lane.b32.xlu0 %v1997_v18, 360 }
 0x26a   :  { %2047 = vbcast.lane.b32.xlu1 %v1997_v18, 352 }
 0x26b   :  { %2059 = vbcast.lane.b32.xlu0 %v1997_v18, 376 }
 0x26e   :  { %2055 = vbcast.lane.b32.xlu1 %v1997_v18, 368 }
 0x26f   :  { %2070 = vbcast.lane.b32.xlu0 %v2064_v51, 264 }
 0x272   :  { %2066 = vbcast.lane.b32.xlu1 %v2064_v51, 256 }
 0x273   :  { %2078 = vbcast.lane.b32.xlu0 %v2064_v51, 280 }
 0x276   :  { %2074 = vbcast.lane.b32.xlu1 %v2064_v51, 272 }
 0x277   :  { %2086 = vbcast.lane.b32.xlu0 %v2064_v51, 296 }
 0x27a   :  { %2082 = vbcast.lane.b32.xlu1 %v2064_v51, 288 }
 0x27b   :  { %2094 = vbcast.lane.b32.xlu0 %v2064_v51, 312 }
 0x27e   :  { %2090 = vbcast.lane.b32.xlu1 %v2064_v51, 304 }
 0x27f   :  { %2102 = vbcast.lane.b32.xlu0 %v2064_v51, 328 }
 0x282   :  { %2098 = vbcast.lane.b32.xlu1 %v2064_v51, 320 }
 0x283   :  { %2110 = vbcast.lane.b32.xlu0 %v2064_v51, 344 }
 0x286   :  { %2106 = vbcast.lane.b32.xlu1 %v2064_v51, 336 }
 0x287   :  { %2118 = vbcast.lane.b32.xlu0 %v2064_v51, 360 }
 0x28a   :  { %2114 = vbcast.lane.b32.xlu1 %v2064_v51, 352 }
 0x28b   :  { %2126 = vbcast.lane.b32.xlu0 %v2064_v51, 376 }
 0x28e   :  { %v1928_v54 = vpop.xlane.xlu1 %1927  ;;  %v1930_v56 = vpop.xlane.xlu0 %1929  ;;  %2122 = vbcast.lane.b32.xlu1 %v2064_v51, 368 }
 0x292   :  { %v1932_v52 = vpop.xlane.xlu1 %1931  ;;  %v1934_v18 = vpop.xlane.xlu0 %1933 }
 0x296   :  { %v1936_v0 = vpop.xlane.xlu1 %1935  ;;  %v1938_v3 = vpop.xlane.xlu0 %1937 }
 0x29a   :  { %v1940_v24 = vpop.xlane.xlu1 %1939  ;;  %v1942_v35 = vpop.xlane.xlu0 %1941 }
 0x29e   :  { %v1944_v47 = vpop.xlane.xlu1 %1943  ;;  %v1946_v14 = vpop.xlane.xlu0 %1945 }
 0x2a2   :  { %v1948_v59 = vpop.xlane.xlu1 %1947  ;;  %v1950_v1 = vpop.xlane.xlu0 %1949 }
 0x2a6   :  { %v1952_v26 = vpop.xlane.xlu1 %1951  ;;  %v1954_v50 = vpop.xlane.xlu0 %1953 }
 0x2aa   :  { %v7941_v37 = vpop.xlane.xlu1 %1955  ;;  %v7943_v36 = vpop.xlane.xlu0 %1957 }
 0x2ae   :  { %v7945_v61 = vpop.xlane.xlu1 %1959  ;;  %v7947_v5 = vpop.xlane.xlu0 %1961 }
 0x2b2   :  { %v7949_v15 = vpop.xlane.xlu1 %1963  ;;  %v7951_v4 = vpop.xlane.xlu0 %1965 }
 0x2b6   :  { %v7953_v34 = vpop.xlane.xlu1 %1967  ;;  %v7955_v53 = vpop.xlane.xlu0 %1969 }
 0x2ba   :  { %v7957_v17 = vpop.xlane.xlu1 %1971  ;;  %v7959_v10 = vpop.xlane.xlu0 %1973 }
 0x2be   :  { %v7961_v51 = vpop.xlane.xlu1 %1975  ;;  %v7963_v49 = vpop.xlane.xlu0 %1977 }
 0x2c2   :  { %v7965_v39 = vpop.xlane.xlu1 %1979  ;;  %v7967_v31 = vpop.xlane.xlu0 %1981 }
 0x2c6   :  { %v7969_v41 = vpop.xlane.xlu1 %1983  ;;  %v7971_v13 = vpop.xlane.xlu0 %1985 }
 0x2ca   :  { %v7973_v22 = vpop.xlane.xlu1 %1987  ;;  %v7975_v62 = vpop.xlane.xlu0 %1989 }
 0x2ce   :  { %v2000_v44 = vpop.permute.xlu1 %1999  ;;  %v2004_v57 = vpop.permute.xlu0 %2003 }
 0x2cf   :  { %v2160_v40 = vadd.f32 %v2000_v44, %v1928_v54  ;;  %v2161_v20 = vadd.f32 %v2004_v57, %v1930_v56 }
 0x2d1   :  { %2225 = vperm.xlu1 %6997, %v2160_v40   ;;  %2228 = vperm.xlu0 %6996, %v2161_v20  }
 0x2d2   :  { %v2008_v21 = vpop.permute.xlu1 %2007  ;;  %v2020_v29 = vpop.permute.xlu0 %2019 }
 0x2d3   :  { %v2162_v63 = vadd.f32 %v2008_v21, %v1932_v52  ;;  %v2165_v25 = vadd.f32 %v2020_v29, %v1938_v3 }
 0x2d5   :  { %2231 = vperm.xlu1 %6997, %v2162_v63  }
 0x2d6   :  { %v2012_v33 = vpop.permute.xlu1 %2011  ;;  %v2028_v42 = vpop.permute.xlu0 %2027 }
 0x2d7   :  { %v2163_v38 = vadd.f32 %v2012_v33, %v1934_v18  ;;  %v2167_v44 = vadd.f32 %v2028_v42, %v1942_v35 }
 0x2d9   :  { %2234 = vperm.xlu0 %6996, %v2163_v38  }
 0x2da   :  { %v2016_v23 = vpop.permute.xlu1 %2015  ;;  %v2036_v8 = vpop.permute.xlu0 %2035 }
 0x2db   :  { %v2164_v43 = vadd.f32 %v2016_v23, %v1936_v0  ;;  %v2169_v21 = vadd.f32 %v2036_v8, %v1946_v14 }
 0x2dd   :  { %2237 = vperm.xlu1 %6997, %v2164_v43   ;;  %2240 = vperm.xlu0 %6996, %v2165_v25  }
 0x2de   :  { %v2024_v11 = vpop.permute.xlu1 %2023  ;;  %v2044_v48 = vpop.permute.xlu0 %2043 }
 0x2df   :  { %v2166_v57 = vadd.f32 %v2024_v11, %v1940_v24  ;;  %v2171_v54 = vadd.f32 %v2044_v48, %v1950_v1 }
 0x2e1   :  { %2243 = vperm.xlu1 %6997, %v2166_v57   ;;  %2246 = vperm.xlu0 %6996, %v2167_v44  }
 0x2e2   :  { %v2032_v20 = vpop.permute.xlu1 %2031  ;;  %v2052_v40 = vpop.permute.xlu0 %2051 }
 0x2e3   :  { %v2168_v63 = vadd.f32 %v2032_v20, %v1944_v47  ;;  %v2173_v25 = vadd.f32 %v2052_v40, %v1954_v50 }
 0x2e5   :  { %2249 = vperm.xlu1 %6997, %v2168_v63   ;;  %2252 = vperm.xlu0 %6996, %v2169_v21  }
 0x2e6   :  { %v2040_v33 = vpop.permute.xlu1 %2039  ;;  %v2060_v38 = vpop.permute.xlu0 %2059 }
 0x2e7   :  { %v2170_v56 = vadd.f32 %v2040_v33, %v1948_v59  ;;  %v2175_v52 = vadd.f32 %v2060_v38, %v7943_v36  ;;  %v10832_v33 = vld [vmem:[#allocation32_spill] sm:$0xff] }
 0x2e9   :  { %2255 = vperm.xlu1 %6997, %v2170_v56   ;;  %2258 = vperm.xlu0 %6996, %v2171_v54   ;;  %v10833_v54 = vld [vmem:[#allocation35_spill] sm:$0xff] }
 0x2ea   :  { %v2048_v29 = vpop.permute.xlu1 %2047  ;;  %v2071_v43 = vpop.permute.xlu0 %2070 }
 0x2eb   :  { %v2172_v23 = vadd.f32 %v2048_v29, %v1952_v26  ;;  %v2177_v48 = vadd.f32 %v2071_v43, %v7947_v5  ;;  %v10834_v29 = vld [vmem:[#allocation34_spill] sm:$0xff] }
 0x2ed   :  { %2261 = vperm.xlu1 %6997, %v2172_v23   ;;  %2264 = vperm.xlu0 %6996, %v2173_v25   ;;  %v10835_v25 = vld [vmem:[#allocation37_spill] sm:$0xff] }
 0x2ee   :  { %v2056_v42 = vpop.permute.xlu1 %2055  ;;  %v2079_v11 = vpop.permute.xlu0 %2078 }
 0x2ef   :  { %v2174_v8 = vadd.f32 %v2056_v42, %v7941_v37  ;;  %v2179_v47 = vadd.f32 %v2079_v11, %v7951_v4  ;;  %v10836_v42 = vld [vmem:[#allocation36_spill] sm:$0xff] }
 0x2f1   :  { %2267 = vperm.xlu1 %6997, %v2174_v8   ;;  %2270 = vperm.xlu0 %6996, %v2175_v52  }
 0x2f2   :  { %v2067_v18 = vpop.permute.xlu1 %2066  ;;  %v2087_v0 = vpop.permute.xlu0 %2086 }
 0x2f3   :  { %v2176_v3 = vadd.f32 %v2067_v18, %v7945_v61  ;;  %v2181_v26 = vadd.f32 %v2087_v0, %v7955_v53  ;;  %v10837_v18 = vld [vmem:[#allocation38_spill] sm:$0xff] }
 0x2f5   :  { %2273 = vperm.xlu1 %6997, %v2176_v3   ;;  %2276 = vperm.xlu0 %6996, %v2177_v48   ;;  %v10838_v48 = vld [vmem:[#allocation40_spill] sm:$0xff] }
 0x2f6   :  { %v2075_v24 = vpop.permute.xlu1 %2074  ;;  %v2095_v35 = vpop.permute.xlu0 %2094 }
 0x2f7   :  { %v2178_v14 = vadd.f32 %v2075_v24, %v7949_v15  ;;  %v2183_v36 = vadd.f32 %v2095_v35, %v7959_v10 }
 0x2f9   :  { %2279 = vperm.xlu1 %6997, %v2178_v14   ;;  %2282 = vperm.xlu0 %6996, %v2179_v47   ;;  %v10839_v47 = vld [vmem:[#allocation42_spill] sm:$0xff] }
 0x2fa   :  { %v2083_v59 = vpop.permute.xlu1 %2082  ;;  %v2103_v1 = vpop.permute.xlu0 %2102 }
 0x2fb   :  { %v2180_v50 = vadd.f32 %v2083_v59, %v7953_v34  ;;  %v2185_v15 = vadd.f32 %v2103_v1, %v7963_v49  ;;  %v10840_v59 = vld [vmem:[#allocation39_spill] sm:$0xff] }
 0x2fd   :  { %2285 = vperm.xlu1 %6997, %v2180_v50   ;;  %2288 = vperm.xlu0 %6996, %v2181_v26  }
 0x2fe   :  { %v2091_v37 = vpop.permute.xlu1 %2090  ;;  %v2111_v5 = vpop.permute.xlu0 %2110 }
 0x2ff   :  { %v2182_v61 = vadd.f32 %v2091_v37, %v7957_v17  ;;  %v2187_v34 = vadd.f32 %v2111_v5, %v7967_v31  ;;  %v10823_v31 = vld [vmem:[#allocation22_spill] sm:$0xff]  ;;  %v10841_v37 = vld [vmem:[#allocation44_spill] sm:$0xff] }
 0x301   :  { %2291 = vperm.xlu1 %6997, %v2182_v61   ;;  %2294 = vperm.xlu0 %6996, %v2183_v36  }
 0x302   :  { %v2099_v4 = vpop.permute.xlu1 %2098  ;;  %v2119_v53 = vpop.permute.xlu0 %2118 }
 0x303   :  { %v2184_v44 = vadd.f32 %v2099_v4, %v7961_v51  ;;  %v2189_v17 = vadd.f32 %v2119_v53, %v7971_v13 }
 0x305   :  { %2297 = vperm.xlu1 %6997, %v2184_v44   ;;  %2300 = vperm.xlu0 %6996, %v2185_v15  }
 0x306   :  { %v2107_v57 = vpop.permute.xlu1 %2106  ;;  %v2127_v21 = vpop.permute.xlu0 %2126 }
 0x307   :  { %v2186_v20 = vadd.f32 %v2107_v57, %v7965_v39  ;;  %v2191_v51 = vadd.f32 %v2127_v21, %v7975_v62  ;;  %v10821_v62 = vld [vmem:[#allocation23_spill] sm:$0xff]  ;;  %v10843_v21 = vld [vmem:[#allocation46_spill] sm:$0xff] }
 0x309   :  { %2303 = vperm.xlu1 %6997, %v2186_v20   ;;  %2306 = vperm.xlu0 %6996, %v2187_v34   ;;  %v10842_v34 = vld [vmem:[#allocation41_spill] sm:$0xff] }
 0x30a   :  { %v2115_v10 = vpop.permute.xlu1 %2114 }
 0x30b   :  { %v2188_v40 = vadd.f32 %v2115_v10, %v7969_v41  ;;  %v10822_v41 = vld [vmem:[#allocation25_spill] sm:$0xff] }
 0x30d   :  { %2309 = vperm.xlu1 %6997, %v2188_v40   ;;  %2312 = vperm.xlu0 %6996, %v2189_v17  }
 0x30e   :  { %v2123_v49 = vpop.permute.xlu1 %2122 }
 0x30f   :  { %v2190_v63 = vadd.f32 %v2123_v49, %v7973_v22 }
 0x311   :  { %2315 = vperm.xlu1 %6997, %v2190_v63   ;;  %2318 = vperm.xlu0 %6996, %v2191_v51  }
 0x330   :  { %2483 = vmax.index.xlane.f32.xlu0 %v7726_v30  ;;  %v10824_v30 = vld [vmem:[#allocation24_spill] sm:$0xff] }
 0x334   :  { %2485 = vmax.index.xlane.f32.xlu0 %v7737_v58 }
 0x335   :  { %2481 = vmax.index.xlane.f32.xlu1 %v7729_v60 }
 0x338   :  { %2487 = vmax.index.xlane.f32.xlu0 %v7734_v32  ;;  %v10825_v32 = vld [vmem:[#allocation27_spill] sm:$0xff] }
 0x339   :  { %2489 = vmax.index.xlane.f32.xlu1 %v7745_v12 }
 0x33c   :  { %2491 = vmax.index.xlane.f32.xlu0 %v7742_v45  ;;  %v10826_v45 = vld [vmem:[#allocation26_spill] sm:$0xff] }
 0x33d   :  { %2493 = vmax.index.xlane.f32.xlu1 %v7753_v7 }
 0x340   :  { %2495 = vmax.index.xlane.f32.xlu0 %v7750_v6  ;;  %v10827_v6 = vld [vmem:[#allocation29_spill] sm:$0xff] }
 0x341   :  { %2497 = vmax.index.xlane.f32.xlu1 %v7761_v16 }
 0x344   :  { %2499 = vmax.index.xlane.f32.xlu0 %v7758_v9  ;;  %v10828_v9 = vld [vmem:[#allocation28_spill] sm:$0xff] }
 0x345   :  { %2501 = vmax.index.xlane.f32.xlu1 %v7769_v28 }
 0x348   :  { %2503 = vmax.index.xlane.f32.xlu0 %v7766_v19  ;;  %v10829_v19 = vld [vmem:[#allocation31_spill] sm:$0xff] }
 0x349   :  { %2505 = vmax.index.xlane.f32.xlu1 %v7778_v27 }
 0x34c   :  { %2507 = vmax.index.xlane.f32.xlu0 %v7775_v46  ;;  %v10830_v46 = vld [vmem:[#allocation30_spill] sm:$0xff] }
 0x34d   :  { %2509 = vmax.index.xlane.f32.xlu1 %v7787_v2 }
 0x350   :  { %2511 = vmax.index.xlane.f32.xlu0 %v7784_v55  ;;  %v2226_v22 = vpop.permute.xlu1 %2225  ;;  %v2229_v13 = vpop.permute.xlu0 %2228  ;;  %v10831_v55 = vld [vmem:[#allocation33_spill] sm:$0xff] }
 0x351   :  { %2513 = vmax.index.xlane.f32.xlu1 %v10821_v62  ;;  %v2323_v0 = vrot.slane %v2226_v22, %v10837_v18  ;;  %v2327_v3 = vrot.slane %v2229_v13, %v10838_v48 }
 0x353   :  { %v2328_v5 = vsel %vm1453_vm0, %v2327_v3, %v2323_v0  ;;  %v10848_v0 = vld [vmem:[#allocation47_spill] sm:$0xff] }
 0x354   :  { %2515 = vmax.index.xlane.f32.xlu0 %v10822_v41  ;;  %v2232_v39 = vpop.permute.xlu1 %2231  ;;  %v10844_v41 = vld [vmem:[#allocation43_spill] sm:$0xff] }
 0x355   :  { %2517 = vmax.index.xlane.f32.xlu1 %v10823_v31  ;;  %v2332_v14 = vrot.slane %v2232_v39, %v10839_v47 }
 0x357   :  { %v2333_v44 = vsel %vm1460_vm1, %v2332_v14, %v2328_v5  ;;  %v10849_v14 = vld [vmem:[#allocation52_spill] sm:$0xff]  ;;  %v10850_v5 = vld [vmem:[#allocation49_spill] sm:$0xff] }
 0x358   :  { %2519 = vmax.index.xlane.f32.xlu0 %v10824_v30  ;;  %v2235_v60 = vpop.permute.xlu0 %2234 }
 0x359   :  { %2521 = vmax.index.xlane.f32.xlu1 %v10825_v32  ;;  %v2337_v1 = vrot.slane %v2235_v60, %v10840_v59  ;;  %v10845_v32 = vld [vmem:[#allocation48_spill] sm:$0xff] }
 0x35b   :  { %v2338_v57 = vsel %vm1467_vm2, %v2337_v1, %v2333_v44 }
 0x35c   :  { %v2238_v58 = vpop.permute.xlu1 %2237  ;;  %2523 = vmax.index.xlane.f32.xlu0 %v10826_v45  ;;  %v2241_v12 = vpop.permute.xlu0 %2240 }
 0x35d   :  { %2525 = vmax.index.xlane.f32.xlu1 %v10827_v6  ;;  %v2342_v36 = vrot.slane %v2238_v58, %v10841_v37  ;;  %v2347_v20 = vrot.slane %v2241_v12, %v10842_v34 }
 0x35f   :  { %v2343_v40 = vsel %vm1474_vm3, %v2342_v36, %v2338_v57 }
 0x360   :  { %v2244_v7 = vpop.permute.xlu1 %2243  ;;  %2527 = vmax.index.xlane.f32.xlu0 %v10828_v9  ;;  %v2247_v16 = vpop.permute.xlu0 %2246  ;;  %v2348_v13 = vsel %vm1481_vm4, %v2347_v20, %v2343_v40 }
 0x361   :  { %2529 = vmax.index.xlane.f32.xlu1 %v10829_v19  ;;  %v2352_v49 = vrot.slane %v2244_v7, %v10843_v21  ;;  %v2357_v31 = vrot.slane %v2247_v16, %v10844_v41  ;;  %v10846_v19 = vld [vmem:[#allocation45_spill] sm:$0xff] }
 0x363   :  { %v2353_v60 = vsel %vm1488_vm5, %v2352_v49, %v2348_v13  ;;  %v10852_v49 = vld [vmem:[#allocation19_spill] sm:$0xff] }
 0x364   :  { %v2250_v28 = vpop.permute.xlu1 %2249  ;;  %2531 = vmax.index.xlane.f32.xlu0 %v10830_v46  ;;  %v2253_v27 = vpop.permute.xlu0 %2252  ;;  %v2358_v9 = vsel %vm1495_vm6, %v2357_v31, %v2353_v60 }
 0x365   :  { %2533 = vmax.index.xlane.f32.xlu1 %v10831_v55  ;;  %v2362_v58 = vrot.slane %v2250_v28, %v10845_v32  ;;  %v2367_v46 = vrot.slane %v2253_v27, %v10846_v19 }
 0x368   :  { %v8022_v2 = vpop.permute.xlu1 %2255  ;;  %2535 = vmax.index.xlane.f32.xlu0 %v10832_v33  ;;  %v8025_v38 = vpop.permute.xlu0 %2258  ;;  %v2363_v33 = vsel %vm1502_vm7, %v2362_v58, %v2358_v9  ;;  %v10853_v58 = vld [vmem:[#allocation20_spill] sm:$0xff] }
 0x369   :  { %2537 = vmax.index.xlane.f32.xlu1 %v10833_v54  ;;  %v10847_v54 = vld [vmem:[#allocation50_spill] sm:$0xff]  ;;  %v2377_v27 = vrot.slane %v8025_v38, %v10848_v0 }
 0x36c   :  { %v8028_v56 = vpop.permute.xlu1 %2261  ;;  %2539 = vmax.index.xlane.f32.xlu0 %v10834_v29  ;;  %v8031_v43 = vpop.permute.xlu0 %2264  ;;  %v2372_v29 = vrot.slane %v8022_v2, %v10847_v54 }
 0x36d   :  { %2541 = vmax.index.xlane.f32.xlu1 %v10835_v25  ;;  %v2382_v2 = vrot.slane %v8028_v56, %v10849_v14  ;;  %v2387_v38 = vrot.slane %v8031_v43, %v10850_v5 }
 0x370   :  { %v8034_v23 = vpop.permute.xlu1 %2267  ;;  %2543 = vmax.index.xlane.f32.xlu0 %v10836_v42  ;;  %v8037_v11 = vpop.permute.xlu0 %2270 }
 0x371   :  { %v2397_v43 = vrot.slane %v8037_v11, %v10852_v49 }
 0x374   :  { %v2274_v52 = vpop.permute.xlu1 %2273  ;;  %v2277_v8 = vpop.permute.xlu0 %2276 }
 0x375   :  { %v2402_v24 = vrot.slane %v2274_v52, %v10837_v18  ;;  %v2406_v35 = vrot.slane %v2277_v8, %v10838_v48  ;;  %v2368_v8 = vsel %vm1509_vm8, %v2367_v46, %v2363_v33  ;;  %v8115_v46 = vld [vmem:[#allocation6] sm:$0xff] }
 0x376   :  { %10856 = vst [vmem:[#allocation25_spill] sm:$0xff] %v8115_v46 }
 0x377   :  { %v2407_v4 = vsel %vm1453_vm0, %v2406_v35, %v2402_v24  ;;  %v2373_v35 = vsel %vm1516_vm9, %v2372_v29, %v2368_v8  ;;  %v8127_v29 = vld [vmem:[#allocation6 + $0x10] sm:$0xff] }
 0x378   :  { %v2280_v26 = vpop.permute.xlu1 %2279  ;;  %v2283_v50 = vpop.permute.xlu0 %2282  ;;  %10858 = vst [vmem:[#allocation24_spill] sm:$0xff] %v8127_v29 }
 0x379   :  { %v2411_v61 = vrot.slane %v2280_v26, %v10839_v47  ;;  %v2416_v15 = vrot.slane %v2283_v50, %v10840_v59 }
 0x37b   :  { %v2412_v53 = vsel %vm1460_vm1, %v2411_v61, %v2407_v4  ;;  %v2378_v61 = vsel %vm1523_vm10, %v2377_v27, %v2373_v35  ;;  %v8146_v27 = vld [vmem:[#allocation6 + $0x38] sm:$0xff] }
 0x37c   :  { %v2286_v10 = vpop.permute.xlu1 %2285  ;;  %v2289_v17 = vpop.permute.xlu0 %2288  ;;  %v2417_v63 = vsel %vm1467_vm2, %v2416_v15, %v2412_v53  ;;  %v2383_v44 = vsel %vm1530_vm11, %v2382_v2, %v2378_v61  ;;  %v10851_v53 = vld [vmem:[#allocation51_spill] sm:$0xff]  ;;  %10861 = vst [vmem:[#allocation29_spill] sm:$0xff] %v8146_v27  ;;  %v8158_v2 = vld [vmem:[#allocation6 + $0x48] sm:$0xff] }
 0x37d   :  { %v2421_v51 = vrot.slane %v2286_v10, %v10841_v37  ;;  %v2426_v62 = vrot.slane %v2289_v17, %v10842_v34  ;;  %v2392_v56 = vrot.slane %v8034_v23, %v10851_v53  ;;  %v2388_v40 = vsel %vm1537_vm12, %v2387_v38, %v2383_v44  ;;  %10863 = vst [vmem:[#allocation31_spill] sm:$0xff] %v8158_v2  ;;  %v8170_v61 = vld [vmem:[#allocation6 + $0x58] sm:$0xff] }
 0x37e   :  { %10865 = vst [vmem:[#allocation33_spill] sm:$0xff] %v8170_v61 }
 0x37f   :  { %v2422_v22 = vsel %vm1474_vm3, %v2421_v51, %v2417_v63 }
 0x380   :  { %v2292_v39 = vpop.permute.xlu1 %2291  ;;  %v2295_v30 = vpop.permute.xlu0 %2294  ;;  %v2427_v12 = vsel %vm1481_vm4, %v2426_v62, %v2422_v22  ;;  %v2393_v62 = vsel %vm1544_vm13, %v2392_v56, %v2388_v40  ;;  %v8183_v56 = vld [vmem:[#allocation6 + $0x68] sm:$0xff] }
 0x381   :  { %v2431_v45 = vrot.slane %v2292_v39, %v10843_v21  ;;  %v2436_v6 = vrot.slane %v2295_v30, %v10844_v41  ;;  %v2398_v39 = vsel %vm1551_vm14, %v2397_v43, %v2393_v62  ;;  %10867 = vst [vmem:[#allocation35_spill] sm:$0xff] %v8183_v56  ;;  %v8196_v43 = vld [vmem:[#allocation6 + $0x78] sm:$0xff] }
 0x382   :  { %10869 = vst [vmem:[#allocation37_spill] sm:$0xff] %v8196_v43 }
 0x383   :  { %v2432_v7 = vsel %vm1488_vm5, %v2431_v45, %v2427_v12  ;;  %v10854_v12 = vld [vmem:[#allocation21_spill] sm:$0xff] }
 0x384   :  { %v2298_v55 = vpop.permute.xlu1 %2297  ;;  %v2301_v16 = vpop.permute.xlu0 %2300  ;;  %v2437_v25 = vsel %vm1495_vm6, %v2436_v6, %v2432_v7  ;;  %v8110_v7 = vld [vmem:[#allocation6 + $0x8] sm:$0xff] }
 0x385   :  { %v2441_v28 = vrot.slane %v2298_v55, %v10845_v32  ;;  %v2446_v42 = vrot.slane %v2301_v16, %v10846_v19  ;;  %10855 = vst [vmem:[#allocation23_spill] sm:$0xff] %v8110_v7  ;;  %v8122_v16 = vld [vmem:[#allocation6 + $0x18] sm:$0xff] }
 0x386   :  { %10857 = vst [vmem:[#allocation22_spill] sm:$0xff] %v8122_v16 }
 0x387   :  { %v2442_v52 = vsel %vm1502_vm7, %v2441_v28, %v2437_v25  ;;  %v8134_v25 = vld [vmem:[#allocation6 + $0x28] sm:$0xff] }
 0x388   :  { %v2304_v3 = vpop.permute.xlu1 %2303  ;;  %v2307_v24 = vpop.permute.xlu0 %2306  ;;  %v2447_v26 = vsel %vm1509_vm8, %v2446_v42, %v2442_v52  ;;  %10859 = vst [vmem:[#allocation27_spill] sm:$0xff] %v8134_v25  ;;  %v8139_v52 = vld [vmem:[#allocation6 + $0x20] sm:$0xff] }
 0x389   :  { %v2451_v1 = vrot.slane %v2304_v3, %v10847_v54  ;;  %v2456_v50 = vrot.slane %v2307_v24, %v10848_v0  ;;  %10860 = vst [vmem:[#allocation26_spill] sm:$0xff] %v8139_v52  ;;  %v8151_v24 = vld [vmem:[#allocation6 + $0x30] sm:$0xff] }
 0x38a   :  { %10862 = vst [vmem:[#allocation28_spill] sm:$0xff] %v8151_v24 }
 0x38b   :  { %v2452_v36 = vsel %vm1516_vm9, %v2451_v1, %v2447_v26  ;;  %v8163_v26 = vld [vmem:[#allocation6 + $0x40] sm:$0xff] }
 0x38c   :  { %v2310_v4 = vpop.permute.xlu1 %2309  ;;  %v2313_v15 = vpop.permute.xlu0 %2312  ;;  %v2457_v20 = vsel %vm1523_vm10, %v2456_v50, %v2452_v36  ;;  %10864 = vst [vmem:[#allocation30_spill] sm:$0xff] %v8163_v26 }
 0x38d   :  { %v2461_v57 = vrot.slane %v2310_v4, %v10849_v14  ;;  %v2466_v10 = vrot.slane %v2313_v15, %v10850_v5  ;;  %v8175_v4 = vld [vmem:[#allocation6 + $0x50] sm:$0xff] }
 0x38e   :  { %10866 = vst [vmem:[#allocation32_spill] sm:$0xff] %v8175_v4 }
 0x38f   :  { %v2462_v17 = vsel %vm1530_vm11, %v2461_v57, %v2457_v20  ;;  %v8188_v20 = vld [vmem:[#allocation6 + $0x60] sm:$0xff] }
 0x390   :  { %v2316_v51 = vpop.permute.xlu1 %2315  ;;  %v2319_v63 = vpop.permute.xlu0 %2318  ;;  %v2467_v13 = vsel %vm1537_vm12, %v2466_v10, %v2462_v17  ;;  %10868 = vst [vmem:[#allocation34_spill] sm:$0xff] %v8188_v20 }
 0x391   :  { %v2471_v22 = vrot.slane %v2316_v51, %v10851_v53  ;;  %v2476_v23 = vrot.slane %v2319_v63, %v10852_v49  ;;  %v8201_v63 = vld [vmem:[#allocation6 + $0x70] sm:$0xff] }
 0x392   :  { %10870 = vst [vmem:[#allocation36_spill] sm:$0xff] %v8201_v63 }
 0x393   :  { %v2472_v31 = vsel %vm1544_vm13, %v2471_v22, %v2467_v13 }
 0x394   :  { %v2477_v30 = vsel %vm1551_vm14, %v2476_v23, %v2472_v31 }
 0x395   :  { %v2478_v60 = vsel %vm1632_vm15, %v2477_v30, %v2398_v39 }
 0x396   :  { %2480 = vst [vmem:[#allocation2] sm:$0x3] %v2478_v60 }
 0x39d   :  { %v6978_v11 = vld.sshfl [vmem:[#allocation2] sm:$0x11 pattern:$0x75316420] }
 0x39e   :  { %v2722_v45 = vrot.slane %v6978_v11, %v10853_v58  ;;  %v2715_v36 = vcombine.high %v6978_v11, %v6978_v11 }
 0x3a0   :  { %v2733_v6 = vrot.slane %v2722_v45, %v10854_v12  ;;  %v2729_v44 = vrot.slane %v2715_v36, %v10853_v58 }
 0x3a2   :  { %v8113_v9 = vadd.f32 %v8110_v7, %v2733_v6  ;;  %v8118_v55 = vadd.f32 %v8115_v46, %v2733_v6  ;;  %v8125_v33 = vadd.f32 %v8122_v16, %v2733_v6  ;;  %v8130_v28 = vadd.f32 %v8127_v29, %v2733_v6 }
 0x3a3   :  { %v8137_v42 = vadd.f32 %v8134_v25, %v2733_v6  ;;  %v8142_v8 = vadd.f32 %v8139_v52, %v2733_v6  ;;  %v8149_v3 = vadd.f32 %v8146_v27, %v2733_v6  ;;  %v8154_v35 = vadd.f32 %v8151_v24, %v2733_v6 }
 0x3a4   :  { %2774 = vmax.xlane.f32.xlu0 %v8113_v9  ;;  %2772 = vmax.xlane.f32.xlu1 %v8118_v55  ;;  %v8161_v1 = vadd.f32 %v8158_v2, %v2733_v6  ;;  %v8166_v50 = vadd.f32 %v8163_v26, %v2733_v6  ;;  %v8173_v38 = vadd.f32 %v8170_v61, %v2733_v6 }
 0x3a5   :  { %v8178_v15 = vadd.f32 %v8175_v4, %v2733_v6  ;;  %v8186_v57 = vadd.f32 %v8183_v56, %v2733_v6  ;;  %v8191_v10 = vadd.f32 %v8188_v20, %v2733_v6  ;;  %v2737_v40 = vrot.slane %v2729_v44, %v10854_v12 }
 0x3a6   :  { %v8199_v51 = vadd.f32 %v8196_v43, %v2733_v6  ;;  %v8204_v62 = vadd.f32 %v8201_v63, %v2733_v6 }
 0x3a7   :  { %v8209_v13 = vadd.f32 %v8110_v7, %v2737_v40  ;;  %v8212_v31 = vadd.f32 %v8115_v46, %v2737_v40  ;;  %v8219_v60 = vadd.f32 %v8122_v16, %v2737_v40  ;;  %v8222_v11 = vadd.f32 %v8127_v29, %v2737_v40 }
 0x3a8   :  { %2778 = vmax.xlane.f32.xlu0 %v8125_v33  ;;  %2776 = vmax.xlane.f32.xlu1 %v8130_v28  ;;  %v8231_v36 = vadd.f32 %v8134_v25, %v2737_v40  ;;  %v8234_v44 = vadd.f32 %v8139_v52, %v2737_v40  ;;  %v8243_v46 = vadd.f32 %v8146_v27, %v2737_v40 }
 0x3a9   :  { %10871 = vst [vmem:[#allocation54_spill] sm:$0xff] %v8209_v13  ;;  %10872 = vst [vmem:[#allocation55_spill] sm:$0xff] %v8212_v31  ;;  %v8246_v7 = vadd.f32 %v8151_v24, %v2737_v40  ;;  %v8255_v58 = vadd.f32 %v8158_v2, %v2737_v40 }
 0x3aa   :  { %10873 = vst [vmem:[#allocation56_spill] sm:$0xff] %v8219_v60  ;;  %10874 = vst [vmem:[#allocation57_spill] sm:$0xff] %v8222_v11 }
 0x3ab   :  { %10875 = vst [vmem:[#allocation58_spill] sm:$0xff] %v8231_v36  ;;  %10876 = vst [vmem:[#allocation59_spill] sm:$0xff] %v8234_v44 }
 0x3ac   :  { %2782 = vmax.xlane.f32.xlu0 %v8137_v42  ;;  %2780 = vmax.xlane.f32.xlu1 %v8142_v8  ;;  %10877 = vst [vmem:[#allocation60_spill] sm:$0xff] %v8243_v46  ;;  %10878 = vst [vmem:[#allocation61_spill] sm:$0xff] %v8246_v7 }
 0x3ad   :  { %10879 = vst [vmem:[#allocation62_spill] sm:$0xff] %v8255_v58 }
 0x3b0   :  { %2786 = vmax.xlane.f32.xlu0 %v8149_v3  ;;  %2784 = vmax.xlane.f32.xlu1 %v8154_v35 }
 0x3b4   :  { %2790 = vmax.xlane.f32.xlu0 %v8161_v1  ;;  %2788 = vmax.xlane.f32.xlu1 %v8166_v50 }
 0x3b8   :  { %2794 = vmax.xlane.f32.xlu0 %v8173_v38  ;;  %2792 = vmax.xlane.f32.xlu1 %v8178_v15 }
 0x3bc   :  { %2798 = vmax.xlane.f32.xlu0 %v8186_v57  ;;  %2796 = vmax.xlane.f32.xlu1 %v8191_v10 }
 0x3bd   :  { %v2484_v17 = vpop.xlane.xlu0 %2483 }
 0x3c0   :  { %2802 = vmax.xlane.f32.xlu0 %v8199_v51  ;;  %2800 = vmax.xlane.f32.xlu1 %v8204_v62 }
 0x3c1   :  { %v2486_v22 = vpop.xlane.xlu0 %2485 }
 0x3c2   :  { %v2482_v23 = vpop.xlane.xlu1 %2481 }
 0x3c4   :  { %2806 = vmax.xlane.f32.xlu0 %v8209_v13  ;;  %2804 = vmax.xlane.f32.xlu1 %v8212_v31 }
 0x3c5   :  { %v2488_v39 = vpop.xlane.xlu0 %2487 }
 0x3c6   :  { %v8216_v30 = vpop.xlane.xlu1 %2489 }
 0x3c8   :  { %2810 = vmax.xlane.f32.xlu0 %v8219_v60  ;;  %2808 = vmax.xlane.f32.xlu1 %v8222_v11 }
 0x3c9   :  { %v8226_v45 = vpop.xlane.xlu0 %2491 }
 0x3ca   :  { %v8228_v6 = vpop.xlane.xlu1 %2493 }
 0x3cc   :  { %2814 = vmax.xlane.f32.xlu0 %v8231_v36  ;;  %2812 = vmax.xlane.f32.xlu1 %v8234_v44  ;;  %v8258_v36 = vadd.f32 %v8163_v26, %v2737_v40  ;;  %v8293_v44 = vadd.f32 %v8201_v63, %v2737_v40 }
 0x3cd   :  { %v8238_v29 = vpop.xlane.xlu0 %2495 }
 0x3ce   :  { %v8240_v16 = vpop.xlane.xlu1 %2497  ;;  %10880 = vst [vmem:[#allocation63_spill] sm:$0xff] %v8258_v36  ;;  %10886 = vst [vmem:[#allocation69_spill] sm:$0xff] %v8293_v44 }
 0x3d0   :  { %2818 = vmax.xlane.f32.xlu0 %v8243_v46  ;;  %2816 = vmax.xlane.f32.xlu1 %v8246_v7  ;;  %v8267_v46 = vadd.f32 %v8170_v61, %v2737_v40  ;;  %v8270_v7 = vadd.f32 %v8175_v4, %v2737_v40  ;;  %v2548_v61 = vrot.slane %v2482_v23, %v10837_v18 }
 0x3d1   :  { %v8250_v52 = vpop.xlane.xlu0 %2499 }
 0x3d2   :  { %v8252_v25 = vpop.xlane.xlu1 %2501  ;;  %10881 = vst [vmem:[#allocation64_spill] sm:$0xff] %v8267_v46  ;;  %10882 = vst [vmem:[#allocation65_spill] sm:$0xff] %v8270_v7 }
 0x3d4   :  { %2822 = vmax.xlane.f32.xlu0 %v8255_v58  ;;  %2820 = vmax.xlane.f32.xlu1 %v8258_v36  ;;  %v8279_v58 = vadd.f32 %v8183_v56, %v2737_v40  ;;  %v8282_v36 = vadd.f32 %v8188_v20, %v2737_v40  ;;  %v2552_v56 = vrot.slane %v2484_v17, %v10838_v48 }
 0x3d5   :  { %v8262_v24 = vpop.xlane.xlu0 %2503 }
 0x3d6   :  { %v8264_v27 = vpop.xlane.xlu1 %2505  ;;  %10883 = vst [vmem:[#allocation66_spill] sm:$0xff] %v8279_v58  ;;  %10884 = vst [vmem:[#allocation67_spill] sm:$0xff] %v8282_v36 }
 0x3d8   :  { %2826 = vmax.xlane.f32.xlu0 %v8267_v46  ;;  %2824 = vmax.xlane.f32.xlu1 %v8270_v7  ;;  %v8290_v7 = vadd.f32 %v8196_v43, %v2737_v40  ;;  %v2557_v43 = vrot.slane %v2486_v22, %v10839_v47  ;;  %v2562_v40 = vrot.slane %v2488_v39, %v10840_v59 }
 0x3d9   :  { %v8274_v26 = vpop.xlane.xlu0 %2507  ;;  %v2572_v22 = vrot.slane %v8226_v45, %v10842_v34  ;;  %v2582_v45 = vrot.slane %v8238_v29, %v10844_v41 }
 0x3da   :  { %v8276_v2 = vpop.xlane.xlu1 %2509  ;;  %10885 = vst [vmem:[#allocation68_spill] sm:$0xff] %v8290_v7 }
 0x3dc   :  { %2830 = vmax.xlane.f32.xlu0 %v8279_v58  ;;  %2828 = vmax.xlane.f32.xlu1 %v8282_v36  ;;  %v2553_v58 = vsel %vm1453_vm0, %v2552_v56, %v2548_v61 }
 0x3dd   :  { %v8286_v4 = vpop.xlane.xlu0 %2511  ;;  %v2558_v63 = vsel %vm1460_vm1, %v2557_v43, %v2553_v58 }
 0x3de   :  { %v2514_v46 = vpop.xlane.xlu1 %2513 }
 0x3df   :  { %v2627_v36 = vrot.slane %v2514_v46, %v10837_v18  ;;  %v2567_v46 = vrot.slane %v8216_v30, %v10841_v37  ;;  %v2577_v30 = vrot.slane %v8228_v6, %v10843_v21 }
 0x3e0   :  { %2834 = vmax.xlane.f32.xlu0 %v8290_v7  ;;  %2832 = vmax.xlane.f32.xlu1 %v8293_v44 }
 0x3e1   :  { %v2516_v20 = vpop.xlane.xlu0 %2515 }
 0x3e2   :  { %v2631_v23 = vrot.slane %v2516_v20, %v10838_v48  ;;  %v2518_v60 = vpop.xlane.xlu1 %2517  ;;  %v2563_v20 = vsel %vm1467_vm2, %v2562_v40, %v2558_v63 }
 0x3e3   :  { %v2636_v11 = vrot.slane %v2518_v60, %v10839_v47 }
 0x3e4   :  { %v2632_v17 = vsel %vm1453_vm0, %v2631_v23, %v2627_v36  ;;  %v2568_v36 = vsel %vm1474_vm3, %v2567_v46, %v2563_v20 }
 0x3e5   :  { %v2520_v7 = vpop.xlane.xlu0 %2519  ;;  %v2637_v61 = vsel %vm1460_vm1, %v2636_v11, %v2632_v17  ;;  %v2573_v11 = vsel %vm1481_vm4, %v2572_v22, %v2568_v36  ;;  %v2592_v22 = vrot.slane %v8250_v52, %v10846_v19  ;;  %v2602_v52 = vrot.slane %v8262_v24, %v10848_v0 }
 0x3e6   :  { %v2641_v44 = vrot.slane %v2520_v7, %v10840_v59  ;;  %v2522_v13 = vpop.xlane.xlu1 %2521  ;;  %v8316_v7 = vld [vmem:[#allocation3 + $0x6] sm:$0x3]  ;;  %v2578_v6 = vsel %vm1488_vm5, %v2577_v30, %v2573_v11 }
 0x3e7   :  { %v2646_v56 = vrot.slane %v2522_v13, %v10841_v37  ;;  %v8329_v40 = vrot.slane %v8316_v7, %v10854_v12  ;;  %v2583_v29 = vsel %vm1495_vm6, %v2582_v45, %v2578_v6 }
 0x3e8   :  { %v2642_v39 = vsel %vm1467_vm2, %v2641_v44, %v2637_v61  ;;  %v2587_v61 = vrot.slane %v8240_v16, %v10845_v32  ;;  %v2597_v16 = vrot.slane %v8252_v25, %v10847_v54 }
 0x3e9   :  { %v2524_v60 = vpop.xlane.xlu0 %2523  ;;  %v2647_v13 = vsel %vm1474_vm3, %v2646_v56, %v2642_v39 }
 0x3ea   :  { %v2651_v58 = vrot.slane %v2524_v60, %v10842_v34  ;;  %v2526_v43 = vpop.xlane.xlu1 %2525  ;;  %v2588_v36 = vsel %vm1502_vm7, %v2587_v61, %v2583_v29  ;;  %v2612_v61 = vrot.slane %v8274_v26, %v10850_v5 }
 0x3eb   :  { %v2656_v63 = vrot.slane %v2526_v43, %v10843_v21 }
 0x3ec   :  { %v2652_v44 = vsel %vm1481_vm4, %v2651_v58, %v2647_v13 }
 0x3ed   :  { %v2528_v23 = vpop.xlane.xlu0 %2527  ;;  %v2657_v56 = vsel %vm1488_vm5, %v2656_v63, %v2652_v44  ;;  %v2593_v63 = vsel %vm1509_vm8, %v2592_v22, %v2588_v36 }
 0x3ee   :  { %v2661_v17 = vrot.slane %v2528_v23, %v10844_v41  ;;  %v2530_v46 = vpop.xlane.xlu1 %2529  ;;  %v2598_v25 = vsel %vm1516_vm9, %v2597_v16, %v2593_v63 }
 0x3ef   :  { %v2666_v20 = vrot.slane %v2530_v46, %v10845_v32  ;;  %v2603_v24 = vsel %vm1523_vm10, %v2602_v52, %v2598_v25 }
 0x3f0   :  { %v2662_v39 = vsel %vm1495_vm6, %v2661_v17, %v2657_v56  ;;  %v2607_v17 = vrot.slane %v8264_v27, %v10849_v14 }
 0x3f1   :  { %v2532_v60 = vpop.xlane.xlu0 %2531  ;;  %2844 = vbcast.lane.b32.xlu1 %v8329_v40, 256  ;;  %v2667_v30 = vsel %vm1502_vm7, %v2666_v20, %v2662_v39  ;;  %v2617_v39 = vrot.slane %v8276_v2, %v10851_v53 }
 0x3f2   :  { %v2671_v58 = vrot.slane %v2532_v60, %v10846_v19  ;;  %v2534_v43 = vpop.xlane.xlu1 %2533  ;;  %v2608_v27 = vsel %vm1530_vm11, %v2607_v17, %v2603_v24 }
 0x3f3   :  { %v2676_v13 = vrot.slane %v2534_v43, %v10847_v54  ;;  %v2613_v26 = vsel %vm1537_vm12, %v2612_v61, %v2608_v27  ;;  %v2622_v43 = vrot.slane %v8286_v4, %v10852_v49  ;;  %v10887_v4 = vld [vmem:[#allocation53_spill] sm:$0xff] }
 0x3f4   :  { %v2672_v11 = vsel %vm1509_vm8, %v2671_v58, %v2667_v30  ;;  %v2618_v2 = vsel %vm1544_vm13, %v2617_v39, %v2613_v26 }
 0x3f5   :  { %v2536_v45 = vpop.xlane.xlu0 %2535  ;;  %2852 = vbcast.lane.b32.xlu1 %v8329_v40, 272  ;;  %v2677_v46 = vsel %vm1516_vm9, %v2676_v13, %v2672_v11  ;;  %v2623_v63 = vsel %vm1551_vm14, %v2622_v43, %v2618_v2 }
 0x3f6   :  { %v2681_v44 = vrot.slane %v2536_v45, %v10848_v0  ;;  %v2538_v23 = vpop.xlane.xlu1 %2537  ;;  %2848 = vbcast.lane.b32.xlu0 %v8329_v40, 264  ;;  %v2909_v45 = vrot.slane %v8316_v7, %v10887_v4 }
 0x3f7   :  { %v2686_v6 = vrot.slane %v2538_v23, %v10849_v14 }
 0x3f8   :  { %v2682_v56 = vsel %vm1523_vm10, %v2681_v44, %v2677_v46 }
 0x3f9   :  { %v2540_v20 = vpop.xlane.xlu0 %2539  ;;  %2856 = vbcast.lane.b32.xlu1 %v8329_v40, 280  ;;  %v2687_v60 = vsel %vm1530_vm11, %v2686_v6, %v2682_v56 }
 0x3fa   :  { %v2691_v29 = vrot.slane %v2540_v20, %v10850_v5  ;;  %v2542_v22 = vpop.xlane.xlu1 %2541  ;;  %2864 = vbcast.lane.b32.xlu0 %v8329_v40, 296 }
 0x3fb   :  { %v2696_v58 = vrot.slane %v2542_v22, %v10851_v53 }
 0x3fc   :  { %v2692_v36 = vsel %vm1537_vm12, %v2691_v29, %v2687_v60 }
 0x3fd   :  { %v2544_v16 = vpop.xlane.xlu0 %2543  ;;  %2860 = vbcast.lane.b32.xlu1 %v8329_v40, 288  ;;  %v2697_v13 = vsel %vm1544_vm13, %v2696_v58, %v2692_v36 }
 0x3fe   :  { %v2701_v30 = vrot.slane %v2544_v16, %v10852_v49  ;;  %2872 = vbcast.lane.b32.xlu0 %v8329_v40, 312 }
 0x400   :  { %v2702_v52 = vsel %vm1551_vm14, %v2701_v30, %v2697_v13 }
 0x401   :  { %v2703_v11 = vsel %vm1632_vm15, %v2702_v52, %v2623_v63  ;;  %2868 = vbcast.lane.b32.xlu1 %v8329_v40, 304 }
 0x402   :  { %2705 = vst [vmem:[#allocation11 + $0x4] sm:$0x3] %v2703_v11  ;;  %2880 = vbcast.lane.b32.xlu0 %v8329_v40, 328 }
 0x405   :  { %2876 = vbcast.lane.b32.xlu1 %v8329_v40, 320 }
 0x406   :  { %2888 = vbcast.lane.b32.xlu0 %v8329_v40, 344 }
 0x409   :  { %2884 = vbcast.lane.b32.xlu1 %v8329_v40, 336 }
 0x40a   :  { %2896 = vbcast.lane.b32.xlu0 %v8329_v40, 360 }
 0x40d   :  { %2892 = vbcast.lane.b32.xlu1 %v8329_v40, 352 }
 0x40e   :  { %2904 = vbcast.lane.b32.xlu0 %v8329_v40, 376 }
 0x411   :  { %2900 = vbcast.lane.b32.xlu1 %v8329_v40, 368 }
 0x412   :  { %2915 = vbcast.lane.b32.xlu0 %v2909_v45, 264 }
 0x415   :  { %2911 = vbcast.lane.b32.xlu1 %v2909_v45, 256 }
 0x416   :  { %2923 = vbcast.lane.b32.xlu0 %v2909_v45, 280 }
 0x419   :  { %2919 = vbcast.lane.b32.xlu1 %v2909_v45, 272 }
 0x41a   :  { %2931 = vbcast.lane.b32.xlu0 %v2909_v45, 296 }
 0x41d   :  { %2927 = vbcast.lane.b32.xlu1 %v2909_v45, 288 }
 0x41e   :  { %2939 = vbcast.lane.b32.xlu0 %v2909_v45, 312 }
 0x421   :  { %2935 = vbcast.lane.b32.xlu1 %v2909_v45, 304 }
 0x422   :  { %2947 = vbcast.lane.b32.xlu0 %v2909_v45, 328 }
 0x425   :  { %2943 = vbcast.lane.b32.xlu1 %v2909_v45, 320 }
 0x426   :  { %2955 = vbcast.lane.b32.xlu0 %v2909_v45, 344 }
 0x429   :  { %2951 = vbcast.lane.b32.xlu1 %v2909_v45, 336 }
 0x42a   :  { %2963 = vbcast.lane.b32.xlu0 %v2909_v45, 360 }
 0x42d   :  { %2959 = vbcast.lane.b32.xlu1 %v2909_v45, 352 }
 0x42e   :  { %2971 = vbcast.lane.b32.xlu0 %v2909_v45, 376 }
 0x431   :  { %v2773_v44 = vpop.xlane.xlu1 %2772  ;;  %v2775_v23 = vpop.xlane.xlu0 %2774  ;;  %2967 = vbcast.lane.b32.xlu1 %v2909_v45, 368 }
 0x435   :  { %v2777_v7 = vpop.xlane.xlu1 %2776  ;;  %v2779_v40 = vpop.xlane.xlu0 %2778 }
 0x439   :  { %v2781_v25 = vpop.xlane.xlu1 %2780  ;;  %v2783_v17 = vpop.xlane.xlu0 %2782 }
 0x43d   :  { %v2785_v46 = vpop.xlane.xlu1 %2784  ;;  %v2787_v6 = vpop.xlane.xlu0 %2786 }
 0x441   :  { %v2789_v24 = vpop.xlane.xlu1 %2788  ;;  %v2791_v61 = vpop.xlane.xlu0 %2790 }
 0x445   :  { %v2793_v56 = vpop.xlane.xlu1 %2792  ;;  %v2795_v20 = vpop.xlane.xlu0 %2794 }
 0x449   :  { %v2797_v29 = vpop.xlane.xlu1 %2796  ;;  %v2799_v22 = vpop.xlane.xlu0 %2798 }
 0x44d   :  { %v8395_v27 = vpop.xlane.xlu1 %2800  ;;  %v8397_v39 = vpop.xlane.xlu0 %2802 }
 0x451   :  { %v8399_v60 = vpop.xlane.xlu1 %2804  ;;  %v8401_v58 = vpop.xlane.xlu0 %2806 }
 0x455   :  { %v8403_v26 = vpop.xlane.xlu1 %2808  ;;  %v8405_v43 = vpop.xlane.xlu0 %2810 }
 0x459   :  { %v8407_v36 = vpop.xlane.xlu1 %2812  ;;  %v8409_v16 = vpop.xlane.xlu0 %2814 }
 0x45d   :  { %v8411_v30 = vpop.xlane.xlu1 %2816  ;;  %v8413_v2 = vpop.xlane.xlu0 %2818 }
 0x461   :  { %v8415_v13 = vpop.xlane.xlu1 %2820  ;;  %v8417_v63 = vpop.xlane.xlu0 %2822 }
 0x465   :  { %v8419_v52 = vpop.xlane.xlu1 %2824  ;;  %v8421_v11 = vpop.xlane.xlu0 %2826 }
 0x469   :  { %v8423_v45 = vpop.xlane.xlu1 %2828  ;;  %v8425_v4 = vpop.xlane.xlu0 %2830 }
 0x46d   :  { %v8427_v12 = vpop.xlane.xlu1 %2832  ;;  %v8429_v49 = vpop.xlane.xlu0 %2834 }
 0x471   :  { %v2845_v53 = vpop.permute.xlu1 %2844  ;;  %v2849_v5 = vpop.permute.xlu0 %2848 }
 0x472   :  { %v3005_v14 = vadd.f32 %v2845_v53, %v2773_v44  ;;  %v3006_v0 = vadd.f32 %v2849_v5, %v2775_v23 }
 0x474   :  { %3070 = vperm.xlu1 %6997, %v3005_v14   ;;  %3073 = vperm.xlu0 %6996, %v3006_v0  }
 0x475   :  { %v2853_v54 = vpop.permute.xlu1 %2852  ;;  %v2865_v19 = vpop.permute.xlu0 %2864 }
 0x476   :  { %v3007_v32 = vadd.f32 %v2853_v54, %v2777_v7  ;;  %v3010_v47 = vadd.f32 %v2865_v19, %v2783_v17 }
 0x478   :  { %3076 = vperm.xlu1 %6997, %v3007_v32  }
 0x479   :  { %v2857_v41 = vpop.permute.xlu1 %2856  ;;  %v2873_v21 = vpop.permute.xlu0 %2872 }
 0x47a   :  { %v3008_v34 = vadd.f32 %v2857_v41, %v2779_v40  ;;  %v3012_v53 = vadd.f32 %v2873_v21, %v2787_v6 }
 0x47c   :  { %3079 = vperm.xlu0 %6996, %v3008_v34  }
 0x47d   :  { %v2861_v37 = vpop.permute.xlu1 %2860  ;;  %v2881_v59 = vpop.permute.xlu0 %2880 }
 0x47e   :  { %v3009_v48 = vadd.f32 %v2861_v37, %v2781_v25  ;;  %v3014_v54 = vadd.f32 %v2881_v59, %v2791_v61 }
 0x480   :  { %3082 = vperm.xlu1 %6997, %v3009_v48   ;;  %3085 = vperm.xlu0 %6996, %v3010_v47  }
 0x481   :  { %v2869_v18 = vpop.permute.xlu1 %2868  ;;  %v2889_v31 = vpop.permute.xlu0 %2888 }
 0x482   :  { %v3011_v5 = vadd.f32 %v2869_v18, %v2785_v46  ;;  %v3016_v44 = vadd.f32 %v2889_v31, %v2795_v20 }
 0x484   :  { %3088 = vperm.xlu1 %6997, %v3011_v5   ;;  %3091 = vperm.xlu0 %6996, %v3012_v53  }
 0x485   :  { %v2877_v0 = vpop.permute.xlu1 %2876  ;;  %v2897_v14 = vpop.permute.xlu0 %2896 }
 0x486   :  { %v3013_v32 = vadd.f32 %v2877_v0, %v2789_v24  ;;  %v3018_v37 = vadd.f32 %v2897_v14, %v2799_v22 }
 0x488   :  { %3094 = vperm.xlu1 %6997, %v3013_v32   ;;  %3097 = vperm.xlu0 %6996, %v3014_v54  }
 0x489   :  { %v2885_v41 = vpop.permute.xlu1 %2884  ;;  %v2905_v34 = vpop.permute.xlu0 %2904 }
 0x48a   :  { %v3015_v23 = vadd.f32 %v2885_v41, %v2793_v56  ;;  %v3020_v7 = vadd.f32 %v2905_v34, %v8397_v39  ;;  %v10899_v41 = vld [vmem:[#allocation64_spill] sm:$0xff] }
 0x48c   :  { %3100 = vperm.xlu1 %6997, %v3015_v23   ;;  %3103 = vperm.xlu0 %6996, %v3016_v44   ;;  %v10900_v44 = vld [vmem:[#allocation67_spill] sm:$0xff] }
 0x48d   :  { %v2893_v48 = vpop.permute.xlu1 %2892  ;;  %v2916_v47 = vpop.permute.xlu0 %2915 }
 0x48e   :  { %v3017_v19 = vadd.f32 %v2893_v48, %v2797_v29  ;;  %v3022_v31 = vadd.f32 %v2916_v47, %v8401_v58  ;;  %v10901_v48 = vld [vmem:[#allocation66_spill] sm:$0xff] }
 0x490   :  { %3106 = vperm.xlu1 %6997, %v3017_v19   ;;  %3109 = vperm.xlu0 %6996, %v3018_v37   ;;  %v10902_v37 = vld [vmem:[#allocation69_spill] sm:$0xff] }
 0x491   :  { %v2901_v18 = vpop.permute.xlu1 %2900  ;;  %v2924_v21 = vpop.permute.xlu0 %2923 }
 0x492   :  { %v3019_v59 = vadd.f32 %v2901_v18, %v8395_v27  ;;  %v3024_v24 = vadd.f32 %v2924_v21, %v8405_v43  ;;  %v10903_v18 = vld [vmem:[#allocation68_spill] sm:$0xff] }
 0x494   :  { %3112 = vperm.xlu1 %6997, %v3019_v59   ;;  %3115 = vperm.xlu0 %6996, %v3020_v7  }
 0x495   :  { %v2912_v40 = vpop.permute.xlu1 %2911  ;;  %v2932_v25 = vpop.permute.xlu0 %2931 }
 0x496   :  { %v3021_v17 = vadd.f32 %v2912_v40, %v8399_v60  ;;  %v3026_v29 = vadd.f32 %v2932_v25, %v8409_v16  ;;  %v10904_v40 = vld [vmem:[#allocation38_spill] sm:$0xff] }
 0x498   :  { %3118 = vperm.xlu1 %6997, %v3021_v17   ;;  %3121 = vperm.xlu0 %6996, %v3022_v31   ;;  %v10905_v31 = vld [vmem:[#allocation40_spill] sm:$0xff] }
 0x499   :  { %v2920_v46 = vpop.permute.xlu1 %2919  ;;  %v2940_v6 = vpop.permute.xlu0 %2939 }
 0x49a   :  { %v3023_v61 = vadd.f32 %v2920_v46, %v8403_v26  ;;  %v3028_v39 = vadd.f32 %v2940_v6, %v8413_v2 }
 0x49c   :  { %3124 = vperm.xlu1 %6997, %v3023_v61   ;;  %3127 = vperm.xlu0 %6996, %v3024_v24   ;;  %v10906_v24 = vld [vmem:[#allocation42_spill] sm:$0xff] }
 0x49d   :  { %v2928_v56 = vpop.permute.xlu1 %2927  ;;  %v2948_v20 = vpop.permute.xlu0 %2947 }
 0x49e   :  { %v3025_v22 = vadd.f32 %v2928_v56, %v8407_v36  ;;  %v3030_v26 = vadd.f32 %v2948_v20, %v8417_v63  ;;  %v10907_v56 = vld [vmem:[#allocation39_spill] sm:$0xff] }
 0x4a0   :  { %3130 = vperm.xlu1 %6997, %v3025_v22   ;;  %3133 = vperm.xlu0 %6996, %v3026_v29  }
 0x4a1   :  { %v2936_v27 = vpop.permute.xlu1 %2935  ;;  %v2956_v58 = vpop.permute.xlu0 %2955 }
 0x4a2   :  { %v3027_v60 = vadd.f32 %v2936_v27, %v8411_v30  ;;  %v3032_v36 = vadd.f32 %v2956_v58, %v8421_v11  ;;  %v10898_v11 = vld [vmem:[#allocation65_spill] sm:$0xff]  ;;  %v10908_v27 = vld [vmem:[#allocation44_spill] sm:$0xff] }
 0x4a4   :  { %3136 = vperm.xlu1 %6997, %v3027_v60   ;;  %3139 = vperm.xlu0 %6996, %v3028_v39  }
 0x4a5   :  { %v2944_v43 = vpop.permute.xlu1 %2943  ;;  %v2964_v16 = vpop.permute.xlu0 %2963 }
 0x4a6   :  { %v3029_v53 = vadd.f32 %v2944_v43, %v8415_v13  ;;  %v3034_v30 = vadd.f32 %v2964_v16, %v8425_v4  ;;  %v10897_v4 = vld [vmem:[#allocation62_spill] sm:$0xff] }
 0x4a8   :  { %3142 = vperm.xlu1 %6997, %v3029_v53   ;;  %3145 = vperm.xlu0 %6996, %v3030_v26  }
 0x4a9   :  { %v2952_v5 = vpop.permute.xlu1 %2951  ;;  %v2972_v54 = vpop.permute.xlu0 %2971 }
 0x4aa   :  { %v3031_v0 = vadd.f32 %v2952_v5, %v8419_v52  ;;  %v3036_v13 = vadd.f32 %v2972_v54, %v8429_v49  ;;  %v10888_v49 = vld [vmem:[#allocation55_spill] sm:$0xff]  ;;  %v10910_v54 = vld [vmem:[#allocation46_spill] sm:$0xff] }
 0x4ac   :  { %3148 = vperm.xlu1 %6997, %v3031_v0   ;;  %3151 = vperm.xlu0 %6996, %v3032_v36   ;;  %v10909_v36 = vld [vmem:[#allocation41_spill] sm:$0xff] }
 0x4ad   :  { %v2960_v2 = vpop.permute.xlu1 %2959 }
 0x4ae   :  { %v3033_v14 = vadd.f32 %v2960_v2, %v8423_v45 }
 0x4b0   :  { %3154 = vperm.xlu1 %6997, %v3033_v14   ;;  %3157 = vperm.xlu0 %6996, %v3034_v30  }
 0x4b1   :  { %v2968_v63 = vpop.permute.xlu1 %2967 }
 0x4b2   :  { %v3035_v32 = vadd.f32 %v2968_v63, %v8427_v12 }
 0x4b4   :  { %3160 = vperm.xlu1 %6997, %v3035_v32   ;;  %3163 = vperm.xlu0 %6996, %v3036_v13  }
 0x4d3   :  { %3328 = vmax.index.xlane.f32.xlu0 %v8113_v9 }
 0x4d7   :  { %3330 = vmax.index.xlane.f32.xlu0 %v8130_v28 }
 0x4d8   :  { %3326 = vmax.index.xlane.f32.xlu1 %v8118_v55  ;;  %v10889_v55 = vld [vmem:[#allocation54_spill] sm:$0xff] }
 0x4db   :  { %3332 = vmax.index.xlane.f32.xlu0 %v8125_v33  ;;  %v10890_v33 = vld [vmem:[#allocation57_spill] sm:$0xff] }
 0x4dc   :  { %3334 = vmax.index.xlane.f32.xlu1 %v8142_v8 }
 0x4df   :  { %3336 = vmax.index.xlane.f32.xlu0 %v8137_v42  ;;  %v10891_v42 = vld [vmem:[#allocation56_spill] sm:$0xff] }
 0x4e0   :  { %3338 = vmax.index.xlane.f32.xlu1 %v8154_v35 }
 0x4e3   :  { %3340 = vmax.index.xlane.f32.xlu0 %v8149_v3  ;;  %v10892_v3 = vld [vmem:[#allocation59_spill] sm:$0xff] }
 0x4e4   :  { %3342 = vmax.index.xlane.f32.xlu1 %v8166_v50 }
 0x4e7   :  { %3344 = vmax.index.xlane.f32.xlu0 %v8161_v1  ;;  %v10893_v1 = vld [vmem:[#allocation58_spill] sm:$0xff] }
 0x4e8   :  { %3346 = vmax.index.xlane.f32.xlu1 %v8178_v15 }
 0x4eb   :  { %3348 = vmax.index.xlane.f32.xlu0 %v8173_v38  ;;  %v10894_v38 = vld [vmem:[#allocation61_spill] sm:$0xff] }
 0x4ec   :  { %3350 = vmax.index.xlane.f32.xlu1 %v8191_v10 }
 0x4ef   :  { %3352 = vmax.index.xlane.f32.xlu0 %v8186_v57  ;;  %v10895_v57 = vld [vmem:[#allocation60_spill] sm:$0xff] }
 0x4f0   :  { %3354 = vmax.index.xlane.f32.xlu1 %v8204_v62 }
 0x4f3   :  { %3356 = vmax.index.xlane.f32.xlu0 %v8199_v51  ;;  %v3071_v12 = vpop.permute.xlu1 %3070  ;;  %v3074_v9 = vpop.permute.xlu0 %3073  ;;  %v10896_v51 = vld [vmem:[#allocation63_spill] sm:$0xff] }
 0x4f4   :  { %3358 = vmax.index.xlane.f32.xlu1 %v10888_v49  ;;  %v3168_v25 = vrot.slane %v3071_v12, %v10904_v40  ;;  %v3172_v17 = vrot.slane %v3074_v9, %v10905_v31 }
 0x4f6   :  { %v3173_v58 = vsel %vm1453_vm0, %v3172_v17, %v3168_v25  ;;  %v10915_v25 = vld [vmem:[#allocation47_spill] sm:$0xff] }
 0x4f7   :  { %3360 = vmax.index.xlane.f32.xlu0 %v10889_v55  ;;  %v3077_v28 = vpop.permute.xlu1 %3076  ;;  %v10911_v55 = vld [vmem:[#allocation43_spill] sm:$0xff] }
 0x4f8   :  { %3362 = vmax.index.xlane.f32.xlu1 %v10890_v33  ;;  %v3177_v61 = vrot.slane %v3077_v28, %v10906_v24 }
 0x4fa   :  { %v3178_v53 = vsel %vm1460_vm1, %v3177_v61, %v3173_v58  ;;  %v10916_v61 = vld [vmem:[#allocation52_spill] sm:$0xff]  ;;  %v10917_v58 = vld [vmem:[#allocation49_spill] sm:$0xff] }
 0x4fb   :  { %3364 = vmax.index.xlane.f32.xlu0 %v10891_v42  ;;  %v3080_v8 = vpop.permute.xlu0 %3079 }
 0x4fc   :  { %3366 = vmax.index.xlane.f32.xlu1 %v10892_v3  ;;  %v3182_v20 = vrot.slane %v3080_v8, %v10907_v56  ;;  %v10912_v3 = vld [vmem:[#allocation48_spill] sm:$0xff] }
 0x4fe   :  { %v3183_v5 = vsel %vm1467_vm2, %v3182_v20, %v3178_v53 }
 0x4ff   :  { %v3083_v35 = vpop.permute.xlu1 %3082  ;;  %3368 = vmax.index.xlane.f32.xlu0 %v10893_v1  ;;  %v3086_v50 = vpop.permute.xlu0 %3085 }
 0x500   :  { %3370 = vmax.index.xlane.f32.xlu1 %v10894_v38  ;;  %v3187_v39 = vrot.slane %v3083_v35, %v10908_v27  ;;  %v3192_v0 = vrot.slane %v3086_v50, %v10909_v36 }
 0x502   :  { %v3188_v14 = vsel %vm1474_vm3, %v3187_v39, %v3183_v5 }
 0x503   :  { %v3089_v15 = vpop.permute.xlu1 %3088  ;;  %3372 = vmax.index.xlane.f32.xlu0 %v10895_v57  ;;  %v3092_v10 = vpop.permute.xlu0 %3091  ;;  %v3193_v9 = vsel %vm1481_vm4, %v3192_v0, %v3188_v14 }
 0x504   :  { %3374 = vmax.index.xlane.f32.xlu1 %v10896_v51  ;;  %v3197_v63 = vrot.slane %v3089_v15, %v10910_v54  ;;  %v3202_v33 = vrot.slane %v3092_v10, %v10911_v55  ;;  %v10913_v51 = vld [vmem:[#allocation45_spill] sm:$0xff] }
 0x506   :  { %v3198_v8 = vsel %vm1488_vm5, %v3197_v63, %v3193_v9  ;;  %v10919_v63 = vld [vmem:[#allocation19_spill] sm:$0xff] }
 0x507   :  { %v3095_v62 = vpop.permute.xlu1 %3094  ;;  %3376 = vmax.index.xlane.f32.xlu0 %v10897_v4  ;;  %v3098_v52 = vpop.permute.xlu0 %3097  ;;  %v3203_v57 = vsel %vm1495_vm6, %v3202_v33, %v3198_v8 }
 0x508   :  { %3378 = vmax.index.xlane.f32.xlu1 %v10898_v11  ;;  %v3207_v35 = vrot.slane %v3095_v62, %v10912_v3  ;;  %v3212_v4 = vrot.slane %v3098_v52, %v10913_v51 }
 0x50b   :  { %v8476_v45 = vpop.permute.xlu1 %3100  ;;  %3380 = vmax.index.xlane.f32.xlu0 %v10899_v41  ;;  %v8479_v34 = vpop.permute.xlu0 %3103  ;;  %v3208_v41 = vsel %vm1502_vm7, %v3207_v35, %v3203_v57  ;;  %v10920_v35 = vld [vmem:[#allocation20_spill] sm:$0xff] }
 0x50c   :  { %3382 = vmax.index.xlane.f32.xlu1 %v10900_v44  ;;  %v10914_v44 = vld [vmem:[#allocation50_spill] sm:$0xff]  ;;  %v3222_v52 = vrot.slane %v8479_v34, %v10915_v25 }
 0x50f   :  { %v8482_v23 = vpop.permute.xlu1 %3106  ;;  %3384 = vmax.index.xlane.f32.xlu0 %v10901_v48  ;;  %v8485_v47 = vpop.permute.xlu0 %3109  ;;  %v3217_v48 = vrot.slane %v8476_v45, %v10914_v44 }
 0x510   :  { %3386 = vmax.index.xlane.f32.xlu1 %v10902_v37  ;;  %v3227_v45 = vrot.slane %v8482_v23, %v10916_v61  ;;  %v3232_v34 = vrot.slane %v8485_v47, %v10917_v58 }
 0x513   :  { %v8488_v19 = vpop.permute.xlu1 %3112  ;;  %3388 = vmax.index.xlane.f32.xlu0 %v10903_v18  ;;  %v8491_v21 = vpop.permute.xlu0 %3115 }
 0x514   :  { %v3242_v47 = vrot.slane %v8491_v21, %v10919_v63 }
 0x517   :  { %v3119_v7 = vpop.permute.xlu1 %3118  ;;  %v3122_v59 = vpop.permute.xlu0 %3121 }
 0x518   :  { %v3247_v46 = vrot.slane %v3119_v7, %v10904_v40  ;;  %v3251_v6 = vrot.slane %v3122_v59, %v10905_v31  ;;  %v3213_v59 = vsel %vm1509_vm8, %v3212_v4, %v3208_v41  ;;  %v10923_v4 = vld [vmem:[#allocation25_spill] sm:$0xff] }
 0x51a   :  { %v3252_v43 = vsel %vm1453_vm0, %v3251_v6, %v3247_v46  ;;  %v3218_v6 = vsel %vm1516_vm9, %v3217_v48, %v3213_v59  ;;  %v10925_v48 = vld [vmem:[#allocation24_spill] sm:$0xff] }
 0x51b   :  { %v3125_v29 = vpop.permute.xlu1 %3124  ;;  %v3128_v22 = vpop.permute.xlu0 %3127 }
 0x51c   :  { %v3256_v60 = vrot.slane %v3125_v29, %v10906_v24  ;;  %v3261_v26 = vrot.slane %v3128_v22, %v10907_v56 }
 0x51e   :  { %v3257_v16 = vsel %vm1460_vm1, %v3256_v60, %v3252_v43  ;;  %v3223_v60 = vsel %vm1523_vm10, %v3222_v52, %v3218_v6  ;;  %v10928_v52 = vld [vmem:[#allocation29_spill] sm:$0xff] }
 0x51f   :  { %v3131_v2 = vpop.permute.xlu1 %3130  ;;  %v3134_v30 = vpop.permute.xlu0 %3133  ;;  %v3262_v32 = vsel %vm1467_vm2, %v3261_v26, %v3257_v16  ;;  %v3228_v53 = vsel %vm1530_vm11, %v3227_v45, %v3223_v60  ;;  %v10918_v16 = vld [vmem:[#allocation51_spill] sm:$0xff]  ;;  %v10932_v60 = vld [vmem:[#allocation33_spill] sm:$0xff] }
 0x520   :  { %v3266_v13 = vrot.slane %v3131_v2, %v10908_v27  ;;  %v3271_v49 = vrot.slane %v3134_v30, %v10909_v36  ;;  %v3237_v23 = vrot.slane %v8488_v19, %v10918_v16  ;;  %v3233_v14 = vsel %vm1537_vm12, %v3232_v34, %v3228_v53  ;;  %v10930_v45 = vld [vmem:[#allocation31_spill] sm:$0xff] }
 0x522   :  { %v3267_v12 = vsel %vm1474_vm3, %v3266_v13, %v3262_v32 }
 0x523   :  { %v3137_v28 = vpop.permute.xlu1 %3136  ;;  %v3140_v42 = vpop.permute.xlu0 %3139  ;;  %v3272_v50 = vsel %vm1481_vm4, %v3271_v49, %v3267_v12  ;;  %v3238_v49 = vsel %vm1544_vm13, %v3237_v23, %v3233_v14  ;;  %v10934_v23 = vld [vmem:[#allocation35_spill] sm:$0xff] }
 0x524   :  { %v3276_v1 = vrot.slane %v3137_v28, %v10910_v54  ;;  %v3281_v38 = vrot.slane %v3140_v42, %v10911_v55  ;;  %v3243_v28 = vsel %vm1551_vm14, %v3242_v47, %v3238_v49  ;;  %v10936_v47 = vld [vmem:[#allocation37_spill] sm:$0xff] }
 0x526   :  { %v3277_v15 = vsel %vm1488_vm5, %v3276_v1, %v3272_v50  ;;  %v10921_v50 = vld [vmem:[#allocation21_spill] sm:$0xff] }
 0x527   :  { %v3143_v11 = vpop.permute.xlu1 %3142  ;;  %v3146_v10 = vpop.permute.xlu0 %3145  ;;  %v3282_v37 = vsel %vm1495_vm6, %v3281_v38, %v3277_v15  ;;  %v10922_v15 = vld [vmem:[#allocation23_spill] sm:$0xff] }
 0x528   :  { %v3286_v62 = vrot.slane %v3143_v11, %v10912_v3  ;;  %v3291_v18 = vrot.slane %v3146_v10, %v10913_v51  ;;  %v10924_v10 = vld [vmem:[#allocation22_spill] sm:$0xff] }
 0x52a   :  { %v3287_v7 = vsel %vm1502_vm7, %v3286_v62, %v3282_v37  ;;  %v10926_v37 = vld [vmem:[#allocation27_spill] sm:$0xff] }
 0x52b   :  { %v3149_v17 = vpop.permute.xlu1 %3148  ;;  %v3152_v46 = vpop.permute.xlu0 %3151  ;;  %v3292_v29 = vsel %vm1509_vm8, %v3291_v18, %v3287_v7  ;;  %v10927_v7 = vld [vmem:[#allocation26_spill] sm:$0xff] }
 0x52c   :  { %v3296_v20 = vrot.slane %v3149_v17, %v10914_v44  ;;  %v3301_v22 = vrot.slane %v3152_v46, %v10915_v25  ;;  %v10929_v46 = vld [vmem:[#allocation28_spill] sm:$0xff] }
 0x52e   :  { %v3297_v39 = vsel %vm1516_vm9, %v3296_v20, %v3292_v29  ;;  %v10931_v29 = vld [vmem:[#allocation30_spill] sm:$0xff] }
 0x52f   :  { %v3155_v43 = vpop.permute.xlu1 %3154  ;;  %v3158_v26 = vpop.permute.xlu0 %3157  ;;  %v3302_v0 = vsel %vm1523_vm10, %v3301_v22, %v3297_v39 }
 0x530   :  { %v3306_v5 = vrot.slane %v3155_v43, %v10916_v61  ;;  %v3311_v2 = vrot.slane %v3158_v26, %v10917_v58  ;;  %v10933_v43 = vld [vmem:[#allocation32_spill] sm:$0xff] }
 0x532   :  { %v3307_v30 = vsel %vm1530_vm11, %v3306_v5, %v3302_v0  ;;  %v10935_v0 = vld [vmem:[#allocation34_spill] sm:$0xff] }
 0x533   :  { %v3161_v13 = vpop.permute.xlu1 %3160  ;;  %v3164_v32 = vpop.permute.xlu0 %3163  ;;  %v3312_v9 = vsel %vm1537_vm12, %v3311_v2, %v3307_v30 }
 0x534   :  { %v3316_v12 = vrot.slane %v3161_v13, %v10918_v16  ;;  %v3321_v19 = vrot.slane %v3164_v32, %v10919_v63  ;;  %v10937_v32 = vld [vmem:[#allocation36_spill] sm:$0xff] }
 0x536   :  { %v3317_v33 = vsel %vm1544_vm13, %v3316_v12, %v3312_v9 }
 0x537   :  { %v3322_v42 = vsel %vm1551_vm14, %v3321_v19, %v3317_v33 }
 0x538   :  { %v3323_v8 = vsel %vm1632_vm15, %v3322_v42, %v3243_v28 }
 0x539   :  { %3325 = vst [vmem:[#allocation2] sm:$0x3] %v3323_v8 }
 0x540   :  { %v6979_v21 = vld.sshfl [vmem:[#allocation2] sm:$0x11 pattern:$0x75316420] }
 0x541   :  { %v3567_v1 = vrot.slane %v6979_v21, %v10920_v35  ;;  %v3560_v39 = vcombine.high %v6979_v21, %v6979_v21 }
 0x543   :  { %v3578_v38 = vrot.slane %v3567_v1, %v10921_v50  ;;  %v3574_v53 = vrot.slane %v3560_v39, %v10920_v35 }
 0x545   :  { %v8565_v57 = vadd.f32 %v10922_v15, %v3578_v38  ;;  %v8568_v11 = vadd.f32 %v10923_v4, %v3578_v38  ;;  %v8573_v41 = vadd.f32 %v10924_v10, %v3578_v38  ;;  %v8576_v62 = vadd.f32 %v10925_v48, %v3578_v38 }
 0x546   :  { %v8581_v18 = vadd.f32 %v10926_v37, %v3578_v38  ;;  %v8584_v59 = vadd.f32 %v10927_v7, %v3578_v38  ;;  %v8589_v17 = vadd.f32 %v10928_v52, %v3578_v38  ;;  %v8592_v6 = vadd.f32 %v10929_v46, %v3578_v38 }
 0x547   :  { %3619 = vmax.xlane.f32.xlu0 %v8565_v57  ;;  %3617 = vmax.xlane.f32.xlu1 %v8568_v11  ;;  %v8597_v20 = vadd.f32 %v10930_v45, %v3578_v38  ;;  %v8600_v22 = vadd.f32 %v10931_v29, %v3578_v38  ;;  %v8605_v34 = vadd.f32 %v10932_v60, %v3578_v38 }
 0x548   :  { %v8608_v26 = vadd.f32 %v10933_v43, %v3578_v38  ;;  %v8614_v5 = vadd.f32 %v10934_v23, %v3578_v38  ;;  %v8617_v2 = vadd.f32 %v10935_v0, %v3578_v38  ;;  %v3582_v14 = vrot.slane %v3574_v53, %v10921_v50 }
 0x549   :  { %v8623_v13 = vadd.f32 %v10936_v47, %v3578_v38  ;;  %v8626_v49 = vadd.f32 %v10937_v32, %v3578_v38 }
 0x54a   :  { %v8631_v9 = vadd.f32 %v10922_v15, %v3582_v14  ;;  %v8634_v33 = vadd.f32 %v10923_v4, %v3582_v14  ;;  %v8641_v8 = vadd.f32 %v10924_v10, %v3582_v14  ;;  %v8644_v21 = vadd.f32 %v10925_v48, %v3582_v14 }
 0x54b   :  { %3623 = vmax.xlane.f32.xlu0 %v8573_v41  ;;  %3621 = vmax.xlane.f32.xlu1 %v8576_v62  ;;  %v8653_v15 = vadd.f32 %v10926_v37, %v3582_v14  ;;  %v8656_v4 = vadd.f32 %v10927_v7, %v3582_v14  ;;  %v8665_v39 = vadd.f32 %v10928_v52, %v3582_v14 }
 0x54c   :  { %10938 = vst [vmem:[#allocation55_spill] sm:$0xff] %v8631_v9  ;;  %10939 = vst [vmem:[#allocation54_spill] sm:$0xff] %v8634_v33  ;;  %v8668_v53 = vadd.f32 %v10929_v46, %v3582_v14  ;;  %v8677_v35 = vadd.f32 %v10930_v45, %v3582_v14 }
 0x54d   :  { %10940 = vst [vmem:[#allocation57_spill] sm:$0xff] %v8641_v8  ;;  %10941 = vst [vmem:[#allocation56_spill] sm:$0xff] %v8644_v21 }
 0x54e   :  { %10942 = vst [vmem:[#allocation59_spill] sm:$0xff] %v8653_v15  ;;  %10943 = vst [vmem:[#allocation58_spill] sm:$0xff] %v8656_v4 }
 0x54f   :  { %3627 = vmax.xlane.f32.xlu0 %v8581_v18  ;;  %3625 = vmax.xlane.f32.xlu1 %v8584_v59  ;;  %10944 = vst [vmem:[#allocation61_spill] sm:$0xff] %v8665_v39  ;;  %10945 = vst [vmem:[#allocation60_spill] sm:$0xff] %v8668_v53 }
 0x550   :  { %10946 = vst [vmem:[#allocation63_spill] sm:$0xff] %v8677_v35 }
 0x553   :  { %3631 = vmax.xlane.f32.xlu0 %v8589_v17  ;;  %3629 = vmax.xlane.f32.xlu1 %v8592_v6 }
 0x557   :  { %3635 = vmax.xlane.f32.xlu0 %v8597_v20  ;;  %3633 = vmax.xlane.f32.xlu1 %v8600_v22 }
 0x55b   :  { %3639 = vmax.xlane.f32.xlu0 %v8605_v34  ;;  %3637 = vmax.xlane.f32.xlu1 %v8608_v26 }
 0x55f   :  { %3643 = vmax.xlane.f32.xlu0 %v8614_v5  ;;  %3641 = vmax.xlane.f32.xlu1 %v8617_v2 }
 0x560   :  { %v3329_v30 = vpop.xlane.xlu0 %3328 }
 0x563   :  { %3647 = vmax.xlane.f32.xlu0 %v8623_v13  ;;  %3645 = vmax.xlane.f32.xlu1 %v8626_v49 }
 0x564   :  { %v3331_v12 = vpop.xlane.xlu0 %3330 }
 0x565   :  { %v3327_v19 = vpop.xlane.xlu1 %3326 }
 0x567   :  { %3651 = vmax.xlane.f32.xlu0 %v8631_v9  ;;  %3649 = vmax.xlane.f32.xlu1 %v8634_v33 }
 0x568   :  { %v3333_v28 = vpop.xlane.xlu0 %3332 }
 0x569   :  { %v8638_v42 = vpop.xlane.xlu1 %3334 }
 0x56b   :  { %3655 = vmax.xlane.f32.xlu0 %v8641_v8  ;;  %3653 = vmax.xlane.f32.xlu1 %v8644_v21 }
 0x56c   :  { %v8648_v1 = vpop.xlane.xlu0 %3336 }
 0x56d   :  { %v8650_v38 = vpop.xlane.xlu1 %3338 }
 0x56f   :  { %3659 = vmax.xlane.f32.xlu0 %v8653_v15  ;;  %3657 = vmax.xlane.f32.xlu1 %v8656_v4  ;;  %v8680_v15 = vadd.f32 %v10931_v29, %v3582_v14  ;;  %v8715_v4 = vadd.f32 %v10937_v32, %v3582_v14 }
 0x570   :  { %v8660_v10 = vpop.xlane.xlu0 %3340 }
 0x571   :  { %v8662_v48 = vpop.xlane.xlu1 %3342  ;;  %10947 = vst [vmem:[#allocation62_spill] sm:$0xff] %v8680_v15  ;;  %10953 = vst [vmem:[#allocation68_spill] sm:$0xff] %v8715_v4 }
 0x573   :  { %3663 = vmax.xlane.f32.xlu0 %v8665_v39  ;;  %3661 = vmax.xlane.f32.xlu1 %v8668_v53  ;;  %v8689_v39 = vadd.f32 %v10932_v60, %v3582_v14  ;;  %v8692_v53 = vadd.f32 %v10933_v43, %v3582_v14  ;;  %v3393_v43 = vrot.slane %v3327_v19, %v10904_v40 }
 0x574   :  { %v8672_v37 = vpop.xlane.xlu0 %3344 }
 0x575   :  { %v8674_v7 = vpop.xlane.xlu1 %3346  ;;  %10948 = vst [vmem:[#allocation65_spill] sm:$0xff] %v8689_v39  ;;  %10949 = vst [vmem:[#allocation64_spill] sm:$0xff] %v8692_v53 }
 0x577   :  { %3667 = vmax.xlane.f32.xlu0 %v8677_v35  ;;  %3665 = vmax.xlane.f32.xlu1 %v8680_v15  ;;  %v8701_v35 = vadd.f32 %v10934_v23, %v3582_v14  ;;  %v8704_v15 = vadd.f32 %v10935_v0, %v3582_v14  ;;  %v3397_v23 = vrot.slane %v3329_v30, %v10905_v31 }
 0x578   :  { %v8684_v52 = vpop.xlane.xlu0 %3348 }
 0x579   :  { %v8686_v46 = vpop.xlane.xlu1 %3350  ;;  %10950 = vst [vmem:[#allocation67_spill] sm:$0xff] %v8701_v35  ;;  %10951 = vst [vmem:[#allocation66_spill] sm:$0xff] %v8704_v15 }
 0x57b   :  { %3671 = vmax.xlane.f32.xlu0 %v8689_v39  ;;  %3669 = vmax.xlane.f32.xlu1 %v8692_v53  ;;  %v8712_v53 = vadd.f32 %v10936_v47, %v3582_v14  ;;  %v3402_v47 = vrot.slane %v3331_v12, %v10906_v24  ;;  %v3407_v14 = vrot.slane %v3333_v28, %v10907_v56 }
 0x57c   :  { %v8696_v45 = vpop.xlane.xlu0 %3352  ;;  %v3417_v28 = vrot.slane %v8648_v1, %v10909_v36  ;;  %v3427_v1 = vrot.slane %v8660_v10, %v10911_v55 }
 0x57d   :  { %v8698_v29 = vpop.xlane.xlu1 %3354  ;;  %10952 = vst [vmem:[#allocation69_spill] sm:$0xff] %v8712_v53 }
 0x57f   :  { %3675 = vmax.xlane.f32.xlu0 %v8701_v35  ;;  %3673 = vmax.xlane.f32.xlu1 %v8704_v15  ;;  %v3398_v35 = vsel %vm1453_vm0, %v3397_v23, %v3393_v43 }
 0x580   :  { %v8708_v60 = vpop.xlane.xlu0 %3356  ;;  %v3403_v32 = vsel %vm1460_vm1, %v3402_v47, %v3398_v35 }
 0x581   :  { %v3359_v39 = vpop.xlane.xlu1 %3358  ;;  %v3408_v12 = vsel %vm1467_vm2, %v3407_v14, %v3403_v32 }
 0x582   :  { %v3472_v15 = vrot.slane %v3359_v39, %v10904_v40  ;;  %v3412_v39 = vrot.slane %v8638_v42, %v10908_v27  ;;  %v3422_v42 = vrot.slane %v8650_v38, %v10910_v54 }
 0x583   :  { %3679 = vmax.xlane.f32.xlu0 %v8712_v53  ;;  %3677 = vmax.xlane.f32.xlu1 %v8715_v4 }
 0x584   :  { %v3361_v0 = vpop.xlane.xlu0 %3360 }
 0x585   :  { %v3476_v19 = vrot.slane %v3361_v0, %v10905_v31  ;;  %v3363_v8 = vpop.xlane.xlu1 %3362 }
 0x586   :  { %v3481_v21 = vrot.slane %v3363_v8, %v10906_v24 }
 0x587   :  { %v3477_v30 = vsel %vm1453_vm0, %v3476_v19, %v3472_v15  ;;  %v3413_v19 = vsel %vm1474_vm3, %v3412_v39, %v3408_v12 }
 0x588   :  { %v3365_v53 = vpop.xlane.xlu0 %3364  ;;  %v3482_v43 = vsel %vm1460_vm1, %v3481_v21, %v3477_v30  ;;  %v3418_v47 = vsel %vm1481_vm4, %v3417_v28, %v3413_v19  ;;  %v3437_v28 = vrot.slane %v8672_v37, %v10913_v51  ;;  %v3447_v37 = vrot.slane %v8684_v52, %v10915_v25 }
 0x589   :  { %v3486_v4 = vrot.slane %v3365_v53, %v10907_v56  ;;  %v3367_v9 = vpop.xlane.xlu1 %3366  ;;  %v8738_v53 = vld [vmem:[#allocation3 + $0x8] sm:$0x3]  ;;  %v3423_v38 = vsel %vm1488_vm5, %v3422_v42, %v3418_v47 }
 0x58a   :  { %v3491_v23 = vrot.slane %v3367_v9, %v10908_v27  ;;  %v8751_v30 = vrot.slane %v8738_v53, %v10921_v50  ;;  %v3428_v10 = vsel %vm1495_vm6, %v3427_v1, %v3423_v38 }
 0x58b   :  { %v3487_v8 = vsel %vm1467_vm2, %v3486_v4, %v3482_v43  ;;  %v3432_v43 = vrot.slane %v8662_v48, %v10912_v3  ;;  %v3442_v48 = vrot.slane %v8674_v7, %v10914_v44 }
 0x58c   :  { %v3369_v15 = vpop.xlane.xlu0 %3368  ;;  %v3492_v9 = vsel %vm1474_vm3, %v3491_v23, %v3487_v8 }
 0x58d   :  { %v3496_v35 = vrot.slane %v3369_v15, %v10909_v36  ;;  %v3371_v0 = vpop.xlane.xlu1 %3370  ;;  %v3433_v19 = vsel %vm1502_vm7, %v3432_v43, %v3428_v10  ;;  %v3457_v43 = vrot.slane %v8696_v45, %v10917_v58 }
 0x58e   :  { %v3501_v21 = vrot.slane %v3371_v0, %v10910_v54 }
 0x58f   :  { %v3497_v4 = vsel %vm1481_vm4, %v3496_v35, %v3492_v9 }
 0x590   :  { %v3373_v14 = vpop.xlane.xlu0 %3372  ;;  %v3502_v23 = vsel %vm1488_vm5, %v3501_v21, %v3497_v4  ;;  %v3438_v21 = vsel %vm1509_vm8, %v3437_v28, %v3433_v19 }
 0x591   :  { %v3506_v32 = vrot.slane %v3373_v14, %v10911_v55  ;;  %v3375_v39 = vpop.xlane.xlu1 %3374  ;;  %v3443_v7 = vsel %vm1516_vm9, %v3442_v48, %v3438_v21 }
 0x592   :  { %v3511_v12 = vrot.slane %v3375_v39, %v10912_v3  ;;  %v3448_v52 = vsel %vm1523_vm10, %v3447_v37, %v3443_v7 }
 0x593   :  { %v3507_v8 = vsel %vm1495_vm6, %v3506_v32, %v3502_v23  ;;  %v3452_v32 = vrot.slane %v8686_v46, %v10916_v61 }
 0x594   :  { %v3377_v15 = vpop.xlane.xlu0 %3376  ;;  %3689 = vbcast.lane.b32.xlu1 %v8751_v30, 256  ;;  %v3512_v42 = vsel %vm1502_vm7, %v3511_v12, %v3507_v8  ;;  %v3462_v8 = vrot.slane %v8698_v29, %v10918_v16 }
 0x595   :  { %v3516_v35 = vrot.slane %v3377_v15, %v10913_v51  ;;  %v3379_v0 = vpop.xlane.xlu1 %3378  ;;  %v3453_v46 = vsel %vm1530_vm11, %v3452_v32, %v3448_v52 }
 0x596   :  { %v3521_v9 = vrot.slane %v3379_v0, %v10914_v44  ;;  %v3458_v45 = vsel %vm1537_vm12, %v3457_v43, %v3453_v46  ;;  %v3467_v0 = vrot.slane %v8708_v60, %v10919_v63  ;;  %v10954_v60 = vld [vmem:[#allocation53_spill] sm:$0xff] }
 0x597   :  { %v3517_v47 = vsel %vm1509_vm8, %v3516_v35, %v3512_v42  ;;  %v3463_v29 = vsel %vm1544_vm13, %v3462_v8, %v3458_v45 }
 0x598   :  { %v3381_v1 = vpop.xlane.xlu0 %3380  ;;  %3697 = vbcast.lane.b32.xlu1 %v8751_v30, 272  ;;  %v3522_v39 = vsel %vm1516_vm9, %v3521_v9, %v3517_v47  ;;  %v3468_v21 = vsel %vm1551_vm14, %v3467_v0, %v3463_v29 }
 0x599   :  { %v3526_v4 = vrot.slane %v3381_v1, %v10915_v25  ;;  %v3383_v14 = vpop.xlane.xlu1 %3382  ;;  %3693 = vbcast.lane.b32.xlu0 %v8751_v30, 264  ;;  %v3754_v1 = vrot.slane %v8738_v53, %v10954_v60 }
 0x59a   :  { %v3531_v38 = vrot.slane %v3383_v14, %v10916_v61 }
 0x59b   :  { %v3527_v23 = vsel %vm1523_vm10, %v3526_v4, %v3522_v39 }
 0x59c   :  { %v3385_v12 = vpop.xlane.xlu0 %3384  ;;  %3701 = vbcast.lane.b32.xlu1 %v8751_v30, 280  ;;  %v3532_v15 = vsel %vm1530_vm11, %v3531_v38, %v3527_v23 }
 0x59d   :  { %v3536_v10 = vrot.slane %v3385_v12, %v10917_v58  ;;  %v3387_v28 = vpop.xlane.xlu1 %3386  ;;  %3709 = vbcast.lane.b32.xlu0 %v8751_v30, 296 }
 0x59e   :  { %v3541_v35 = vrot.slane %v3387_v28, %v10918_v16 }
 0x59f   :  { %v3537_v19 = vsel %vm1537_vm12, %v3536_v10, %v3532_v15 }
 0x5a0   :  { %v3389_v48 = vpop.xlane.xlu0 %3388  ;;  %3705 = vbcast.lane.b32.xlu1 %v8751_v30, 288  ;;  %v3542_v9 = vsel %vm1544_vm13, %v3541_v35, %v3537_v19 }
 0x5a1   :  { %v3546_v42 = vrot.slane %v3389_v48, %v10919_v63  ;;  %3717 = vbcast.lane.b32.xlu0 %v8751_v30, 312 }
 0x5a3   :  { %v3547_v37 = vsel %vm1551_vm14, %v3546_v42, %v3542_v9 }
 0x5a4   :  { %v3548_v47 = vsel %vm1632_vm15, %v3547_v37, %v3468_v21  ;;  %3713 = vbcast.lane.b32.xlu1 %v8751_v30, 304 }
 0x5a5   :  { %3550 = vst [vmem:[#allocation11 + $0x6] sm:$0x3] %v3548_v47  ;;  %3725 = vbcast.lane.b32.xlu0 %v8751_v30, 328 }
 0x5a8   :  { %3721 = vbcast.lane.b32.xlu1 %v8751_v30, 320 }
 0x5a9   :  { %3733 = vbcast.lane.b32.xlu0 %v8751_v30, 344 }
 0x5ac   :  { %3729 = vbcast.lane.b32.xlu1 %v8751_v30, 336 }
 0x5ad   :  { %3741 = vbcast.lane.b32.xlu0 %v8751_v30, 360 }
 0x5b0   :  { %3737 = vbcast.lane.b32.xlu1 %v8751_v30, 352 }
 0x5b1   :  { %3749 = vbcast.lane.b32.xlu0 %v8751_v30, 376 }
 0x5b4   :  { %3745 = vbcast.lane.b32.xlu1 %v8751_v30, 368 }
 0x5b5   :  { %3760 = vbcast.lane.b32.xlu0 %v3754_v1, 264 }
 0x5b8   :  { %3756 = vbcast.lane.b32.xlu1 %v3754_v1, 256 }
 0x5b9   :  { %3768 = vbcast.lane.b32.xlu0 %v3754_v1, 280 }
 0x5bc   :  { %3764 = vbcast.lane.b32.xlu1 %v3754_v1, 272 }
 0x5bd   :  { %3776 = vbcast.lane.b32.xlu0 %v3754_v1, 296 }
 0x5c0   :  { %3772 = vbcast.lane.b32.xlu1 %v3754_v1, 288 }
 0x5c1   :  { %3784 = vbcast.lane.b32.xlu0 %v3754_v1, 312 }
 0x5c4   :  { %3780 = vbcast.lane.b32.xlu1 %v3754_v1, 304 }
 0x5c5   :  { %3792 = vbcast.lane.b32.xlu0 %v3754_v1, 328 }
 0x5c8   :  { %3788 = vbcast.lane.b32.xlu1 %v3754_v1, 320 }
 0x5c9   :  { %3800 = vbcast.lane.b32.xlu0 %v3754_v1, 344 }
 0x5cc   :  { %3796 = vbcast.lane.b32.xlu1 %v3754_v1, 336 }
 0x5cd   :  { %3808 = vbcast.lane.b32.xlu0 %v3754_v1, 360 }
 0x5d0   :  { %3804 = vbcast.lane.b32.xlu1 %v3754_v1, 352 }
 0x5d1   :  { %3816 = vbcast.lane.b32.xlu0 %v3754_v1, 376 }
 0x5d4   :  { %v3618_v4 = vpop.xlane.xlu1 %3617  ;;  %v3620_v14 = vpop.xlane.xlu0 %3619  ;;  %3812 = vbcast.lane.b32.xlu1 %v3754_v1, 368 }
 0x5d8   :  { %v3622_v53 = vpop.xlane.xlu1 %3621  ;;  %v3624_v30 = vpop.xlane.xlu0 %3623 }
 0x5dc   :  { %v3626_v7 = vpop.xlane.xlu1 %3625  ;;  %v3628_v32 = vpop.xlane.xlu0 %3627 }
 0x5e0   :  { %v3630_v39 = vpop.xlane.xlu1 %3629  ;;  %v3632_v38 = vpop.xlane.xlu0 %3631 }
 0x5e4   :  { %v3634_v52 = vpop.xlane.xlu1 %3633  ;;  %v3636_v43 = vpop.xlane.xlu0 %3635 }
 0x5e8   :  { %v3638_v23 = vpop.xlane.xlu1 %3637  ;;  %v3640_v12 = vpop.xlane.xlu0 %3639 }
 0x5ec   :  { %v3642_v10 = vpop.xlane.xlu1 %3641  ;;  %v3644_v28 = vpop.xlane.xlu0 %3643 }
 0x5f0   :  { %v8817_v46 = vpop.xlane.xlu1 %3645  ;;  %v8819_v8 = vpop.xlane.xlu0 %3647 }
 0x5f4   :  { %v8821_v15 = vpop.xlane.xlu1 %3649  ;;  %v8823_v35 = vpop.xlane.xlu0 %3651 }
 0x5f8   :  { %v8825_v45 = vpop.xlane.xlu1 %3653  ;;  %v8827_v0 = vpop.xlane.xlu0 %3655 }
 0x5fc   :  { %v8829_v19 = vpop.xlane.xlu1 %3657  ;;  %v8831_v48 = vpop.xlane.xlu0 %3659 }
 0x600   :  { %v8833_v42 = vpop.xlane.xlu1 %3661  ;;  %v8835_v29 = vpop.xlane.xlu0 %3663 }
 0x604   :  { %v8837_v9 = vpop.xlane.xlu1 %3665  ;;  %v8839_v21 = vpop.xlane.xlu0 %3667 }
 0x608   :  { %v8841_v37 = vpop.xlane.xlu1 %3669  ;;  %v8843_v47 = vpop.xlane.xlu0 %3671 }
 0x60c   :  { %v8845_v1 = vpop.xlane.xlu1 %3673  ;;  %v8847_v60 = vpop.xlane.xlu0 %3675 }
 0x610   :  { %v8849_v50 = vpop.xlane.xlu1 %3677  ;;  %v8851_v63 = vpop.xlane.xlu0 %3679 }
 0x614   :  { %v3690_v16 = vpop.permute.xlu1 %3689  ;;  %v3694_v58 = vpop.permute.xlu0 %3693 }
 0x615   :  { %v3850_v61 = vadd.f32 %v3690_v16, %v3618_v4  ;;  %v3851_v25 = vadd.f32 %v3694_v58, %v3620_v14 }
 0x617   :  { %3915 = vperm.xlu1 %6997, %v3850_v61   ;;  %3918 = vperm.xlu0 %6996, %v3851_v25  }
 0x618   :  { %v3698_v44 = vpop.permute.xlu1 %3697  ;;  %v3710_v51 = vpop.permute.xlu0 %3709 }
 0x619   :  { %v3852_v3 = vadd.f32 %v3698_v44, %v3622_v53  ;;  %v3855_v24 = vadd.f32 %v3710_v51, %v3628_v32 }
 0x61b   :  { %3921 = vperm.xlu1 %6997, %v3852_v3  }
 0x61c   :  { %v3702_v55 = vpop.permute.xlu1 %3701  ;;  %v3718_v54 = vpop.permute.xlu0 %3717 }
 0x61d   :  { %v3853_v36 = vadd.f32 %v3702_v55, %v3624_v30  ;;  %v3857_v16 = vadd.f32 %v3718_v54, %v3632_v38 }
 0x61f   :  { %3924 = vperm.xlu0 %6996, %v3853_v36  }
 0x620   :  { %v3706_v27 = vpop.permute.xlu1 %3705  ;;  %v3726_v56 = vpop.permute.xlu0 %3725 }
 0x621   :  { %v3854_v31 = vadd.f32 %v3706_v27, %v3626_v7  ;;  %v3859_v44 = vadd.f32 %v3726_v56, %v3636_v43 }
 0x623   :  { %3927 = vperm.xlu1 %6997, %v3854_v31   ;;  %3930 = vperm.xlu0 %6996, %v3855_v24  }
 0x624   :  { %v3714_v40 = vpop.permute.xlu1 %3713  ;;  %v3734_v33 = vpop.permute.xlu0 %3733 }
 0x625   :  { %v3856_v58 = vadd.f32 %v3714_v40, %v3630_v39  ;;  %v3861_v4 = vadd.f32 %v3734_v33, %v3640_v12 }
 0x627   :  { %3933 = vperm.xlu1 %6997, %v3856_v58   ;;  %3936 = vperm.xlu0 %6996, %v3857_v16  }
 0x628   :  { %v3722_v25 = vpop.permute.xlu1 %3721  ;;  %v3742_v61 = vpop.permute.xlu0 %3741 }
 0x629   :  { %v3858_v3 = vadd.f32 %v3722_v25, %v3634_v52  ;;  %v3863_v27 = vadd.f32 %v3742_v61, %v3644_v28 }
 0x62b   :  { %3939 = vperm.xlu1 %6997, %v3858_v3   ;;  %3942 = vperm.xlu0 %6996, %v3859_v44  }
 0x62c   :  { %v3730_v55 = vpop.permute.xlu1 %3729  ;;  %v3750_v36 = vpop.permute.xlu0 %3749 }
 0x62d   :  { %v3860_v14 = vadd.f32 %v3730_v55, %v3638_v23  ;;  %v3865_v53 = vadd.f32 %v3750_v36, %v8819_v8  ;;  %v10966_v55 = vld [vmem:[#allocation65_spill] sm:$0xff] }
 0x62f   :  { %3945 = vperm.xlu1 %6997, %v3860_v14   ;;  %3948 = vperm.xlu0 %6996, %v3861_v4   ;;  %v10967_v4 = vld [vmem:[#allocation66_spill] sm:$0xff] }
 0x630   :  { %v3738_v31 = vpop.permute.xlu1 %3737  ;;  %v3761_v24 = vpop.permute.xlu0 %3760 }
 0x631   :  { %v3862_v51 = vadd.f32 %v3738_v31, %v3642_v10  ;;  %v3867_v33 = vadd.f32 %v3761_v24, %v8823_v35  ;;  %v10968_v31 = vld [vmem:[#allocation67_spill] sm:$0xff] }
 0x633   :  { %3951 = vperm.xlu1 %6997, %v3862_v51   ;;  %3954 = vperm.xlu0 %6996, %v3863_v27   ;;  %v10969_v27 = vld [vmem:[#allocation68_spill] sm:$0xff] }
 0x634   :  { %v3746_v40 = vpop.permute.xlu1 %3745  ;;  %v3769_v54 = vpop.permute.xlu0 %3768 }
 0x635   :  { %v3864_v56 = vadd.f32 %v3746_v40, %v8817_v46  ;;  %v3869_v52 = vadd.f32 %v3769_v54, %v8827_v0  ;;  %v10970_v40 = vld [vmem:[#allocation69_spill] sm:$0xff] }
 0x637   :  { %3957 = vperm.xlu1 %6997, %v3864_v56   ;;  %3960 = vperm.xlu0 %6996, %v3865_v53  }
 0x638   :  { %v3757_v30 = vpop.permute.xlu1 %3756  ;;  %v3777_v7 = vpop.permute.xlu0 %3776 }
 0x639   :  { %v3866_v32 = vadd.f32 %v3757_v30, %v8821_v15  ;;  %v3871_v10 = vadd.f32 %v3777_v7, %v8831_v48  ;;  %v10971_v30 = vld [vmem:[#allocation38_spill] sm:$0xff] }
 0x63b   :  { %3963 = vperm.xlu1 %6997, %v3866_v32   ;;  %3966 = vperm.xlu0 %6996, %v3867_v33   ;;  %v10972_v33 = vld [vmem:[#allocation40_spill] sm:$0xff] }
 0x63c   :  { %v3765_v39 = vpop.permute.xlu1 %3764  ;;  %v3785_v38 = vpop.permute.xlu0 %3784 }
 0x63d   :  { %v3868_v43 = vadd.f32 %v3765_v39, %v8825_v45  ;;  %v3873_v8 = vadd.f32 %v3785_v38, %v8835_v29 }
 0x63f   :  { %3969 = vperm.xlu1 %6997, %v3868_v43   ;;  %3972 = vperm.xlu0 %6996, %v3869_v52   ;;  %v10973_v52 = vld [vmem:[#allocation42_spill] sm:$0xff] }
 0x640   :  { %v3773_v23 = vpop.permute.xlu1 %3772  ;;  %v3793_v12 = vpop.permute.xlu0 %3792 }
 0x641   :  { %v3870_v28 = vadd.f32 %v3773_v23, %v8829_v19  ;;  %v3875_v45 = vadd.f32 %v3793_v12, %v8839_v21  ;;  %v10974_v23 = vld [vmem:[#allocation39_spill] sm:$0xff] }
 0x643   :  { %3975 = vperm.xlu1 %6997, %v3870_v28   ;;  %3978 = vperm.xlu0 %6996, %v3871_v10  }
 0x644   :  { %v3781_v46 = vpop.permute.xlu1 %3780  ;;  %v3801_v35 = vpop.permute.xlu0 %3800 }
 0x645   :  { %v3872_v15 = vadd.f32 %v3781_v46, %v8833_v42  ;;  %v3877_v19 = vadd.f32 %v3801_v35, %v8843_v47  ;;  %v10965_v47 = vld [vmem:[#allocation64_spill] sm:$0xff] }
 0x646   :  { %v10975_v46 = vld [vmem:[#allocation44_spill] sm:$0xff] }
 0x647   :  { %3981 = vperm.xlu1 %6997, %v3872_v15   ;;  %3984 = vperm.xlu0 %6996, %v3873_v8  }
 0x648   :  { %v3789_v0 = vpop.permute.xlu1 %3788  ;;  %v3809_v48 = vpop.permute.xlu0 %3808 }
 0x649   :  { %v3874_v16 = vadd.f32 %v3789_v0, %v8837_v9  ;;  %v3879_v42 = vadd.f32 %v3809_v48, %v8847_v60  ;;  %v10964_v60 = vld [vmem:[#allocation63_spill] sm:$0xff] }
 0x64b   :  { %3987 = vperm.xlu1 %6997, %v3874_v16   ;;  %3990 = vperm.xlu0 %6996, %v3875_v45  }
 0x64c   :  { %v3797_v58 = vpop.permute.xlu1 %3796  ;;  %v3817_v44 = vpop.permute.xlu0 %3816 }
 0x64d   :  { %v3876_v25 = vadd.f32 %v3797_v58, %v8841_v37  ;;  %v3881_v9 = vadd.f32 %v3817_v44, %v8851_v63  ;;  %v10955_v63 = vld [vmem:[#allocation54_spill] sm:$0xff] }
 0x64e   :  { %v10977_v44 = vld [vmem:[#allocation46_spill] sm:$0xff] }
 0x64f   :  { %3993 = vperm.xlu1 %6997, %v3876_v25   ;;  %3996 = vperm.xlu0 %6996, %v3877_v19   ;;  %v10976_v19 = vld [vmem:[#allocation41_spill] sm:$0xff] }
 0x650   :  { %v3805_v29 = vpop.permute.xlu1 %3804 }
 0x651   :  { %v3878_v61 = vadd.f32 %v3805_v29, %v8845_v1 }
 0x653   :  { %3999 = vperm.xlu1 %6997, %v3878_v61   ;;  %4002 = vperm.xlu0 %6996, %v3879_v42  }
 0x654   :  { %v3813_v21 = vpop.permute.xlu1 %3812 }
 0x655   :  { %v3880_v3 = vadd.f32 %v3813_v21, %v8849_v50 }
 0x657   :  { %4005 = vperm.xlu1 %6997, %v3880_v3   ;;  %4008 = vperm.xlu0 %6996, %v3881_v9  }
 0x676   :  { %4173 = vmax.index.xlane.f32.xlu0 %v8565_v57 }
 0x67a   :  { %4175 = vmax.index.xlane.f32.xlu0 %v8576_v62 }
 0x67b   :  { %4171 = vmax.index.xlane.f32.xlu1 %v8568_v11  ;;  %v10956_v11 = vld [vmem:[#allocation55_spill] sm:$0xff] }
 0x67e   :  { %4177 = vmax.index.xlane.f32.xlu0 %v8573_v41  ;;  %v10957_v41 = vld [vmem:[#allocation56_spill] sm:$0xff] }
 0x67f   :  { %4179 = vmax.index.xlane.f32.xlu1 %v8584_v59 }
 0x682   :  { %4181 = vmax.index.xlane.f32.xlu0 %v8581_v18  ;;  %v10958_v18 = vld [vmem:[#allocation57_spill] sm:$0xff] }
 0x683   :  { %4183 = vmax.index.xlane.f32.xlu1 %v8592_v6 }
 0x686   :  { %4185 = vmax.index.xlane.f32.xlu0 %v8589_v17  ;;  %v10959_v17 = vld [vmem:[#allocation58_spill] sm:$0xff] }
 0x687   :  { %4187 = vmax.index.xlane.f32.xlu1 %v8600_v22 }
 0x68a   :  { %4189 = vmax.index.xlane.f32.xlu0 %v8597_v20  ;;  %v10960_v20 = vld [vmem:[#allocation59_spill] sm:$0xff] }
 0x68b   :  { %4191 = vmax.index.xlane.f32.xlu1 %v8608_v26 }
 0x68e   :  { %4193 = vmax.index.xlane.f32.xlu0 %v8605_v34  ;;  %v10961_v34 = vld [vmem:[#allocation60_spill] sm:$0xff] }
 0x68f   :  { %4195 = vmax.index.xlane.f32.xlu1 %v8617_v2 }
 0x692   :  { %4197 = vmax.index.xlane.f32.xlu0 %v8614_v5  ;;  %v10962_v5 = vld [vmem:[#allocation61_spill] sm:$0xff] }
 0x693   :  { %4199 = vmax.index.xlane.f32.xlu1 %v8626_v49 }
 0x696   :  { %4201 = vmax.index.xlane.f32.xlu0 %v8623_v13  ;;  %v3916_v50 = vpop.permute.xlu1 %3915  ;;  %v3919_v57 = vpop.permute.xlu0 %3918  ;;  %v10963_v13 = vld [vmem:[#allocation62_spill] sm:$0xff] }
 0x697   :  { %4203 = vmax.index.xlane.f32.xlu1 %v10955_v63  ;;  %v4013_v7 = vrot.slane %v3916_v50, %v10971_v30  ;;  %v4017_v32 = vrot.slane %v3919_v57, %v10972_v33 }
 0x699   :  { %v4018_v35 = vsel %vm1453_vm0, %v4017_v32, %v4013_v7  ;;  %v10982_v7 = vld [vmem:[#allocation47_spill] sm:$0xff] }
 0x69a   :  { %4205 = vmax.index.xlane.f32.xlu0 %v10956_v11  ;;  %v3922_v62 = vpop.permute.xlu1 %3921  ;;  %v10978_v11 = vld [vmem:[#allocation43_spill] sm:$0xff] }
 0x69b   :  { %4207 = vmax.index.xlane.f32.xlu1 %v10957_v41  ;;  %v4022_v43 = vrot.slane %v3922_v62, %v10973_v52 }
 0x69d   :  { %v4023_v16 = vsel %vm1460_vm1, %v4022_v43, %v4018_v35  ;;  %v10983_v43 = vld [vmem:[#allocation52_spill] sm:$0xff]  ;;  %v10984_v35 = vld [vmem:[#allocation49_spill] sm:$0xff] }
 0x69e   :  { %4209 = vmax.index.xlane.f32.xlu0 %v10958_v18  ;;  %v3925_v59 = vpop.permute.xlu0 %3924 }
 0x69f   :  { %4211 = vmax.index.xlane.f32.xlu1 %v10959_v17  ;;  %v4027_v12 = vrot.slane %v3925_v59, %v10974_v23  ;;  %v10979_v17 = vld [vmem:[#allocation48_spill] sm:$0xff] }
 0x6a1   :  { %v4028_v58 = vsel %vm1467_vm2, %v4027_v12, %v4023_v16 }
 0x6a2   :  { %v3928_v6 = vpop.permute.xlu1 %3927  ;;  %4213 = vmax.index.xlane.f32.xlu0 %v10960_v20  ;;  %v3931_v22 = vpop.permute.xlu0 %3930 }
 0x6a3   :  { %4215 = vmax.index.xlane.f32.xlu1 %v10961_v34  ;;  %v4032_v8 = vrot.slane %v3928_v6, %v10975_v46  ;;  %v4037_v25 = vrot.slane %v3931_v22, %v10976_v19 }
 0x6a5   :  { %v4033_v61 = vsel %vm1474_vm3, %v4032_v8, %v4028_v58 }
 0x6a6   :  { %v3934_v26 = vpop.permute.xlu1 %3933  ;;  %4217 = vmax.index.xlane.f32.xlu0 %v10962_v5  ;;  %v3937_v2 = vpop.permute.xlu0 %3936  ;;  %v4038_v57 = vsel %vm1481_vm4, %v4037_v25, %v4033_v61 }
 0x6a7   :  { %4219 = vmax.index.xlane.f32.xlu1 %v10963_v13  ;;  %v4042_v21 = vrot.slane %v3934_v26, %v10977_v44  ;;  %v4047_v41 = vrot.slane %v3937_v2, %v10978_v11  ;;  %v10980_v13 = vld [vmem:[#allocation45_spill] sm:$0xff] }
 0x6a9   :  { %v4043_v59 = vsel %vm1488_vm5, %v4042_v21, %v4038_v57  ;;  %v10986_v21 = vld [vmem:[#allocation19_spill] sm:$0xff] }
 0x6aa   :  { %v3940_v49 = vpop.permute.xlu1 %3939  ;;  %4221 = vmax.index.xlane.f32.xlu0 %v10964_v60  ;;  %v3943_v37 = vpop.permute.xlu0 %3942  ;;  %v4048_v5 = vsel %vm1495_vm6, %v4047_v41, %v4043_v59 }
 0x6ab   :  { %4223 = vmax.index.xlane.f32.xlu1 %v10965_v47  ;;  %v4052_v6 = vrot.slane %v3940_v49, %v10979_v17  ;;  %v4057_v60 = vrot.slane %v3943_v37, %v10980_v13 }
 0x6ae   :  { %v8898_v1 = vpop.permute.xlu1 %3945  ;;  %4225 = vmax.index.xlane.f32.xlu0 %v10966_v55  ;;  %v8901_v36 = vpop.permute.xlu0 %3948  ;;  %v4053_v55 = vsel %vm1502_vm7, %v4052_v6, %v4048_v5  ;;  %v10987_v6 = vld [vmem:[#allocation20_spill] sm:$0xff] }
 0x6af   :  { %4227 = vmax.index.xlane.f32.xlu1 %v10967_v4  ;;  %v10981_v4 = vld [vmem:[#allocation50_spill] sm:$0xff]  ;;  %v4067_v37 = vrot.slane %v8901_v36, %v10982_v7 }
 0x6b2   :  { %v8904_v14 = vpop.permute.xlu1 %3951  ;;  %4229 = vmax.index.xlane.f32.xlu0 %v10968_v31  ;;  %v8907_v24 = vpop.permute.xlu0 %3954  ;;  %v4062_v31 = vrot.slane %v8898_v1, %v10981_v4 }
 0x6b3   :  { %4231 = vmax.index.xlane.f32.xlu1 %v10969_v27  ;;  %v4072_v1 = vrot.slane %v8904_v14, %v10983_v43  ;;  %v4077_v36 = vrot.slane %v8907_v24, %v10984_v35 }
 0x6b6   :  { %v8910_v51 = vpop.permute.xlu1 %3957  ;;  %4233 = vmax.index.xlane.f32.xlu0 %v10970_v40  ;;  %v8913_v54 = vpop.permute.xlu0 %3960 }
 0x6b7   :  { %v4087_v24 = vrot.slane %v8913_v54, %v10986_v21 }
 0x6ba   :  { %v3964_v53 = vpop.permute.xlu1 %3963  ;;  %v3967_v56 = vpop.permute.xlu0 %3966 }
 0x6bb   :  { %v4092_v39 = vrot.slane %v3964_v53, %v10971_v30  ;;  %v4096_v38 = vrot.slane %v3967_v56, %v10972_v33  ;;  %v4058_v56 = vsel %vm1509_vm8, %v4057_v60, %v4053_v55  ;;  %v8991_v60 = vld [vmem:[#allocation6] sm:$0xff] }
 0x6bc   :  { %10990 = vst [vmem:[#allocation25_spill] sm:$0xff] %v8991_v60 }
 0x6bd   :  { %v4097_v0 = vsel %vm1453_vm0, %v4096_v38, %v4092_v39  ;;  %v4063_v38 = vsel %vm1516_vm9, %v4062_v31, %v4058_v56  ;;  %v9003_v31 = vld [vmem:[#allocation6 + $0x10] sm:$0xff] }
 0x6be   :  { %v3970_v10 = vpop.permute.xlu1 %3969  ;;  %v3973_v28 = vpop.permute.xlu0 %3972  ;;  %10992 = vst [vmem:[#allocation24_spill] sm:$0xff] %v9003_v31 }
 0x6bf   :  { %v4101_v15 = vrot.slane %v3970_v10, %v10973_v52  ;;  %v4106_v45 = vrot.slane %v3973_v28, %v10974_v23 }
 0x6c1   :  { %v4102_v48 = vsel %vm1460_vm1, %v4101_v15, %v4097_v0  ;;  %v4068_v15 = vsel %vm1523_vm10, %v4067_v37, %v4063_v38  ;;  %v9022_v37 = vld [vmem:[#allocation6 + $0x38] sm:$0xff] }
 0x6c2   :  { %v3976_v29 = vpop.permute.xlu1 %3975  ;;  %v3979_v42 = vpop.permute.xlu0 %3978  ;;  %v4107_v3 = vsel %vm1467_vm2, %v4106_v45, %v4102_v48  ;;  %v4073_v16 = vsel %vm1530_vm11, %v4072_v1, %v4068_v15  ;;  %v10985_v48 = vld [vmem:[#allocation51_spill] sm:$0xff]  ;;  %10995 = vst [vmem:[#allocation29_spill] sm:$0xff] %v9022_v37  ;;  %v9034_v1 = vld [vmem:[#allocation6 + $0x48] sm:$0xff] }
 0x6c3   :  { %v4111_v9 = vrot.slane %v3976_v29, %v10975_v46  ;;  %v4116_v63 = vrot.slane %v3979_v42, %v10976_v19  ;;  %v4082_v14 = vrot.slane %v8910_v51, %v10985_v48  ;;  %v4078_v61 = vsel %vm1537_vm12, %v4077_v36, %v4073_v16  ;;  %10997 = vst [vmem:[#allocation31_spill] sm:$0xff] %v9034_v1  ;;  %v9046_v15 = vld [vmem:[#allocation6 + $0x58] sm:$0xff] }
 0x6c4   :  { %10999 = vst [vmem:[#allocation33_spill] sm:$0xff] %v9046_v15 }
 0x6c5   :  { %v4112_v50 = vsel %vm1474_vm3, %v4111_v9, %v4107_v3 }
 0x6c6   :  { %v3982_v62 = vpop.permute.xlu1 %3981  ;;  %v3985_v18 = vpop.permute.xlu0 %3984  ;;  %v4117_v22 = vsel %vm1481_vm4, %v4116_v63, %v4112_v50  ;;  %v4083_v63 = vsel %vm1544_vm13, %v4082_v14, %v4078_v61  ;;  %v9059_v14 = vld [vmem:[#allocation6 + $0x68] sm:$0xff] }
 0x6c7   :  { %v4121_v20 = vrot.slane %v3982_v62, %v10977_v44  ;;  %v4126_v34 = vrot.slane %v3985_v18, %v10978_v11  ;;  %v4088_v62 = vsel %vm1551_vm14, %v4087_v24, %v4083_v63  ;;  %11001 = vst [vmem:[#allocation35_spill] sm:$0xff] %v9059_v14  ;;  %v9072_v24 = vld [vmem:[#allocation6 + $0x78] sm:$0xff] }
 0x6c8   :  { %11003 = vst [vmem:[#allocation37_spill] sm:$0xff] %v9072_v24 }
 0x6c9   :  { %v4122_v26 = vsel %vm1488_vm5, %v4121_v20, %v4117_v22  ;;  %v10988_v22 = vld [vmem:[#allocation21_spill] sm:$0xff] }
 0x6ca   :  { %v3988_v47 = vpop.permute.xlu1 %3987  ;;  %v3991_v2 = vpop.permute.xlu0 %3990  ;;  %v4127_v27 = vsel %vm1495_vm6, %v4126_v34, %v4122_v26  ;;  %v8986_v26 = vld [vmem:[#allocation6 + $0x8] sm:$0xff] }
 0x6cb   :  { %v4131_v49 = vrot.slane %v3988_v47, %v10979_v17  ;;  %v4136_v40 = vrot.slane %v3991_v2, %v10980_v13  ;;  %10989 = vst [vmem:[#allocation23_spill] sm:$0xff] %v8986_v26  ;;  %v8998_v2 = vld [vmem:[#allocation6 + $0x18] sm:$0xff] }
 0x6cc   :  { %10991 = vst [vmem:[#allocation22_spill] sm:$0xff] %v8998_v2 }
 0x6cd   :  { %v4132_v53 = vsel %vm1502_vm7, %v4131_v49, %v4127_v27  ;;  %v9010_v27 = vld [vmem:[#allocation6 + $0x28] sm:$0xff] }
 0x6ce   :  { %v3994_v32 = vpop.permute.xlu1 %3993  ;;  %v3997_v39 = vpop.permute.xlu0 %3996  ;;  %v4137_v10 = vsel %vm1509_vm8, %v4136_v40, %v4132_v53  ;;  %10993 = vst [vmem:[#allocation27_spill] sm:$0xff] %v9010_v27  ;;  %v9015_v53 = vld [vmem:[#allocation6 + $0x20] sm:$0xff] }
 0x6cf   :  { %v4141_v12 = vrot.slane %v3994_v32, %v10981_v4  ;;  %v4146_v28 = vrot.slane %v3997_v39, %v10982_v7  ;;  %10994 = vst [vmem:[#allocation26_spill] sm:$0xff] %v9015_v53  ;;  %v9027_v39 = vld [vmem:[#allocation6 + $0x30] sm:$0xff] }
 0x6d0   :  { %10996 = vst [vmem:[#allocation28_spill] sm:$0xff] %v9027_v39 }
 0x6d1   :  { %v4142_v8 = vsel %vm1516_vm9, %v4141_v12, %v4137_v10  ;;  %v9039_v10 = vld [vmem:[#allocation6 + $0x40] sm:$0xff] }
 0x6d2   :  { %v4000_v0 = vpop.permute.xlu1 %3999  ;;  %v4003_v45 = vpop.permute.xlu0 %4002  ;;  %v4147_v25 = vsel %vm1523_vm10, %v4146_v28, %v4142_v8  ;;  %10998 = vst [vmem:[#allocation30_spill] sm:$0xff] %v9039_v10 }
 0x6d3   :  { %v4151_v58 = vrot.slane %v4000_v0, %v10983_v43  ;;  %v4156_v29 = vrot.slane %v4003_v45, %v10984_v35  ;;  %v9051_v0 = vld [vmem:[#allocation6 + $0x50] sm:$0xff] }
 0x6d4   :  { %11000 = vst [vmem:[#allocation32_spill] sm:$0xff] %v9051_v0 }
 0x6d5   :  { %v4152_v42 = vsel %vm1530_vm11, %v4151_v58, %v4147_v25  ;;  %v9064_v25 = vld [vmem:[#allocation6 + $0x60] sm:$0xff] }
 0x6d6   :  { %v4006_v9 = vpop.permute.xlu1 %4005  ;;  %v4009_v3 = vpop.permute.xlu0 %4008  ;;  %v4157_v57 = vsel %vm1537_vm12, %v4156_v29, %v4152_v42  ;;  %11002 = vst [vmem:[#allocation34_spill] sm:$0xff] %v9064_v25 }
 0x6d7   :  { %v4161_v50 = vrot.slane %v4006_v9, %v10985_v48  ;;  %v4166_v51 = vrot.slane %v4009_v3, %v10986_v21  ;;  %v9077_v3 = vld [vmem:[#allocation6 + $0x70] sm:$0xff] }
 0x6d8   :  { %11004 = vst [vmem:[#allocation36_spill] sm:$0xff] %v9077_v3 }
 0x6d9   :  { %v4162_v41 = vsel %vm1544_vm13, %v4161_v50, %v4157_v57 }
 0x6da   :  { %v4167_v18 = vsel %vm1551_vm14, %v4166_v51, %v4162_v41 }
 0x6db   :  { %v4168_v59 = vsel %vm1632_vm15, %v4167_v18, %v4088_v62 }
 0x6dc   :  { %4170 = vst [vmem:[#allocation2] sm:$0x3] %v4168_v59 }
 0x6e3   :  { %v6980_v54 = vld.sshfl [vmem:[#allocation2] sm:$0x11 pattern:$0x75316420] }
 0x6e4   :  { %v4412_v20 = vrot.slane %v6980_v54, %v10987_v6  ;;  %v4405_v8 = vcombine.high %v6980_v54, %v6980_v54 }
 0x6e6   :  { %v4423_v34 = vrot.slane %v4412_v20, %v10988_v22  ;;  %v4419_v16 = vrot.slane %v4405_v8, %v10987_v6 }
 0x6e8   :  { %v8989_v5 = vadd.f32 %v8986_v26, %v4423_v34  ;;  %v8994_v47 = vadd.f32 %v8991_v60, %v4423_v34  ;;  %v9001_v55 = vadd.f32 %v8998_v2, %v4423_v34  ;;  %v9006_v49 = vadd.f32 %v9003_v31, %v4423_v34 }
 0x6e9   :  { %v9013_v40 = vadd.f32 %v9010_v27, %v4423_v34  ;;  %v9018_v56 = vadd.f32 %v9015_v53, %v4423_v34  ;;  %v9025_v32 = vadd.f32 %v9022_v37, %v4423_v34  ;;  %v9030_v38 = vadd.f32 %v9027_v39, %v4423_v34 }
 0x6ea   :  { %4464 = vmax.xlane.f32.xlu0 %v8989_v5  ;;  %4462 = vmax.xlane.f32.xlu1 %v8994_v47  ;;  %v9037_v12 = vadd.f32 %v9034_v1, %v4423_v34  ;;  %v9042_v28 = vadd.f32 %v9039_v10, %v4423_v34  ;;  %v9049_v36 = vadd.f32 %v9046_v15, %v4423_v34 }
 0x6eb   :  { %v9054_v45 = vadd.f32 %v9051_v0, %v4423_v34  ;;  %v9062_v58 = vadd.f32 %v9059_v14, %v4423_v34  ;;  %v9067_v29 = vadd.f32 %v9064_v25, %v4423_v34  ;;  %v4427_v61 = vrot.slane %v4419_v16, %v10988_v22 }
 0x6ec   :  { %v9075_v9 = vadd.f32 %v9072_v24, %v4423_v34  ;;  %v9080_v63 = vadd.f32 %v9077_v3, %v4423_v34 }
 0x6ed   :  { %v9085_v57 = vadd.f32 %v8986_v26, %v4427_v61  ;;  %v9088_v41 = vadd.f32 %v8991_v60, %v4427_v61  ;;  %v9095_v59 = vadd.f32 %v8998_v2, %v4427_v61  ;;  %v9098_v54 = vadd.f32 %v9003_v31, %v4427_v61 }
 0x6ee   :  { %4468 = vmax.xlane.f32.xlu0 %v9001_v55  ;;  %4466 = vmax.xlane.f32.xlu1 %v9006_v49  ;;  %v9107_v8 = vadd.f32 %v9010_v27, %v4427_v61  ;;  %v9110_v16 = vadd.f32 %v9015_v53, %v4427_v61  ;;  %v9119_v60 = vadd.f32 %v9022_v37, %v4427_v61 }
 0x6ef   :  { %11005 = vst [vmem:[#allocation54_spill] sm:$0xff] %v9085_v57  ;;  %11006 = vst [vmem:[#allocation55_spill] sm:$0xff] %v9088_v41  ;;  %v9122_v26 = vadd.f32 %v9027_v39, %v4427_v61  ;;  %v9131_v6 = vadd.f32 %v9034_v1, %v4427_v61 }
 0x6f0   :  { %11007 = vst [vmem:[#allocation56_spill] sm:$0xff] %v9095_v59  ;;  %11008 = vst [vmem:[#allocation57_spill] sm:$0xff] %v9098_v54 }
 0x6f1   :  { %11009 = vst [vmem:[#allocation58_spill] sm:$0xff] %v9107_v8  ;;  %11010 = vst [vmem:[#allocation59_spill] sm:$0xff] %v9110_v16 }
 0x6f2   :  { %4472 = vmax.xlane.f32.xlu0 %v9013_v40  ;;  %4470 = vmax.xlane.f32.xlu1 %v9018_v56  ;;  %11011 = vst [vmem:[#allocation60_spill] sm:$0xff] %v9119_v60  ;;  %11012 = vst [vmem:[#allocation61_spill] sm:$0xff] %v9122_v26 }
 0x6f3   :  { %11013 = vst [vmem:[#allocation62_spill] sm:$0xff] %v9131_v6 }
 0x6f6   :  { %4476 = vmax.xlane.f32.xlu0 %v9025_v32  ;;  %4474 = vmax.xlane.f32.xlu1 %v9030_v38 }
 0x6fa   :  { %4480 = vmax.xlane.f32.xlu0 %v9037_v12  ;;  %4478 = vmax.xlane.f32.xlu1 %v9042_v28 }
 0x6fe   :  { %4484 = vmax.xlane.f32.xlu0 %v9049_v36  ;;  %4482 = vmax.xlane.f32.xlu1 %v9054_v45 }
 0x702   :  { %4488 = vmax.xlane.f32.xlu0 %v9062_v58  ;;  %4486 = vmax.xlane.f32.xlu1 %v9067_v29 }
 0x703   :  { %v4174_v42 = vpop.xlane.xlu0 %4173 }
 0x706   :  { %4492 = vmax.xlane.f32.xlu0 %v9075_v9  ;;  %4490 = vmax.xlane.f32.xlu1 %v9080_v63 }
 0x707   :  { %v4176_v50 = vpop.xlane.xlu0 %4175 }
 0x708   :  { %v4172_v51 = vpop.xlane.xlu1 %4171 }
 0x70a   :  { %4496 = vmax.xlane.f32.xlu0 %v9085_v57  ;;  %4494 = vmax.xlane.f32.xlu1 %v9088_v41 }
 0x70b   :  { %v4178_v62 = vpop.xlane.xlu0 %4177 }
 0x70c   :  { %v9092_v18 = vpop.xlane.xlu1 %4179 }
 0x70e   :  { %4500 = vmax.xlane.f32.xlu0 %v9095_v59  ;;  %4498 = vmax.xlane.f32.xlu1 %v9098_v54 }
 0x70f   :  { %v9102_v20 = vpop.xlane.xlu0 %4181 }
 0x710   :  { %v9104_v34 = vpop.xlane.xlu1 %4183 }
 0x712   :  { %4504 = vmax.xlane.f32.xlu0 %v9107_v8  ;;  %4502 = vmax.xlane.f32.xlu1 %v9110_v16  ;;  %v9134_v8 = vadd.f32 %v9039_v10, %v4427_v61  ;;  %v9169_v16 = vadd.f32 %v9077_v3, %v4427_v61 }
 0x713   :  { %v9114_v31 = vpop.xlane.xlu0 %4185 }
 0x714   :  { %v9116_v2 = vpop.xlane.xlu1 %4187  ;;  %11014 = vst [vmem:[#allocation63_spill] sm:$0xff] %v9134_v8  ;;  %11020 = vst [vmem:[#allocation69_spill] sm:$0xff] %v9169_v16 }
 0x716   :  { %4508 = vmax.xlane.f32.xlu0 %v9119_v60  ;;  %4506 = vmax.xlane.f32.xlu1 %v9122_v26  ;;  %v9143_v60 = vadd.f32 %v9046_v15, %v4427_v61  ;;  %v9146_v26 = vadd.f32 %v9051_v0, %v4427_v61  ;;  %v4238_v15 = vrot.slane %v4172_v51, %v10971_v30 }
 0x717   :  { %v9126_v53 = vpop.xlane.xlu0 %4189 }
 0x718   :  { %v9128_v27 = vpop.xlane.xlu1 %4191  ;;  %11015 = vst [vmem:[#allocation64_spill] sm:$0xff] %v9143_v60  ;;  %11016 = vst [vmem:[#allocation65_spill] sm:$0xff] %v9146_v26 }
 0x71a   :  { %4512 = vmax.xlane.f32.xlu0 %v9131_v6  ;;  %4510 = vmax.xlane.f32.xlu1 %v9134_v8  ;;  %v9155_v6 = vadd.f32 %v9059_v14, %v4427_v61  ;;  %v9158_v8 = vadd.f32 %v9064_v25, %v4427_v61  ;;  %v4242_v14 = vrot.slane %v4174_v42, %v10972_v33 }
 0x71b   :  { %v9138_v39 = vpop.xlane.xlu0 %4193 }
 0x71c   :  { %v9140_v37 = vpop.xlane.xlu1 %4195  ;;  %11017 = vst [vmem:[#allocation66_spill] sm:$0xff] %v9155_v6  ;;  %11018 = vst [vmem:[#allocation67_spill] sm:$0xff] %v9158_v8 }
 0x71e   :  { %4516 = vmax.xlane.f32.xlu0 %v9143_v60  ;;  %4514 = vmax.xlane.f32.xlu1 %v9146_v26  ;;  %v9166_v26 = vadd.f32 %v9072_v24, %v4427_v61  ;;  %v4247_v24 = vrot.slane %v4176_v50, %v10973_v52  ;;  %v4252_v61 = vrot.slane %v4178_v62, %v10974_v23 }
 0x71f   :  { %v9150_v10 = vpop.xlane.xlu0 %4197  ;;  %v4262_v50 = vrot.slane %v9102_v20, %v10976_v19  ;;  %v4272_v20 = vrot.slane %v9114_v31, %v10978_v11 }
 0x720   :  { %v9152_v1 = vpop.xlane.xlu1 %4199  ;;  %11019 = vst [vmem:[#allocation68_spill] sm:$0xff] %v9166_v26 }
 0x722   :  { %4520 = vmax.xlane.f32.xlu0 %v9155_v6  ;;  %4518 = vmax.xlane.f32.xlu1 %v9158_v8  ;;  %v4243_v6 = vsel %vm1453_vm0, %v4242_v14, %v4238_v15 }
 0x723   :  { %v9162_v0 = vpop.xlane.xlu0 %4201  ;;  %v4248_v3 = vsel %vm1460_vm1, %v4247_v24, %v4243_v6 }
 0x724   :  { %v4204_v60 = vpop.xlane.xlu1 %4203 }
 0x725   :  { %v4317_v8 = vrot.slane %v4204_v60, %v10971_v30  ;;  %v4257_v60 = vrot.slane %v9092_v18, %v10975_v46  ;;  %v4267_v18 = vrot.slane %v9104_v34, %v10977_v44 }
 0x726   :  { %4524 = vmax.xlane.f32.xlu0 %v9166_v26  ;;  %4522 = vmax.xlane.f32.xlu1 %v9169_v16 }
 0x727   :  { %v4206_v25 = vpop.xlane.xlu0 %4205 }
 0x728   :  { %v4321_v51 = vrot.slane %v4206_v25, %v10972_v33  ;;  %v4208_v59 = vpop.xlane.xlu1 %4207  ;;  %v4253_v25 = vsel %vm1467_vm2, %v4252_v61, %v4248_v3 }
 0x729   :  { %v4326_v54 = vrot.slane %v4208_v59, %v10973_v52 }
 0x72a   :  { %v4322_v42 = vsel %vm1453_vm0, %v4321_v51, %v4317_v8  ;;  %v4258_v8 = vsel %vm1474_vm3, %v4257_v60, %v4253_v25 }
 0x72b   :  { %v4210_v26 = vpop.xlane.xlu0 %4209  ;;  %v4327_v15 = vsel %vm1460_vm1, %v4326_v54, %v4322_v42  ;;  %v4263_v54 = vsel %vm1481_vm4, %v4262_v50, %v4258_v8  ;;  %v4282_v50 = vrot.slane %v9126_v53, %v10980_v13  ;;  %v4292_v53 = vrot.slane %v9138_v39, %v10982_v7 }
 0x72c   :  { %v4331_v16 = vrot.slane %v4210_v26, %v10974_v23  ;;  %v4212_v57 = vpop.xlane.xlu1 %4211  ;;  %v9192_v26 = vld [vmem:[#allocation3 + $0xa] sm:$0x3]  ;;  %v4268_v34 = vsel %vm1488_vm5, %v4267_v18, %v4263_v54 }
 0x72d   :  { %v4336_v14 = vrot.slane %v4212_v57, %v10975_v46  ;;  %v9205_v61 = vrot.slane %v9192_v26, %v10988_v22  ;;  %v4273_v31 = vsel %vm1495_vm6, %v4272_v20, %v4268_v34 }
 0x72e   :  { %v4332_v62 = vsel %vm1467_vm2, %v4331_v16, %v4327_v15  ;;  %v4277_v15 = vrot.slane %v9116_v2, %v10979_v17  ;;  %v4287_v2 = vrot.slane %v9128_v27, %v10981_v4 }
 0x72f   :  { %v4214_v59 = vpop.xlane.xlu0 %4213  ;;  %v4337_v57 = vsel %vm1474_vm3, %v4336_v14, %v4332_v62 }
 0x730   :  { %v4341_v6 = vrot.slane %v4214_v59, %v10976_v19  ;;  %v4216_v24 = vpop.xlane.xlu1 %4215  ;;  %v4278_v8 = vsel %vm1502_vm7, %v4277_v15, %v4273_v31  ;;  %v4302_v15 = vrot.slane %v9150_v10, %v10984_v35 }
 0x731   :  { %v4346_v3 = vrot.slane %v4216_v24, %v10977_v44 }
 0x732   :  { %v4342_v16 = vsel %vm1481_vm4, %v4341_v6, %v4337_v57 }
 0x733   :  { %v4218_v51 = vpop.xlane.xlu0 %4217  ;;  %v4347_v14 = vsel %vm1488_vm5, %v4346_v3, %v4342_v16  ;;  %v4283_v3 = vsel %vm1509_vm8, %v4282_v50, %v4278_v8 }
 0x734   :  { %v4351_v42 = vrot.slane %v4218_v51, %v10978_v11  ;;  %v4220_v60 = vpop.xlane.xlu1 %4219  ;;  %v4288_v27 = vsel %vm1516_vm9, %v4287_v2, %v4283_v3 }
 0x735   :  { %v4356_v25 = vrot.slane %v4220_v60, %v10979_v17  ;;  %v4293_v39 = vsel %vm1523_vm10, %v4292_v53, %v4288_v27 }
 0x736   :  { %v4352_v62 = vsel %vm1495_vm6, %v4351_v42, %v4347_v14  ;;  %v4297_v42 = vrot.slane %v9140_v37, %v10983_v43 }
 0x737   :  { %v4222_v59 = vpop.xlane.xlu0 %4221  ;;  %4534 = vbcast.lane.b32.xlu1 %v9205_v61, 256  ;;  %v4357_v18 = vsel %vm1502_vm7, %v4356_v25, %v4352_v62  ;;  %v4307_v62 = vrot.slane %v9152_v1, %v10985_v48 }
 0x738   :  { %v4361_v6 = vrot.slane %v4222_v59, %v10980_v13  ;;  %v4224_v24 = vpop.xlane.xlu1 %4223  ;;  %v4298_v37 = vsel %vm1530_vm11, %v4297_v42, %v4293_v39 }
 0x739   :  { %v4366_v57 = vrot.slane %v4224_v24, %v10981_v4  ;;  %v4303_v10 = vsel %vm1537_vm12, %v4302_v15, %v4298_v37  ;;  %v4312_v24 = vrot.slane %v9162_v0, %v10986_v21  ;;  %v11021_v0 = vld [vmem:[#allocation53_spill] sm:$0xff] }
 0x73a   :  { %v4362_v54 = vsel %vm1509_vm8, %v4361_v6, %v4357_v18  ;;  %v4308_v1 = vsel %vm1544_vm13, %v4307_v62, %v4303_v10 }
 0x73b   :  { %v4226_v20 = vpop.xlane.xlu0 %4225  ;;  %4542 = vbcast.lane.b32.xlu1 %v9205_v61, 272  ;;  %v4367_v60 = vsel %vm1516_vm9, %v4366_v57, %v4362_v54  ;;  %v4313_v3 = vsel %vm1551_vm14, %v4312_v24, %v4308_v1 }
 0x73c   :  { %v4371_v16 = vrot.slane %v4226_v20, %v10982_v7  ;;  %v4228_v51 = vpop.xlane.xlu1 %4227  ;;  %4538 = vbcast.lane.b32.xlu0 %v9205_v61, 264  ;;  %v4599_v20 = vrot.slane %v9192_v26, %v11021_v0 }
 0x73d   :  { %v4376_v34 = vrot.slane %v4228_v51, %v10983_v43 }
 0x73e   :  { %v4372_v14 = vsel %vm1523_vm10, %v4371_v16, %v4367_v60 }
 0x73f   :  { %v4230_v25 = vpop.xlane.xlu0 %4229  ;;  %4546 = vbcast.lane.b32.xlu1 %v9205_v61, 280  ;;  %v4377_v59 = vsel %vm1530_vm11, %v4376_v34, %v4372_v14 }
 0x740   :  { %v4381_v31 = vrot.slane %v4230_v25, %v10984_v35  ;;  %v4232_v50 = vpop.xlane.xlu1 %4231  ;;  %4554 = vbcast.lane.b32.xlu0 %v9205_v61, 296 }
 0x741   :  { %v4386_v6 = vrot.slane %v4232_v50, %v10985_v48 }
 0x742   :  { %v4382_v8 = vsel %vm1537_vm12, %v4381_v31, %v4377_v59 }
 0x743   :  { %v4234_v2 = vpop.xlane.xlu0 %4233  ;;  %4550 = vbcast.lane.b32.xlu1 %v9205_v61, 288  ;;  %v4387_v57 = vsel %vm1544_vm13, %v4386_v6, %v4382_v8 }
 0x744   :  { %v4391_v18 = vrot.slane %v4234_v2, %v10986_v21  ;;  %4562 = vbcast.lane.b32.xlu0 %v9205_v61, 312 }
 0x746   :  { %v4392_v53 = vsel %vm1551_vm14, %v4391_v18, %v4387_v57 }
 0x747   :  { %v4393_v54 = vsel %vm1632_vm15, %v4392_v53, %v4313_v3  ;;  %4558 = vbcast.lane.b32.xlu1 %v9205_v61, 304 }
 0x748   :  { %4395 = vst [vmem:[#allocation11 + $0x8] sm:$0x3] %v4393_v54  ;;  %4570 = vbcast.lane.b32.xlu0 %v9205_v61, 328 }
 0x74b   :  { %4566 = vbcast.lane.b32.xlu1 %v9205_v61, 320 }
 0x74c   :  { %4578 = vbcast.lane.b32.xlu0 %v9205_v61, 344 }
 0x74f   :  { %4574 = vbcast.lane.b32.xlu1 %v9205_v61, 336 }
 0x750   :  { %4586 = vbcast.lane.b32.xlu0 %v9205_v61, 360 }
 0x753   :  { %4582 = vbcast.lane.b32.xlu1 %v9205_v61, 352 }
 0x754   :  { %4594 = vbcast.lane.b32.xlu0 %v9205_v61, 376 }
 0x757   :  { %4590 = vbcast.lane.b32.xlu1 %v9205_v61, 368 }
 0x758   :  { %4605 = vbcast.lane.b32.xlu0 %v4599_v20, 264 }
 0x75b   :  { %4601 = vbcast.lane.b32.xlu1 %v4599_v20, 256 }
 0x75c   :  { %4613 = vbcast.lane.b32.xlu0 %v4599_v20, 280 }
 0x75f   :  { %4609 = vbcast.lane.b32.xlu1 %v4599_v20, 272 }
 0x760   :  { %4621 = vbcast.lane.b32.xlu0 %v4599_v20, 296 }
 0x763   :  { %4617 = vbcast.lane.b32.xlu1 %v4599_v20, 288 }
 0x764   :  { %4629 = vbcast.lane.b32.xlu0 %v4599_v20, 312 }
 0x767   :  { %4625 = vbcast.lane.b32.xlu1 %v4599_v20, 304 }
 0x768   :  { %4637 = vbcast.lane.b32.xlu0 %v4599_v20, 328 }
 0x76b   :  { %4633 = vbcast.lane.b32.xlu1 %v4599_v20, 320 }
 0x76c   :  { %4645 = vbcast.lane.b32.xlu0 %v4599_v20, 344 }
 0x76f   :  { %4641 = vbcast.lane.b32.xlu1 %v4599_v20, 336 }
 0x770   :  { %4653 = vbcast.lane.b32.xlu0 %v4599_v20, 360 }
 0x773   :  { %4649 = vbcast.lane.b32.xlu1 %v4599_v20, 352 }
 0x774   :  { %4661 = vbcast.lane.b32.xlu0 %v4599_v20, 376 }
 0x777   :  { %v4463_v16 = vpop.xlane.xlu1 %4462  ;;  %v4465_v51 = vpop.xlane.xlu0 %4464  ;;  %4657 = vbcast.lane.b32.xlu1 %v4599_v20, 368 }
 0x77b   :  { %v4467_v26 = vpop.xlane.xlu1 %4466  ;;  %v4469_v61 = vpop.xlane.xlu0 %4468 }
 0x77f   :  { %v4471_v27 = vpop.xlane.xlu1 %4470  ;;  %v4473_v42 = vpop.xlane.xlu0 %4472 }
 0x783   :  { %v4475_v60 = vpop.xlane.xlu1 %4474  ;;  %v4477_v34 = vpop.xlane.xlu0 %4476 }
 0x787   :  { %v4479_v39 = vpop.xlane.xlu1 %4478  ;;  %v4481_v15 = vpop.xlane.xlu0 %4480 }
 0x78b   :  { %v4483_v14 = vpop.xlane.xlu1 %4482  ;;  %v4485_v25 = vpop.xlane.xlu0 %4484 }
 0x78f   :  { %v4487_v31 = vpop.xlane.xlu1 %4486  ;;  %v4489_v50 = vpop.xlane.xlu0 %4488 }
 0x793   :  { %v9271_v37 = vpop.xlane.xlu1 %4490  ;;  %v9273_v62 = vpop.xlane.xlu0 %4492 }
 0x797   :  { %v9275_v59 = vpop.xlane.xlu1 %4494  ;;  %v9277_v6 = vpop.xlane.xlu0 %4496 }
 0x79b   :  { %v9279_v10 = vpop.xlane.xlu1 %4498  ;;  %v9281_v24 = vpop.xlane.xlu0 %4500 }
 0x79f   :  { %v9283_v8 = vpop.xlane.xlu1 %4502  ;;  %v9285_v2 = vpop.xlane.xlu0 %4504 }
 0x7a3   :  { %v9287_v18 = vpop.xlane.xlu1 %4506  ;;  %v9289_v1 = vpop.xlane.xlu0 %4508 }
 0x7a7   :  { %v9291_v57 = vpop.xlane.xlu1 %4510  ;;  %v9293_v3 = vpop.xlane.xlu0 %4512 }
 0x7ab   :  { %v9295_v53 = vpop.xlane.xlu1 %4514  ;;  %v9297_v54 = vpop.xlane.xlu0 %4516 }
 0x7af   :  { %v9299_v20 = vpop.xlane.xlu1 %4518  ;;  %v9301_v0 = vpop.xlane.xlu0 %4520 }
 0x7b3   :  { %v9303_v22 = vpop.xlane.xlu1 %4522  ;;  %v9305_v21 = vpop.xlane.xlu0 %4524 }
 0x7b7   :  { %v4535_v48 = vpop.permute.xlu1 %4534  ;;  %v4539_v35 = vpop.permute.xlu0 %4538 }
 0x7b8   :  { %v4695_v43 = vadd.f32 %v4535_v48, %v4463_v16  ;;  %v4696_v7 = vadd.f32 %v4539_v35, %v4465_v51 }
 0x7ba   :  { %4760 = vperm.xlu1 %6997, %v4695_v43   ;;  %4763 = vperm.xlu0 %6996, %v4696_v7  }
 0x7bb   :  { %v4543_v4 = vpop.permute.xlu1 %4542  ;;  %v4555_v13 = vpop.permute.xlu0 %4554 }
 0x7bc   :  { %v4697_v17 = vadd.f32 %v4543_v4, %v4467_v26  ;;  %v4700_v52 = vadd.f32 %v4555_v13, %v4473_v42 }
 0x7be   :  { %4766 = vperm.xlu1 %6997, %v4697_v17  }
 0x7bf   :  { %v4547_v11 = vpop.permute.xlu1 %4546  ;;  %v4563_v44 = vpop.permute.xlu0 %4562 }
 0x7c0   :  { %v4698_v19 = vadd.f32 %v4547_v11, %v4469_v61  ;;  %v4702_v48 = vadd.f32 %v4563_v44, %v4477_v34 }
 0x7c2   :  { %4769 = vperm.xlu0 %6996, %v4698_v19  }
 0x7c3   :  { %v4551_v46 = vpop.permute.xlu1 %4550  ;;  %v4571_v23 = vpop.permute.xlu0 %4570 }
 0x7c4   :  { %v4699_v33 = vadd.f32 %v4551_v46, %v4471_v27  ;;  %v4704_v4 = vadd.f32 %v4571_v23, %v4481_v15 }
 0x7c6   :  { %4772 = vperm.xlu1 %6997, %v4699_v33   ;;  %4775 = vperm.xlu0 %6996, %v4700_v52  }
 0x7c7   :  { %v4559_v30 = vpop.permute.xlu1 %4558  ;;  %v4579_v41 = vpop.permute.xlu0 %4578 }
 0x7c8   :  { %v4701_v35 = vadd.f32 %v4559_v30, %v4475_v60  ;;  %v4706_v16 = vadd.f32 %v4579_v41, %v4485_v25 }
 0x7ca   :  { %4778 = vperm.xlu1 %6997, %v4701_v35   ;;  %4781 = vperm.xlu0 %6996, %v4702_v48  }
 0x7cb   :  { %v4567_v7 = vpop.permute.xlu1 %4566  ;;  %v4587_v43 = vpop.permute.xlu0 %4586 }
 0x7cc   :  { %v4703_v17 = vadd.f32 %v4567_v7, %v4479_v39  ;;  %v4708_v46 = vadd.f32 %v4587_v43, %v4489_v50 }
 0x7ce   :  { %4784 = vperm.xlu1 %6997, %v4703_v17   ;;  %4787 = vperm.xlu0 %6996, %v4704_v4  }
 0x7cf   :  { %v4575_v11 = vpop.permute.xlu1 %4574  ;;  %v4595_v19 = vpop.permute.xlu0 %4594 }
 0x7d0   :  { %v4705_v51 = vadd.f32 %v4575_v11, %v4483_v14  ;;  %v4710_v26 = vadd.f32 %v4595_v19, %v9273_v62  ;;  %v11033_v11 = vld [vmem:[#allocation64_spill] sm:$0xff] }
 0x7d2   :  { %4790 = vperm.xlu1 %6997, %v4705_v51   ;;  %4793 = vperm.xlu0 %6996, %v4706_v16   ;;  %v11034_v16 = vld [vmem:[#allocation67_spill] sm:$0xff] }
 0x7d3   :  { %v4583_v33 = vpop.permute.xlu1 %4582  ;;  %v4606_v52 = vpop.permute.xlu0 %4605 }
 0x7d4   :  { %v4707_v13 = vadd.f32 %v4583_v33, %v4487_v31  ;;  %v4712_v41 = vadd.f32 %v4606_v52, %v9277_v6  ;;  %v11035_v33 = vld [vmem:[#allocation66_spill] sm:$0xff] }
 0x7d6   :  { %4796 = vperm.xlu1 %6997, %v4707_v13   ;;  %4799 = vperm.xlu0 %6996, %v4708_v46   ;;  %v11036_v46 = vld [vmem:[#allocation69_spill] sm:$0xff] }
 0x7d7   :  { %v4591_v30 = vpop.permute.xlu1 %4590  ;;  %v4614_v44 = vpop.permute.xlu0 %4613 }
 0x7d8   :  { %v4709_v23 = vadd.f32 %v4591_v30, %v9271_v37  ;;  %v4714_v39 = vadd.f32 %v4614_v44, %v9281_v24  ;;  %v11037_v30 = vld [vmem:[#allocation68_spill] sm:$0xff] }
 0x7da   :  { %4802 = vperm.xlu1 %6997, %v4709_v23   ;;  %4805 = vperm.xlu0 %6996, %v4710_v26  }
 0x7db   :  { %v4602_v61 = vpop.permute.xlu1 %4601  ;;  %v4622_v27 = vpop.permute.xlu0 %4621 }
 0x7dc   :  { %v4711_v42 = vadd.f32 %v4602_v61, %v9275_v59  ;;  %v4716_v31 = vadd.f32 %v4622_v27, %v9285_v2  ;;  %v11038_v61 = vld [vmem:[#allocation38_spill] sm:$0xff] }
 0x7de   :  { %4808 = vperm.xlu1 %6997, %v4711_v42   ;;  %4811 = vperm.xlu0 %6996, %v4712_v41   ;;  %v11039_v41 = vld [vmem:[#allocation40_spill] sm:$0xff] }
 0x7df   :  { %v4610_v60 = vpop.permute.xlu1 %4609  ;;  %v4630_v34 = vpop.permute.xlu0 %4629 }
 0x7e0   :  { %v4713_v15 = vadd.f32 %v4610_v60, %v9279_v10  ;;  %v4718_v62 = vadd.f32 %v4630_v34, %v9289_v1 }
 0x7e2   :  { %4814 = vperm.xlu1 %6997, %v4713_v15   ;;  %4817 = vperm.xlu0 %6996, %v4714_v39   ;;  %v11040_v39 = vld [vmem:[#allocation42_spill] sm:$0xff] }
 0x7e3   :  { %v4618_v14 = vpop.permute.xlu1 %4617  ;;  %v4638_v25 = vpop.permute.xlu0 %4637 }
 0x7e4   :  { %v4715_v50 = vadd.f32 %v4618_v14, %v9283_v8  ;;  %v4720_v10 = vadd.f32 %v4638_v25, %v9293_v3  ;;  %v11041_v14 = vld [vmem:[#allocation39_spill] sm:$0xff] }
 0x7e6   :  { %4820 = vperm.xlu1 %6997, %v4715_v50   ;;  %4823 = vperm.xlu0 %6996, %v4716_v31  }
 0x7e7   :  { %v4626_v37 = vpop.permute.xlu1 %4625  ;;  %v4646_v6 = vpop.permute.xlu0 %4645 }
 0x7e8   :  { %v4717_v59 = vadd.f32 %v4626_v37, %v9287_v18  ;;  %v4722_v8 = vadd.f32 %v4646_v6, %v9297_v54  ;;  %v11032_v54 = vld [vmem:[#allocation65_spill] sm:$0xff]  ;;  %v11042_v37 = vld [vmem:[#allocation44_spill] sm:$0xff] }
 0x7ea   :  { %4826 = vperm.xlu1 %6997, %v4717_v59   ;;  %4829 = vperm.xlu0 %6996, %v4718_v62  }
 0x7eb   :  { %v4634_v24 = vpop.permute.xlu1 %4633  ;;  %v4654_v2 = vpop.permute.xlu0 %4653 }
 0x7ec   :  { %v4719_v48 = vadd.f32 %v4634_v24, %v9291_v57  ;;  %v4724_v18 = vadd.f32 %v4654_v2, %v9301_v0  ;;  %v11031_v0 = vld [vmem:[#allocation62_spill] sm:$0xff] }
 0x7ee   :  { %4832 = vperm.xlu1 %6997, %v4719_v48   ;;  %4835 = vperm.xlu0 %6996, %v4720_v10  }
 0x7ef   :  { %v4642_v35 = vpop.permute.xlu1 %4641  ;;  %v4662_v4 = vpop.permute.xlu0 %4661 }
 0x7f0   :  { %v4721_v7 = vadd.f32 %v4642_v35, %v9295_v53  ;;  %v4726_v57 = vadd.f32 %v4662_v4, %v9305_v21  ;;  %v11022_v21 = vld [vmem:[#allocation55_spill] sm:$0xff]  ;;  %v11044_v4 = vld [vmem:[#allocation46_spill] sm:$0xff] }
 0x7f2   :  { %4838 = vperm.xlu1 %6997, %v4721_v7   ;;  %4841 = vperm.xlu0 %6996, %v4722_v8   ;;  %v11043_v8 = vld [vmem:[#allocation41_spill] sm:$0xff] }
 0x7f3   :  { %v4650_v1 = vpop.permute.xlu1 %4649 }
 0x7f4   :  { %v4723_v43 = vadd.f32 %v4650_v1, %v9299_v20 }
 0x7f6   :  { %4844 = vperm.xlu1 %6997, %v4723_v43   ;;  %4847 = vperm.xlu0 %6996, %v4724_v18  }
 0x7f7   :  { %v4658_v3 = vpop.permute.xlu1 %4657 }
 0x7f8   :  { %v4725_v17 = vadd.f32 %v4658_v3, %v9303_v22 }
 0x7fa   :  { %4850 = vperm.xlu1 %6997, %v4725_v17   ;;  %4853 = vperm.xlu0 %6996, %v4726_v57  }
 0x819   :  { %5018 = vmax.index.xlane.f32.xlu0 %v8989_v5 }
 0x81d   :  { %5020 = vmax.index.xlane.f32.xlu0 %v9006_v49 }
 0x81e   :  { %5016 = vmax.index.xlane.f32.xlu1 %v8994_v47  ;;  %v11023_v47 = vld [vmem:[#allocation54_spill] sm:$0xff] }
 0x821   :  { %5022 = vmax.index.xlane.f32.xlu0 %v9001_v55  ;;  %v11024_v55 = vld [vmem:[#allocation57_spill] sm:$0xff] }
 0x822   :  { %5024 = vmax.index.xlane.f32.xlu1 %v9018_v56 }
 0x825   :  { %5026 = vmax.index.xlane.f32.xlu0 %v9013_v40  ;;  %v11025_v40 = vld [vmem:[#allocation56_spill] sm:$0xff] }
 0x826   :  { %5028 = vmax.index.xlane.f32.xlu1 %v9030_v38 }
 0x829   :  { %5030 = vmax.index.xlane.f32.xlu0 %v9025_v32  ;;  %v11026_v32 = vld [vmem:[#allocation59_spill] sm:$0xff] }
 0x82a   :  { %5032 = vmax.index.xlane.f32.xlu1 %v9042_v28 }
 0x82d   :  { %5034 = vmax.index.xlane.f32.xlu0 %v9037_v12  ;;  %v11027_v12 = vld [vmem:[#allocation58_spill] sm:$0xff] }
 0x82e   :  { %5036 = vmax.index.xlane.f32.xlu1 %v9054_v45 }
 0x831   :  { %5038 = vmax.index.xlane.f32.xlu0 %v9049_v36  ;;  %v11028_v36 = vld [vmem:[#allocation61_spill] sm:$0xff] }
 0x832   :  { %5040 = vmax.index.xlane.f32.xlu1 %v9067_v29 }
 0x835   :  { %5042 = vmax.index.xlane.f32.xlu0 %v9062_v58  ;;  %v11029_v58 = vld [vmem:[#allocation60_spill] sm:$0xff] }
 0x836   :  { %5044 = vmax.index.xlane.f32.xlu1 %v9080_v63 }
 0x839   :  { %5046 = vmax.index.xlane.f32.xlu0 %v9075_v9  ;;  %v4761_v22 = vpop.permute.xlu1 %4760  ;;  %v4764_v5 = vpop.permute.xlu0 %4763  ;;  %v11030_v9 = vld [vmem:[#allocation63_spill] sm:$0xff] }
 0x83a   :  { %5048 = vmax.index.xlane.f32.xlu1 %v11022_v21  ;;  %v4858_v27 = vrot.slane %v4761_v22, %v11038_v61  ;;  %v4862_v42 = vrot.slane %v4764_v5, %v11039_v41 }
 0x83c   :  { %v4863_v6 = vsel %vm1453_vm0, %v4862_v42, %v4858_v27  ;;  %v11049_v27 = vld [vmem:[#allocation47_spill] sm:$0xff] }
 0x83d   :  { %5050 = vmax.index.xlane.f32.xlu0 %v11023_v47  ;;  %v4767_v49 = vpop.permute.xlu1 %4766  ;;  %v11045_v47 = vld [vmem:[#allocation43_spill] sm:$0xff] }
 0x83e   :  { %5052 = vmax.index.xlane.f32.xlu1 %v11024_v55  ;;  %v4867_v15 = vrot.slane %v4767_v49, %v11040_v39 }
 0x840   :  { %v4868_v48 = vsel %vm1460_vm1, %v4867_v15, %v4863_v6  ;;  %v11050_v15 = vld [vmem:[#allocation52_spill] sm:$0xff]  ;;  %v11051_v6 = vld [vmem:[#allocation49_spill] sm:$0xff] }
 0x841   :  { %5054 = vmax.index.xlane.f32.xlu0 %v11025_v40  ;;  %v4770_v56 = vpop.permute.xlu0 %4769 }
 0x842   :  { %5056 = vmax.index.xlane.f32.xlu1 %v11026_v32  ;;  %v4872_v25 = vrot.slane %v4770_v56, %v11041_v14  ;;  %v11046_v32 = vld [vmem:[#allocation48_spill] sm:$0xff] }
 0x844   :  { %v4873_v35 = vsel %vm1467_vm2, %v4872_v25, %v4868_v48 }
 0x845   :  { %v4773_v38 = vpop.permute.xlu1 %4772  ;;  %5058 = vmax.index.xlane.f32.xlu0 %v11027_v12  ;;  %v4776_v28 = vpop.permute.xlu0 %4775 }
 0x846   :  { %5060 = vmax.index.xlane.f32.xlu1 %v11028_v36  ;;  %v4877_v62 = vrot.slane %v4773_v38, %v11042_v37  ;;  %v4882_v7 = vrot.slane %v4776_v28, %v11043_v8 }
 0x848   :  { %v4878_v43 = vsel %vm1474_vm3, %v4877_v62, %v4873_v35 }
 0x849   :  { %v4779_v45 = vpop.permute.xlu1 %4778  ;;  %5062 = vmax.index.xlane.f32.xlu0 %v11029_v58  ;;  %v4782_v29 = vpop.permute.xlu0 %4781  ;;  %v4883_v5 = vsel %vm1481_vm4, %v4882_v7, %v4878_v43 }
 0x84a   :  { %5064 = vmax.index.xlane.f32.xlu1 %v11030_v9  ;;  %v4887_v3 = vrot.slane %v4779_v45, %v11044_v4  ;;  %v4892_v55 = vrot.slane %v4782_v29, %v11045_v47  ;;  %v11047_v9 = vld [vmem:[#allocation45_spill] sm:$0xff] }
 0x84c   :  { %v4888_v56 = vsel %vm1488_vm5, %v4887_v3, %v4883_v5  ;;  %v11053_v3 = vld [vmem:[#allocation19_spill] sm:$0xff] }
 0x84d   :  { %v4785_v63 = vpop.permute.xlu1 %4784  ;;  %5066 = vmax.index.xlane.f32.xlu0 %v11031_v0  ;;  %v4788_v53 = vpop.permute.xlu0 %4787  ;;  %v4893_v58 = vsel %vm1495_vm6, %v4892_v55, %v4888_v56 }
 0x84e   :  { %5068 = vmax.index.xlane.f32.xlu1 %v11032_v54  ;;  %v4897_v38 = vrot.slane %v4785_v63, %v11046_v32  ;;  %v4902_v0 = vrot.slane %v4788_v53, %v11047_v9 }
 0x851   :  { %v9352_v20 = vpop.permute.xlu1 %4790  ;;  %5070 = vmax.index.xlane.f32.xlu0 %v11033_v11  ;;  %v9355_v19 = vpop.permute.xlu0 %4793  ;;  %v4898_v11 = vsel %vm1502_vm7, %v4897_v38, %v4893_v58  ;;  %v11054_v38 = vld [vmem:[#allocation20_spill] sm:$0xff] }
 0x852   :  { %5072 = vmax.index.xlane.f32.xlu1 %v11034_v16  ;;  %v11048_v16 = vld [vmem:[#allocation50_spill] sm:$0xff]  ;;  %v4912_v53 = vrot.slane %v9355_v19, %v11049_v27 }
 0x855   :  { %v9358_v51 = vpop.permute.xlu1 %4796  ;;  %5074 = vmax.index.xlane.f32.xlu0 %v11035_v33  ;;  %v9361_v52 = vpop.permute.xlu0 %4799  ;;  %v4907_v33 = vrot.slane %v9352_v20, %v11048_v16 }
 0x856   :  { %5076 = vmax.index.xlane.f32.xlu1 %v11036_v46  ;;  %v4917_v20 = vrot.slane %v9358_v51, %v11050_v15  ;;  %v4922_v19 = vrot.slane %v9361_v52, %v11051_v6 }
 0x859   :  { %v9364_v13 = vpop.permute.xlu1 %4802  ;;  %5078 = vmax.index.xlane.f32.xlu0 %v11037_v30  ;;  %v9367_v44 = vpop.permute.xlu0 %4805 }
 0x85a   :  { %v4932_v52 = vrot.slane %v9367_v44, %v11053_v3 }
 0x85d   :  { %v4809_v26 = vpop.permute.xlu1 %4808  ;;  %v4812_v23 = vpop.permute.xlu0 %4811 }
 0x85e   :  { %v4937_v60 = vrot.slane %v4809_v26, %v11038_v61  ;;  %v4941_v34 = vrot.slane %v4812_v23, %v11039_v41  ;;  %v4903_v23 = vsel %vm1509_vm8, %v4902_v0, %v4898_v11  ;;  %v11057_v0 = vld [vmem:[#allocation25_spill] sm:$0xff] }
 0x860   :  { %v4942_v24 = vsel %vm1453_vm0, %v4941_v34, %v4937_v60  ;;  %v4908_v34 = vsel %vm1516_vm9, %v4907_v33, %v4903_v23  ;;  %v11059_v33 = vld [vmem:[#allocation24_spill] sm:$0xff] }
 0x861   :  { %v4815_v31 = vpop.permute.xlu1 %4814  ;;  %v4818_v50 = vpop.permute.xlu0 %4817 }
 0x862   :  { %v4946_v59 = vrot.slane %v4815_v31, %v11040_v39  ;;  %v4951_v10 = vrot.slane %v4818_v50, %v11041_v14 }
 0x864   :  { %v4947_v2 = vsel %vm1460_vm1, %v4946_v59, %v4942_v24  ;;  %v4913_v59 = vsel %vm1523_vm10, %v4912_v53, %v4908_v34  ;;  %v11062_v53 = vld [vmem:[#allocation29_spill] sm:$0xff] }
 0x865   :  { %v4821_v1 = vpop.permute.xlu1 %4820  ;;  %v4824_v18 = vpop.permute.xlu0 %4823  ;;  %v4952_v17 = vsel %vm1467_vm2, %v4951_v10, %v4947_v2  ;;  %v4918_v48 = vsel %vm1530_vm11, %v4917_v20, %v4913_v59  ;;  %v11052_v2 = vld [vmem:[#allocation51_spill] sm:$0xff]  ;;  %v11066_v59 = vld [vmem:[#allocation33_spill] sm:$0xff] }
 0x866   :  { %v4956_v57 = vrot.slane %v4821_v1, %v11042_v37  ;;  %v4961_v21 = vrot.slane %v4824_v18, %v11043_v8  ;;  %v4927_v51 = vrot.slane %v9364_v13, %v11052_v2  ;;  %v4923_v43 = vsel %vm1537_vm12, %v4922_v19, %v4918_v48  ;;  %v11064_v20 = vld [vmem:[#allocation31_spill] sm:$0xff] }
 0x868   :  { %v4957_v22 = vsel %vm1474_vm3, %v4956_v57, %v4952_v17 }
 0x869   :  { %v4827_v49 = vpop.permute.xlu1 %4826  ;;  %v4830_v40 = vpop.permute.xlu0 %4829  ;;  %v4962_v28 = vsel %vm1481_vm4, %v4961_v21, %v4957_v22  ;;  %v4928_v21 = vsel %vm1544_vm13, %v4927_v51, %v4923_v43  ;;  %v11068_v51 = vld [vmem:[#allocation35_spill] sm:$0xff] }
 0x86a   :  { %v4966_v12 = vrot.slane %v4827_v49, %v11044_v4  ;;  %v4971_v36 = vrot.slane %v4830_v40, %v11045_v47  ;;  %v4933_v49 = vsel %vm1551_vm14, %v4932_v52, %v4928_v21  ;;  %v11070_v52 = vld [vmem:[#allocation37_spill] sm:$0xff] }
 0x86c   :  { %v4967_v45 = vsel %vm1488_vm5, %v4966_v12, %v4962_v28  ;;  %v11055_v28 = vld [vmem:[#allocation21_spill] sm:$0xff] }
 0x86d   :  { %v4833_v54 = vpop.permute.xlu1 %4832  ;;  %v4836_v29 = vpop.permute.xlu0 %4835  ;;  %v4972_v46 = vsel %vm1495_vm6, %v4971_v36, %v4967_v45  ;;  %v11056_v45 = vld [vmem:[#allocation23_spill] sm:$0xff] }
 0x86e   :  { %v4976_v63 = vrot.slane %v4833_v54, %v11046_v32  ;;  %v4981_v30 = vrot.slane %v4836_v29, %v11047_v9  ;;  %v11058_v29 = vld [vmem:[#allocation22_spill] sm:$0xff] }
 0x870   :  { %v4977_v26 = vsel %vm1502_vm7, %v4976_v63, %v4972_v46  ;;  %v11060_v46 = vld [vmem:[#allocation27_spill] sm:$0xff] }
 0x871   :  { %v4839_v42 = vpop.permute.xlu1 %4838  ;;  %v4842_v60 = vpop.permute.xlu0 %4841  ;;  %v4982_v31 = vsel %vm1509_vm8, %v4981_v30, %v4977_v26  ;;  %v11061_v26 = vld [vmem:[#allocation26_spill] sm:$0xff] }
 0x872   :  { %v4986_v25 = vrot.slane %v4839_v42, %v11048_v16  ;;  %v4991_v50 = vrot.slane %v4842_v60, %v11049_v27  ;;  %v11063_v60 = vld [vmem:[#allocation28_spill] sm:$0xff] }
 0x874   :  { %v4987_v62 = vsel %vm1516_vm9, %v4986_v25, %v4982_v31  ;;  %v11065_v31 = vld [vmem:[#allocation30_spill] sm:$0xff] }
 0x875   :  { %v4845_v24 = vpop.permute.xlu1 %4844  ;;  %v4848_v10 = vpop.permute.xlu0 %4847  ;;  %v4992_v7 = vsel %vm1523_vm10, %v4991_v50, %v4987_v62 }
 0x876   :  { %v4996_v35 = vrot.slane %v4845_v24, %v11050_v15  ;;  %v5001_v1 = vrot.slane %v4848_v10, %v11051_v6  ;;  %v11067_v24 = vld [vmem:[#allocation32_spill] sm:$0xff] }
 0x878   :  { %v4997_v18 = vsel %vm1530_vm11, %v4996_v35, %v4992_v7  ;;  %v11069_v7 = vld [vmem:[#allocation34_spill] sm:$0xff] }
 0x879   :  { %v4851_v57 = vpop.permute.xlu1 %4850  ;;  %v4854_v17 = vpop.permute.xlu0 %4853  ;;  %v5002_v5 = vsel %vm1537_vm12, %v5001_v1, %v4997_v18 }
 0x87a   :  { %v5006_v22 = vrot.slane %v4851_v57, %v11052_v2  ;;  %v5011_v13 = vrot.slane %v4854_v17, %v11053_v3  ;;  %v11071_v17 = vld [vmem:[#allocation36_spill] sm:$0xff] }
 0x87c   :  { %v5007_v55 = vsel %vm1544_vm13, %v5006_v22, %v5002_v5 }
 0x87d   :  { %v5012_v40 = vsel %vm1551_vm14, %v5011_v13, %v5007_v55 }
 0x87e   :  { %v5013_v56 = vsel %vm1632_vm15, %v5012_v40, %v4933_v49 }
 0x87f   :  { %5015 = vst [vmem:[#allocation2] sm:$0x3] %v5013_v56 }
 0x886   :  { %v6981_v44 = vld.sshfl [vmem:[#allocation2] sm:$0x11 pattern:$0x75316420] }
 0x887   :  { %v5257_v12 = vrot.slane %v6981_v44, %v11054_v38  ;;  %v5250_v62 = vcombine.high %v6981_v44, %v6981_v44 }
 0x889   :  { %v5268_v36 = vrot.slane %v5257_v12, %v11055_v28  ;;  %v5264_v48 = vrot.slane %v5250_v62, %v11054_v38 }
 0x88b   :  { %v9441_v58 = vadd.f32 %v11056_v45, %v5268_v36  ;;  %v9444_v54 = vadd.f32 %v11057_v0, %v5268_v36  ;;  %v9449_v11 = vadd.f32 %v11058_v29, %v5268_v36  ;;  %v9452_v63 = vadd.f32 %v11059_v33, %v5268_v36 }
 0x88c   :  { %v9457_v30 = vadd.f32 %v11060_v46, %v5268_v36  ;;  %v9460_v23 = vadd.f32 %v11061_v26, %v5268_v36  ;;  %v9465_v42 = vadd.f32 %v11062_v53, %v5268_v36  ;;  %v9468_v34 = vadd.f32 %v11063_v60, %v5268_v36 }
 0x88d   :  { %5309 = vmax.xlane.f32.xlu0 %v9441_v58  ;;  %5307 = vmax.xlane.f32.xlu1 %v9444_v54  ;;  %v9473_v25 = vadd.f32 %v11064_v20, %v5268_v36  ;;  %v9476_v50 = vadd.f32 %v11065_v31, %v5268_v36  ;;  %v9481_v19 = vadd.f32 %v11066_v59, %v5268_v36 }
 0x88e   :  { %v9484_v10 = vadd.f32 %v11067_v24, %v5268_v36  ;;  %v9490_v35 = vadd.f32 %v11068_v51, %v5268_v36  ;;  %v9493_v1 = vadd.f32 %v11069_v7, %v5268_v36  ;;  %v5272_v43 = vrot.slane %v5264_v48, %v11055_v28 }
 0x88f   :  { %v9499_v57 = vadd.f32 %v11070_v52, %v5268_v36  ;;  %v9502_v21 = vadd.f32 %v11071_v17, %v5268_v36 }
 0x890   :  { %v9507_v5 = vadd.f32 %v11056_v45, %v5272_v43  ;;  %v9510_v55 = vadd.f32 %v11057_v0, %v5272_v43  ;;  %v9517_v56 = vadd.f32 %v11058_v29, %v5272_v43  ;;  %v9520_v44 = vadd.f32 %v11059_v33, %v5272_v43 }
 0x891   :  { %5313 = vmax.xlane.f32.xlu0 %v9449_v11  ;;  %5311 = vmax.xlane.f32.xlu1 %v9452_v63  ;;  %v9529_v45 = vadd.f32 %v11060_v46, %v5272_v43  ;;  %v9532_v0 = vadd.f32 %v11061_v26, %v5272_v43  ;;  %v9541_v62 = vadd.f32 %v11062_v53, %v5272_v43 }
 0x892   :  { %11072 = vst [vmem:[#allocation55_spill] sm:$0xff] %v9507_v5  ;;  %11073 = vst [vmem:[#allocation54_spill] sm:$0xff] %v9510_v55  ;;  %v9544_v48 = vadd.f32 %v11063_v60, %v5272_v43  ;;  %v9553_v38 = vadd.f32 %v11064_v20, %v5272_v43 }
 0x893   :  { %11074 = vst [vmem:[#allocation57_spill] sm:$0xff] %v9517_v56  ;;  %11075 = vst [vmem:[#allocation56_spill] sm:$0xff] %v9520_v44 }
 0x894   :  { %11076 = vst [vmem:[#allocation59_spill] sm:$0xff] %v9529_v45  ;;  %11077 = vst [vmem:[#allocation58_spill] sm:$0xff] %v9532_v0 }
 0x895   :  { %5317 = vmax.xlane.f32.xlu0 %v9457_v30  ;;  %5315 = vmax.xlane.f32.xlu1 %v9460_v23  ;;  %11078 = vst [vmem:[#allocation61_spill] sm:$0xff] %v9541_v62  ;;  %11079 = vst [vmem:[#allocation60_spill] sm:$0xff] %v9544_v48 }
 0x896   :  { %11080 = vst [vmem:[#allocation63_spill] sm:$0xff] %v9553_v38 }
 0x899   :  { %5321 = vmax.xlane.f32.xlu0 %v9465_v42  ;;  %5319 = vmax.xlane.f32.xlu1 %v9468_v34 }
 0x89d   :  { %5325 = vmax.xlane.f32.xlu0 %v9473_v25  ;;  %5323 = vmax.xlane.f32.xlu1 %v9476_v50 }
 0x8a1   :  { %5329 = vmax.xlane.f32.xlu0 %v9481_v19  ;;  %5327 = vmax.xlane.f32.xlu1 %v9484_v10 }
 0x8a5   :  { %5333 = vmax.xlane.f32.xlu0 %v9490_v35  ;;  %5331 = vmax.xlane.f32.xlu1 %v9493_v1 }
 0x8a6   :  { %v5019_v18 = vpop.xlane.xlu0 %5018 }
 0x8a9   :  { %5337 = vmax.xlane.f32.xlu0 %v9499_v57  ;;  %5335 = vmax.xlane.f32.xlu1 %v9502_v21 }
 0x8aa   :  { %v5021_v22 = vpop.xlane.xlu0 %5020 }
 0x8ab   :  { %v5017_v13 = vpop.xlane.xlu1 %5016 }
 0x8ad   :  { %5341 = vmax.xlane.f32.xlu0 %v9507_v5  ;;  %5339 = vmax.xlane.f32.xlu1 %v9510_v55 }
 0x8ae   :  { %v5023_v49 = vpop.xlane.xlu0 %5022 }
 0x8af   :  { %v9514_v40 = vpop.xlane.xlu1 %5024 }
 0x8b1   :  { %5345 = vmax.xlane.f32.xlu0 %v9517_v56  ;;  %5343 = vmax.xlane.f32.xlu1 %v9520_v44 }
 0x8b2   :  { %v9524_v12 = vpop.xlane.xlu0 %5026 }
 0x8b3   :  { %v9526_v36 = vpop.xlane.xlu1 %5028 }
 0x8b5   :  { %5349 = vmax.xlane.f32.xlu0 %v9529_v45  ;;  %5347 = vmax.xlane.f32.xlu1 %v9532_v0  ;;  %v9556_v45 = vadd.f32 %v11065_v31, %v5272_v43  ;;  %v9591_v0 = vadd.f32 %v11071_v17, %v5272_v43 }
 0x8b6   :  { %v9536_v29 = vpop.xlane.xlu0 %5030 }
 0x8b7   :  { %v9538_v33 = vpop.xlane.xlu1 %5032  ;;  %11081 = vst [vmem:[#allocation62_spill] sm:$0xff] %v9556_v45  ;;  %11087 = vst [vmem:[#allocation68_spill] sm:$0xff] %v9591_v0 }
 0x8b9   :  { %5353 = vmax.xlane.f32.xlu0 %v9541_v62  ;;  %5351 = vmax.xlane.f32.xlu1 %v9544_v48  ;;  %v9565_v62 = vadd.f32 %v11066_v59, %v5272_v43  ;;  %v9568_v48 = vadd.f32 %v11067_v24, %v5272_v43  ;;  %v5083_v24 = vrot.slane %v5017_v13, %v11038_v61 }
 0x8ba   :  { %v9548_v46 = vpop.xlane.xlu0 %5034 }
 0x8bb   :  { %v9550_v26 = vpop.xlane.xlu1 %5036  ;;  %11082 = vst [vmem:[#allocation65_spill] sm:$0xff] %v9565_v62  ;;  %11083 = vst [vmem:[#allocation64_spill] sm:$0xff] %v9568_v48 }
 0x8bd   :  { %5357 = vmax.xlane.f32.xlu0 %v9553_v38  ;;  %5355 = vmax.xlane.f32.xlu1 %v9556_v45  ;;  %v9577_v38 = vadd.f32 %v11068_v51, %v5272_v43  ;;  %v9580_v45 = vadd.f32 %v11069_v7, %v5272_v43  ;;  %v5087_v51 = vrot.slane %v5019_v18, %v11039_v41 }
 0x8be   :  { %v9560_v53 = vpop.xlane.xlu0 %5038 }
 0x8bf   :  { %v9562_v60 = vpop.xlane.xlu1 %5040  ;;  %11084 = vst [vmem:[#allocation67_spill] sm:$0xff] %v9577_v38  ;;  %11085 = vst [vmem:[#allocation66_spill] sm:$0xff] %v9580_v45 }
 0x8c1   :  { %5361 = vmax.xlane.f32.xlu0 %v9565_v62  ;;  %5359 = vmax.xlane.f32.xlu1 %v9568_v48  ;;  %v9588_v48 = vadd.f32 %v11070_v52, %v5272_v43  ;;  %v5092_v52 = vrot.slane %v5021_v22, %v11040_v39  ;;  %v5097_v43 = vrot.slane %v5023_v49, %v11041_v14 }
 0x8c2   :  { %v9572_v20 = vpop.xlane.xlu0 %5042  ;;  %v5107_v49 = vrot.slane %v9524_v12, %v11043_v8  ;;  %v5117_v12 = vrot.slane %v9536_v29, %v11045_v47 }
 0x8c3   :  { %v9574_v31 = vpop.xlane.xlu1 %5044  ;;  %11086 = vst [vmem:[#allocation69_spill] sm:$0xff] %v9588_v48 }
 0x8c5   :  { %5365 = vmax.xlane.f32.xlu0 %v9577_v38  ;;  %5363 = vmax.xlane.f32.xlu1 %v9580_v45  ;;  %v5088_v38 = vsel %vm1453_vm0, %v5087_v51, %v5083_v24 }
 0x8c6   :  { %v9584_v59 = vpop.xlane.xlu0 %5046  ;;  %v5093_v17 = vsel %vm1460_vm1, %v5092_v52, %v5088_v38 }
 0x8c7   :  { %v5049_v62 = vpop.xlane.xlu1 %5048  ;;  %v5098_v22 = vsel %vm1467_vm2, %v5097_v43, %v5093_v17 }
 0x8c8   :  { %v5162_v45 = vrot.slane %v5049_v62, %v11038_v61  ;;  %v5102_v62 = vrot.slane %v9514_v40, %v11042_v37  ;;  %v5112_v40 = vrot.slane %v9526_v36, %v11044_v4 }
 0x8c9   :  { %5369 = vmax.xlane.f32.xlu0 %v9588_v48  ;;  %5367 = vmax.xlane.f32.xlu1 %v9591_v0 }
 0x8ca   :  { %v5051_v7 = vpop.xlane.xlu0 %5050 }
 0x8cb   :  { %v5166_v13 = vrot.slane %v5051_v7, %v11039_v41  ;;  %v5053_v56 = vpop.xlane.xlu1 %5052 }
 0x8cc   :  { %v5171_v44 = vrot.slane %v5053_v56, %v11040_v39 }
 0x8cd   :  { %v5167_v18 = vsel %vm1453_vm0, %v5166_v13, %v5162_v45  ;;  %v5103_v13 = vsel %vm1474_vm3, %v5102_v62, %v5098_v22 }
 0x8ce   :  { %v5055_v48 = vpop.xlane.xlu0 %5054  ;;  %v5172_v24 = vsel %vm1460_vm1, %v5171_v44, %v5167_v18  ;;  %v5108_v52 = vsel %vm1481_vm4, %v5107_v49, %v5103_v13  ;;  %v5127_v49 = vrot.slane %v9548_v46, %v11047_v9  ;;  %v5137_v46 = vrot.slane %v9560_v53, %v11049_v27 }
 0x8cf   :  { %v5176_v0 = vrot.slane %v5055_v48, %v11041_v14  ;;  %v5057_v5 = vpop.xlane.xlu1 %5056  ;;  %v9614_v48 = vld [vmem:[#allocation3 + $0xc] sm:$0x3]  ;;  %v5113_v36 = vsel %vm1488_vm5, %v5112_v40, %v5108_v52 }
 0x8d0   :  { %v5181_v51 = vrot.slane %v5057_v5, %v11042_v37  ;;  %v9627_v18 = vrot.slane %v9614_v48, %v11055_v28  ;;  %v5118_v29 = vsel %vm1495_vm6, %v5117_v12, %v5113_v36 }
 0x8d1   :  { %v5177_v56 = vsel %vm1467_vm2, %v5176_v0, %v5172_v24  ;;  %v5122_v24 = vrot.slane %v9538_v33, %v11046_v32  ;;  %v5132_v33 = vrot.slane %v9550_v26, %v11048_v16 }
 0x8d2   :  { %v5059_v45 = vpop.xlane.xlu0 %5058  ;;  %v5182_v5 = vsel %vm1474_vm3, %v5181_v51, %v5177_v56 }
 0x8d3   :  { %v5186_v38 = vrot.slane %v5059_v45, %v11043_v8  ;;  %v5061_v7 = vpop.xlane.xlu1 %5060  ;;  %v5123_v13 = vsel %vm1502_vm7, %v5122_v24, %v5118_v29  ;;  %v5147_v24 = vrot.slane %v9572_v20, %v11051_v6 }
 0x8d4   :  { %v5191_v44 = vrot.slane %v5061_v7, %v11044_v4 }
 0x8d5   :  { %v5187_v0 = vsel %vm1481_vm4, %v5186_v38, %v5182_v5 }
 0x8d6   :  { %v5063_v43 = vpop.xlane.xlu0 %5062  ;;  %v5192_v51 = vsel %vm1488_vm5, %v5191_v44, %v5187_v0  ;;  %v5128_v44 = vsel %vm1509_vm8, %v5127_v49, %v5123_v13 }
 0x8d7   :  { %v5196_v17 = vrot.slane %v5063_v43, %v11045_v47  ;;  %v5065_v62 = vpop.xlane.xlu1 %5064  ;;  %v5133_v26 = vsel %vm1516_vm9, %v5132_v33, %v5128_v44 }
 0x8d8   :  { %v5201_v22 = vrot.slane %v5065_v62, %v11046_v32  ;;  %v5138_v53 = vsel %vm1523_vm10, %v5137_v46, %v5133_v26 }
 0x8d9   :  { %v5197_v56 = vsel %vm1495_vm6, %v5196_v17, %v5192_v51  ;;  %v5142_v17 = vrot.slane %v9562_v60, %v11050_v15 }
 0x8da   :  { %v5067_v45 = vpop.xlane.xlu0 %5066  ;;  %5379 = vbcast.lane.b32.xlu1 %v9627_v18, 256  ;;  %v5202_v40 = vsel %vm1502_vm7, %v5201_v22, %v5197_v56  ;;  %v5152_v56 = vrot.slane %v9574_v31, %v11052_v2 }
 0x8db   :  { %v5206_v38 = vrot.slane %v5067_v45, %v11047_v9  ;;  %v5069_v7 = vpop.xlane.xlu1 %5068  ;;  %v5143_v60 = vsel %vm1530_vm11, %v5142_v17, %v5138_v53 }
 0x8dc   :  { %v5211_v5 = vrot.slane %v5069_v7, %v11048_v16  ;;  %v5148_v20 = vsel %vm1537_vm12, %v5147_v24, %v5143_v60  ;;  %v5157_v7 = vrot.slane %v9584_v59, %v11053_v3  ;;  %v11088_v59 = vld [vmem:[#allocation53_spill] sm:$0xff] }
 0x8dd   :  { %v5207_v52 = vsel %vm1509_vm8, %v5206_v38, %v5202_v40  ;;  %v5153_v31 = vsel %vm1544_vm13, %v5152_v56, %v5148_v20 }
 0x8de   :  { %v5071_v12 = vpop.xlane.xlu0 %5070  ;;  %5387 = vbcast.lane.b32.xlu1 %v9627_v18, 272  ;;  %v5212_v62 = vsel %vm1516_vm9, %v5211_v5, %v5207_v52  ;;  %v5158_v44 = vsel %vm1551_vm14, %v5157_v7, %v5153_v31 }
 0x8df   :  { %v5216_v0 = vrot.slane %v5071_v12, %v11049_v27  ;;  %v5073_v43 = vpop.xlane.xlu1 %5072  ;;  %5383 = vbcast.lane.b32.xlu0 %v9627_v18, 264  ;;  %v5444_v12 = vrot.slane %v9614_v48, %v11088_v59 }
 0x8e0   :  { %v5221_v36 = vrot.slane %v5073_v43, %v11050_v15 }
 0x8e1   :  { %v5217_v51 = vsel %vm1523_vm10, %v5216_v0, %v5212_v62 }
 0x8e2   :  { %v5075_v22 = vpop.xlane.xlu0 %5074  ;;  %5391 = vbcast.lane.b32.xlu1 %v9627_v18, 280  ;;  %v5222_v45 = vsel %vm1530_vm11, %v5221_v36, %v5217_v51 }
 0x8e3   :  { %v5226_v29 = vrot.slane %v5075_v22, %v11051_v6  ;;  %v5077_v49 = vpop.xlane.xlu1 %5076  ;;  %5399 = vbcast.lane.b32.xlu0 %v9627_v18, 296 }
 0x8e4   :  { %v5231_v38 = vrot.slane %v5077_v49, %v11052_v2 }
 0x8e5   :  { %v5227_v13 = vsel %vm1537_vm12, %v5226_v29, %v5222_v45 }
 0x8e6   :  { %v5079_v33 = vpop.xlane.xlu0 %5078  ;;  %5395 = vbcast.lane.b32.xlu1 %v9627_v18, 288  ;;  %v5232_v5 = vsel %vm1544_vm13, %v5231_v38, %v5227_v13 }
 0x8e7   :  { %v5236_v40 = vrot.slane %v5079_v33, %v11053_v3  ;;  %5407 = vbcast.lane.b32.xlu0 %v9627_v18, 312 }
 0x8e9   :  { %v5237_v46 = vsel %vm1551_vm14, %v5236_v40, %v5232_v5 }
 0x8ea   :  { %v5238_v52 = vsel %vm1632_vm15, %v5237_v46, %v5158_v44  ;;  %5403 = vbcast.lane.b32.xlu1 %v9627_v18, 304 }
 0x8eb   :  { %5240 = vst [vmem:[#allocation11 + $0xa] sm:$0x3] %v5238_v52  ;;  %5415 = vbcast.lane.b32.xlu0 %v9627_v18, 328 }
 0x8ee   :  { %5411 = vbcast.lane.b32.xlu1 %v9627_v18, 320 }
 0x8ef   :  { %5423 = vbcast.lane.b32.xlu0 %v9627_v18, 344 }
 0x8f2   :  { %5419 = vbcast.lane.b32.xlu1 %v9627_v18, 336 }
 0x8f3   :  { %5431 = vbcast.lane.b32.xlu0 %v9627_v18, 360 }
 0x8f6   :  { %5427 = vbcast.lane.b32.xlu1 %v9627_v18, 352 }
 0x8f7   :  { %5439 = vbcast.lane.b32.xlu0 %v9627_v18, 376 }
 0x8fa   :  { %5435 = vbcast.lane.b32.xlu1 %v9627_v18, 368 }
 0x8fb   :  { %5450 = vbcast.lane.b32.xlu0 %v5444_v12, 264 }
 0x8fe   :  { %5446 = vbcast.lane.b32.xlu1 %v5444_v12, 256 }
 0x8ff   :  { %5458 = vbcast.lane.b32.xlu0 %v5444_v12, 280 }
 0x902   :  { %5454 = vbcast.lane.b32.xlu1 %v5444_v12, 272 }
 0x903   :  { %5466 = vbcast.lane.b32.xlu0 %v5444_v12, 296 }
 0x906   :  { %5462 = vbcast.lane.b32.xlu1 %v5444_v12, 288 }
 0x907   :  { %5474 = vbcast.lane.b32.xlu0 %v5444_v12, 312 }
 0x90a   :  { %5470 = vbcast.lane.b32.xlu1 %v5444_v12, 304 }
 0x90b   :  { %5482 = vbcast.lane.b32.xlu0 %v5444_v12, 328 }
 0x90e   :  { %5478 = vbcast.lane.b32.xlu1 %v5444_v12, 320 }
 0x90f   :  { %5490 = vbcast.lane.b32.xlu0 %v5444_v12, 344 }
 0x912   :  { %5486 = vbcast.lane.b32.xlu1 %v5444_v12, 336 }
 0x913   :  { %5498 = vbcast.lane.b32.xlu0 %v5444_v12, 360 }
 0x916   :  { %5494 = vbcast.lane.b32.xlu1 %v5444_v12, 352 }
 0x917   :  { %5506 = vbcast.lane.b32.xlu0 %v5444_v12, 376 }
 0x91a   :  { %v5308_v0 = vpop.xlane.xlu1 %5307  ;;  %v5310_v43 = vpop.xlane.xlu0 %5309  ;;  %5502 = vbcast.lane.b32.xlu1 %v5444_v12, 368 }
 0x91e   :  { %v5312_v48 = vpop.xlane.xlu1 %5311  ;;  %v5314_v18 = vpop.xlane.xlu0 %5313 }
 0x922   :  { %v5316_v26 = vpop.xlane.xlu1 %5315  ;;  %v5318_v17 = vpop.xlane.xlu0 %5317 }
 0x926   :  { %v5320_v62 = vpop.xlane.xlu1 %5319  ;;  %v5322_v36 = vpop.xlane.xlu0 %5321 }
 0x92a   :  { %v5324_v53 = vpop.xlane.xlu1 %5323  ;;  %v5326_v24 = vpop.xlane.xlu0 %5325 }
 0x92e   :  { %v5328_v51 = vpop.xlane.xlu1 %5327  ;;  %v5330_v22 = vpop.xlane.xlu0 %5329 }
 0x932   :  { %v5332_v29 = vpop.xlane.xlu1 %5331  ;;  %v5334_v49 = vpop.xlane.xlu0 %5333 }
 0x936   :  { %v9693_v60 = vpop.xlane.xlu1 %5335  ;;  %v9695_v56 = vpop.xlane.xlu0 %5337 }
 0x93a   :  { %v9697_v45 = vpop.xlane.xlu1 %5339  ;;  %v9699_v38 = vpop.xlane.xlu0 %5341 }
 0x93e   :  { %v9701_v20 = vpop.xlane.xlu1 %5343  ;;  %v9703_v7 = vpop.xlane.xlu0 %5345 }
 0x942   :  { %v9705_v13 = vpop.xlane.xlu1 %5347  ;;  %v9707_v33 = vpop.xlane.xlu0 %5349 }
 0x946   :  { %v9709_v40 = vpop.xlane.xlu1 %5351  ;;  %v9711_v31 = vpop.xlane.xlu0 %5353 }
 0x94a   :  { %v9713_v5 = vpop.xlane.xlu1 %5355  ;;  %v9715_v44 = vpop.xlane.xlu0 %5357 }
 0x94e   :  { %v9717_v46 = vpop.xlane.xlu1 %5359  ;;  %v9719_v52 = vpop.xlane.xlu0 %5361 }
 0x952   :  { %v9721_v12 = vpop.xlane.xlu1 %5363  ;;  %v9723_v59 = vpop.xlane.xlu0 %5365 }
 0x956   :  { %v9725_v28 = vpop.xlane.xlu1 %5367  ;;  %v9727_v3 = vpop.xlane.xlu0 %5369 }
 0x95a   :  { %v5380_v2 = vpop.permute.xlu1 %5379  ;;  %v5384_v6 = vpop.permute.xlu0 %5383 }
 0x95b   :  { %v5540_v15 = vadd.f32 %v5380_v2, %v5308_v0  ;;  %v5541_v27 = vadd.f32 %v5384_v6, %v5310_v43 }
 0x95d   :  { %5605 = vperm.xlu1 %6997, %v5540_v15   ;;  %5608 = vperm.xlu0 %6996, %v5541_v27  }
 0x95e   :  { %v5388_v16 = vpop.permute.xlu1 %5387  ;;  %v5400_v9 = vpop.permute.xlu0 %5399 }
 0x95f   :  { %v5542_v32 = vadd.f32 %v5388_v16, %v5312_v48  ;;  %v5545_v39 = vadd.f32 %v5400_v9, %v5318_v17 }
 0x961   :  { %5611 = vperm.xlu1 %6997, %v5542_v32  }
 0x962   :  { %v5392_v47 = vpop.permute.xlu1 %5391  ;;  %v5408_v4 = vpop.permute.xlu0 %5407 }
 0x963   :  { %v5543_v8 = vadd.f32 %v5392_v47, %v5314_v18  ;;  %v5547_v2 = vadd.f32 %v5408_v4, %v5322_v36 }
 0x965   :  { %5614 = vperm.xlu0 %6996, %v5543_v8  }
 0x966   :  { %v5396_v37 = vpop.permute.xlu1 %5395  ;;  %v5416_v14 = vpop.permute.xlu0 %5415 }
 0x967   :  { %v5544_v41 = vadd.f32 %v5396_v37, %v5316_v26  ;;  %v5549_v16 = vadd.f32 %v5416_v14, %v5326_v24 }
 0x969   :  { %5617 = vperm.xlu1 %6997, %v5544_v41   ;;  %5620 = vperm.xlu0 %6996, %v5545_v39  }
 0x96a   :  { %v5404_v61 = vpop.permute.xlu1 %5403  ;;  %v5424_v55 = vpop.permute.xlu0 %5423 }
 0x96b   :  { %v5546_v6 = vadd.f32 %v5404_v61, %v5320_v62  ;;  %v5551_v0 = vadd.f32 %v5424_v55, %v5330_v22 }
 0x96d   :  { %5623 = vperm.xlu1 %6997, %v5546_v6   ;;  %5626 = vperm.xlu0 %6996, %v5547_v2  }
 0x96e   :  { %v5412_v27 = vpop.permute.xlu1 %5411  ;;  %v5432_v15 = vpop.permute.xlu0 %5431 }
 0x96f   :  { %v5548_v32 = vadd.f32 %v5412_v27, %v5324_v53  ;;  %v5553_v37 = vadd.f32 %v5432_v15, %v5334_v49 }
 0x971   :  { %5629 = vperm.xlu1 %6997, %v5548_v32   ;;  %5632 = vperm.xlu0 %6996, %v5549_v16  }
 0x972   :  { %v5420_v47 = vpop.permute.xlu1 %5419  ;;  %v5440_v8 = vpop.permute.xlu0 %5439 }
 0x973   :  { %v5550_v43 = vadd.f32 %v5420_v47, %v5328_v51  ;;  %v5555_v48 = vadd.f32 %v5440_v8, %v9695_v56  ;;  %v11100_v47 = vld [vmem:[#allocation65_spill] sm:$0xff] }
 0x975   :  { %5635 = vperm.xlu1 %6997, %v5550_v43   ;;  %5638 = vperm.xlu0 %6996, %v5551_v0   ;;  %v11101_v0 = vld [vmem:[#allocation66_spill] sm:$0xff] }
 0x976   :  { %v5428_v41 = vpop.permute.xlu1 %5427  ;;  %v5451_v39 = vpop.permute.xlu0 %5450 }
 0x977   :  { %v5552_v9 = vadd.f32 %v5428_v41, %v5332_v29  ;;  %v5557_v55 = vadd.f32 %v5451_v39, %v9699_v38  ;;  %v11102_v41 = vld [vmem:[#allocation67_spill] sm:$0xff] }
 0x979   :  { %5641 = vperm.xlu1 %6997, %v5552_v9   ;;  %5644 = vperm.xlu0 %6996, %v5553_v37   ;;  %v11103_v37 = vld [vmem:[#allocation68_spill] sm:$0xff] }
 0x97a   :  { %v5436_v61 = vpop.permute.xlu1 %5435  ;;  %v5459_v4 = vpop.permute.xlu0 %5458 }
 0x97b   :  { %v5554_v14 = vadd.f32 %v5436_v61, %v9693_v60  ;;  %v5559_v53 = vadd.f32 %v5459_v4, %v9703_v7  ;;  %v11104_v61 = vld [vmem:[#allocation69_spill] sm:$0xff] }
 0x97d   :  { %5647 = vperm.xlu1 %6997, %v5554_v14   ;;  %5650 = vperm.xlu0 %6996, %v5555_v48  }
 0x97e   :  { %v5447_v18 = vpop.permute.xlu1 %5446  ;;  %v5467_v26 = vpop.permute.xlu0 %5466 }
 0x97f   :  { %v5556_v17 = vadd.f32 %v5447_v18, %v9697_v45  ;;  %v5561_v29 = vadd.f32 %v5467_v26, %v9707_v33  ;;  %v11105_v18 = vld [vmem:[#allocation38_spill] sm:$0xff] }
 0x981   :  { %5653 = vperm.xlu1 %6997, %v5556_v17   ;;  %5656 = vperm.xlu0 %6996, %v5557_v55   ;;  %v11106_v55 = vld [vmem:[#allocation40_spill] sm:$0xff] }
 0x982   :  { %v5455_v62 = vpop.permute.xlu1 %5454  ;;  %v5475_v36 = vpop.permute.xlu0 %5474 }
 0x983   :  { %v5558_v24 = vadd.f32 %v5455_v62, %v9701_v20  ;;  %v5563_v56 = vadd.f32 %v5475_v36, %v9711_v31 }
 0x985   :  { %5659 = vperm.xlu1 %6997, %v5558_v24   ;;  %5662 = vperm.xlu0 %6996, %v5559_v53   ;;  %v11107_v53 = vld [vmem:[#allocation42_spill] sm:$0xff] }
 0x986   :  { %v5463_v51 = vpop.permute.xlu1 %5462  ;;  %v5483_v22 = vpop.permute.xlu0 %5482 }
 0x987   :  { %v5560_v49 = vadd.f32 %v5463_v51, %v9705_v13  ;;  %v5565_v20 = vadd.f32 %v5483_v22, %v9715_v44  ;;  %v11108_v51 = vld [vmem:[#allocation39_spill] sm:$0xff] }
 0x989   :  { %5665 = vperm.xlu1 %6997, %v5560_v49   ;;  %5668 = vperm.xlu0 %6996, %v5561_v29  }
 0x98a   :  { %v5471_v60 = vpop.permute.xlu1 %5470  ;;  %v5491_v38 = vpop.permute.xlu0 %5490 }
 0x98b   :  { %v5562_v45 = vadd.f32 %v5471_v60, %v9709_v40  ;;  %v5567_v13 = vadd.f32 %v5491_v38, %v9719_v52  ;;  %v11099_v52 = vld [vmem:[#allocation64_spill] sm:$0xff] }
 0x98c   :  { %v11109_v60 = vld [vmem:[#allocation44_spill] sm:$0xff] }
 0x98d   :  { %5671 = vperm.xlu1 %6997, %v5562_v45   ;;  %5674 = vperm.xlu0 %6996, %v5563_v56  }
 0x98e   :  { %v5479_v7 = vpop.permute.xlu1 %5478  ;;  %v5499_v33 = vpop.permute.xlu0 %5498 }
 0x98f   :  { %v5564_v2 = vadd.f32 %v5479_v7, %v9713_v5  ;;  %v5569_v40 = vadd.f32 %v5499_v33, %v9723_v59  ;;  %v11098_v59 = vld [vmem:[#allocation63_spill] sm:$0xff] }
 0x991   :  { %5677 = vperm.xlu1 %6997, %v5564_v2   ;;  %5680 = vperm.xlu0 %6996, %v5565_v20  }
 0x992   :  { %v5487_v6 = vpop.permute.xlu1 %5486  ;;  %v5507_v16 = vpop.permute.xlu0 %5506 }
 0x993   :  { %v5566_v27 = vadd.f32 %v5487_v6, %v9717_v46  ;;  %v5571_v5 = vadd.f32 %v5507_v16, %v9727_v3  ;;  %v11089_v3 = vld [vmem:[#allocation54_spill] sm:$0xff] }
 0x994   :  { %v11111_v16 = vld [vmem:[#allocation46_spill] sm:$0xff] }
 0x995   :  { %5683 = vperm.xlu1 %6997, %v5566_v27   ;;  %5686 = vperm.xlu0 %6996, %v5567_v13   ;;  %v11110_v13 = vld [vmem:[#allocation41_spill] sm:$0xff] }
 0x996   :  { %v5495_v31 = vpop.permute.xlu1 %5494 }
 0x997   :  { %v5568_v15 = vadd.f32 %v5495_v31, %v9721_v12 }
 0x999   :  { %5689 = vperm.xlu1 %6997, %v5568_v15   ;;  %5692 = vperm.xlu0 %6996, %v5569_v40  }
 0x99a   :  { %v5503_v44 = vpop.permute.xlu1 %5502 }
 0x99b   :  { %v5570_v32 = vadd.f32 %v5503_v44, %v9725_v28 }
 0x99d   :  { %5695 = vperm.xlu1 %6997, %v5570_v32   ;;  %5698 = vperm.xlu0 %6996, %v5571_v5  }
 0x9bc   :  { %5863 = vmax.index.xlane.f32.xlu0 %v9441_v58 }
 0x9c0   :  { %5865 = vmax.index.xlane.f32.xlu0 %v9452_v63 }
 0x9c1   :  { %5861 = vmax.index.xlane.f32.xlu1 %v9444_v54  ;;  %v11090_v54 = vld [vmem:[#allocation55_spill] sm:$0xff] }
 0x9c4   :  { %5867 = vmax.index.xlane.f32.xlu0 %v9449_v11  ;;  %v11091_v11 = vld [vmem:[#allocation56_spill] sm:$0xff] }
 0x9c5   :  { %5869 = vmax.index.xlane.f32.xlu1 %v9460_v23 }
 0x9c8   :  { %5871 = vmax.index.xlane.f32.xlu0 %v9457_v30  ;;  %v11092_v30 = vld [vmem:[#allocation57_spill] sm:$0xff] }
 0x9c9   :  { %5873 = vmax.index.xlane.f32.xlu1 %v9468_v34 }
 0x9cc   :  { %5875 = vmax.index.xlane.f32.xlu0 %v9465_v42  ;;  %v11093_v42 = vld [vmem:[#allocation58_spill] sm:$0xff] }
 0x9cd   :  { %5877 = vmax.index.xlane.f32.xlu1 %v9476_v50 }
 0x9d0   :  { %5879 = vmax.index.xlane.f32.xlu0 %v9473_v25  ;;  %v11094_v25 = vld [vmem:[#allocation59_spill] sm:$0xff] }
 0x9d1   :  { %5881 = vmax.index.xlane.f32.xlu1 %v9484_v10 }
 0x9d4   :  { %5883 = vmax.index.xlane.f32.xlu0 %v9481_v19  ;;  %v11095_v19 = vld [vmem:[#allocation60_spill] sm:$0xff] }
 0x9d5   :  { %5885 = vmax.index.xlane.f32.xlu1 %v9493_v1 }
 0x9d8   :  { %5887 = vmax.index.xlane.f32.xlu0 %v9490_v35  ;;  %v11096_v35 = vld [vmem:[#allocation61_spill] sm:$0xff] }
 0x9d9   :  { %5889 = vmax.index.xlane.f32.xlu1 %v9502_v21 }
 0x9dc   :  { %5891 = vmax.index.xlane.f32.xlu0 %v9499_v57  ;;  %v5606_v28 = vpop.permute.xlu1 %5605  ;;  %v5609_v58 = vpop.permute.xlu0 %5608  ;;  %v11097_v57 = vld [vmem:[#allocation62_spill] sm:$0xff] }
 0x9dd   :  { %5893 = vmax.index.xlane.f32.xlu1 %v11089_v3  ;;  %v5703_v26 = vrot.slane %v5606_v28, %v11105_v18  ;;  %v5707_v17 = vrot.slane %v5609_v58, %v11106_v55 }
 0x9df   :  { %v5708_v38 = vsel %vm1453_vm0, %v5707_v17, %v5703_v26  ;;  %v11116_v26 = vld [vmem:[#allocation47_spill] sm:$0xff] }
 0x9e0   :  { %5895 = vmax.index.xlane.f32.xlu0 %v11090_v54  ;;  %v5612_v63 = vpop.permute.xlu1 %5611  ;;  %v11112_v54 = vld [vmem:[#allocation43_spill] sm:$0xff] }
 0x9e1   :  { %5897 = vmax.index.xlane.f32.xlu1 %v11091_v11  ;;  %v5712_v24 = vrot.slane %v5612_v63, %v11107_v53 }
 0x9e3   :  { %v5713_v2 = vsel %vm1460_vm1, %v5712_v24, %v5708_v38  ;;  %v11117_v24 = vld [vmem:[#allocation52_spill] sm:$0xff]  ;;  %v11118_v38 = vld [vmem:[#allocation49_spill] sm:$0xff] }
 0x9e4   :  { %5899 = vmax.index.xlane.f32.xlu0 %v11092_v30  ;;  %v5615_v23 = vpop.permute.xlu0 %5614 }
 0x9e5   :  { %5901 = vmax.index.xlane.f32.xlu1 %v11093_v42  ;;  %v5717_v22 = vrot.slane %v5615_v23, %v11108_v51  ;;  %v11113_v42 = vld [vmem:[#allocation48_spill] sm:$0xff] }
 0x9e7   :  { %v5718_v6 = vsel %vm1467_vm2, %v5717_v22, %v5713_v2 }
 0x9e8   :  { %v5618_v34 = vpop.permute.xlu1 %5617  ;;  %5903 = vmax.index.xlane.f32.xlu0 %v11094_v25  ;;  %v5621_v50 = vpop.permute.xlu0 %5620 }
 0x9e9   :  { %5905 = vmax.index.xlane.f32.xlu1 %v11095_v19  ;;  %v5722_v56 = vrot.slane %v5618_v34, %v11109_v60  ;;  %v5727_v27 = vrot.slane %v5621_v50, %v11110_v13 }
 0x9eb   :  { %v5723_v15 = vsel %vm1474_vm3, %v5722_v56, %v5718_v6 }
 0x9ec   :  { %v5624_v10 = vpop.permute.xlu1 %5623  ;;  %5907 = vmax.index.xlane.f32.xlu0 %v11096_v35  ;;  %v5627_v1 = vpop.permute.xlu0 %5626  ;;  %v5728_v58 = vsel %vm1481_vm4, %v5727_v27, %v5723_v15 }
 0x9ed   :  { %5909 = vmax.index.xlane.f32.xlu1 %v11097_v57  ;;  %v5732_v44 = vrot.slane %v5624_v10, %v11111_v16  ;;  %v5737_v11 = vrot.slane %v5627_v1, %v11112_v54  ;;  %v11114_v57 = vld [vmem:[#allocation45_spill] sm:$0xff] }
 0x9ef   :  { %v5733_v23 = vsel %vm1488_vm5, %v5732_v44, %v5728_v58  ;;  %v11120_v44 = vld [vmem:[#allocation19_spill] sm:$0xff] }
 0x9f0   :  { %v5630_v21 = vpop.permute.xlu1 %5629  ;;  %5911 = vmax.index.xlane.f32.xlu0 %v11098_v59  ;;  %v5633_v46 = vpop.permute.xlu0 %5632  ;;  %v5738_v35 = vsel %vm1495_vm6, %v5737_v11, %v5733_v23 }
 0x9f1   :  { %5913 = vmax.index.xlane.f32.xlu1 %v11099_v52  ;;  %v5742_v34 = vrot.slane %v5630_v21, %v11113_v42  ;;  %v5747_v59 = vrot.slane %v5633_v46, %v11114_v57 }
 0x9f4   :  { %v9774_v12 = vpop.permute.xlu1 %5635  ;;  %5915 = vmax.index.xlane.f32.xlu0 %v11100_v47  ;;  %v9777_v8 = vpop.permute.xlu0 %5638  ;;  %v5743_v47 = vsel %vm1502_vm7, %v5742_v34, %v5738_v35  ;;  %v11121_v34 = vld [vmem:[#allocation20_spill] sm:$0xff] }
 0x9f5   :  { %5917 = vmax.index.xlane.f32.xlu1 %v11101_v0  ;;  %v11115_v0 = vld [vmem:[#allocation50_spill] sm:$0xff]  ;;  %v5757_v46 = vrot.slane %v9777_v8, %v11116_v26 }
 0x9f8   :  { %v9780_v43 = vpop.permute.xlu1 %5641  ;;  %5919 = vmax.index.xlane.f32.xlu0 %v11102_v41  ;;  %v9783_v39 = vpop.permute.xlu0 %5644  ;;  %v5752_v41 = vrot.slane %v9774_v12, %v11115_v0 }
 0x9f9   :  { %5921 = vmax.index.xlane.f32.xlu1 %v11103_v37  ;;  %v5762_v12 = vrot.slane %v9780_v43, %v11117_v24  ;;  %v5767_v8 = vrot.slane %v9783_v39, %v11118_v38 }
 0x9fc   :  { %v9786_v9 = vpop.permute.xlu1 %5647  ;;  %5923 = vmax.index.xlane.f32.xlu0 %v11104_v61  ;;  %v9789_v4 = vpop.permute.xlu0 %5650 }
 0x9fd   :  { %v5777_v39 = vrot.slane %v9789_v4, %v11120_v44 }
 0xa00   :  { %v5654_v48 = vpop.permute.xlu1 %5653  ;;  %v5657_v14 = vpop.permute.xlu0 %5656 }
 0xa01   :  { %v5782_v62 = vrot.slane %v5654_v48, %v11105_v18  ;;  %v5786_v36 = vrot.slane %v5657_v14, %v11106_v55  ;;  %v5748_v14 = vsel %vm1509_vm8, %v5747_v59, %v5743_v47  ;;  %v7031_v59 = vld [vmem:[#allocation6] sm:$0xff] }
 0xa03   :  { %v5787_v7 = vsel %vm1453_vm0, %v5786_v36, %v5782_v62  ;;  %v5753_v36 = vsel %vm1516_vm9, %v5752_v41, %v5748_v14  ;;  %v7033_v41 = vld [vmem:[#allocation6 + $0x10] sm:$0xff] }
 0xa04   :  { %v5660_v29 = vpop.permute.xlu1 %5659  ;;  %v5663_v49 = vpop.permute.xlu0 %5662 }
 0xa05   :  { %v5791_v45 = vrot.slane %v5660_v29, %v11107_v53  ;;  %v5796_v20 = vrot.slane %v5663_v49, %v11108_v51 }
 0xa07   :  { %v5792_v33 = vsel %vm1460_vm1, %v5791_v45, %v5787_v7  ;;  %v5758_v45 = vsel %vm1523_vm10, %v5757_v46, %v5753_v36  ;;  %v7036_v46 = vld [vmem:[#allocation6 + $0x38] sm:$0xff] }
 0xa08   :  { %v5666_v31 = vpop.permute.xlu1 %5665  ;;  %v5669_v40 = vpop.permute.xlu0 %5668  ;;  %v5797_v32 = vsel %vm1467_vm2, %v5796_v20, %v5792_v33  ;;  %v5763_v2 = vsel %vm1530_vm11, %v5762_v12, %v5758_v45  ;;  %v11119_v33 = vld [vmem:[#allocation51_spill] sm:$0xff]  ;;  %v7038_v12 = vld [vmem:[#allocation6 + $0x48] sm:$0xff] }
 0xa09   :  { %v5801_v5 = vrot.slane %v5666_v31, %v11109_v60  ;;  %v5806_v3 = vrot.slane %v5669_v40, %v11110_v13  ;;  %v5772_v43 = vrot.slane %v9786_v9, %v11119_v33  ;;  %v5768_v15 = vsel %vm1537_vm12, %v5767_v8, %v5763_v2  ;;  %v7040_v45 = vld [vmem:[#allocation6 + $0x58] sm:$0xff] }
 0xa0b   :  { %v5802_v28 = vsel %vm1474_vm3, %v5801_v5, %v5797_v32 }
 0xa0c   :  { %v5672_v63 = vpop.permute.xlu1 %5671  ;;  %v5675_v30 = vpop.permute.xlu0 %5674  ;;  %v5807_v50 = vsel %vm1481_vm4, %v5806_v3, %v5802_v28  ;;  %v5773_v3 = vsel %vm1544_vm13, %v5772_v43, %v5768_v15  ;;  %v7042_v43 = vld [vmem:[#allocation6 + $0x68] sm:$0xff] }
 0xa0d   :  { %v5811_v25 = vrot.slane %v5672_v63, %v11111_v16  ;;  %v5816_v19 = vrot.slane %v5675_v30, %v11112_v54  ;;  %v5778_v63 = vsel %vm1551_vm14, %v5777_v39, %v5773_v3  ;;  %v7044_v39 = vld [vmem:[#allocation6 + $0x78] sm:$0xff] }
 0xa0f   :  { %v5812_v10 = vsel %vm1488_vm5, %v5811_v25, %v5807_v50  ;;  %v11122_v50 = vld [vmem:[#allocation21_spill] sm:$0xff] }
 0xa10   :  { %v5678_v52 = vpop.permute.xlu1 %5677  ;;  %v5681_v1 = vpop.permute.xlu0 %5680  ;;  %v5817_v37 = vsel %vm1495_vm6, %v5816_v19, %v5812_v10  ;;  %v7030_v10 = vld [vmem:[#allocation6 + $0x8] sm:$0xff] }
 0xa11   :  { %v5821_v21 = vrot.slane %v5678_v52, %v11113_v42  ;;  %v5826_v61 = vrot.slane %v5681_v1, %v11114_v57  ;;  %v7032_v1 = vld [vmem:[#allocation6 + $0x18] sm:$0xff] }
 0xa13   :  { %v5822_v48 = vsel %vm1502_vm7, %v5821_v21, %v5817_v37  ;;  %v7034_v37 = vld [vmem:[#allocation6 + $0x28] sm:$0xff] }
 0xa14   :  { %v5684_v17 = vpop.permute.xlu1 %5683  ;;  %v5687_v62 = vpop.permute.xlu0 %5686  ;;  %v5827_v29 = vsel %vm1509_vm8, %v5826_v61, %v5822_v48  ;;  %v7035_v48 = vld [vmem:[#allocation6 + $0x20] sm:$0xff] }
 0xa15   :  { %v5831_v22 = vrot.slane %v5684_v17, %v11115_v0  ;;  %v5836_v49 = vrot.slane %v5687_v62, %v11116_v26  ;;  %v7037_v62 = vld [vmem:[#allocation6 + $0x30] sm:$0xff] }
 0xa17   :  { %v5832_v56 = vsel %vm1516_vm9, %v5831_v22, %v5827_v29  ;;  %v7039_v29 = vld [vmem:[#allocation6 + $0x40] sm:$0xff] }
 0xa18   :  { %v5690_v7 = vpop.permute.xlu1 %5689  ;;  %v5693_v20 = vpop.permute.xlu0 %5692  ;;  %v5837_v27 = vsel %vm1523_vm10, %v5836_v49, %v5832_v56 }
 0xa19   :  { %v5841_v6 = vrot.slane %v5690_v7, %v11117_v24  ;;  %v5846_v31 = vrot.slane %v5693_v20, %v11118_v38  ;;  %v7041_v7 = vld [vmem:[#allocation6 + $0x50] sm:$0xff] }
 0xa1b   :  { %v5842_v40 = vsel %vm1530_vm11, %v5841_v6, %v5837_v27  ;;  %v7043_v27 = vld [vmem:[#allocation6 + $0x60] sm:$0xff] }
 0xa1c   :  { %v5696_v5 = vpop.permute.xlu1 %5695  ;;  %v5699_v32 = vpop.permute.xlu0 %5698  ;;  %v5847_v58 = vsel %vm1537_vm12, %v5846_v31, %v5842_v40 }
 0xa1d   :  { %v5851_v28 = vrot.slane %v5696_v5, %v11119_v33  ;;  %v5856_v9 = vrot.slane %v5699_v32, %v11120_v44  ;;  %v7045_v32 = vld [vmem:[#allocation6 + $0x70] sm:$0xff] }
 0xa1f   :  { %v5852_v11 = vsel %vm1544_vm13, %v5851_v28, %v5847_v58 }
 0xa20   :  { %v5857_v30 = vsel %vm1551_vm14, %v5856_v9, %v5852_v11 }
 0xa21   :  { %v5858_v23 = vsel %vm1632_vm15, %v5857_v30, %v5778_v63 }
 0xa22   :  { %5860 = vst [vmem:[#allocation2] sm:$0x3] %v5858_v23 }
 0xa29   :  { %v6982_v4 = vld.sshfl [vmem:[#allocation2] sm:$0x11 pattern:$0x75316420] }
 0xa2a   :  { %v6102_v25 = vrot.slane %v6982_v4, %v11121_v34  ;;  %v6095_v56 = vcombine.high %v6982_v4, %v6982_v4 }
 0xa2c   :  { %v6113_v19 = vrot.slane %v6102_v25, %v11122_v50  ;;  %v6109_v2 = vrot.slane %v6095_v56, %v11121_v34 }
 0xa2e   :  { %v9862_v35 = vadd.f32 %v7030_v10, %v6113_v19  ;;  %v9864_v52 = vadd.f32 %v7031_v59, %v6113_v19  ;;  %v9868_v47 = vadd.f32 %v7032_v1, %v6113_v19  ;;  %v9870_v21 = vadd.f32 %v7033_v41, %v6113_v19 }
 0xa2f   :  { %v9874_v61 = vadd.f32 %v7034_v37, %v6113_v19  ;;  %v9876_v14 = vadd.f32 %v7035_v48, %v6113_v19  ;;  %v9880_v17 = vadd.f32 %v7036_v46, %v6113_v19  ;;  %v9882_v36 = vadd.f32 %v7037_v62, %v6113_v19 }
 0xa30   :  { %6154 = vmax.xlane.f32.xlu0 %v9862_v35  ;;  %6152 = vmax.xlane.f32.xlu1 %v9864_v52  ;;  %v9886_v22 = vadd.f32 %v7038_v12, %v6113_v19  ;;  %v9888_v49 = vadd.f32 %v7039_v29, %v6113_v19  ;;  %v9892_v8 = vadd.f32 %v7040_v45, %v6113_v19 }
 0xa31   :  { %v9894_v20 = vadd.f32 %v7041_v7, %v6113_v19  ;;  %v9899_v6 = vadd.f32 %v7042_v43, %v6113_v19  ;;  %v9901_v31 = vadd.f32 %v7043_v27, %v6113_v19  ;;  %v6117_v15 = vrot.slane %v6109_v2, %v11122_v50 }
 0xa32   :  { %11123 = vst [vmem:[#allocation23_spill] sm:$0xff] %v9886_v22  ;;  %11124 = vst [vmem:[#allocation25_spill] sm:$0xff] %v9888_v49  ;;  %v9906_v5 = vadd.f32 %v7044_v39, %v6113_v19  ;;  %v9908_v3 = vadd.f32 %v7045_v32, %v6113_v19 }
 0xa33   :  { %11125 = vst [vmem:[#allocation22_spill] sm:$0xff] %v9892_v8  ;;  %11126 = vst [vmem:[#allocation24_spill] sm:$0xff] %v9894_v20  ;;  %v9912_v58 = vadd.f32 %v7030_v10, %v6117_v15  ;;  %v9914_v11 = vadd.f32 %v7031_v59, %v6117_v15  ;;  %v9920_v23 = vadd.f32 %v7032_v1, %v6117_v15 }
 0xa34   :  { %6158 = vmax.xlane.f32.xlu0 %v9868_v47  ;;  %6156 = vmax.xlane.f32.xlu1 %v9870_v21  ;;  %11127 = vst [vmem:[#allocation27_spill] sm:$0xff] %v9899_v6  ;;  %11128 = vst [vmem:[#allocation26_spill] sm:$0xff] %v9901_v31  ;;  %v9922_v4 = vadd.f32 %v7033_v41, %v6117_v15  ;;  %v9930_v19 = vadd.f32 %v7034_v37, %v6117_v15 }
 0xa35   :  { %11129 = vst [vmem:[#allocation29_spill] sm:$0xff] %v9906_v5  ;;  %11130 = vst [vmem:[#allocation28_spill] sm:$0xff] %v9908_v3  ;;  %v9932_v10 = vadd.f32 %v7035_v48, %v6117_v15  ;;  %v9940_v41 = vadd.f32 %v7036_v46, %v6117_v15  ;;  %v9942_v56 = vadd.f32 %v7037_v62, %v6117_v15 }
 0xa36   :  { %v9950_v2 = vadd.f32 %v7038_v12, %v6117_v15 }
 0xa38   :  { %6162 = vmax.xlane.f32.xlu0 %v9874_v61  ;;  %6160 = vmax.xlane.f32.xlu1 %v9876_v14  ;;  %11131 = vst [vmem:[#allocation31_spill] sm:$0xff] %v9950_v2 }
 0xa3c   :  { %6166 = vmax.xlane.f32.xlu0 %v9880_v17  ;;  %6164 = vmax.xlane.f32.xlu1 %v9882_v36 }
 0xa40   :  { %6170 = vmax.xlane.f32.xlu0 %v9886_v22  ;;  %6168 = vmax.xlane.f32.xlu1 %v9888_v49 }
 0xa44   :  { %6174 = vmax.xlane.f32.xlu0 %v9892_v8  ;;  %6172 = vmax.xlane.f32.xlu1 %v9894_v20  ;;  %v9972_v8 = vadd.f32 %v7043_v27, %v6117_v15 }
 0xa46   :  { %11135 = vst [vmem:[#allocation35_spill] sm:$0xff] %v9972_v8 }
 0xa48   :  { %6178 = vmax.xlane.f32.xlu0 %v9899_v6  ;;  %6176 = vmax.xlane.f32.xlu1 %v9901_v31  ;;  %v9960_v6 = vadd.f32 %v7040_v45, %v6117_v15  ;;  %v9962_v31 = vadd.f32 %v7041_v7, %v6117_v15 }
 0xa49   :  { %v5864_v40 = vpop.xlane.xlu0 %5863 }
 0xa4a   :  { %11132 = vst [vmem:[#allocation30_spill] sm:$0xff] %v9960_v6  ;;  %11133 = vst [vmem:[#allocation33_spill] sm:$0xff] %v9962_v31  ;;  %v5932_v22 = vrot.slane %v5864_v40, %v11106_v55 }
 0xa4c   :  { %6182 = vmax.xlane.f32.xlu0 %v9906_v5  ;;  %6180 = vmax.xlane.f32.xlu1 %v9908_v3  ;;  %v9952_v5 = vadd.f32 %v7039_v29, %v6117_v15  ;;  %v9970_v3 = vadd.f32 %v7042_v43, %v6117_v15 }
 0xa4d   :  { %v5866_v28 = vpop.xlane.xlu0 %5865 }
 0xa4e   :  { %v5862_v9 = vpop.xlane.xlu1 %5861  ;;  %11134 = vst [vmem:[#allocation32_spill] sm:$0xff] %v9970_v3 }
 0xa4f   :  { %v5928_v7 = vrot.slane %v5862_v9, %v11105_v18  ;;  %v5937_v9 = vrot.slane %v5866_v28, %v11107_v53 }
 0xa50   :  { %6186 = vmax.xlane.f32.xlu0 %v9912_v58  ;;  %6184 = vmax.xlane.f32.xlu1 %v9914_v11 }
 0xa51   :  { %v5868_v63 = vpop.xlane.xlu0 %5867  ;;  %v5933_v27 = vsel %vm1453_vm0, %v5932_v22, %v5928_v7 }
 0xa52   :  { %v9918_v30 = vpop.xlane.xlu1 %5869 }
 0xa53   :  { %v5947_v22 = vrot.slane %v9918_v30, %v11109_v60 }
 0xa54   :  { %6190 = vmax.xlane.f32.xlu0 %v9920_v23  ;;  %6188 = vmax.xlane.f32.xlu1 %v9922_v4 }
 0xa55   :  { %v9926_v34 = vpop.xlane.xlu0 %5871 }
 0xa56   :  { %v9928_v25 = vpop.xlane.xlu1 %5873 }
 0xa57   :  { %v5957_v30 = vrot.slane %v9928_v25, %v11111_v16 }
 0xa58   :  { %6194 = vmax.xlane.f32.xlu0 %v9930_v19  ;;  %6192 = vmax.xlane.f32.xlu1 %v9932_v10 }
 0xa59   :  { %v9936_v59 = vpop.xlane.xlu0 %5875 }
 0xa5a   :  { %v9938_v1 = vpop.xlane.xlu1 %5877 }
 0xa5c   :  { %6198 = vmax.xlane.f32.xlu0 %v9940_v41  ;;  %6196 = vmax.xlane.f32.xlu1 %v9942_v56 }
 0xa5d   :  { %v9946_v37 = vpop.xlane.xlu0 %5879 }
 0xa5e   :  { %v9948_v48 = vpop.xlane.xlu1 %5881 }
 0xa60   :  { %6202 = vmax.xlane.f32.xlu0 %v9950_v2  ;;  %6200 = vmax.xlane.f32.xlu1 %v9952_v5 }
 0xa61   :  { %v9956_v46 = vpop.xlane.xlu0 %5883 }
 0xa62   :  { %v9958_v62 = vpop.xlane.xlu1 %5885 }
 0xa64   :  { %6206 = vmax.xlane.f32.xlu0 %v9960_v6  ;;  %6204 = vmax.xlane.f32.xlu1 %v9962_v31  ;;  %v9979_v6 = vadd.f32 %v7044_v39, %v6117_v15  ;;  %v9981_v31 = vadd.f32 %v7045_v32, %v6117_v15  ;;  %v5942_v15 = vrot.slane %v5868_v63, %v11108_v51 }
 0xa65   :  { %v9966_v12 = vpop.xlane.xlu0 %5887  ;;  %v5938_v32 = vsel %vm1460_vm1, %v5937_v9, %v5933_v27  ;;  %v5952_v63 = vrot.slane %v9926_v34, %v11110_v13 }
 0xa66   :  { %v9968_v29 = vpop.xlane.xlu1 %5889  ;;  %11136 = vst [vmem:[#allocation34_spill] sm:$0xff] %v9979_v6  ;;  %11137 = vst [vmem:[#allocation37_spill] sm:$0xff] %v9981_v31  ;;  %v5943_v28 = vsel %vm1467_vm2, %v5942_v15, %v5938_v32 }
 0xa67   :  { %v5948_v27 = vsel %vm1474_vm3, %v5947_v22, %v5943_v28 }
 0xa68   :  { %6210 = vmax.xlane.f32.xlu0 %v9970_v3  ;;  %6208 = vmax.xlane.f32.xlu1 %v9972_v8 }
 0xa69   :  { %v9976_v45 = vpop.xlane.xlu0 %5891 }
 0xa6a   :  { %v5894_v20 = vpop.xlane.xlu1 %5893 }
 0xa6b   :  { %v6007_v3 = vrot.slane %v5894_v20, %v11105_v18 }
 0xa6c   :  { %6214 = vmax.xlane.f32.xlu0 %v9979_v6  ;;  %6212 = vmax.xlane.f32.xlu1 %v9981_v31 }
 0xa6d   :  { %v5896_v43 = vpop.xlane.xlu0 %5895 }
 0xa6e   :  { %v6011_v8 = vrot.slane %v5896_v43, %v11106_v55  ;;  %v5898_v2 = vpop.xlane.xlu1 %5897 }
 0xa6f   :  { %v6016_v39 = vrot.slane %v5898_v2, %v11107_v53 }
 0xa70   :  { %v6012_v40 = vsel %vm1453_vm0, %v6011_v8, %v6007_v3 }
 0xa71   :  { %v5900_v6 = vpop.xlane.xlu0 %5899  ;;  %v6017_v20 = vsel %vm1460_vm1, %v6016_v39, %v6012_v40  ;;  %v5953_v39 = vsel %vm1481_vm4, %v5952_v63, %v5948_v27  ;;  %v5972_v63 = vrot.slane %v9946_v37, %v11114_v57  ;;  %v5982_v37 = vrot.slane %v9956_v46, %v11116_v26 }
 0xa72   :  { %v6021_v31 = vrot.slane %v5900_v6, %v11108_v51  ;;  %v5902_v49 = vpop.xlane.xlu1 %5901  ;;  %v10004_v6 = vld [vmem:[#allocation3 + $0xe] sm:$0x3]  ;;  %v5958_v25 = vsel %vm1488_vm5, %v5957_v30, %v5953_v39 }
 0xa73   :  { %v6026_v7 = vrot.slane %v5902_v49, %v11109_v60  ;;  %v10017_v40 = vrot.slane %v10004_v6, %v11122_v50 }
 0xa74   :  { %v6022_v8 = vsel %vm1467_vm2, %v6021_v31, %v6017_v20  ;;  %v5962_v31 = vrot.slane %v9936_v59, %v11112_v54  ;;  %v5967_v20 = vrot.slane %v9938_v1, %v11113_v42  ;;  %v5977_v1 = vrot.slane %v9948_v48, %v11115_v0 }
 0xa75   :  { %v5904_v3 = vpop.xlane.xlu0 %5903  ;;  %v6027_v49 = vsel %vm1474_vm3, %v6026_v7, %v6022_v8 }
 0xa76   :  { %v6031_v2 = vrot.slane %v5904_v3, %v11110_v13  ;;  %v5906_v43 = vpop.xlane.xlu1 %5905  ;;  %v5963_v59 = vsel %vm1495_vm6, %v5962_v31, %v5958_v25  ;;  %v5992_v25 = vrot.slane %v9966_v12, %v11118_v38 }
 0xa77   :  { %v6036_v9 = vrot.slane %v5906_v43, %v11111_v16  ;;  %v5968_v43 = vsel %vm1502_vm7, %v5967_v20, %v5963_v59 }
 0xa78   :  { %v6032_v34 = vsel %vm1481_vm4, %v6031_v2, %v6027_v49  ;;  %v5973_v49 = vsel %vm1509_vm8, %v5972_v63, %v5968_v43  ;;  %v5997_v63 = vrot.slane %v9968_v29, %v11119_v33 }
 0xa79   :  { %v5908_v15 = vpop.xlane.xlu0 %5907  ;;  %v6037_v7 = vsel %vm1488_vm5, %v6036_v9, %v6032_v34  ;;  %v5978_v48 = vsel %vm1516_vm9, %v5977_v1, %v5973_v49 }
 0xa7a   :  { %v6041_v32 = vrot.slane %v5908_v15, %v11112_v54  ;;  %v5910_v22 = vpop.xlane.xlu1 %5909  ;;  %v5987_v15 = vrot.slane %v9958_v62, %v11117_v24  ;;  %v5983_v46 = vsel %vm1523_vm10, %v5982_v37, %v5978_v48 }
 0xa7b   :  { %v6046_v28 = vrot.slane %v5910_v22, %v11113_v42 }
 0xa7c   :  { %v6042_v50 = vsel %vm1495_vm6, %v6041_v32, %v6037_v7  ;;  %v5988_v62 = vsel %vm1530_vm11, %v5987_v15, %v5983_v46 }
 0xa7d   :  { %6224 = vbcast.lane.b32.xlu1 %v10017_v40, 256  ;;  %v5912_v8 = vpop.xlane.xlu0 %5911  ;;  %v6047_v27 = vsel %vm1502_vm7, %v6046_v28, %v6042_v50  ;;  %v5993_v12 = vsel %vm1537_vm12, %v5992_v25, %v5988_v62 }
 0xa7e   :  { %v6051_v3 = vrot.slane %v5912_v8, %v11114_v57  ;;  %v5914_v2 = vpop.xlane.xlu1 %5913  ;;  %v5998_v29 = vsel %vm1544_vm13, %v5997_v63, %v5993_v12 }
 0xa7f   :  { %v6056_v30 = vrot.slane %v5914_v2, %v11115_v0 }
 0xa80   :  { %v6052_v9 = vsel %vm1509_vm8, %v6051_v3, %v6047_v27  ;;  %v6002_v3 = vrot.slane %v9976_v45, %v11120_v44  ;;  %v11138_v45 = vld [vmem:[#allocation53_spill] sm:$0xff] }
 0xa81   :  { %6232 = vbcast.lane.b32.xlu1 %v10017_v40, 272  ;;  %v5916_v39 = vpop.xlane.xlu0 %5915  ;;  %v6057_v32 = vsel %vm1516_vm9, %v6056_v30, %v6052_v9  ;;  %v6289_v9 = vrot.slane %v10004_v6, %v11138_v45 }
 0xa82   :  { %v6061_v31 = vrot.slane %v5916_v39, %v11116_v26  ;;  %v5918_v34 = vpop.xlane.xlu1 %5917  ;;  %6228 = vbcast.lane.b32.xlu0 %v10017_v40, 264  ;;  %v6003_v30 = vsel %vm1551_vm14, %v6002_v3, %v5998_v29 }
 0xa83   :  { %v6066_v22 = vrot.slane %v5918_v34, %v11117_v24 }
 0xa84   :  { %v6062_v20 = vsel %vm1523_vm10, %v6061_v31, %v6057_v32 }
 0xa85   :  { %6236 = vbcast.lane.b32.xlu1 %v10017_v40, 280  ;;  %v5920_v7 = vpop.xlane.xlu0 %5919  ;;  %v6067_v50 = vsel %vm1530_vm11, %v6066_v22, %v6062_v20 }
 0xa86   :  { %v6071_v28 = vrot.slane %v5920_v7, %v11118_v38  ;;  %v5922_v59 = vpop.xlane.xlu1 %5921  ;;  %6244 = vbcast.lane.b32.xlu0 %v10017_v40, 296 }
 0xa87   :  { %v6076_v8 = vrot.slane %v5922_v59, %v11119_v33 }
 0xa88   :  { %v6072_v2 = vsel %vm1537_vm12, %v6071_v28, %v6067_v50 }
 0xa89   :  { %6240 = vbcast.lane.b32.xlu1 %v10017_v40, 288  ;;  %v5924_v43 = vpop.xlane.xlu0 %5923  ;;  %v6077_v27 = vsel %vm1544_vm13, %v6076_v8, %v6072_v2  ;;  %v11139_v2 = vld [vmem:[#allocation25_spill] sm:$0xff] }
 0xa8a   :  { %v6081_v1 = vrot.slane %v5924_v43, %v11120_v44  ;;  %6252 = vbcast.lane.b32.xlu0 %v10017_v40, 312  ;;  %v11140_v43 = vld [vmem:[#allocation31_spill] sm:$0xff] }
 0xa8c   :  { %v6082_v49 = vsel %vm1551_vm14, %v6081_v1, %v6077_v27  ;;  %v11142_v27 = vld [vmem:[#allocation24_spill] sm:$0xff] }
 0xa8d   :  { %v6083_v37 = vsel %vm1632_vm15, %v6082_v49, %v6003_v30  ;;  %6248 = vbcast.lane.b32.xlu1 %v10017_v40, 304  ;;  %v11143_v30 = vld [vmem:[#allocation22_spill] sm:$0xff] }
 0xa8e   :  { %6085 = vst [vmem:[#allocation11 + $0xc] sm:$0x3] %v6083_v37  ;;  %6260 = vbcast.lane.b32.xlu0 %v10017_v40, 328 }
 0xa91   :  { %6256 = vbcast.lane.b32.xlu1 %v10017_v40, 320 }
 0xa92   :  { %6268 = vbcast.lane.b32.xlu0 %v10017_v40, 344 }
 0xa95   :  { %6264 = vbcast.lane.b32.xlu1 %v10017_v40, 336 }
 0xa96   :  { %6276 = vbcast.lane.b32.xlu0 %v10017_v40, 360 }
 0xa99   :  { %6272 = vbcast.lane.b32.xlu1 %v10017_v40, 352 }
 0xa9a   :  { %6284 = vbcast.lane.b32.xlu0 %v10017_v40, 376 }
 0xa9d   :  { %6280 = vbcast.lane.b32.xlu1 %v10017_v40, 368 }
 0xa9e   :  { %6295 = vbcast.lane.b32.xlu0 %v6289_v9, 264 }
 0xaa1   :  { %6291 = vbcast.lane.b32.xlu1 %v6289_v9, 256 }
 0xaa2   :  { %6303 = vbcast.lane.b32.xlu0 %v6289_v9, 280 }
 0xaa5   :  { %6299 = vbcast.lane.b32.xlu1 %v6289_v9, 272 }
 0xaa6   :  { %6311 = vbcast.lane.b32.xlu0 %v6289_v9, 296 }
 0xaa9   :  { %6307 = vbcast.lane.b32.xlu1 %v6289_v9, 288 }
 0xaaa   :  { %6319 = vbcast.lane.b32.xlu0 %v6289_v9, 312 }
 0xaad   :  { %6315 = vbcast.lane.b32.xlu1 %v6289_v9, 304 }
 0xaae   :  { %6327 = vbcast.lane.b32.xlu0 %v6289_v9, 328 }
 0xab1   :  { %6323 = vbcast.lane.b32.xlu1 %v6289_v9, 320 }
 0xab2   :  { %6335 = vbcast.lane.b32.xlu0 %v6289_v9, 344 }
 0xab5   :  { %6331 = vbcast.lane.b32.xlu1 %v6289_v9, 336 }
 0xab6   :  { %6343 = vbcast.lane.b32.xlu0 %v6289_v9, 360 }
 0xab9   :  { %6339 = vbcast.lane.b32.xlu1 %v6289_v9, 352 }
 0xaba   :  { %6351 = vbcast.lane.b32.xlu0 %v6289_v9, 376 }
 0xabd   :  { %v10083_v39 = vpop.xlane.xlu1 %6152  ;;  %6347 = vbcast.lane.b32.xlu1 %v6289_v9, 368  ;;  %v10085_v6 = vpop.xlane.xlu0 %6154 }
 0xac1   :  { %v10087_v40 = vpop.xlane.xlu1 %6156  ;;  %v10089_v31 = vpop.xlane.xlu0 %6158 }
 0xac5   :  { %v10091_v34 = vpop.xlane.xlu1 %6160  ;;  %v10093_v48 = vpop.xlane.xlu0 %6162 }
 0xac9   :  { %v10095_v15 = vpop.xlane.xlu1 %6164  ;;  %v10097_v32 = vpop.xlane.xlu0 %6166 }
 0xacd   :  { %v10099_v22 = vpop.xlane.xlu1 %6168  ;;  %v10101_v46 = vpop.xlane.xlu0 %6170 }
 0xad1   :  { %v10103_v25 = vpop.xlane.xlu1 %6172  ;;  %v10105_v20 = vpop.xlane.xlu0 %6174 }
 0xad5   :  { %v10107_v7 = vpop.xlane.xlu1 %6176  ;;  %v10109_v28 = vpop.xlane.xlu0 %6178 }
 0xad9   :  { %v10111_v59 = vpop.xlane.xlu1 %6180  ;;  %6706 = vmax.index.xlane.f32.xlu0 %v9864_v52  ;;  %v10114_v62 = vpop.xlane.xlu0 %6182 }
 0xadd   :  { %v10116_v63 = vpop.xlane.xlu1 %6184  ;;  %6738 = vmax.index.xlane.f32.xlu0 %v9914_v11  ;;  %v10119_v50 = vpop.xlane.xlu0 %6186 }
 0xae1   :  { %6708 = vmax.index.xlane.f32.xlu1 %v9862_v35  ;;  %v10122_v8 = vpop.xlane.xlu1 %6188  ;;  %6740 = vmax.index.xlane.f32.xlu0 %v9912_v58  ;;  %v10125_v12 = vpop.xlane.xlu0 %6190 }
 0xae5   :  { %6742 = vmax.index.xlane.f32.xlu1 %v9922_v4  ;;  %v10128_v3 = vpop.xlane.xlu1 %6192  ;;  %6710 = vmax.index.xlane.f32.xlu0 %v9870_v21  ;;  %v10131_v52 = vpop.xlane.xlu0 %6194 }
 0xae9   :  { %6744 = vmax.index.xlane.f32.xlu1 %v9920_v23  ;;  %v10134_v11 = vpop.xlane.xlu1 %6196  ;;  %6712 = vmax.index.xlane.f32.xlu0 %v9868_v47  ;;  %v10137_v35 = vpop.xlane.xlu0 %6198 }
 0xaed   :  { %6746 = vmax.index.xlane.f32.xlu1 %v9932_v10  ;;  %v10140_v58 = vpop.xlane.xlu1 %6200  ;;  %6714 = vmax.index.xlane.f32.xlu0 %v9876_v14  ;;  %v10143_v4 = vpop.xlane.xlu0 %6202 }
 0xaf1   :  { %6748 = vmax.index.xlane.f32.xlu1 %v9930_v19  ;;  %v10146_v21 = vpop.xlane.xlu1 %6204  ;;  %6716 = vmax.index.xlane.f32.xlu0 %v9874_v61  ;;  %v10149_v23 = vpop.xlane.xlu0 %6206 }
 0xaf5   :  { %6750 = vmax.index.xlane.f32.xlu1 %v9942_v56  ;;  %v10152_v47 = vpop.xlane.xlu1 %6208  ;;  %6718 = vmax.index.xlane.f32.xlu0 %v9882_v36  ;;  %v10155_v10 = vpop.xlane.xlu0 %6210  ;;  %v11141_v36 = vld [vmem:[#allocation23_spill] sm:$0xff] }
 0xaf9   :  { %6752 = vmax.index.xlane.f32.xlu1 %v9940_v41  ;;  %v10158_v14 = vpop.xlane.xlu1 %6212  ;;  %6720 = vmax.index.xlane.f32.xlu0 %v9880_v17  ;;  %v10161_v19 = vpop.xlane.xlu0 %6214  ;;  %v11144_v17 = vld [vmem:[#allocation33_spill] sm:$0xff] }
 0xafd   :  { %6754 = vmax.index.xlane.f32.xlu1 %v9952_v5  ;;  %v6225_v61 = vpop.permute.xlu1 %6224  ;;  %6722 = vmax.index.xlane.f32.xlu0 %v11139_v2  ;;  %v6229_v56 = vpop.permute.xlu0 %6228 }
 0xafe   :  { %v6386_v33 = vadd.f32 %v6229_v56, %v10085_v6 }
 0xb01   :  { %6756 = vmax.index.xlane.f32.xlu1 %v11140_v43  ;;  %v6233_v1 = vpop.permute.xlu1 %6232  ;;  %6724 = vmax.index.xlane.f32.xlu0 %v11141_v36  ;;  %v6245_v29 = vpop.permute.xlu0 %6244  ;;  %v6385_v43 = vadd.f32 %v6225_v61, %v10083_v39 }
 0xb02   :  { %v6390_v24 = vadd.f32 %v6245_v29, %v10093_v48 }
 0xb05   :  { %6726 = vmax.index.xlane.f32.xlu1 %v11142_v27  ;;  %v6237_v41 = vpop.permute.xlu1 %6236  ;;  %6728 = vmax.index.xlane.f32.xlu0 %v11143_v30  ;;  %v6253_v37 = vpop.permute.xlu0 %6252  ;;  %v6387_v27 = vadd.f32 %v6233_v1, %v10087_v40 }
 0xb06   :  { %v6388_v30 = vadd.f32 %v6237_v41, %v10089_v31  ;;  %v6392_v6 = vadd.f32 %v6253_v37, %v10097_v32 }
 0xb09   :  { %6758 = vmax.index.xlane.f32.xlu1 %v11144_v17  ;;  %v6241_v49 = vpop.permute.xlu1 %6240  ;;  %v6261_v45 = vpop.permute.xlu0 %6260 }
 0xb0a   :  { %v6389_v17 = vadd.f32 %v6241_v49, %v10091_v34  ;;  %v6394_v61 = vadd.f32 %v6261_v45, %v10101_v46 }
 0xb0d   :  { %v6249_v5 = vpop.permute.xlu1 %6248  ;;  %v6269_v44 = vpop.permute.xlu0 %6268 }
 0xb0e   :  { %v6391_v39 = vadd.f32 %v6249_v5, %v10095_v15  ;;  %v6396_v48 = vadd.f32 %v6269_v44, %v10105_v20 }
 0xb11   :  { %v6257_v9 = vpop.permute.xlu1 %6256  ;;  %v6277_v38 = vpop.permute.xlu0 %6276 }
 0xb12   :  { %v6393_v40 = vadd.f32 %v6257_v9, %v10099_v22  ;;  %v6398_v32 = vadd.f32 %v6277_v38, %v10109_v28 }
 0xb15   :  { %v6265_v2 = vpop.permute.xlu1 %6264  ;;  %v6285_v0 = vpop.permute.xlu0 %6284 }
 0xb16   :  { %v6395_v34 = vadd.f32 %v6265_v2, %v10103_v25  ;;  %v6400_v29 = vadd.f32 %v6285_v0, %v10114_v62 }
 0xb19   :  { %v6273_v36 = vpop.permute.xlu1 %6272  ;;  %v6296_v31 = vpop.permute.xlu0 %6295 }
 0xb1a   :  { %6450 = vperm.xlu1 %6997, %v6385_v43   ;;  %v6397_v15 = vadd.f32 %v6273_v36, %v10107_v7  ;;  %v6402_v25 = vadd.f32 %v6296_v31, %v10119_v50 }
 0xb1b   :  { %6453 = vperm.xlu0 %6996, %v6386_v33  }
 0xb1d   :  { %v6281_v26 = vpop.permute.xlu1 %6280 }
 0xb1e   :  { %6456 = vperm.xlu1 %6997, %v6387_v27   ;;  %v6399_v22 = vadd.f32 %v6281_v26, %v10111_v59 }
 0xb1f   :  { %6459 = vperm.xlu0 %6996, %v6388_v30  }
 0xb21   :  { %v6292_v33 = vpop.permute.xlu1 %6291 }
 0xb22   :  { %6462 = vperm.xlu1 %6997, %v6389_v17   ;;  %v6401_v44 = vadd.f32 %v6292_v33, %v10116_v63 }
 0xb23   :  { %6465 = vperm.xlu0 %6996, %v6390_v24   ;;  %v6304_v24 = vpop.permute.xlu0 %6303 }
 0xb24   :  { %v6404_v7 = vadd.f32 %v6304_v24, %v10125_v12 }
 0xb25   :  { %v6300_v56 = vpop.permute.xlu1 %6299 }
 0xb26   :  { %6468 = vperm.xlu1 %6997, %v6391_v39   ;;  %v6403_v38 = vadd.f32 %v6300_v56, %v10122_v8 }
 0xb27   :  { %6471 = vperm.xlu0 %6996, %v6392_v6   ;;  %v6312_v46 = vpop.permute.xlu0 %6311 }
 0xb28   :  { %v6406_v59 = vadd.f32 %v6312_v46, %v10131_v52 }
 0xb29   :  { %v6308_v1 = vpop.permute.xlu1 %6307 }
 0xb2a   :  { %6474 = vperm.xlu1 %6997, %v6393_v40   ;;  %v6405_v26 = vadd.f32 %v6308_v1, %v10128_v3 }
 0xb2b   :  { %6477 = vperm.xlu0 %6996, %v6394_v61   ;;  %v6320_v41 = vpop.permute.xlu0 %6319  ;;  %v11145_v61 = vld [vmem:[#allocation28_spill] sm:$0xff] }
 0xb2c   :  { %v6408_v63 = vadd.f32 %v6320_v41, %v10137_v35 }
 0xb2d   :  { %v6316_v20 = vpop.permute.xlu1 %6315 }
 0xb2e   :  { %6480 = vperm.xlu1 %6997, %v6395_v34   ;;  %v6407_v62 = vadd.f32 %v6316_v20, %v10134_v11  ;;  %v11147_v20 = vld [vmem:[#allocation26_spill] sm:$0xff] }
 0xb2f   :  { %6483 = vperm.xlu0 %6996, %v6396_v48   ;;  %v6328_v0 = vpop.permute.xlu0 %6327 }
 0xb30   :  { %v6410_v12 = vadd.f32 %v6328_v0, %v10143_v4 }
 0xb31   :  { %v6324_v28 = vpop.permute.xlu1 %6323 }
 0xb32   :  { %6486 = vperm.xlu1 %6997, %v6397_v15   ;;  %v6409_v8 = vadd.f32 %v6324_v28, %v10140_v58 }
 0xb33   :  { %6489 = vperm.xlu0 %6996, %v6398_v32   ;;  %v6336_v49 = vpop.permute.xlu0 %6335  ;;  %v11146_v32 = vld [vmem:[#allocation30_spill] sm:$0xff] }
 0xb34   :  { %v6412_v5 = vadd.f32 %v6336_v49, %v10149_v23 }
 0xb35   :  { %v6332_v50 = vpop.permute.xlu1 %6331 }
 0xb36   :  { %6492 = vperm.xlu1 %6997, %v6399_v22   ;;  %v6411_v52 = vadd.f32 %v6332_v50, %v10146_v21 }
 0xb37   :  { %6495 = vperm.xlu0 %6996, %v6400_v29   ;;  %v6344_v3 = vpop.permute.xlu0 %6343 }
 0xb38   :  { %v6414_v35 = vadd.f32 %v6344_v3, %v10155_v10 }
 0xb39   :  { %v6340_v37 = vpop.permute.xlu1 %6339 }
 0xb3a   :  { %6498 = vperm.xlu1 %6997, %v6401_v44   ;;  %v6413_v11 = vadd.f32 %v6340_v37, %v10152_v47  ;;  %v11149_v37 = vld [vmem:[#allocation27_spill] sm:$0xff] }
 0xb3b   :  { %6501 = vperm.xlu0 %6996, %v6402_v25   ;;  %v6352_v9 = vpop.permute.xlu0 %6351 }
 0xb3c   :  { %v6416_v4 = vadd.f32 %v6352_v9, %v10161_v19  ;;  %v11150_v9 = vld [vmem:[#allocation32_spill] sm:$0xff] }
 0xb3d   :  { %v6348_v45 = vpop.permute.xlu1 %6347 }
 0xb3e   :  { %6504 = vperm.xlu1 %6997, %v6403_v38   ;;  %v6415_v58 = vadd.f32 %v6348_v45, %v10158_v14 }
 0xb3f   :  { %6507 = vperm.xlu0 %6996, %v6404_v7  }
 0xb42   :  { %6510 = vperm.xlu1 %6997, %v6405_v26  }
 0xb43   :  { %6513 = vperm.xlu0 %6996, %v6406_v59   ;;  %v11148_v59 = vld [vmem:[#allocation35_spill] sm:$0xff] }
 0xb46   :  { %6516 = vperm.xlu1 %6997, %v6407_v62  }
 0xb47   :  { %6519 = vperm.xlu0 %6996, %v6408_v63  }
 0xb4a   :  { %6522 = vperm.xlu1 %6997, %v6409_v8  }
 0xb4b   :  { %6525 = vperm.xlu0 %6996, %v6410_v12  }
 0xb4e   :  { %6528 = vperm.xlu1 %6997, %v6411_v52  }
 0xb4f   :  { %6531 = vperm.xlu0 %6996, %v6412_v5  }
 0xb52   :  { %6534 = vperm.xlu1 %6997, %v6413_v11  }
 0xb53   :  { %6537 = vperm.xlu0 %6996, %v6414_v35  }
 0xb56   :  { %6540 = vperm.xlu1 %6997, %v6415_v58  }
 0xb57   :  { %6543 = vperm.xlu0 %6996, %v6416_v4  }
 0xb66   :  { %v6707_v2 = vpop.xlane.xlu0 %6706 }
 0xb67   :  { %v6773_v36 = vrot.slane %v6707_v2, %v11105_v18 }
 0xb6a   :  { %v6739_v21 = vpop.xlane.xlu0 %6738 }
 0xb6b   :  { %v6852_v47 = vrot.slane %v6739_v21, %v11105_v18 }
 0xb6e   :  { %v6709_v43 = vpop.xlane.xlu1 %6708  ;;  %v6741_v23 = vpop.xlane.xlu0 %6740 }
 0xb6f   :  { %v6777_v10 = vrot.slane %v6709_v43, %v11106_v55  ;;  %v6856_v27 = vrot.slane %v6741_v23, %v11106_v55 }
 0xb71   :  { %v6778_v30 = vsel %vm1453_vm0, %v6777_v10, %v6773_v36  ;;  %v6857_v14 = vsel %vm1453_vm0, %v6856_v27, %v6852_v47  ;;  %v11151_v36 = vld [vmem:[#allocation37_spill] sm:$0xff] }
 0xb72   :  { %v6743_v17 = vpop.xlane.xlu1 %6742  ;;  %v6711_v19 = vpop.xlane.xlu0 %6710 }
 0xb73   :  { %v6861_v39 = vrot.slane %v6743_v17, %v11107_v53  ;;  %v6782_v6 = vrot.slane %v6711_v19, %v11107_v53  ;;  %v11152_v19 = vld [vmem:[#allocation29_spill] sm:$0xff] }
 0xb75   :  { %v6862_v33 = vsel %vm1460_vm1, %v6861_v39, %v6857_v14  ;;  %v6783_v40 = vsel %vm1460_vm1, %v6782_v6, %v6778_v30 }
 0xb76   :  { %v6745_v31 = vpop.xlane.xlu1 %6744  ;;  %6734 = vmax.index.xlane.f32.xlu0 %v11145_v61  ;;  %v6713_v34 = vpop.xlane.xlu0 %6712 }
 0xb77   :  { %v6866_v48 = vrot.slane %v6745_v31, %v11108_v51  ;;  %v6787_v56 = vrot.slane %v6713_v34, %v11108_v51  ;;  %v11154_v31 = vld [vmem:[#allocation47_spill] sm:$0xff] }
 0xb79   :  { %v6867_v24 = vsel %vm1467_vm2, %v6866_v48, %v6862_v33  ;;  %v6788_v15 = vsel %vm1467_vm2, %v6787_v56, %v6783_v40  ;;  %v11153_v33 = vld [vmem:[#allocation50_spill] sm:$0xff] }
 0xb7a   :  { %6760 = vmax.index.xlane.f32.xlu1 %v11146_v32  ;;  %v6747_v1 = vpop.xlane.xlu1 %6746  ;;  %v6715_v22 = vpop.xlane.xlu0 %6714  ;;  %v11155_v56 = vld [vmem:[#allocation34_spill] sm:$0xff] }
 0xb7b   :  { %v6871_v46 = vrot.slane %v6747_v1, %v11109_v60  ;;  %v6792_v29 = vrot.slane %v6715_v22, %v11109_v60 }
 0xb7d   :  { %v6872_v44 = vsel %vm1474_vm3, %v6871_v46, %v6867_v24  ;;  %v6793_v25 = vsel %vm1474_vm3, %v6792_v29, %v6788_v15 }
 0xb7e   :  { %6730 = vmax.index.xlane.f32.xlu1 %v11147_v20  ;;  %v6749_v41 = vpop.xlane.xlu1 %6748  ;;  %v6717_v38 = vpop.xlane.xlu0 %6716 }
 0xb7f   :  { %v6876_v7 = vrot.slane %v6749_v41, %v11110_v13  ;;  %v6797_v28 = vrot.slane %v6717_v38, %v11110_v13 }
 0xb81   :  { %v6877_v26 = vsel %vm1481_vm4, %v6876_v7, %v6872_v44  ;;  %v6798_v0 = vsel %vm1481_vm4, %v6797_v28, %v6793_v25 }
 0xb82   :  { %6762 = vmax.index.xlane.f32.xlu1 %v11148_v59  ;;  %v6751_v62 = vpop.xlane.xlu1 %6750  ;;  %v6719_v63 = vpop.xlane.xlu0 %6718 }
 0xb83   :  { %v6881_v50 = vrot.slane %v6751_v62, %v11111_v16  ;;  %v6802_v49 = vrot.slane %v6719_v63, %v11111_v16 }
 0xb85   :  { %v6882_v8 = vsel %vm1488_vm5, %v6881_v50, %v6877_v26  ;;  %v6803_v12 = vsel %vm1488_vm5, %v6802_v49, %v6798_v0 }
 0xb86   :  { %6732 = vmax.index.xlane.f32.xlu1 %v11149_v37  ;;  %v6753_v3 = vpop.xlane.xlu1 %6752  ;;  %v6721_v52 = vpop.xlane.xlu0 %6720 }
 0xb87   :  { %v6886_v5 = vrot.slane %v6753_v3, %v11112_v54  ;;  %v6807_v11 = vrot.slane %v6721_v52, %v11112_v54 }
 0xb89   :  { %v6887_v35 = vsel %vm1495_vm6, %v6886_v5, %v6882_v8  ;;  %v6808_v45 = vsel %vm1495_vm6, %v6807_v11, %v6803_v12 }
 0xb8a   :  { %6764 = vmax.index.xlane.f32.xlu1 %v11150_v9  ;;  %v6755_v58 = vpop.xlane.xlu1 %6754  ;;  %v6723_v4 = vpop.xlane.xlu0 %6722 }
 0xb8b   :  { %v6891_v2 = vrot.slane %v6755_v58, %v11113_v42  ;;  %v6812_v21 = vrot.slane %v6723_v4, %v11113_v42 }
 0xb8d   :  { %v6892_v43 = vsel %vm1502_vm7, %v6891_v2, %v6887_v35  ;;  %v6813_v23 = vsel %vm1502_vm7, %v6812_v21, %v6808_v45 }
 0xb8e   :  { %6766 = vmax.index.xlane.f32.xlu1 %v11151_v36  ;;  %v6757_v47 = vpop.xlane.xlu1 %6756  ;;  %v6725_v10 = vpop.xlane.xlu0 %6724 }
 0xb8f   :  { %v6896_v27 = vrot.slane %v6757_v47, %v11114_v57  ;;  %v6817_v30 = vrot.slane %v6725_v10, %v11114_v57 }
 0xb91   :  { %v6897_v14 = vsel %vm1509_vm8, %v6896_v27, %v6892_v43  ;;  %v6818_v17 = vsel %vm1509_vm8, %v6817_v30, %v6813_v23 }
 0xb92   :  { %6736 = vmax.index.xlane.f32.xlu1 %v11152_v19  ;;  %v6727_v39 = vpop.xlane.xlu1 %6726  ;;  %v6729_v6 = vpop.xlane.xlu0 %6728 }
 0xb93   :  { %v6822_v40 = vrot.slane %v6727_v39, %v11153_v33  ;;  %v6827_v61 = vrot.slane %v6729_v6, %v11154_v31 }
 0xb95   :  { %v6823_v34 = vsel %vm1516_vm9, %v6822_v40, %v6818_v17 }
 0xb96   :  { %v10252_v48 = vsel %vm1523_vm10, %v6827_v61, %v6823_v34  ;;  %6768 = vmax.index.xlane.f32.xlu1 %v11155_v56  ;;  %v6759_v24 = vpop.xlane.xlu1 %6758 }
 0xb97   :  { %v6901_v15 = vrot.slane %v6759_v24, %v11153_v33 }
 0xb99   :  { %v10257_v32 = vsel %vm1516_vm9, %v6901_v15, %v6897_v14 }
 0xb9a   :  { %v6451_v1 = vpop.permute.xlu1 %6450  ;;  %v6454_v22 = vpop.permute.xlu0 %6453 }
 0xb9b   :  { %v6548_v50 = vrot.slane %v6451_v1, %v11105_v18  ;;  %v6552_v49 = vrot.slane %v6454_v22, %v11106_v55 }
 0xb9d   :  { %v6553_v5 = vsel %vm1453_vm0, %v6552_v49, %v6548_v50  ;;  %v11156_v50 = vld [vmem:[#allocation52_spill] sm:$0xff] }
 0xb9e   :  { %v6457_v46 = vpop.permute.xlu1 %6456  ;;  %v6460_v29 = vpop.permute.xlu0 %6459 }
 0xb9f   :  { %v6557_v37 = vrot.slane %v6457_v46, %v11107_v53  ;;  %v6562_v11 = vrot.slane %v6460_v29, %v11108_v51 }
 0xba1   :  { %v6558_v9 = vsel %vm1460_vm1, %v6557_v37, %v6553_v5  ;;  %v11157_v37 = vld [vmem:[#allocation49_spill] sm:$0xff] }
 0xba2   :  { %v6463_v44 = vpop.permute.xlu1 %6462  ;;  %v6466_v25 = vpop.permute.xlu0 %6465 }
 0xba3   :  { %v6567_v58 = vrot.slane %v6463_v44, %v11109_v60  ;;  %v6572_v43 = vrot.slane %v6466_v25, %v11110_v13 }
 0xba6   :  { %v6469_v20 = vpop.permute.xlu1 %6468  ;;  %v6472_v41 = vpop.permute.xlu0 %6471 }
 0xba7   :  { %v6577_v10 = vrot.slane %v6469_v20, %v11111_v16  ;;  %v6582_v17 = vrot.slane %v6472_v41, %v11112_v54 }
 0xbaa   :  { %v6475_v38 = vpop.permute.xlu1 %6474  ;;  %v6478_v7 = vpop.permute.xlu0 %6477 }
 0xbab   :  { %v6587_v40 = vrot.slane %v6475_v38, %v11113_v42  ;;  %v6592_v24 = vrot.slane %v6478_v7, %v11114_v57 }
 0xbae   :  { %v6481_v28 = vpop.permute.xlu1 %6480  ;;  %v10259_v26 = vpop.permute.xlu0 %6483 }
 0xbaf   :  { %v6597_v46 = vrot.slane %v6481_v28, %v11153_v33  ;;  %v6602_v20 = vrot.slane %v10259_v26, %v11154_v31 }
 0xbb2   :  { %v10261_v0 = vpop.permute.xlu1 %6486  ;;  %v10263_v59 = vpop.permute.xlu0 %6489 }
 0xbb3   :  { %v6607_v28 = vrot.slane %v10261_v0, %v11156_v50  ;;  %v6612_v26 = vrot.slane %v10263_v59, %v11157_v37 }
 0xbb6   :  { %v10265_v62 = vpop.permute.xlu1 %6492  ;;  %v10267_v63 = vpop.permute.xlu0 %6495 }
 0xbba   :  { %v6499_v8 = vpop.permute.xlu1 %6498  ;;  %v6502_v12 = vpop.permute.xlu0 %6501 }
 0xbbb   :  { %v6627_v3 = vrot.slane %v6499_v8, %v11105_v18  ;;  %v6631_v52 = vrot.slane %v6502_v12, %v11106_v55  ;;  %v6563_v55 = vsel %vm1467_vm2, %v6562_v11, %v6558_v9  ;;  %v11158_v11 = vld [vmem:[#allocation51_spill] sm:$0xff] }
 0xbbc   :  { %v6568_v47 = vsel %vm1474_vm3, %v6567_v58, %v6563_v55  ;;  %v6617_v0 = vrot.slane %v10265_v62, %v11158_v11 }
 0xbbd   :  { %v6632_v2 = vsel %vm1453_vm0, %v6631_v52, %v6627_v3  ;;  %v6573_v14 = vsel %vm1481_vm4, %v6572_v43, %v6568_v47 }
 0xbbe   :  { %v6505_v35 = vpop.permute.xlu1 %6504  ;;  %v6508_v45 = vpop.permute.xlu0 %6507  ;;  %v6578_v6 = vsel %vm1488_vm5, %v6577_v10, %v6573_v14 }
 0xbbf   :  { %v6636_v4 = vrot.slane %v6505_v35, %v11107_v53  ;;  %v6641_v21 = vrot.slane %v6508_v45, %v11108_v51  ;;  %v6583_v56 = vsel %vm1495_vm6, %v6582_v17, %v6578_v6 }
 0xbc0   :  { %v6588_v22 = vsel %vm1502_vm7, %v6587_v40, %v6583_v56 }
 0xbc1   :  { %v6637_v18 = vsel %vm1460_vm1, %v6636_v4, %v6632_v2  ;;  %v6593_v25 = vsel %vm1509_vm8, %v6592_v24, %v6588_v22  ;;  %v11159_v4 = vld [vmem:[#allocation19_spill] sm:$0xff] }
 0xbc2   :  { %v6511_v23 = vpop.permute.xlu1 %6510  ;;  %v6514_v36 = vpop.permute.xlu0 %6513  ;;  %v6642_v53 = vsel %vm1467_vm2, %v6641_v21, %v6637_v18  ;;  %v6598_v7 = vsel %vm1516_vm9, %v6597_v46, %v6593_v25  ;;  %v6622_v59 = vrot.slane %v10267_v63, %v11159_v4  ;;  %v6983_v63 = vld [vmem:[#allocation9] ss:$0 sm:$0xff] }
 0xbc3   :  { %v6646_v27 = vrot.slane %v6511_v23, %v11109_v60  ;;  %v6651_v30 = vrot.slane %v6514_v36, %v11110_v13  ;;  %v6603_v12 = vsel %vm1523_vm10, %v6602_v20, %v6598_v7 }
 0xbc4   :  { %v6608_v5 = vsel %vm1530_vm11, %v6607_v28, %v6603_v12 }
 0xbc5   :  { %v6647_v51 = vsel %vm1474_vm3, %v6646_v27, %v6642_v53  ;;  %v6613_v58 = vsel %vm1537_vm12, %v6612_v26, %v6608_v5 }
 0xbc6   :  { %v6517_v19 = vpop.permute.xlu1 %6516  ;;  %v6520_v39 = vpop.permute.xlu0 %6519  ;;  %v6652_v60 = vsel %vm1481_vm4, %v6651_v30, %v6647_v51  ;;  %v6618_v18 = vsel %vm1544_vm13, %v6617_v0, %v6613_v58 }
 0xbc7   :  { %v6656_v61 = vrot.slane %v6517_v19, %v11111_v16  ;;  %v6661_v34 = vrot.slane %v6520_v39, %v11112_v54  ;;  %v6623_v36 = vsel %vm1551_vm14, %v6622_v59, %v6618_v18 }
 0xbc9   :  { %v6657_v13 = vsel %vm1488_vm5, %v6656_v61, %v6652_v60 }
 0xbca   :  { %v6523_v15 = vpop.permute.xlu1 %6522  ;;  %v6526_v1 = vpop.permute.xlu0 %6525  ;;  %v6662_v16 = vsel %vm1495_vm6, %v6661_v34, %v6657_v13 }
 0xbcb   :  { %v6666_v29 = vrot.slane %v6523_v15, %v11113_v42  ;;  %v6671_v44 = vrot.slane %v6526_v1, %v11114_v57 }
 0xbcd   :  { %v6667_v54 = vsel %vm1502_vm7, %v6666_v29, %v6662_v16 }
 0xbce   :  { %v6529_v41 = vpop.permute.xlu1 %6528  ;;  %v6532_v38 = vpop.permute.xlu0 %6531  ;;  %v6672_v49 = vsel %vm1509_vm8, %v6671_v44, %v6667_v54 }
 0xbcf   :  { %v6676_v42 = vrot.slane %v6529_v41, %v11153_v33  ;;  %v6681_v57 = vrot.slane %v6532_v38, %v11154_v31 }
 0xbd1   :  { %v6677_v8 = vsel %vm1516_vm9, %v6676_v42, %v6672_v49 }
 0xbd2   :  { %v6535_v3 = vpop.permute.xlu1 %6534  ;;  %v6538_v52 = vpop.permute.xlu0 %6537  ;;  %v6682_v35 = vsel %vm1523_vm10, %v6681_v57, %v6677_v8 }
 0xbd3   :  { %v6686_v33 = vrot.slane %v6535_v3, %v11156_v50  ;;  %v6691_v45 = vrot.slane %v6538_v52, %v11157_v37 }
 0xbd5   :  { %v6687_v9 = vsel %vm1530_vm11, %v6686_v33, %v6682_v35 }
 0xbd6   :  { %v6541_v2 = vpop.permute.xlu1 %6540  ;;  %v6544_v21 = vpop.permute.xlu0 %6543  ;;  %v6692_v43 = vsel %vm1537_vm12, %v6691_v45, %v6687_v9 }
 0xbd7   :  { %v6696_v55 = vrot.slane %v6541_v2, %v11158_v11  ;;  %v6701_v62 = vrot.slane %v6544_v21, %v11159_v4 }
 0xbd9   :  { %v6697_v23 = vsel %vm1544_vm13, %v6696_v55, %v6692_v43 }
 0xbda   :  { %v6702_v47 = vsel %vm1551_vm14, %v6701_v62, %v6697_v23 }
 0xbdb   :  { %v6703_v10 = vsel %vm1632_vm15, %v6702_v47, %v6623_v36 }
 0xbdc   :  { %6705 = vst [vmem:[#allocation2] sm:$0x3] %v6703_v10 }
 0xbe3   :  { %v6931_v27 = vld [vmem:[#allocation2] sm:$0x3] }
 0xbe4   :  { %v6939_v53 = vadd.f32 %v6983_v63, %v6931_v27 }
 0xbe6   :  { %6940 = vst [vmem:[#allocation12] sm:$0x3] %v6939_v53 }
 0xbe7   :  { %7145 = shalt.err (!%p7142_p8)
}
 0xbe8   :  { %s7146_s24 = scalar_lea.hbm %s10390_s5, 32 }
 0xbe9   :  { %p7147_p9 = scmp.ne.s32.totalorder %s10390_s5, %s7146_s24  ;;  %p7150_p10 = scmp.lt.u32.totalorder %s7146_s24, %s10390_s5 }
 0xbeb   :  { %p7152_p11 = pnand %p7150_p10, %p7147_p9 }
 0xbed   :  { %7155 = shalt.err (!%p7152_p11)
}
 0xbee   :  { %6962 = dma.vmem_to_hbm [thread:$0]  %s6960_s20, 32, %s10390_s5, [#allocation13]  }
 0xbef   :  { %s7199_s5 = smov [#allocation11]  }
 0xbf0   :  { %s6946_s0 = sshll.u32 %s7199_s5, 4  ;;  %s6947_s0 = int_to_ptr.vmem [resolvable:$true] %s6946_s0 }
 0xbf1   :  { %s7156_s6 = scalar_lea.vmem %s6947_s0, 256  ;;  %p7161_p13 = scmp.lt.s32.totalorder %s6947_s0, %s6947_s0 }
 0xbf2   :  { %p7157_p12 = scmp.ne.s32.totalorder %s6947_s0, %s7156_s6  ;;  %p7162_p0 = scmp.lt.s32.totalorder %s7156_s6, %s7156_s6 }
 0xbf4   :  { %p7163_p1 = por %p7162_p0, %p7161_p13 }
 0xbf6   :  { %p7164_p2 = pnand %p7163_p1, %p7157_p12 }
 0xc03   :  { %v6735_v13 = vpop.xlane.xlu0 %6734 }
 0xc04   :  { %v6842_v46 = vrot.slane %v6735_v13, %v11158_v11 }
 0xc07   :  { %v6761_v30 = vpop.xlane.xlu1 %6760 }
 0xc08   :  { %v6906_v40 = vrot.slane %v6761_v30, %v11154_v31 }
 0xc0a   :  { %v6907_v1 = vsel %vm1523_vm10, %v6906_v40, %v10257_v32 }
 0xc0b   :  { %v6731_v51 = vpop.xlane.xlu1 %6730 }
 0xc0c   :  { %v6832_v6 = vrot.slane %v6731_v51, %v11156_v50 }
 0xc0e   :  { %v6833_v24 = vsel %vm1530_vm11, %v6832_v6, %v10252_v48 }
 0xc0f   :  { %v6763_v14 = vpop.xlane.xlu1 %6762 }
 0xc10   :  { %v6911_v60 = vrot.slane %v6763_v14, %v11156_v50 }
 0xc12   :  { %v6912_v29 = vsel %vm1530_vm11, %v6911_v60, %v6907_v1 }
 0xc13   :  { %v6733_v17 = vpop.xlane.xlu1 %6732 }
 0xc14   :  { %v6837_v61 = vrot.slane %v6733_v17, %v11157_v37 }
 0xc16   :  { %v6838_v22 = vsel %vm1537_vm12, %v6837_v61, %v6833_v24 }
 0xc17   :  { %v6765_v19 = vpop.xlane.xlu1 %6764  ;;  %v6843_v25 = vsel %vm1544_vm13, %v6842_v46, %v6838_v22 }
 0xc18   :  { %v6916_v56 = vrot.slane %v6765_v19, %v11157_v37 }
 0xc1a   :  { %v6917_v44 = vsel %vm1537_vm12, %v6916_v56, %v6912_v29 }
 0xc1b   :  { %v6767_v39 = vpop.xlane.xlu1 %6766 }
 0xc1c   :  { %v6921_v15 = vrot.slane %v6767_v39, %v11158_v11 }
 0xc1e   :  { %v6922_v54 = vsel %vm1544_vm13, %v6921_v15, %v6917_v44 }
 0xc1f   :  { %v6737_v34 = vpop.xlane.xlu1 %6736 }
 0xc20   :  { %v6847_v31 = vrot.slane %v6737_v34, %v11159_v4 }
 0xc22   :  { %v6848_v32 = vsel %vm1551_vm14, %v6847_v31, %v6843_v25 }
 0xc23   :  { %v6769_v16 = vpop.xlane.xlu1 %6768 }
 0xc24   :  { %v6926_v48 = vrot.slane %v6769_v16, %v11159_v4 }
 0xc26   :  { %v6927_v20 = vsel %vm1551_vm14, %v6926_v48, %v6922_v54 }
 0xc27   :  { %v6928_v41 = vsel %vm1632_vm15, %v6927_v20, %v6848_v32 }
 0xc28   :  { %6930 = vst [vmem:[#allocation11 + $0xe] sm:$0x3] %v6928_v41 }
 0xc29   :  { %7167 = shalt.err (!%p7164_p2)
}
 0xc2a   :  { %s7168_s9 = scalar_lea.hbm %s10389_s4, 256 }
 0xc2b   :  { %p7169_p3 = scmp.ne.s32.totalorder %s10389_s4, %s7168_s9  ;;  %p7172_p4 = scmp.lt.u32.totalorder %s7168_s9, %s10389_s4 }
 0xc2d   :  { %p7174_p5 = pnand %p7172_p4, %p7169_p3 }
 0xc2f   :  { %7177 = shalt.err (!%p7174_p5)
}
 0xc30   :  { %6952 = dma.vmem_to_hbm [thread:$0]  %s6947_s0, 256, %s10389_s4, [#allocation5], %s7192_s1, %s7192_s1, %s7193_s17  }
 0xc31   :  { %7184 = dma.done.wait [#allocation5], 256  }
 0xc32   :  { %7185 = vsyncadd [#allocation5], 4294967040 }
 0xc33   :  { %7186 = dma.done.wait [#allocation13], 32  }
 0xc34   :  { %7187 = vsyncadd [#allocation13], 4294967264 }
 0xc35   :  { %6969 = vsyncpa [#allocation4], 1 }
 0xc36   :  { %6970 = vsyncpa [#allocation7], 1 }
 0xc37   :  { %6971 = vsyncpa [#allocation10], 1 }
 0xc38   :  { %6972 = vsyncpa [#allocation5], 1 }
 0xc39   :  { %6973 = vsyncpa [#allocation13], 1 }

</bundles_post_ra>
